<compile_context>
chip_gen: v5e
topology: v5e:2x2
jax: 0.10.0
libtpu: 0.0.40
codegen_flags: <defaults>
</compile_context>

<pallas_src>
import functools

import jax
import jax.numpy as jnp
from jax import lax
from jax.experimental import pallas as pl
from jax.experimental.pallas import tpu as pltpu


def _layer_dims(B, H0, W0, conv_w):
    """Static per-layer (B, H, W, Cin, Cout) configuration from packed weights."""
    dims = []
    H, W = H0, W0
    for w in conv_w:
        cin, cout = w.shape[0] // 9, w.shape[1]
        dims.append((B, H, W, cin, cout))
        H, W = H // 2, W // 2
    return tuple(dims)


# ----------------------------------------------------------------------------
# Fused kernel: whole forward pass, single invocation, everything in VMEM.
# ----------------------------------------------------------------------------
def _simple_cnn_kernel(x_ref,
                       w1_ref, b1_ref, w2_ref, b2_ref,
                       w3_ref, b3_ref, w4_ref, b4_ref,
                       lw_ref, lb_ref,
                       out_ref,
                       cA1, rB1, cA2, rB2, cA3, rB3, cA4, rB4,
                       *, dims):
    conv_w = (w1_ref, w2_ref, w3_ref, w4_ref)
    conv_b = (b1_ref, b2_ref, b3_ref, b4_ref)
    col_scratch = (cA1, cA2, cA3, cA4)          # +-1 (dw) shift staging, f32
    row_scratch = (rB1, rB2, rB3, rB4)          # +-W (dh) shift staging, f32

    a = x_ref[...]                                            # (B*H0*W0, C0) f32

    for li, (B, H, W, cin, cout) in enumerate(dims):
        M = B * H * W
        padW = max(W, 8)                  # sublane-aligned pad rows for +-W shifts
        cA = col_scratch[li]              # (M + 16, cin)
        rB = row_scratch[li]              # (2*padW + M, 3*cin)

        # Flat index -> (row-in-image, col-in-image).  H, W are powers of two
        # (16 -> 8 -> 4 -> 2), so shifts/ands only, no integer div/mod.
        w_bits = W.bit_length() - 1
        idx = lax.broadcasted_iota(jnp.int32, (M, 1), 0)
        col = jnp.bitwise_and(idx, W - 1)
        row = jnp.bitwise_and(jnp.right_shift(idx, w_bits), H - 1)

        # ---- stage 1: column (dw = -1, +1) shifted copies ----------------------
        # The pad rows of cA are never consumed: the only output rows that read
        # them have col == 0 / col == W-1 and are masked to 0 by the select, so
        # no zero-fill of the scratch is needed at all.
        cA[8:8 + M, :] = a
        left = jnp.where(col > 0, cA[7:7 + M, :], 0.0)        # value at (r, c-1)
        right = jnp.where(col < W - 1, cA[9:9 + M, :], 0.0)   # value at (r, c+1)
        a3 = jnp.concatenate([left, a, right], axis=1)        # (M, 3*cin)

        # ---- stage 2: row (dh = -1, +1) shifts of the 3-copy block -------------
        # +-W row shifts are 8-sublane aligned for layers 1-2 (W = 16, 8); the
        # cross-image / cross-batch wrap rows are exactly the masked ones, so the
        # pad contents of rB are likewise never consumed.
        rB[padW:padW + M, :] = a3
        top = jnp.where(row > 0, rB[padW - W:padW - W + M, :], 0.0)
        bot = jnp.where(row < H - 1, rB[padW + W:padW + W + M, :], 0.0)
        patches = jnp.concatenate([top, a3, bot], axis=1)     # (M, 9*cin)

        # ---- conv as ONE im2col matmul (bf16 x bf16 -> f32), bias, ReLU --------
        acc = jnp.dot(patches.astype(jnp.bfloat16), conv_w[li][...],
                      preferred_element_type=jnp.float32)
        act = jnp.maximum(acc + conv_b[li][...], 0.0)         # (M, cout) f32

        # ---- fused 2x2 (stride 2) max pool -------------------------------------
        H2, W2 = H // 2, W // 2
        x5 = act.reshape(B * H2, 2, W2, 2, cout)
        a = jnp.max(jnp.max(x5, axis=3), axis=1).reshape(B * H2 * W2, cout)

    # After 4 pools the spatial extent is 1x1, so `a` is already (B, 256).
    # TODO(synk): nn.Dropout(p=0.9) is identity in eval mode; training-mode
    # dropout (matching PyTorch's RNG stream) is not reproduced here.
    y = jnp.dot(a.astype(jnp.bfloat16), lw_ref[...],
                preferred_element_type=jnp.float32) + lb_ref[...]

    # Softmax over dim=0 (the batch axis), faithfully matching the reference.
    m = jnp.max(y, axis=0, keepdims=True)
    e = jnp.exp(y - m)
    s = jnp.sum(e, axis=0, keepdims=True)
    out_ref[...] = (e * pl.reciprocal(s, approx=True)).astype(out_ref.dtype)


def simple_cnn_forward(x_nchw, params):
    conv_w = params["conv_w"]            # 4x (9*Cin, Cout) bf16 (im2col-packed)
    conv_b = params["conv_b"]            # 4x (1, Cout)     f32
    lin_w, lin_b = params["lin_w"], params["lin_b"]

    B, C0, H0, W0 = x_nchw.shape
    assert H0 == 16 and W0 == 16, "SimpleCNN needs 16x16 inputs (4 pools -> 1x1)"
    dims = _layer_dims(B, H0, W0, conv_w)
    out_dim = lin_w.shape[1]

    # NCHW -> NHWC -> flat (B*H*W, C); cheap one-time XLA glue.
    x_flat = jnp.transpose(x_nchw, (0, 2, 3, 1)).reshape(B * H0 * W0, C0)
    x_flat = x_flat.astype(jnp.float32)

    scratch = []
    flops = 0
    for (b, h, w, cin, cout) in dims:
        M = b * h * w
        padW = max(w, 8)
        scratch.append(pltpu.VMEM((M + 16, cin), jnp.float32))            # dw stage
        scratch.append(pltpu.VMEM((2 * padW + M, 3 * cin), jnp.float32))  # dh stage
        flops += 2 * M * (9 * cin) * cout
    flops += 2 * B * lin_w.shape[0] * out_dim

    bytes_accessed = (x_flat.size * 4 + B * out_dim * 4
                      + sum(int(w.size) * 2 for w in conv_w)
                      + sum(int(b_.size) * 4 for b_ in conv_b)
                      + int(lin_w.size) * 2 + int(lin_b.size) * 4)

    kernel = functools.partial(_simple_cnn_kernel, dims=dims)

    # TODO(synk): on v7x a ("parallel",) batch grid would engage the 2nd TensorCore,
    # but softmax(dim=0) couples all batch rows, so that needs a 2-call split; at
    # B=2 the whole net is one launch and <1 MiB of VMEM on every generation.
    return pl.pallas_call(
        kernel,
        out_shape=jax.ShapeDtypeStruct((B, out_dim), jnp.float32),
        scratch_shapes=scratch,
        cost_estimate=pl.CostEstimate(
            flops=int(flops),
            transcendentals=int(B * out_dim),
            bytes_accessed=int(bytes_accessed)),
    )(x_flat,
      conv_w[0], conv_b[0], conv_w[1], conv_b[1],
      conv_w[2], conv_b[2], conv_w[3], conv_b[3],
      lin_w, lin_b)


# ----------------------------------------------------------------------------
# Parameter init and a pure-JAX reference for a sanity check.
# ----------------------------------------------------------------------------
def init_params(key, in_channels, output_dim):
    chans = [in_channels, 4, 16, 64, 256]
    keys = jax.random.split(key, 2 * 4 + 2)
    conv_w, conv_b = [], []
    for li in range(4):
        cin, cout = chans[li], chans[li + 1]
        bound = 1.0 / (cin * 9) ** 0.5
        w = jax.random.uniform(keys[2 * li], (3, 3, cin, cout),
                               jnp.float32, -bound, bound)
        # Pack as (9*cin, cout): row index = (kh*3 + kw)*cin + ci, which matches
        # the [dh=-1|0|+1] x [dw=-1|0|+1] x cin column order of the im2col patches.
        conv_w.append(w.reshape(9 * cin, cout).astype(jnp.bfloat16))
        conv_b.append(jax.random.uniform(keys[2 * li + 1], (1, cout),
                                         jnp.float32, -bound, bound))
    lbound = 1.0 / 256.0 ** 0.5
    lin_w = jax.random.uniform(keys[-2], (256, output_dim),
                               jnp.float32, -lbound, lbound).astype(jnp.bfloat16)
    lin_b = jax.random.uniform(keys[-1], (1, output_dim),
                               jnp.float32, -lbound, lbound)
    return {"conv_w": conv_w, "conv_b": conv_b, "lin_w": lin_w, "lin_b": lin_b}


def reference_forward(x_nchw, params):
    x = jnp.transpose(x_nchw, (0, 2, 3, 1)).astype(jnp.float32)     # NHWC
    for wp, b in zip(params["conv_w"], params["conv_b"]):
        cin, cout = wp.shape[0] // 9, wp.shape[1]
        w = wp.astype(jnp.float32).reshape(3, 3, cin, cout)
        x = lax.conv_general_dilated(x, w, (1, 1), "SAME",
                                     dimension_numbers=("NHWC", "HWIO", "NHWC"))
        x = jnp.maximum(x + b.reshape(1, 1, 1, cout), 0.0)
        x = lax.reduce_window(x, -jnp.inf, lax.max,
                              (1, 2, 2, 1), (1, 2, 2, 1), "VALID")
    feat = x.reshape(x.shape[0], -1)
    y = feat @ params["lin_w"].astype(jnp.float32) + params["lin_b"]
    return jax.nn.softmax(y, axis=0)


if __name__ == "__main__":
    key = jax.random.PRNGKey(0)
    kx, kp = jax.random.split(key)
    in_channels, output_dim = 4, 256
    x = jax.random.normal(kx, (2, in_channels, 16, 16), jnp.float32)  # NCHW
    params = init_params(kp, in_channels, output_dim)

    out = jax.jit(simple_cnn_forward)(x, params)
    jax.block_until_ready(out)
    assert out.shape == (2, output_dim)
    assert bool(jnp.all(jnp.isfinite(out)))

    ref = reference_forward(x, params)
    max_err = float(jnp.max(jnp.abs(out - ref)))
    assert max_err < 5e-2, f"mismatch vs reference: {max_err}"

    print("KERNEL_OK")
</pallas_src>

<mosaic_0001>
module attributes {stable_mosaic.version = 11 : i64} {
  func.func @_simple_cnn_kernel(%arg0: memref<512x4xf32, #tpu.memory_space<vmem>>, %arg1: memref<36x4xbf16, #tpu.memory_space<vmem>>, %arg2: memref<1x4xf32, #tpu.memory_space<vmem>>, %arg3: memref<36x16xbf16, #tpu.memory_space<vmem>>, %arg4: memref<1x16xf32, #tpu.memory_space<vmem>>, %arg5: memref<144x64xbf16, #tpu.memory_space<vmem>>, %arg6: memref<1x64xf32, #tpu.memory_space<vmem>>, %arg7: memref<576x256xbf16, #tpu.memory_space<vmem>>, %arg8: memref<1x256xf32, #tpu.memory_space<vmem>>, %arg9: memref<256x256xbf16, #tpu.memory_space<vmem>>, %arg10: memref<1x256xf32, #tpu.memory_space<vmem>>, %arg11: memref<2x256xf32, #tpu.memory_space<vmem>>, %arg12: memref<528x4xf32, #tpu.memory_space<vmem>>, %arg13: memref<544x12xf32, #tpu.memory_space<vmem>>, %arg14: memref<144x4xf32, #tpu.memory_space<vmem>>, %arg15: memref<144x12xf32, #tpu.memory_space<vmem>>, %arg16: memref<48x16xf32, #tpu.memory_space<vmem>>, %arg17: memref<48x48xf32, #tpu.memory_space<vmem>>, %arg18: memref<24x64xf32, #tpu.memory_space<vmem>>, %arg19: memref<24x192xf32, #tpu.memory_space<vmem>>) attributes {dimension_semantics = [], scalar_prefetch = 0 : i64, scratch_operands = 8 : i64, tpu.core_type = #tpu.core_type<tc>} {
    %c0 = arith.constant 0 : index
    %c0_0 = arith.constant 0 : index
    %0 = vector.load %arg0[%c0, %c0_0] : memref<512x4xf32, #tpu.memory_space<vmem>>, vector<512x4xf32>
    %1 = tpu.iota {dimensions = array<i32: 0>} : vector<512x1xi32>
    %c15_i32 = arith.constant 15 : i32
    %2 = vector.broadcast %c15_i32 : i32 to vector<512x1xi32>
    %3 = arith.andi %1, %2 : vector<512x1xi32>
    %c4_i32 = arith.constant 4 : i32
    %4 = vector.broadcast %c4_i32 : i32 to vector<512x1xi32>
    %5 = arith.shrsi %1, %4 : vector<512x1xi32>
    %c15_i32_1 = arith.constant 15 : i32
    %6 = vector.broadcast %c15_i32_1 : i32 to vector<512x1xi32>
    %7 = arith.andi %5, %6 : vector<512x1xi32>
    %c8 = arith.constant 8 : index
    %c0_2 = arith.constant 0 : index
    %8 = vector.load %arg12[%c8, %c0_2] : memref<528x4xf32, #tpu.memory_space<vmem>>, vector<512x4xf32>
    tpu.vector_store %arg12[%c8, %c0_2], %0 {strides = array<i32>} : memref<528x4xf32, #tpu.memory_space<vmem>>, vector<512x4xf32>,
    %c0_i32 = arith.constant 0 : i32
    %9 = vector.broadcast %c0_i32 : i32 to vector<512x1xi32>
    %10 = arith.cmpi sgt, %3, %9 : vector<512x1xi32>
    %c7 = arith.constant 7 : index
    %c0_3 = arith.constant 0 : index
    %11 = vector.load %arg12[%c7, %c0_3] : memref<528x4xf32, #tpu.memory_space<vmem>>, vector<512x4xf32>
    %cst = arith.constant 0.000000e+00 : f32
    %12 = vector.shape_cast %10 : vector<512x1xi1> to vector<512x1xi1>
    %13 = vector.broadcast %12 : vector<512x1xi1> to vector<512x4xi1>
    %14 = vector.broadcast %cst : f32 to vector<512x4xf32>
    %15 = arith.select %13, %11, %14 : vector<512x4xi1>, vector<512x4xf32>
    %c15_i32_4 = arith.constant 15 : i32
    %16 = vector.broadcast %c15_i32_4 : i32 to vector<512x1xi32>
    %17 = arith.cmpi slt, %3, %16 : vector<512x1xi32>
    %c9 = arith.constant 9 : index
    %c0_5 = arith.constant 0 : index
    %18 = vector.load %arg12[%c9, %c0_5] : memref<528x4xf32, #tpu.memory_space<vmem>>, vector<512x4xf32>
    %cst_6 = arith.constant 0.000000e+00 : f32
    %19 = vector.shape_cast %17 : vector<512x1xi1> to vector<512x1xi1>
    %20 = vector.broadcast %19 : vector<512x1xi1> to vector<512x4xi1>
    %21 = vector.broadcast %cst_6 : f32 to vector<512x4xf32>
    %22 = arith.select %20, %18, %21 : vector<512x4xi1>, vector<512x4xf32>
    %23 = tpu.concatenate %15, %0, %22 in 1 : vector<512x4xf32>, vector<512x4xf32>, vector<512x4xf32> -> vector<512x12xf32>
    %c16 = arith.constant 16 : index
    %c0_7 = arith.constant 0 : index
    %24 = vector.load %arg13[%c16, %c0_7] : memref<544x12xf32, #tpu.memory_space<vmem>>, vector<512x12xf32>
    tpu.vector_store %arg13[%c16, %c0_7], %23 {strides = array<i32>} : memref<544x12xf32, #tpu.memory_space<vmem>>, vector<512x12xf32>,
    %c0_i32_8 = arith.constant 0 : i32
    %25 = vector.broadcast %c0_i32_8 : i32 to vector<512x1xi32>
    %26 = arith.cmpi sgt, %7, %25 : vector<512x1xi32>
    %c0_9 = arith.constant 0 : index
    %c0_10 = arith.constant 0 : index
    %27 = vector.load %arg13[%c0_9, %c0_10] : memref<544x12xf32, #tpu.memory_space<vmem>>, vector<512x12xf32>
    %cst_11 = arith.constant 0.000000e+00 : f32
    %28 = vector.shape_cast %26 : vector<512x1xi1> to vector<512x1xi1>
    %29 = vector.broadcast %28 : vector<512x1xi1> to vector<512x12xi1>
    %30 = vector.broadcast %cst_11 : f32 to vector<512x12xf32>
    %31 = arith.select %29, %27, %30 : vector<512x12xi1>, vector<512x12xf32>
    %c15_i32_12 = arith.constant 15 : i32
    %32 = vector.broadcast %c15_i32_12 : i32 to vector<512x1xi32>
    %33 = arith.cmpi slt, %7, %32 : vector<512x1xi32>
    %c32 = arith.constant 32 : index
    %c0_13 = arith.constant 0 : index
    %34 = vector.load %arg13[%c32, %c0_13] : memref<544x12xf32, #tpu.memory_space<vmem>>, vector<512x12xf32>
    %cst_14 = arith.constant 0.000000e+00 : f32
    %35 = vector.shape_cast %33 : vector<512x1xi1> to vector<512x1xi1>
    %36 = vector.broadcast %35 : vector<512x1xi1> to vector<512x12xi1>
    %37 = vector.broadcast %cst_14 : f32 to vector<512x12xf32>
    %38 = arith.select %36, %34, %37 : vector<512x12xi1>, vector<512x12xf32>
    %39 = tpu.concatenate %31, %23, %38 in 1 : vector<512x12xf32>, vector<512x12xf32>, vector<512x12xf32> -> vector<512x36xf32>
    %40 = arith.truncf %39 : vector<512x36xf32> to vector<512x36xbf16>
    %c0_15 = arith.constant 0 : index
    %c0_16 = arith.constant 0 : index
    %41 = vector.load %arg1[%c0_15, %c0_16] : memref<36x4xbf16, #tpu.memory_space<vmem>>, vector<36x4xbf16>
    %cst_17 = arith.constant dense<0.000000e+00> : vector<512x4xf32>
    %42 = tpu.matmul %40, %41, %cst_17 {dimension_numbers = #tpu.dot_dimension_numbers<[1], [0], [0], [1], [0, 0, 1, 1], [], []>} : vector<512x36xbf16>, vector<36x4xbf16>, vector<512x4xf32> -> vector<512x4xf32>
    %c0_18 = arith.constant 0 : index
    %c0_19 = arith.constant 0 : index
    %43 = vector.load %arg2[%c0_18, %c0_19] : memref<1x4xf32, #tpu.memory_space<vmem>>, vector<1x4xf32>
    %44 = vector.broadcast %43 : vector<1x4xf32> to vector<512x4xf32>
    %45 = arith.addf %42, %44 : vector<512x4xf32>
    %cst_20 = arith.constant 0.000000e+00 : f32
    %46 = vector.broadcast %cst_20 : f32 to vector<512x4xf32>
    %47 = arith.maximumf %45, %46 : vector<512x4xf32>
    %48 = vector.shape_cast %47 : vector<512x4xf32> to vector<16x2x8x2x4xf32>
    %cst_21 = arith.constant dense<0xFF800000> : vector<16x2x8x4xf32>
    %49 = vector.multi_reduction <maximumf>, %48, %cst_21 [3] : vector<16x2x8x2x4xf32> to vector<16x2x8x4xf32>
    %cst_22 = arith.constant dense<0xFF800000> : vector<16x8x4xf32>
    %50 = vector.multi_reduction <maximumf>, %49, %cst_22 [1] : vector<16x2x8x4xf32> to vector<16x8x4xf32>
    %51 = vector.shape_cast %50 : vector<16x8x4xf32> to vector<128x4xf32>
    %52 = tpu.iota {dimensions = array<i32: 0>} : vector<128x1xi32>
    %c7_i32 = arith.constant 7 : i32
    %53 = vector.broadcast %c7_i32 : i32 to vector<128x1xi32>
    %54 = arith.andi %52, %53 : vector<128x1xi32>
    %c3_i32 = arith.constant 3 : i32
    %55 = vector.broadcast %c3_i32 : i32 to vector<128x1xi32>
    %56 = arith.shrsi %52, %55 : vector<128x1xi32>
    %c7_i32_23 = arith.constant 7 : i32
    %57 = vector.broadcast %c7_i32_23 : i32 to vector<128x1xi32>
    %58 = arith.andi %56, %57 : vector<128x1xi32>
    %c8_24 = arith.constant 8 : index
    %c0_25 = arith.constant 0 : index
    %59 = vector.load %arg14[%c8_24, %c0_25] : memref<144x4xf32, #tpu.memory_space<vmem>>, vector<128x4xf32>
    tpu.vector_store %arg14[%c8_24, %c0_25], %51 {strides = array<i32>} : memref<144x4xf32, #tpu.memory_space<vmem>>, vector<128x4xf32>,
    %c0_i32_26 = arith.constant 0 : i32
    %60 = vector.broadcast %c0_i32_26 : i32 to vector<128x1xi32>
    %61 = arith.cmpi sgt, %54, %60 : vector<128x1xi32>
    %c7_27 = arith.constant 7 : index
    %c0_28 = arith.constant 0 : index
    %62 = vector.load %arg14[%c7_27, %c0_28] : memref<144x4xf32, #tpu.memory_space<vmem>>, vector<128x4xf32>
    %cst_29 = arith.constant 0.000000e+00 : f32
    %63 = vector.shape_cast %61 : vector<128x1xi1> to vector<128x1xi1>
    %64 = vector.broadcast %63 : vector<128x1xi1> to vector<128x4xi1>
    %65 = vector.broadcast %cst_29 : f32 to vector<128x4xf32>
    %66 = arith.select %64, %62, %65 : vector<128x4xi1>, vector<128x4xf32>
    %c7_i32_30 = arith.constant 7 : i32
    %67 = vector.broadcast %c7_i32_30 : i32 to vector<128x1xi32>
    %68 = arith.cmpi slt, %54, %67 : vector<128x1xi32>
    %c9_31 = arith.constant 9 : index
    %c0_32 = arith.constant 0 : index
    %69 = vector.load %arg14[%c9_31, %c0_32] : memref<144x4xf32, #tpu.memory_space<vmem>>, vector<128x4xf32>
    %cst_33 = arith.constant 0.000000e+00 : f32
    %70 = vector.shape_cast %68 : vector<128x1xi1> to vector<128x1xi1>
    %71 = vector.broadcast %70 : vector<128x1xi1> to vector<128x4xi1>
    %72 = vector.broadcast %cst_33 : f32 to vector<128x4xf32>
    %73 = arith.select %71, %69, %72 : vector<128x4xi1>, vector<128x4xf32>
    %74 = tpu.concatenate %66, %51, %73 in 1 : vector<128x4xf32>, vector<128x4xf32>, vector<128x4xf32> -> vector<128x12xf32>
    %c8_34 = arith.constant 8 : index
    %c0_35 = arith.constant 0 : index
    %75 = vector.load %arg15[%c8_34, %c0_35] : memref<144x12xf32, #tpu.memory_space<vmem>>, vector<128x12xf32>
    tpu.vector_store %arg15[%c8_34, %c0_35], %74 {strides = array<i32>} : memref<144x12xf32, #tpu.memory_space<vmem>>, vector<128x12xf32>,
    %c0_i32_36 = arith.constant 0 : i32
    %76 = vector.broadcast %c0_i32_36 : i32 to vector<128x1xi32>
    %77 = arith.cmpi sgt, %58, %76 : vector<128x1xi32>
    %c0_37 = arith.constant 0 : index
    %c0_38 = arith.constant 0 : index
    %78 = vector.load %arg15[%c0_37, %c0_38] : memref<144x12xf32, #tpu.memory_space<vmem>>, vector<128x12xf32>
    %cst_39 = arith.constant 0.000000e+00 : f32
    %79 = vector.shape_cast %77 : vector<128x1xi1> to vector<128x1xi1>
    %80 = vector.broadcast %79 : vector<128x1xi1> to vector<128x12xi1>
    %81 = vector.broadcast %cst_39 : f32 to vector<128x12xf32>
    %82 = arith.select %80, %78, %81 : vector<128x12xi1>, vector<128x12xf32>
    %c7_i32_40 = arith.constant 7 : i32
    %83 = vector.broadcast %c7_i32_40 : i32 to vector<128x1xi32>
    %84 = arith.cmpi slt, %58, %83 : vector<128x1xi32>
    %c16_41 = arith.constant 16 : index
    %c0_42 = arith.constant 0 : index
    %85 = vector.load %arg15[%c16_41, %c0_42] : memref<144x12xf32, #tpu.memory_space<vmem>>, vector<128x12xf32>
    %cst_43 = arith.constant 0.000000e+00 : f32
    %86 = vector.shape_cast %84 : vector<128x1xi1> to vector<128x1xi1>
    %87 = vector.broadcast %86 : vector<128x1xi1> to vector<128x12xi1>
    %88 = vector.broadcast %cst_43 : f32 to vector<128x12xf32>
    %89 = arith.select %87, %85, %88 : vector<128x12xi1>, vector<128x12xf32>
    %90 = tpu.concatenate %82, %74, %89 in 1 : vector<128x12xf32>, vector<128x12xf32>, vector<128x12xf32> -> vector<128x36xf32>
    %91 = arith.truncf %90 : vector<128x36xf32> to vector<128x36xbf16>
    %c0_44 = arith.constant 0 : index
    %c0_45 = arith.constant 0 : index
    %92 = vector.load %arg3[%c0_44, %c0_45] : memref<36x16xbf16, #tpu.memory_space<vmem>>, vector<36x16xbf16>
    %cst_46 = arith.constant dense<0.000000e+00> : vector<128x16xf32>
    %93 = tpu.matmul %91, %92, %cst_46 {dimension_numbers = #tpu.dot_dimension_numbers<[1], [0], [0], [1], [0, 0, 1, 1], [], []>} : vector<128x36xbf16>, vector<36x16xbf16>, vector<128x16xf32> -> vector<128x16xf32>
    %c0_47 = arith.constant 0 : index
    %c0_48 = arith.constant 0 : index
    %94 = vector.load %arg4[%c0_47, %c0_48] : memref<1x16xf32, #tpu.memory_space<vmem>>, vector<1x16xf32>
    %95 = vector.broadcast %94 : vector<1x16xf32> to vector<128x16xf32>
    %96 = arith.addf %93, %95 : vector<128x16xf32>
    %cst_49 = arith.constant 0.000000e+00 : f32
    %97 = vector.broadcast %cst_49 : f32 to vector<128x16xf32>
    %98 = arith.maximumf %96, %97 : vector<128x16xf32>
    %99 = vector.shape_cast %98 : vector<128x16xf32> to vector<8x2x4x2x16xf32>
    %cst_50 = arith.constant dense<0xFF800000> : vector<8x2x4x16xf32>
    %100 = vector.multi_reduction <maximumf>, %99, %cst_50 [3] : vector<8x2x4x2x16xf32> to vector<8x2x4x16xf32>
    %cst_51 = arith.constant dense<0xFF800000> : vector<8x4x16xf32>
    %101 = vector.multi_reduction <maximumf>, %100, %cst_51 [1] : vector<8x2x4x16xf32> to vector<8x4x16xf32>
    %102 = vector.shape_cast %101 : vector<8x4x16xf32> to vector<32x16xf32>
    %103 = tpu.iota {dimensions = array<i32: 0>} : vector<32x1xi32>
    %c3_i32_52 = arith.constant 3 : i32
    %104 = vector.broadcast %c3_i32_52 : i32 to vector<32x1xi32>
    %105 = arith.andi %103, %104 : vector<32x1xi32>
    %c2_i32 = arith.constant 2 : i32
    %106 = vector.broadcast %c2_i32 : i32 to vector<32x1xi32>
    %107 = arith.shrsi %103, %106 : vector<32x1xi32>
    %c3_i32_53 = arith.constant 3 : i32
    %108 = vector.broadcast %c3_i32_53 : i32 to vector<32x1xi32>
    %109 = arith.andi %107, %108 : vector<32x1xi32>
    %c8_54 = arith.constant 8 : index
    %c0_55 = arith.constant 0 : index
    %110 = vector.load %arg16[%c8_54, %c0_55] : memref<48x16xf32, #tpu.memory_space<vmem>>, vector<32x16xf32>
    tpu.vector_store %arg16[%c8_54, %c0_55], %102 {strides = array<i32>} : memref<48x16xf32, #tpu.memory_space<vmem>>, vector<32x16xf32>,
    %c0_i32_56 = arith.constant 0 : i32
    %111 = vector.broadcast %c0_i32_56 : i32 to vector<32x1xi32>
    %112 = arith.cmpi sgt, %105, %111 : vector<32x1xi32>
    %c7_57 = arith.constant 7 : index
    %c0_58 = arith.constant 0 : index
    %113 = vector.load %arg16[%c7_57, %c0_58] : memref<48x16xf32, #tpu.memory_space<vmem>>, vector<32x16xf32>
    %cst_59 = arith.constant 0.000000e+00 : f32
    %114 = vector.shape_cast %112 : vector<32x1xi1> to vector<32x1xi1>
    %115 = vector.broadcast %114 : vector<32x1xi1> to vector<32x16xi1>
    %116 = vector.broadcast %cst_59 : f32 to vector<32x16xf32>
    %117 = arith.select %115, %113, %116 : vector<32x16xi1>, vector<32x16xf32>
    %c3_i32_60 = arith.constant 3 : i32
    %118 = vector.broadcast %c3_i32_60 : i32 to vector<32x1xi32>
    %119 = arith.cmpi slt, %105, %118 : vector<32x1xi32>
    %c9_61 = arith.constant 9 : index
    %c0_62 = arith.constant 0 : index
    %120 = vector.load %arg16[%c9_61, %c0_62] : memref<48x16xf32, #tpu.memory_space<vmem>>, vector<32x16xf32>
    %cst_63 = arith.constant 0.000000e+00 : f32
    %121 = vector.shape_cast %119 : vector<32x1xi1> to vector<32x1xi1>
    %122 = vector.broadcast %121 : vector<32x1xi1> to vector<32x16xi1>
    %123 = vector.broadcast %cst_63 : f32 to vector<32x16xf32>
    %124 = arith.select %122, %120, %123 : vector<32x16xi1>, vector<32x16xf32>
    %125 = tpu.concatenate %117, %102, %124 in 1 : vector<32x16xf32>, vector<32x16xf32>, vector<32x16xf32> -> vector<32x48xf32>
    %c8_64 = arith.constant 8 : index
    %c0_65 = arith.constant 0 : index
    %126 = vector.load %arg17[%c8_64, %c0_65] : memref<48x48xf32, #tpu.memory_space<vmem>>, vector<32x48xf32>
    tpu.vector_store %arg17[%c8_64, %c0_65], %125 {strides = array<i32>} : memref<48x48xf32, #tpu.memory_space<vmem>>, vector<32x48xf32>,
    %c0_i32_66 = arith.constant 0 : i32
    %127 = vector.broadcast %c0_i32_66 : i32 to vector<32x1xi32>
    %128 = arith.cmpi sgt, %109, %127 : vector<32x1xi32>
    %c4 = arith.constant 4 : index
    %c0_67 = arith.constant 0 : index
    %129 = vector.load %arg17[%c4, %c0_67] : memref<48x48xf32, #tpu.memory_space<vmem>>, vector<32x48xf32>
    %cst_68 = arith.constant 0.000000e+00 : f32
    %130 = vector.shape_cast %128 : vector<32x1xi1> to vector<32x1xi1>
    %131 = vector.broadcast %130 : vector<32x1xi1> to vector<32x48xi1>
    %132 = vector.broadcast %cst_68 : f32 to vector<32x48xf32>
    %133 = arith.select %131, %129, %132 : vector<32x48xi1>, vector<32x48xf32>
    %c3_i32_69 = arith.constant 3 : i32
    %134 = vector.broadcast %c3_i32_69 : i32 to vector<32x1xi32>
    %135 = arith.cmpi slt, %109, %134 : vector<32x1xi32>
    %c12 = arith.constant 12 : index
    %c0_70 = arith.constant 0 : index
    %136 = vector.load %arg17[%c12, %c0_70] : memref<48x48xf32, #tpu.memory_space<vmem>>, vector<32x48xf32>
    %cst_71 = arith.constant 0.000000e+00 : f32
    %137 = vector.shape_cast %135 : vector<32x1xi1> to vector<32x1xi1>
    %138 = vector.broadcast %137 : vector<32x1xi1> to vector<32x48xi1>
    %139 = vector.broadcast %cst_71 : f32 to vector<32x48xf32>
    %140 = arith.select %138, %136, %139 : vector<32x48xi1>, vector<32x48xf32>
    %141 = tpu.concatenate %133, %125, %140 in 1 : vector<32x48xf32>, vector<32x48xf32>, vector<32x48xf32> -> vector<32x144xf32>
    %142 = arith.truncf %141 : vector<32x144xf32> to vector<32x144xbf16>
    %c0_72 = arith.constant 0 : index
    %c0_73 = arith.constant 0 : index
    %143 = vector.load %arg5[%c0_72, %c0_73] : memref<144x64xbf16, #tpu.memory_space<vmem>>, vector<144x64xbf16>
    %cst_74 = arith.constant dense<0.000000e+00> : vector<32x64xf32>
    %144 = tpu.matmul %142, %143, %cst_74 {dimension_numbers = #tpu.dot_dimension_numbers<[1], [0], [0], [1], [0, 0, 1, 1], [], []>} : vector<32x144xbf16>, vector<144x64xbf16>, vector<32x64xf32> -> vector<32x64xf32>
    %c0_75 = arith.constant 0 : index
    %c0_76 = arith.constant 0 : index
    %145 = vector.load %arg6[%c0_75, %c0_76] : memref<1x64xf32, #tpu.memory_space<vmem>>, vector<1x64xf32>
    %146 = vector.broadcast %145 : vector<1x64xf32> to vector<32x64xf32>
    %147 = arith.addf %144, %146 : vector<32x64xf32>
    %cst_77 = arith.constant 0.000000e+00 : f32
    %148 = vector.broadcast %cst_77 : f32 to vector<32x64xf32>
    %149 = arith.maximumf %147, %148 : vector<32x64xf32>
    %150 = vector.shape_cast %149 : vector<32x64xf32> to vector<4x2x2x2x64xf32>
    %cst_78 = arith.constant dense<0xFF800000> : vector<4x2x2x64xf32>
    %151 = vector.multi_reduction <maximumf>, %150, %cst_78 [3] : vector<4x2x2x2x64xf32> to vector<4x2x2x64xf32>
    %cst_79 = arith.constant dense<0xFF800000> : vector<4x2x64xf32>
    %152 = vector.multi_reduction <maximumf>, %151, %cst_79 [1] : vector<4x2x2x64xf32> to vector<4x2x64xf32>
    %153 = vector.shape_cast %152 : vector<4x2x64xf32> to vector<8x64xf32>
    %154 = tpu.iota {dimensions = array<i32: 0>} : vector<8x1xi32>
    %c1_i32 = arith.constant 1 : i32
    %155 = vector.broadcast %c1_i32 : i32 to vector<8x1xi32>
    %156 = arith.andi %154, %155 : vector<8x1xi32>
    %c1_i32_80 = arith.constant 1 : i32
    %157 = vector.broadcast %c1_i32_80 : i32 to vector<8x1xi32>
    %158 = arith.shrsi %154, %157 : vector<8x1xi32>
    %c1_i32_81 = arith.constant 1 : i32
    %159 = vector.broadcast %c1_i32_81 : i32 to vector<8x1xi32>
    %160 = arith.andi %158, %159 : vector<8x1xi32>
    %c8_82 = arith.constant 8 : index
    %c0_83 = arith.constant 0 : index
    %161 = vector.load %arg18[%c8_82, %c0_83] : memref<24x64xf32, #tpu.memory_space<vmem>>, vector<8x64xf32>
    tpu.vector_store %arg18[%c8_82, %c0_83], %153 {strides = array<i32>} : memref<24x64xf32, #tpu.memory_space<vmem>>, vector<8x64xf32>,
    %c0_i32_84 = arith.constant 0 : i32
    %162 = vector.broadcast %c0_i32_84 : i32 to vector<8x1xi32>
    %163 = arith.cmpi sgt, %156, %162 : vector<8x1xi32>
    %c7_85 = arith.constant 7 : index
    %c0_86 = arith.constant 0 : index
    %164 = vector.load %arg18[%c7_85, %c0_86] : memref<24x64xf32, #tpu.memory_space<vmem>>, vector<8x64xf32>
    %cst_87 = arith.constant 0.000000e+00 : f32
    %165 = vector.shape_cast %163 : vector<8x1xi1> to vector<8x1xi1>
    %166 = vector.broadcast %165 : vector<8x1xi1> to vector<8x64xi1>
    %167 = vector.broadcast %cst_87 : f32 to vector<8x64xf32>
    %168 = arith.select %166, %164, %167 : vector<8x64xi1>, vector<8x64xf32>
    %c1_i32_88 = arith.constant 1 : i32
    %169 = vector.broadcast %c1_i32_88 : i32 to vector<8x1xi32>
    %170 = arith.cmpi slt, %156, %169 : vector<8x1xi32>
    %c9_89 = arith.constant 9 : index
    %c0_90 = arith.constant 0 : index
    %171 = vector.load %arg18[%c9_89, %c0_90] : memref<24x64xf32, #tpu.memory_space<vmem>>, vector<8x64xf32>
    %cst_91 = arith.constant 0.000000e+00 : f32
    %172 = vector.shape_cast %170 : vector<8x1xi1> to vector<8x1xi1>
    %173 = vector.broadcast %172 : vector<8x1xi1> to vector<8x64xi1>
    %174 = vector.broadcast %cst_91 : f32 to vector<8x64xf32>
    %175 = arith.select %173, %171, %174 : vector<8x64xi1>, vector<8x64xf32>
    %176 = tpu.concatenate %168, %153, %175 in 1 : vector<8x64xf32>, vector<8x64xf32>, vector<8x64xf32> -> vector<8x192xf32>
    %c8_92 = arith.constant 8 : index
    %c0_93 = arith.constant 0 : index
    %177 = vector.load %arg19[%c8_92, %c0_93] : memref<24x192xf32, #tpu.memory_space<vmem>>, vector<8x192xf32>
    tpu.vector_store %arg19[%c8_92, %c0_93], %176 {strides = array<i32>} : memref<24x192xf32, #tpu.memory_space<vmem>>, vector<8x192xf32>,
    %c0_i32_94 = arith.constant 0 : i32
    %178 = vector.broadcast %c0_i32_94 : i32 to vector<8x1xi32>
    %179 = arith.cmpi sgt, %160, %178 : vector<8x1xi32>
    %c6 = arith.constant 6 : index
    %c0_95 = arith.constant 0 : index
    %180 = vector.load %arg19[%c6, %c0_95] : memref<24x192xf32, #tpu.memory_space<vmem>>, vector<8x192xf32>
    %cst_96 = arith.constant 0.000000e+00 : f32
    %181 = vector.shape_cast %179 : vector<8x1xi1> to vector<8x1xi1>
    %182 = vector.broadcast %181 : vector<8x1xi1> to vector<8x192xi1>
    %183 = vector.broadcast %cst_96 : f32 to vector<8x192xf32>
    %184 = arith.select %182, %180, %183 : vector<8x192xi1>, vector<8x192xf32>
    %c1_i32_97 = arith.constant 1 : i32
    %185 = vector.broadcast %c1_i32_97 : i32 to vector<8x1xi32>
    %186 = arith.cmpi slt, %160, %185 : vector<8x1xi32>
    %c10 = arith.constant 10 : index
    %c0_98 = arith.constant 0 : index
    %187 = vector.load %arg19[%c10, %c0_98] : memref<24x192xf32, #tpu.memory_space<vmem>>, vector<8x192xf32>
    %cst_99 = arith.constant 0.000000e+00 : f32
    %188 = vector.shape_cast %186 : vector<8x1xi1> to vector<8x1xi1>
    %189 = vector.broadcast %188 : vector<8x1xi1> to vector<8x192xi1>
    %190 = vector.broadcast %cst_99 : f32 to vector<8x192xf32>
    %191 = arith.select %189, %187, %190 : vector<8x192xi1>, vector<8x192xf32>
    %192 = tpu.concatenate %184, %176, %191 in 1 : vector<8x192xf32>, vector<8x192xf32>, vector<8x192xf32> -> vector<8x576xf32>
    %193 = arith.truncf %192 : vector<8x576xf32> to vector<8x576xbf16>
    %c0_100 = arith.constant 0 : index
    %c0_101 = arith.constant 0 : index
    %194 = vector.load %arg7[%c0_100, %c0_101] : memref<576x256xbf16, #tpu.memory_space<vmem>>, vector<576x256xbf16>
    %cst_102 = arith.constant dense<0.000000e+00> : vector<8x256xf32>
    %195 = tpu.matmul %193, %194, %cst_102 {dimension_numbers = #tpu.dot_dimension_numbers<[1], [0], [0], [1], [0, 0, 1, 1], [], []>} : vector<8x576xbf16>, vector<576x256xbf16>, vector<8x256xf32> -> vector<8x256xf32>
    %c0_103 = arith.constant 0 : index
    %c0_104 = arith.constant 0 : index
    %196 = vector.load %arg8[%c0_103, %c0_104] : memref<1x256xf32, #tpu.memory_space<vmem>>, vector<1x256xf32>
    %197 = vector.broadcast %196 : vector<1x256xf32> to vector<8x256xf32>
    %198 = arith.addf %195, %197 : vector<8x256xf32>
    %cst_105 = arith.constant 0.000000e+00 : f32
    %199 = vector.broadcast %cst_105 : f32 to vector<8x256xf32>
    %200 = arith.maximumf %198, %199 : vector<8x256xf32>
    %201 = vector.shape_cast %200 : vector<8x256xf32> to vector<2x2x1x2x256xf32>
    %cst_106 = arith.constant dense<0xFF800000> : vector<2x2x1x256xf32>
    %202 = vector.multi_reduction <maximumf>, %201, %cst_106 [3] : vector<2x2x1x2x256xf32> to vector<2x2x1x256xf32>
    %cst_107 = arith.constant dense<0xFF800000> : vector<2x1x256xf32>
    %203 = vector.multi_reduction <maximumf>, %202, %cst_107 [1] : vector<2x2x1x256xf32> to vector<2x1x256xf32>
    %204 = vector.shape_cast %203 : vector<2x1x256xf32> to vector<2x256xf32>
    %205 = arith.truncf %204 : vector<2x256xf32> to vector<2x256xbf16>
    %c0_108 = arith.constant 0 : index
    %c0_109 = arith.constant 0 : index
    %206 = vector.load %arg9[%c0_108, %c0_109] : memref<256x256xbf16, #tpu.memory_space<vmem>>, vector<256x256xbf16>
    %cst_110 = arith.constant dense<0.000000e+00> : vector<2x256xf32>
    %207 = tpu.matmul %205, %206, %cst_110 {dimension_numbers = #tpu.dot_dimension_numbers<[1], [0], [0], [1], [0, 0, 1, 1], [], []>} : vector<2x256xbf16>, vector<256x256xbf16>, vector<2x256xf32> -> vector<2x256xf32>
    %c0_111 = arith.constant 0 : index
    %c0_112 = arith.constant 0 : index
    %208 = vector.load %arg10[%c0_111, %c0_112] : memref<1x256xf32, #tpu.memory_space<vmem>>, vector<1x256xf32>
    %209 = vector.broadcast %208 : vector<1x256xf32> to vector<2x256xf32>
    %210 = arith.addf %207, %209 : vector<2x256xf32>
    %cst_113 = arith.constant dense<0xFF800000> : vector<256xf32>
    %211 = vector.multi_reduction <maximumf>, %210, %cst_113 [0] : vector<2x256xf32> to vector<256xf32>
    %212 = vector.shape_cast %211 : vector<256xf32> to vector<1x256xf32>
    %213 = vector.broadcast %212 : vector<1x256xf32> to vector<2x256xf32>
    %214 = arith.subf %210, %213 : vector<2x256xf32>
    %215 = math.exp %214 : vector<2x256xf32>
    %cst_114 = arith.constant dense<0.000000e+00> : vector<256xf32>
    %216 = vector.multi_reduction <add>, %215, %cst_114 [0] : vector<2x256xf32> to vector<256xf32>
    %217 = vector.shape_cast %216 : vector<256xf32> to vector<1x256xf32>
    %218 = tpu.reciprocal %217 {approx = true} : vector<1x256xf32> -> vector<1x256xf32>
    %219 = vector.broadcast %218 : vector<1x256xf32> to vector<2x256xf32>
    %220 = arith.mulf %215, %219 : vector<2x256xf32>
    %c0_115 = arith.constant 0 : index
    %c0_116 = arith.constant 0 : index
    %221 = vector.load %arg11[%c0_115, %c0_116] : memref<2x256xf32, #tpu.memory_space<vmem>>, vector<2x256xf32>
    tpu.vector_store %arg11[%c0_115, %c0_116], %220 {strides = array<i32>} : memref<2x256xf32, #tpu.memory_space<vmem>>, vector<2x256xf32>,
    return
  }
}

</mosaic_0001>

<bundles_post_ra>
// kernel: simple_cnn_forward.1
= control target key start
LH: loop header
LB: loop body
LE: loop exit
PB: predicated region body
PF: predicated region fallthrough
CT: control target
= control target key end

     0   :  { %16 = vsyncpa [#allocation11], 0  ;;  %s16492_s0 = inlined_call_operand.vmem [shape: f32[512,4], index: 0, kind: input, shape index: {}]   ;;  %s16493_s1 = inlined_call_operand.vmem [shape: bf16[36,4], index: 1, kind: input, shape index: {}]   ;;  %s16494_s2 = inlined_call_operand.vmem [shape: f32[1,4], index: 2, kind: input, shape index: {}]   ;;  %s16495_s3 = inlined_call_operand.vmem [shape: bf16[36,16], index: 3, kind: input, shape index: {}]   ;;  %s16496_s4 = inlined_call_operand.hbm [shape: f32[1,16], index: 4, kind: input, shape index: {}]   ;;  %s16497_s5 = inlined_call_operand.vmem [shape: bf16[144,64], index: 5, kind: input, shape index: {}]   ;;  %s16498_s6 = inlined_call_operand.hbm [shape: f32[1,64], index: 6, kind: input, shape index: {}]   ;;  %s16499_s7 = inlined_call_operand.vmem [shape: bf16[576,256], index: 7, kind: input, shape index: {}]   ;;  %s16500_s8 = inlined_call_operand.vmem [shape: f32[1,256], index: 8, kind: input, shape index: {}]   ;;  %s16501_s9 = inlined_call_operand.vmem [shape: bf16[256,256], index: 9, kind: input, shape index: {}]   ;;  %s16502_s10 = inlined_call_operand.hbm [shape: f32[1,256], index: 10, kind: input, shape index: {}]   ;;  %s16503_s11 = inlined_call_operand.hbm [shape: f32[2,256], index: 11, kind: output, shape index: {}]  }
   0x1   :  { %17 = vsyncpa [#allocation14], 0  ;;  %s45_s19 = sshll.u32 %s16498_s6, 4  ;;  %s46_s19 = int_to_ptr.hbm [resolvable:$true] %s45_s19 }
   0x2   :  { %18 = vsyncpa [#allocation12], 0  ;;  %s10650_s20 = smov [#allocation13]   ;;  %s32_s24 = sshll.u32 %s16496_s4, 4  ;;  %s33_s24 = int_to_ptr.hbm [resolvable:$true] %s32_s24 }
   0x3   :  { %s47_s21 = sshll.u32 %s10650_s20, 4  ;;  %s10651_s25 = smov [#allocation10]   ;;  %s48_s21 = int_to_ptr.vmem [resolvable:$true] %s47_s21 }
   0x4   :  { %50 = dma.hbm_to_vmem [thread:$0]  %s46_s19, 16, %s48_s21, [#allocation14]  }
   0x5   :  { %s34_s26 = sshll.u32 %s10651_s25, 4  ;;  %s62_s29 = sshll.u32 %s16502_s10, 4  ;;  %s35_s26 = int_to_ptr.vmem [resolvable:$true] %s34_s26  ;;  %s63_s29 = int_to_ptr.hbm [resolvable:$true] %s62_s29 }
   0x6   :  { %37 = dma.hbm_to_vmem [thread:$0]  %s33_s24, 16, %s35_s26, [#allocation11]  }
   0x7   :  { %s10652_s6 = smov [#allocation15]  }
   0x8   :  { %s64_s30 = sshll.u32 %s10652_s6, 4  ;;  %s65_s30 = int_to_ptr.vmem [resolvable:$true] %s64_s30 }
   0x9   :  { %67 = dma.hbm_to_vmem [thread:$0]  %s63_s29, 32, %s65_s30, [#allocation14]  }
   0xa   :  { %10644 = dma.done.wait [#allocation11], 16  }
   0xb   :  { %10645 = vsyncadd [#allocation11], 4294967280 }
   0xc   :  { %10646 = dma.done.wait [#allocation14], 48  }
   0xd   :  { %10647 = vsyncadd [#allocation14], 4294967248  ;;  %v145_v0 = vlaneseq  ;;  %vm402_vm0 = vcmask 31744   ;;  %v83_v1 = vld [vmem:[%s16492_s0 + $0x10] sm:$0xff]  ;;  %v84_v2 = vld [vmem:[%s16492_s0 + $0x18] sm:$0xff]  ;;  %s10653_s16 = smov 4  }
   0xe   :  { %v85_v3 = vld [vmem:[%s16492_s0 + $0x20] sm:$0xff]  ;;  %1175 = vrot.lane.b32.xlu0 %v83_v1, %s10653_s16  ;;  %405 = vst.msk [vmem:[#allocation2 + $0x18] sm:$0xff] %vm402_vm0, %v83_v1  ;;  %v82_v6 = vld [vmem:[%s16492_s0 + $0x8] sm:$0xff]  ;;  %v88_v9 = vld [vmem:[%s16492_s0 + $0x38] sm:$0xff]  ;;  %s10654_s29 = smov 8   ;;  %vm1683_vm11 = vcmask 64512  }
   0xf   :  { %v10741_v4 = vshrl.u32 %v145_v0, 7  ;;  %v81_v5 = vld [vmem:[%s16492_s0] sm:$0xff]  ;;  %406 = vst.msk [vmem:[#allocation2 + $0x20] sm:$0xff] %vm402_vm0, %v84_v2  ;;  %v86_v7 = vld [vmem:[%s16492_s0 + $0x28] sm:$0xff]  ;;  %v87_v10 = vld [vmem:[%s16492_s0 + $0x30] sm:$0xff]  ;;  %vm1748_vm12 = vcmask 97280  }
  0x10   :  { %1171 = vrot.lane.b32.xlu2 %v81_v5, %s10653_s16  ;;  %407 = vst.msk [vmem:[#allocation2 + $0x28] sm:$0xff] %vm402_vm0, %v85_v3  ;;  %v89_v11 = vld [vmem:[%s16492_s0 + $0x40] sm:$0xff]  ;;  %v90_v14 = vld [vmem:[%s16492_s0 + $0x48] sm:$0xff]  ;;  %v91_v20 = vld [vmem:[%s16492_s0 + $0x50] sm:$0xff]  ;;  %s10655_s17 = smov 12   ;;  %s10656_s18 = smov 24  }
  0x11   :  { %16670 = vst [vmem:[#allocation20_spill] sm:$0xff] %v10741_v4  ;;  %v10758_v8 = vadd.s32 24, %v10741_v4  ;;  %v10784_v16 = vadd.s32 8, %v10741_v4  ;;  %v10795_v22 = vadd.s32 40, %v10741_v4  ;;  %v92_v27 = vld [vmem:[%s16492_s0 + $0x58] sm:$0xff]  ;;  %v10805_v28 = vadd.s32 56, %v10741_v4 }
  0x12   :  { %403 = vst.msk [vmem:[#allocation2 + $0x8] sm:$0xff] %vm402_vm0, %v81_v5  ;;  %v93_v31 = vld [vmem:[%s16492_s0 + $0x60] sm:$0xff]  ;;  %v94_v35 = vld [vmem:[%s16492_s0 + $0x68] sm:$0xff]  ;;  %v10824_v36 = vadd.s32 72, %v10741_v4  ;;  %v95_v39 = vld [vmem:[%s16492_s0 + $0x70] sm:$0xff]  ;;  %v10838_v43 = vadd.s32 88, %v10741_v4 }
  0x13   :  { %16671 = vst [vmem:[#allocation21_spill] sm:$0xff] %v10758_v8  ;;  %v213_v12 = vand.u32 15, %v10758_v8  ;;  %v211_v19 = vand.u32 15, %v10784_v16  ;;  %v215_v23 = vand.u32 15, %v10795_v22  ;;  %v217_v30 = vand.u32 15, %v10805_v28  ;;  %v96_v46 = vld [vmem:[%s16492_s0 + $0x78] sm:$0xff] }
  0x14   :  { %404 = vst.msk [vmem:[#allocation2 + $0x10] sm:$0xff] %vm402_vm0, %v82_v6  ;;  %v219_v38 = vand.u32 15, %v10824_v36  ;;  %v221_v45 = vand.u32 15, %v10838_v43  ;;  %v97_v47 = vld [vmem:[%s16492_s0 + $0x80] sm:$0xff]  ;;  %v10855_v51 = vadd.s32 104, %v10741_v4  ;;  %v98_v53 = vld [vmem:[%s16492_s0 + $0x88] sm:$0xff] }
  0x15   :  { %408 = vst.msk [vmem:[#allocation2 + $0x30] sm:$0xff] %vm402_vm0, %v86_v7  ;;  %vm790_vm1 = vcmp.lt.s32.totalorder %v213_v12, 15  ;;  %vm788_vm2 = vcmp.lt.s32.totalorder %v211_v19, 15  ;;  %vm792_vm3 = vcmp.lt.s32.totalorder %v215_v23, 15  ;;  %vm794_vm4 = vcmp.lt.s32.totalorder %v217_v30, 15  ;;  %v99_v54 = vld [vmem:[%s16492_s0 + $0x90] sm:$0xff] }
  0x16   :  { %409 = vst.msk [vmem:[#allocation2 + $0x38] sm:$0xff] %vm402_vm0, %v87_v10  ;;  %v853_v13 = vld [vmem:[#allocation2 + $0x19] sm:$0xff]  ;;  %1177 = vrot.lane.b32.xlu0 %v84_v2, %s10653_s16  ;;  %vm796_vm5 = vcmp.lt.s32.totalorder %v219_v38, 15  ;;  %vm798_vm6 = vcmp.lt.s32.totalorder %v221_v45, 15  ;;  %v223_v52 = vand.u32 15, %v10855_v51  ;;  %v10871_v58 = vadd.s32 120, %v10741_v4 }
  0x17   :  { %410 = vst.msk [vmem:[#allocation2 + $0x40] sm:$0xff] %vm402_vm0, %v88_v9  ;;  %1431 = vrot.lane.b32.xlu1 %v853_v13, %s10654_s29  ;;  %v854_v15 = vld [vmem:[#allocation2 + $0x21] sm:$0xff]  ;;  %v100_v60 = vld [vmem:[%s16492_s0 + $0x98] sm:$0xff]  ;;  %v10880_v61 = vld [vmem:[%s16492_s0 + $0xa0] sm:$0xff]  ;;  %v10890_v2 = vadd.s32 16, %v10741_v4  ;;  %v10906_v23 = vadd.s32 152, %v10741_v4 }
  0x18   :  { %411 = vst.msk [vmem:[#allocation2 + $0x48] sm:$0xff] %vm402_vm0, %v89_v11  ;;  %1173 = vrot.lane.b32.xlu2 %v82_v6, %s10653_s16  ;;  %v1046_v18 = vsel %vm790_vm1, %v854_v15, 0.0  ;;  %vm800_vm7 = vcmp.lt.s32.totalorder %v223_v52, 15  ;;  %v225_v59 = vand.u32 15, %v10871_v58  ;;  %v10900_v15 = vadd.s32 32, %v10741_v4  ;;  %s10660_s12 = smov 96  }
  0x19   :  { %412 = vst.msk [vmem:[#allocation2 + $0x50] sm:$0xff] %vm402_vm0, %v90_v14  ;;  %v212_v5 = vand.u32 15, %v10890_v2  ;;  %v229_v30 = vand.u32 15, %v10906_v23  ;;  %v10935_v45 = vadd.s32 48, %v10741_v4  ;;  %s10661_s23 = smov 64  }
  0x1a   :  { %16672 = vst [vmem:[#allocation22_spill] sm:$0xff] %v10784_v16  ;;  %vm802_vm8 = vcmp.lt.s32.totalorder %v225_v59, 15 }
  0x1b   :  { %v851_v17 = vld [vmem:[#allocation2 + $0x9] sm:$0xff]  ;;  %413 = vst.msk [vmem:[#allocation2 + $0x58] sm:$0xff] %vm402_vm0, %v91_v20  ;;  %v852_v21 = vld [vmem:[#allocation2 + $0x11] sm:$0xff]  ;;  %vm469_vm9 = vcmp.gt.s32.totalorder %v212_v5, 0  ;;  %vm10926_vm15 = vcmp.lt.s32.totalorder %v229_v30, 15 }
  0x1c   :  { %16673 = vst [vmem:[#allocation23_spill] sm:$0xff] %v10795_v22  ;;  %v1044_v24 = vsel %vm788_vm2, %v852_v21, 0.0  ;;  %v855_v29 = vld [vmem:[#allocation2 + $0x29] sm:$0xff] }
  0x1d   :  { %v856_v25 = vld [vmem:[#allocation2 + $0x31] sm:$0xff]  ;;  %16674 = vst [vmem:[#allocation24_spill] sm:$0xff] %v10805_v28 }
  0x1e   :  { %1427 = vrot.lane.b32.xlu0 %v851_v17, %s10654_s29  ;;  %v1048_v26 = vsel %vm792_vm3, %v856_v25, 0.0  ;;  %414 = vst.msk [vmem:[#allocation2 + $0x60] sm:$0xff] %vm402_vm0, %v92_v27  ;;  %v857_v32 = vld [vmem:[#allocation2 + $0x39] sm:$0xff] }
  0x1f   :  { %1433 = vrot.lane.b32.xlu1 %v1046_v18, %s10654_s29  ;;  %415 = vst.msk [vmem:[#allocation2 + $0x68] sm:$0xff] %vm402_vm0, %v93_v31  ;;  %v858_v33 = vld [vmem:[#allocation2 + $0x41] sm:$0xff] }
  0x20   :  { %1179 = vrot.lane.b32.xlu2 %v85_v3, %s10653_s16  ;;  %v1050_v34 = vsel %vm794_vm4, %v858_v33, 0.0  ;;  %416 = vst.msk [vmem:[#allocation2 + $0x70] sm:$0xff] %vm402_vm0, %v94_v35  ;;  %v859_v37 = vld [vmem:[#allocation2 + $0x49] sm:$0xff]  ;;  %v10893_v3 = vadd.s32 136, %v10741_v4 }
  0x21   :  { %16675 = vst [vmem:[#allocation25_spill] sm:$0xff] %v10824_v36  ;;  %v531_v18 = vld [vmem:[#allocation2 + $0x7] sm:$0xff] }
  0x22   :  { %417 = vst.msk [vmem:[#allocation2 + $0x78] sm:$0xff] %vm402_vm0, %v95_v39  ;;  %v860_v40 = vld [vmem:[#allocation2 + $0x51] sm:$0xff]  ;;  %v227_v6 = vand.u32 15, %v10893_v3 }
  0x23   :  { %v1052_v42 = vsel %vm796_vm5, %v860_v40, 0.0  ;;  %16676 = vst [vmem:[#allocation26_spill] sm:$0xff] %v10838_v43 }
  0x24   :  { %418 = vst.msk [vmem:[#allocation2 + $0x80] sm:$0xff] %vm402_vm0, %v96_v46  ;;  %vm804_vm10 = vcmp.lt.s32.totalorder %v227_v6, 15 }
  0x25   :  { %v861_v41 = vld [vmem:[#allocation2 + $0x59] sm:$0xff]  ;;  %419 = vst.msk [vmem:[#allocation2 + $0x88] sm:$0xff] %vm402_vm0, %v97_v47 }
  0x26   :  { %1181 = vrot.lane.b32.xlu0 %v86_v7, %s10653_s16  ;;  %v862_v48 = vld [vmem:[#allocation2 + $0x61] sm:$0xff]  ;;  %16677 = vst [vmem:[#allocation27_spill] sm:$0xff] %v10855_v51 }
  0x27   :  { %1429 = vrot.lane.b32.xlu1 %v1044_v24, %s10654_s29  ;;  %v863_v44 = vld [vmem:[#allocation2 + $0x69] sm:$0xff]  ;;  %v1054_v49 = vsel %vm798_vm6, %v862_v48, 0.0  ;;  %420 = vst.msk [vmem:[#allocation2 + $0x90] sm:$0xff] %vm402_vm0, %v98_v53 }
  0x28   :  { %1437 = vrot.lane.b32.xlu2 %v1048_v26, %s10654_s29  ;;  %421 = vst.msk [vmem:[#allocation2 + $0x98] sm:$0xff] %vm402_vm0, %v99_v54 }
  0x29   :  { %v864_v55 = vld [vmem:[#allocation2 + $0x71] sm:$0xff]  ;;  %16678 = vst [vmem:[#allocation28_spill] sm:$0xff] %v10871_v58 }
  0x2a   :  { %v1056_v56 = vsel %vm800_vm7, %v864_v55, 0.0  ;;  %422 = vst.msk [vmem:[#allocation2 + $0xa0] sm:$0xff] %vm402_vm0, %v100_v60  ;;  %v536_v55 = vld [vmem:[#allocation2 + $0x2f] sm:$0xff] }
  0x2b   :  { %v865_v50 = vld [vmem:[#allocation2 + $0x79] sm:$0xff]  ;;  %423 = vst.msk [vmem:[#allocation2 + $0xa8] sm:$0xff] %vm402_vm0, %v10880_v61 }
  0x2c   :  { %v866_v62 = vld [vmem:[#allocation2 + $0x81] sm:$0xff]  ;;  %16679 = vst [vmem:[#allocation29_spill] sm:$0xff] %v10890_v2 }
  0x2d   :  { %v1058_v63 = vsel %vm802_vm8, %v866_v62, 0.0  ;;  %16680 = vst [vmem:[#allocation30_spill] sm:$0xff] %v10900_v15 }
  0x2e   :  { %1183 = vrot.lane.b32.xlu0 %v87_v10, %s10653_s16  ;;  %v867_v57 = vld [vmem:[#allocation2 + $0x89] sm:$0xff]  ;;  %16683 = vst [vmem:[#allocation31_spill] sm:$0xff] %v10935_v45 }
  0x2f   :  { %1435 = vrot.lane.b32.xlu1 %v855_v29, %s10654_s29  ;;  %v868_v10 = vld [vmem:[#allocation2 + $0x91] sm:$0xff] }
  0x30   :  { %1439 = vrot.lane.b32.xlu2 %v857_v32, %s10654_s29  ;;  %v1060_v13 = vsel %vm804_vm10, %v868_v10, 0.0  ;;  %v537_v10 = vld [vmem:[#allocation2 + $0x37] sm:$0xff] }
  0x31   :  { %v869_v0 = vld [vmem:[#allocation2 + $0x99] sm:$0xff] }
  0x36   :  { %1441 = vrot.lane.b32.xlu0 %v1050_v34, %s10654_s29  ;;  %v274_v34 = vshra.s32 %v10741_v4, 4 }
  0x37   :  { %1185 = vrot.lane.b32.xlu1 %v88_v9, %s10653_s16  ;;  %v533_v9 = vld [vmem:[#allocation2 + $0x17] sm:$0xff] }
  0x38   :  { %1189 = vrot.lane.b32.xlu2 %v90_v14, %s10653_s16  ;;  %v725_v12 = vsel %vm469_vm9, %v533_v9, 0.0  ;;  %v210_v14 = vand.u32 15, %v10741_v4 }
  0x3a   :  { %vm467_vm13 = vcmp.gt.s32.totalorder %v210_v14, 0 }
  0x3b   :  { %v723_v25 = vsel %vm467_vm13, %v531_v18, 0.0  ;;  %v10981_v18 = vld [vmem:[%s16492_s0 + $0xb0] sm:$0xff] }
  0x3c   :  { %425 = vst.msk [vmem:[#allocation2 + $0xb8] sm:$0xff] %vm402_vm0, %v10981_v18 }
  0x3e   :  { %1443 = vrot.lane.b32.xlu0 %v859_v37, %s10654_s29  ;;  %v279_v37 = vshra.s32 %v10795_v22, 4 }
  0x3f   :  { %1187 = vrot.lane.b32.xlu1 %v89_v11, %s10653_s16 }
  0x40   :  { %1193 = vrot.lane.b32.xlu2 %v92_v27, %s10653_s16  ;;  %v534_v27 = vld [vmem:[#allocation2 + $0x1f] sm:$0xff]  ;;  %v10947_v52 = vand.u32 15, %v279_v37  ;;  %v280_v37 = vshra.s32 %v10935_v45, 4 }
  0x42   :  { %vm1818_vm1 = vcmp.gt.s32.totalorder %v10947_v52, 0 }
  0x46   :  { %1447 = vrot.lane.b32.xlu0 %v861_v41, %s10654_s29  ;;  %v870_v41 = vld [vmem:[#allocation2 + $0xa1] sm:$0xff] }
  0x47   :  { %1445 = vrot.lane.b32.xlu1 %v1052_v42, %s10654_s29  ;;  %v1062_v48 = vsel %vm10926_vm15, %v870_v41, 0.0 }
  0x48   :  { %1197 = vrot.lane.b32.xlu2 %v94_v35, %s10653_s16  ;;  %v275_v35 = vshra.s32 %v10784_v16, 4 }
  0x4e   :  { %1451 = vrot.lane.b32.xlu0 %v863_v44, %s10654_s29 }
  0x4f   :  { %1191 = vrot.lane.b32.xlu1 %v91_v20, %s10653_s16  ;;  %v278_v20 = vshra.s32 %v10900_v15, 4 }
  0x50   :  { %1201 = vrot.lane.b32.xlu2 %v96_v46, %s10653_s16 }
  0x51   :  { %v10915_v29 = vand.u32 15, %v278_v20 }
  0x53   :  { %vm1817_vm14 = vcmp.gt.s32.totalorder %v10915_v29, 0  ;;  %vm2137_vm15 = vcmp.lt.s32.totalorder %v10915_v29, 15 }
  0x56   :  { %1455 = vrot.lane.b32.xlu0 %v865_v50, %s10654_s29  ;;  %v10945_v50 = vand.u32 15, %v275_v35  ;;  %v277_v35 = vshra.s32 %v10758_v8, 4 }
  0x57   :  { %1449 = vrot.lane.b32.xlu1 %v1054_v49, %s10654_s29  ;;  %v10943_v49 = vand.u32 15, %v274_v34  ;;  %v276_v34 = vshra.s32 %v10890_v2, 4 }
  0x58   :  { %1205 = vrot.lane.b32.xlu2 %v98_v53, %s10653_s16  ;;  %v214_v53 = vand.u32 15, %v10900_v15  ;;  %vm2134_vm3 = vcmp.lt.s32.totalorder %v10945_v50, 15 }
  0x59   :  { %vm2133_vm2 = vcmp.lt.s32.totalorder %v10943_v49, 15 }
  0x5a   :  { %vm10956_vm4 = vcmp.gt.s32.totalorder %v214_v53, 0  ;;  %v11025_v53 = vand.u32 15, %v277_v35  ;;  %v11077_v35 = vadd.s32 184, %v10741_v4 }
  0x5c   :  { %vm2136_vm8 = vcmp.lt.s32.totalorder %v11025_v53, 15 }
  0x5e   :  { %1459 = vrot.lane.b32.xlu0 %v867_v57, %s10654_s29 }
  0x5f   :  { %1195 = vrot.lane.b32.xlu1 %v93_v31, %s10653_s16 }
  0x60   :  { %1209 = vrot.lane.b32.xlu2 %v100_v60, %s10653_s16 }
  0x66   :  { %1463 = vrot.lane.b32.xlu0 %v869_v0, %s10654_s29 }
  0x67   :  { %1453 = vrot.lane.b32.xlu1 %v1056_v56, %s10654_s29  ;;  %v216_v56 = vand.u32 15, %v10935_v45  ;;  %v11631_v45 = vadd.s32 176, %v10741_v4 }
  0x69   :  { %vm10966_vm5 = vcmp.gt.s32.totalorder %v216_v56, 0 }
  0x6a   :  { %v1172_v1 = vpop.permute.xlu2 %1171 }
  0x6b   :  { %v1619_v31 = vsel %vm402_vm0, %v723_v25, %v1172_v1  ;;  %v281_v1 = vshra.s32 %v10805_v28, 4  ;;  %v729_v25 = vsel %vm10966_vm5, %v537_v10, 0.0  ;;  %v11603_v28 = vadd.s32 208, %v10741_v4 }
  0x6d   :  { %16716 = vst [vmem:[#allocation42_spill] sm:$0xff] %v11603_v28 }
  0x6f   :  { %1199 = vrot.lane.b32.xlu1 %v95_v39, %s10653_s16 }
  0x72   :  { %v1174_v11 = vpop.permute.xlu2 %1173 }
  0x77   :  { %1457 = vrot.lane.b32.xlu1 %v1058_v63, %s10654_s29  ;;  %v535_v63 = vld [vmem:[#allocation2 + $0x27] sm:$0xff] }
  0x7a   :  { %v10913_v26 = vpop.permute.xlu2 %1179 }
  0x7f   :  { %1203 = vrot.lane.b32.xlu1 %v97_v47, %s10653_s16  ;;  %v532_v47 = vld [vmem:[#allocation2 + $0xf] sm:$0xff] }
  0x80   :  { %v1176_v7 = vpop.permute.xlu0 %1175  ;;  %v1620_v57 = vsel %vm402_vm0, %v532_v47, %v1174_v11 }
  0x81   :  { %v1621_v17 = vsel %vm402_vm0, %v725_v12, %v1176_v7 }
  0x87   :  { %1461 = vrot.lane.b32.xlu1 %v1060_v13, %s10654_s29 }
  0x88   :  { %v1178_v19 = vpop.permute.xlu0 %1177 }
  0x89   :  { %v1432_v21 = vpop.permute.xlu1 %1431  ;;  %v1622_v32 = vsel %vm402_vm0, %v534_v27, %v1178_v19  ;;  %v727_v19 = vsel %vm10956_vm4, %v535_v63, 0.0 }
  0x8a   :  { %v10909_v24 = vsel %vm1683_vm11, %v1621_v17, %v1432_v21  ;;  %v10976_v17 = vld [vmem:[%s16492_s0 + $0xa8] sm:$0xff]  ;;  %v10988_v21 = vand.u32 15, %v281_v1  ;;  %v1623_v27 = vsel %vm402_vm0, %v727_v19, %v10913_v26  ;;  %v105_v19 = vld [vmem:[%s16492_s0 + $0xc0] sm:$0xff] }
  0x8b   :  { %1751 = vst.msk [vmem:[#allocation3 + $0x20] sm:$0xff] %vm1748_vm12, %v10909_v24 }
  0x8c   :  { %424 = vst.msk [vmem:[#allocation2 + $0xb0] sm:$0xff] %vm402_vm0, %v10976_v17  ;;  %vm1820_vm6 = vcmp.gt.s32.totalorder %v10988_v21, 0 }
  0x8d   :  { %427 = vst.msk [vmem:[#allocation2 + $0xc8] sm:$0xff] %vm402_vm0, %v105_v19 }
  0x8f   :  { %1207 = vrot.lane.b32.xlu1 %v99_v54, %s10653_s16  ;;  %v1438_v54 = vpop.permute.xlu2 %1437 }
  0x90   :  { %v1428_v33 = vpop.permute.xlu0 %1427 }
  0x91   :  { %v1434_v38 = vpop.permute.xlu1 %1433  ;;  %v1684_v39 = vsel %vm1683_vm11, %v1619_v31, %v1428_v33  ;;  %v11000_v31 = vadd.s32 64, %v10741_v4 }
  0x92   :  { %v10931_v42 = vsel %vm1683_vm11, %v1622_v32, %v1434_v38  ;;  %1749 = vst.msk [vmem:[#allocation3 + $0x10] sm:$0xff] %vm1748_vm12, %v1684_v39  ;;  %v1881_v44 = vld [vmem:[#allocation3 + $0x20] sm:$0xff]  ;;  %v11005_v32 = vadd.s32 168, %v10741_v4 }
  0x93   :  { %1752 = vst.msk [vmem:[#allocation3 + $0x28] sm:$0xff] %vm1748_vm12, %v10931_v42  ;;  %v10939_v46 = vsel %vm1817_vm14, %v1881_v44, 0.0  ;;  %v2329_v13 = vsel %vm2133_vm2, %v1881_v44, 0.0  ;;  %v10076_v44 = vpack.i.bf16 %v10931_v42, %v10909_v24  ;;  %v872_v24 = vld [vmem:[#allocation2 + $0xb1] sm:$0xff]  ;;  %vm2138_vm2 = vcmp.lt.s32.totalorder %v10947_v52, 15 }
  0x94   :  { %16688 = vst [vmem:[#allocation32_spill] sm:$0xff] %v11000_v31  ;;  %v231_v40 = vand.u32 15, %v11005_v32 }
  0x96   :  { %vm808_vm7 = vcmp.lt.s32.totalorder %v231_v40, 15 }
  0x97   :  { %1465 = vrot.lane.b32.xlu1 %v1062_v48, %s10654_s29  ;;  %v1440_v30 = vpop.permute.xlu2 %1439  ;;  %v11023_v48 = vand.u32 15, %v276_v34  ;;  %v1064_v42 = vsel %vm808_vm7, %v872_v24, 0.0 }
  0x98   :  { %v1182_v59 = vpop.permute.xlu0 %1181 }
  0x99   :  { %v1430_v60 = vpop.permute.xlu1 %1429  ;;  %v1624_v0 = vsel %vm402_vm0, %v536_v55, %v1182_v59  ;;  %vm2135_vm10 = vcmp.lt.s32.totalorder %v11023_v48, 15 }
  0x9a   :  { %v1685_v5 = vsel %vm1683_vm11, %v1620_v57, %v1430_v60  ;;  %v1882_v6 = vld [vmem:[#allocation3 + $0x28] sm:$0xff]  ;;  %v10964_v7 = vsel %vm1683_vm11, %v1624_v0, %v1438_v54  ;;  %v11027_v54 = vand.u32 15, %v280_v37  ;;  %v218_v60 = vand.u32 15, %v11000_v31 }
  0x9b   :  { %1750 = vst.msk [vmem:[#allocation3 + $0x18] sm:$0xff] %vm1748_vm12, %v1685_v5  ;;  %v10071_v11 = vpack.i.bf16 %v1685_v5, %v1684_v39  ;;  %v10971_v12 = vsel %vm1818_vm1, %v1882_v6, 0.0  ;;  %v2330_v14 = vsel %vm2134_vm3, %v1882_v6, 0.0  ;;  %v282_v39 = vshra.s32 %v11000_v31, 4  ;;  %v538_v57 = vld [vmem:[#allocation2 + $0x3f] sm:$0xff] }
  0x9c   :  { %v10101_v20 = vpack.i.bf16 %v2330_v14, %v2329_v13  ;;  %1754 = vst.msk [vmem:[#allocation3 + $0x38] sm:$0xff] %vm1748_vm12, %v10964_v7  ;;  %vm1819_vm9 = vcmp.gt.s32.totalorder %v11027_v54, 0  ;;  %v283_v0 = vshra.s32 %v10824_v36, 4  ;;  %v11049_v14 = vld [vmem:[%s16492_s0 + $0xb8] sm:$0xff]  ;;  %vm11055_vm14 = vcmp.gt.s32.totalorder %v218_v60, 0 }
  0x9d   :  { %10072 = vrot.lane.b32.xlu2 %v10071_v11, %s10655_s17  ;;  %v11032_v56 = vand.u32 15, %v282_v39  ;;  %426 = vst.msk [vmem:[#allocation2 + $0xc0] sm:$0xff] %vm402_vm0, %v11049_v14  ;;  %v233_v39 = vand.u32 15, %v11077_v35 }
  0x9e   :  { %10102 = vrot.lane.b32.xlu0 %v10101_v20, %s10656_s18 }
  0x9f   :  { %1211 = vrot.lane.b32.xlu1 %v10880_v61, %s10653_s16  ;;  %vm1821_vm13 = vcmp.gt.s32.totalorder %v11032_v56, 0  ;;  %vm810_vm3 = vcmp.lt.s32.totalorder %v233_v39, 15  ;;  %v1190_v52 = vpop.permute.xlu2 %1189 }
  0xa0   :  { %v1184_v33 = vpop.permute.xlu0 %1183 }
  0xa1   :  { %v1436_v38 = vpop.permute.xlu1 %1435  ;;  %v1625_v26 = vsel %vm402_vm0, %v729_v25, %v1184_v33  ;;  %v539_v25 = vld [vmem:[#allocation2 + $0x47] sm:$0xff]  ;;  %v11065_v33 = vadd.s32 80, %v10741_v4 }
  0xa2   :  { %v1688_v61 = vsel %vm1683_vm11, %v1623_v27, %v1436_v38  ;;  %v11016_v41 = vsel %vm1683_vm11, %v1625_v26, %v1440_v30  ;;  %v11062_v30 = vand.u32 15, %v283_v0  ;;  %v731_v34 = vsel %vm11055_vm14, %v539_v25, 0.0 }
  0xa3   :  { %1753 = vst.msk [vmem:[#allocation3 + $0x30] sm:$0xff] %vm1748_vm12, %v1688_v61  ;;  %v1884_v47 = vld [vmem:[#allocation3 + $0x38] sm:$0xff]  ;;  %v10081_v6 = vpack.i.bf16 %v10964_v7, %v1688_v61  ;;  %v284_v26 = vshra.s32 %v11065_v33, 4  ;;  %v285_v0 = vshra.s32 %v10838_v43, 4  ;;  %v541_v7 = vld [vmem:[#allocation2 + $0x57] sm:$0xff] }
  0xa4   :  { %1755 = vst.msk [vmem:[#allocation3 + $0x40] sm:$0xff] %vm1748_vm12, %v11016_v41  ;;  %v11029_v55 = vsel %vm1820_vm6, %v1884_v47, 0.0  ;;  %v2332_v63 = vsel %vm2136_vm8, %v1884_v47, 0.0  ;;  %vm1822_vm1 = vcmp.gt.s32.totalorder %v11062_v30, 0  ;;  %v874_v60 = vld [vmem:[#allocation2 + $0xc1] sm:$0xff]  ;;  %vm2139_vm6 = vcmp.lt.s32.totalorder %v11027_v54, 15 }
  0xa5   :  { %10077 = vrot.lane.b32.xlu2 %v10076_v44, %s10655_s17  ;;  %16691 = vst [vmem:[#allocation33_spill] sm:$0xff] %v11065_v33  ;;  %v11114_v25 = vand.u32 15, %v285_v0  ;;  %vm2140_vm8 = vcmp.lt.s32.totalorder %v10988_v21, 15 }
  0xa7   :  { %1469 = vrot.lane.b32.xlu1 %v1064_v42, %s10654_s29  ;;  %v540_v42 = vld [vmem:[#allocation2 + $0x4f] sm:$0xff]  ;;  %vm1824_vm7 = vcmp.gt.s32.totalorder %v11114_v25, 0  ;;  %v1194_v21 = vpop.permute.xlu2 %1193 }
  0xa8   :  { %v1442_v59 = vpop.permute.xlu0 %1441 }
  0xa9   :  { %v1186_v62 = vpop.permute.xlu1 %1185 }
  0xaa   :  { %v1626_v1 = vsel %vm402_vm0, %v538_v57, %v1186_v62  ;;  %v1883_v5 = vld [vmem:[#allocation3 + $0x30] sm:$0xff]  ;;  %v1066_v62 = vsel %vm810_vm3, %v874_v60, 0.0 }
  0xab   :  { %v1691_v9 = vsel %vm1683_vm11, %v1626_v1, %v1442_v59  ;;  %v11044_v10 = vsel %vm1819_vm9, %v1883_v5, 0.0  ;;  %v2331_v11 = vsel %vm2135_vm10, %v1883_v5, 0.0  ;;  %v1885_v13 = vld [vmem:[#allocation3 + $0x40] sm:$0xff]  ;;  %v11090_v59 = vand.u32 15, %v284_v26 }
  0xac   :  { %1756 = vst.msk [vmem:[#allocation3 + $0x48] sm:$0xff] %vm1748_vm12, %v1691_v9  ;;  %v10106_v20 = vpack.i.bf16 %v2332_v63, %v2331_v11  ;;  %v11059_v27 = vsel %vm1821_vm13, %v1885_v13, 0.0  ;;  %v2333_v61 = vsel %vm2137_vm15, %v1885_v13, 0.0  ;;  %v10086_v29 = vpack.i.bf16 %v1691_v9, %v11016_v41  ;;  %v11103_v11 = vld [vmem:[%s16492_s0 + $0xc8] sm:$0xff]  ;;  %v11108_v13 = vld [vmem:[%s16492_s0 + $0xd0] sm:$0xff] }
  0xad   :  { %10082 = vrot.lane.b32.xlu2 %v10081_v6, %s10655_s17  ;;  %v1628_v41 = vsel %vm402_vm0, %v540_v42, %v1190_v52  ;;  %v220_v63 = vand.u32 15, %v11065_v33  ;;  %vm1823_vm4 = vcmp.gt.s32.totalorder %v11090_v59, 0  ;;  %428 = vst.msk [vmem:[#allocation2 + $0xd0] sm:$0xff] %vm402_vm0, %v11103_v11  ;;  %v11131_v26 = vadd.s32 200, %v10741_v4 }
  0xae   :  { %10107 = vrot.lane.b32.xlu0 %v10106_v20, %s10656_s18  ;;  %429 = vst.msk [vmem:[#allocation2 + $0xd8] sm:$0xff] %vm402_vm0, %v11108_v13  ;;  %vm2141_vm15 = vcmp.lt.s32.totalorder %v11032_v56, 15  ;;  %v544_v56 = vld [vmem:[#allocation2 + $0x6f] sm:$0xff] }
  0xaf   :  { %1215 = vrot.lane.b32.xlu1 %v10981_v18, %s10653_s16  ;;  %vm11110_vm5 = vcmp.gt.s32.totalorder %v220_v63, 0 }
  0xb0   :  { %v1444_v37 = vpop.permute.xlu0 %1443 }
  0xb1   :  { %v1188_v38 = vpop.permute.xlu1 %1187 }
  0xb2   :  { %v1627_v40 = vsel %vm402_vm0, %v731_v34, %v1188_v38  ;;  %v733_v38 = vsel %vm11110_vm5, %v541_v7, 0.0  ;;  %v123_v7 = vld [vmem:[%s16492_s0 + $0x150] sm:$0xff] }
  0xb3   :  { %v1692_v18 = vsel %vm1683_vm11, %v1627_v40, %v1444_v37  ;;  %v1886_v44 = vld [vmem:[#allocation3 + $0x48] sm:$0xff]  ;;  %v11122_v37 = vadd.s32 96, %v10741_v4  ;;  %445 = vst.msk [vmem:[#allocation2 + $0x158] sm:$0xff] %vm402_vm0, %v123_v7 }
  0xb4   :  { %1757 = vst.msk [vmem:[#allocation3 + $0x50] sm:$0xff] %vm1748_vm12, %v1692_v18  ;;  %v2334_v47 = vsel %vm2138_vm2, %v1886_v44, 0.0  ;;  %v11087_v24 = vsel %vm1822_vm1, %v1886_v44, 0.0  ;;  %vm2142_vm1 = vcmp.lt.s32.totalorder %v11062_v30, 15  ;;  %v11201_v30 = vld [vmem:[%s16492_s0 + $0xd8] sm:$0xff] }
  0xb5   :  { %10087 = vrot.lane.b32.xlu2 %v10086_v29, %s10655_s17  ;;  %v10111_v57 = vpack.i.bf16 %v2334_v47, %v2333_v61  ;;  %16694 = vst [vmem:[#allocation34_spill] sm:$0xff] %v11122_v37  ;;  %v286_v61 = vshra.s32 %v11122_v37, 4  ;;  %v235_v29 = vand.u32 15, %v11131_v26  ;;  %v876_v60 = vld [vmem:[#allocation2 + $0xd1] sm:$0xff]  ;;  %v222_v0 = vand.u32 15, %v11122_v37 }
  0xb6   :  { %430 = vst.msk [vmem:[#allocation2 + $0xe0] sm:$0xff] %vm402_vm0, %v11201_v30 }
  0xb7   :  { %10112 = vrot.lane.b32.xlu0 %v10111_v57, %s10656_s18  ;;  %1473 = vrot.lane.b32.xlu1 %v1066_v62, %s10654_s29  ;;  %vm812_vm9 = vcmp.lt.s32.totalorder %v235_v29, 15  ;;  %v542_v57 = vld [vmem:[#allocation2 + $0x5f] sm:$0xff]  ;;  %v11142_v62 = vand.u32 15, %v286_v61  ;;  %vm11160_vm13 = vcmp.gt.s32.totalorder %v222_v0, 0 }
  0xb8   :  { %v1448_v39 = vpop.permute.xlu0 %1447  ;;  %v1630_v63 = vsel %vm402_vm0, %v542_v57, %v1194_v21 }
  0xb9   :  { %v1446_v1 = vpop.permute.xlu1 %1445  ;;  %vm1825_vm10 = vcmp.gt.s32.totalorder %v11142_v62, 0 }
  0xba   :  { %v1693_v5 = vsel %vm1683_vm11, %v1628_v41, %v1446_v1  ;;  %v1068_v41 = vsel %vm812_vm9, %v876_v60, 0.0  ;;  %v287_v1 = vshra.s32 %v10855_v51, 4  ;;  %vm16543_vm9 = vcmask 1041408  }
  0xbb   :  { %1758 = vst.msk [vmem:[#allocation3 + $0x58] sm:$0xff] %vm1748_vm12, %v1693_v5  ;;  %v10091_v6 = vpack.i.bf16 %v1693_v5, %v1692_v18  ;;  %v1887_v9 = vld [vmem:[#allocation3 + $0x50] sm:$0xff] }
  0xbc   :  { %v11116_v34 = vsel %vm1823_vm4, %v1887_v9, 0.0  ;;  %v2335_v47 = vsel %vm2139_vm6, %v1887_v9, 0.0  ;;  %v11164_v61 = vand.u32 15, %v287_v1  ;;  %vm2143_vm6 = vcmp.lt.s32.totalorder %v11090_v59, 15 }
  0xbd   :  { %10092 = vrot.lane.b32.xlu2 %v10091_v6, %s10655_s17 }
  0xbe   :  { %vm1826_vm14 = vcmp.gt.s32.totalorder %v11164_v61, 0 }
  0xbf   :  { %1219 = vrot.lane.b32.xlu1 %v105_v19, %s10653_s16 }
  0xc1   :  { %v1192_v40 = vpop.permute.xlu1 %1191 }
  0xc2   :  { %v1629_v18 = vsel %vm402_vm0, %v733_v38, %v1192_v40  ;;  %v1888_v44 = vld [vmem:[#allocation3 + $0x58] sm:$0xff]  ;;  %v11158_v38 = vld [vmem:[%s16492_s0 + $0x158] sm:$0xff] }
  0xc3   :  { %v1694_v54 = vsel %vm1683_vm11, %v1629_v18, %v1448_v39  ;;  %v11139_v19 = vsel %vm1824_vm7, %v1888_v44, 0.0  ;;  %v2336_v42 = vsel %vm2140_vm8, %v1888_v44, 0.0  ;;  %v543_v40 = vld [vmem:[#allocation2 + $0x67] sm:$0xff]  ;;  %v11172_v18 = vld [vmem:[%s16492_s0 + $0x160] sm:$0xff]  ;;  %v11176_v44 = vadd.s32 112, %v10741_v4  ;;  %446 = vst.msk [vmem:[#allocation2 + $0x160] sm:$0xff] %vm402_vm0, %v11158_v38 }
  0xc4   :  { %1759 = vst.msk [vmem:[#allocation3 + $0x60] sm:$0xff] %vm1748_vm12, %v1694_v54  ;;  %v10116_v52 = vpack.i.bf16 %v2336_v42, %v2335_v47  ;;  %v735_v47 = vsel %vm11160_vm13, %v543_v40, 0.0  ;;  %v11186_v42 = vadd.s32 344, %v10741_v4  ;;  %vm2144_vm7 = vcmp.lt.s32.totalorder %v11114_v25, 15  ;;  %v546_v25 = vld [vmem:[#allocation2 + $0x7f] sm:$0xff] }
  0xc5   :  { %16697 = vst [vmem:[#allocation35_spill] sm:$0xff] %v11176_v44  ;;  %v288_v21 = vshra.s32 %v11176_v44, 4  ;;  %vm2145_vm13 = vcmp.lt.s32.totalorder %v11142_v62, 15 }
  0xc6   :  { %10117 = vrot.lane.b32.xlu0 %v10116_v52, %s10656_s18  ;;  %447 = vst.msk [vmem:[#allocation2 + $0x168] sm:$0xff] %vm402_vm0, %v11172_v18  ;;  %v1452_v52 = vpop.permute.xlu0 %1451  ;;  %v253_v60 = vand.u32 15, %v11186_v42 }
  0xc7   :  { %1477 = vrot.lane.b32.xlu1 %v1068_v41, %s10654_s29 }
  0xc8   :  { %vm830_vm2 = vcmp.lt.s32.totalorder %v253_v60, 15 }
  0xc9   :  { %v1450_v5 = vpop.permute.xlu1 %1449 }
  0xca   :  { %v1695_v6 = vsel %vm1683_vm11, %v1630_v63, %v1450_v5 }
  0xcb   :  { %1760 = vst.msk [vmem:[#allocation3 + $0x68] sm:$0xff] %vm1748_vm12, %v1695_v6  ;;  %v10096_v9 = vpack.i.bf16 %v1695_v6, %v1694_v54  ;;  %v1889_v20 = vld [vmem:[#allocation3 + $0x60] sm:$0xff]  ;;  %v1198_v54 = vpop.permute.xlu2 %1197 }
  0xcc   :  { %v11166_v29 = vsel %vm1825_vm10, %v1889_v20, 0.0  ;;  %v2337_v5 = vsel %vm2141_vm15, %v1889_v20, 0.0  ;;  %v1632_v40 = vsel %vm402_vm0, %v544_v56, %v1198_v54  ;;  %v545_v54 = vld [vmem:[#allocation2 + $0x77] sm:$0xff]  ;;  %vm2146_vm15 = vcmp.lt.s32.totalorder %v11164_v61, 15  ;;  %v548_v61 = vld [vmem:[#allocation2 + $0x8f] sm:$0xff] }
  0xcd   :  { %10097 = vrot.lane.b32.xlu2 %v10096_v9, %s10655_s17  ;;  %v894_v39 = vld [vmem:[#allocation2 + $0x161] sm:$0xff] }
  0xce   :  { %v1086_v20 = vsel %vm830_vm2, %v894_v39, 0.0  ;;  %v162_v39 = vadd.s32 128, %v10741_v4 }
  0xcf   :  { %1255 = vrot.lane.b32.xlu1 %v123_v7, %s10653_s16  ;;  %v11205_v7 = vand.u32 15, %v288_v21 }
  0xd1   :  { %v1196_v57 = vpop.permute.xlu1 %1195  ;;  %vm1827_vm3 = vcmp.gt.s32.totalorder %v11205_v7, 0  ;;  %vm2147_vm2 = vcmp.lt.s32.totalorder %v11205_v7, 15  ;;  %v11342_v7 = vld [vmem:[%s16492_s0 + $0xf0] sm:$0xff] }
  0xd2   :  { %v1631_v41 = vsel %vm402_vm0, %v735_v47, %v1196_v57  ;;  %v1890_v63 = vld [vmem:[#allocation3 + $0x68] sm:$0xff]  ;;  %v224_v47 = vand.u32 15, %v11176_v44  ;;  %433 = vst.msk [vmem:[#allocation2 + $0xf8] sm:$0xff] %vm402_vm0, %v11342_v7 }
  0xd3   :  { %v1696_v0 = vsel %vm1683_vm11, %v1631_v41, %v1452_v52  ;;  %v11195_v1 = vsel %vm1826_vm14, %v1890_v63, 0.0  ;;  %v2338_v6 = vsel %vm2142_vm1, %v1890_v63, 0.0  ;;  %v289_v52 = vshra.s32 %v10871_v58, 4  ;;  %v1202_v60 = vpop.permute.xlu2 %1201 }
  0xd4   :  { %1761 = vst.msk [vmem:[#allocation3 + $0x70] sm:$0xff] %vm1748_vm12, %v1696_v0  ;;  %v10121_v9 = vpack.i.bf16 %v2338_v6, %v2337_v5  ;;  %vm11217_vm4 = vcmp.gt.s32.totalorder %v224_v47, 0 }
  0xd5   :  { %1213 = vrot.lane.b32.xlu2 %v10976_v17, %s10653_s16  ;;  %v11221_v5 = vand.u32 15, %v289_v52  ;;  %v737_v56 = vsel %vm11217_vm4, %v545_v54, 0.0 }
  0xd6   :  { %10122 = vrot.lane.b32.xlu0 %v10121_v9, %s10656_s18  ;;  %v877_v9 = vld [vmem:[#allocation2 + $0xd9] sm:$0xff] }
  0xd7   :  { %1513 = vrot.lane.b32.xlu1 %v1086_v20, %s10654_s29  ;;  %vm1828_vm5 = vcmp.gt.s32.totalorder %v11221_v5, 0 }
  0xd9   :  { %v1454_v57 = vpop.permute.xlu1 %1453 }
  0xda   :  { %v1697_v17 = vsel %vm1683_vm11, %v1632_v40, %v1454_v57  ;;  %v290_v40 = vshra.s32 %v162_v39, 4  ;;  %v121_v57 = vld [vmem:[%s16492_s0 + $0x140] sm:$0xff] }
  0xdb   :  { %1762 = vst.msk [vmem:[#allocation3 + $0x78] sm:$0xff] %vm1748_vm12, %v1697_v17  ;;  %v10131_v21 = vpack.i.bf16 %v1697_v17, %v1696_v0  ;;  %v1891_v41 = vld [vmem:[#allocation3 + $0x70] sm:$0xff]  ;;  %v1456_v0 = vpop.permute.xlu0 %1455  ;;  %v11239_v54 = vpop.permute.xlu2 %1205 }
  0xdc   :  { %v11223_v6 = vsel %vm1827_vm3, %v1891_v41, 0.0  ;;  %443 = vst.msk [vmem:[#allocation2 + $0x148] sm:$0xff] %vm402_vm0, %v121_v57  ;;  %vm2148_vm3 = vcmp.lt.s32.totalorder %v11221_v5, 15 }
  0xdd   :  { %10132 = vrot.lane.b32.xlu2 %v10131_v21, %s10655_s17  ;;  %v2339_v21 = vsel %vm2143_vm6, %v1891_v41, 0.0  ;;  %v11251_v41 = vand.u32 15, %v290_v40  ;;  %vm1814_vm6 = vcmp.gt.s32.totalorder %v10945_v50, 0 }
  0xdf   :  { %1479 = vrot.lane.b32.xlu1 %v877_v9, %s10654_s29  ;;  %vm1829_vm8 = vcmp.gt.s32.totalorder %v11251_v41, 0 }
  0xe1   :  { %v1200_v20 = vpop.permute.xlu1 %1199 }
  0xe2   :  { %v1633_v47 = vsel %vm402_vm0, %v737_v56, %v1200_v20  ;;  %v1892_v52 = vld [vmem:[#allocation3 + $0x78] sm:$0xff]  ;;  %v11247_v56 = vld [vmem:[%s16492_s0 + $0x148] sm:$0xff] }
  0xe3   :  { %v11237_v17 = vsel %vm1828_vm5, %v1892_v52, 0.0  ;;  %v2340_v63 = vsel %vm2144_vm7, %v1892_v52, 0.0  ;;  %v1698_v59 = vsel %vm1683_vm11, %v1633_v47, %v1456_v0  ;;  %v3070_v0 = vld [vmem:[%s16493_s1 + $0x10] sm:$0x3]  ;;  %444 = vst.msk [vmem:[#allocation2 + $0x150] sm:$0xff] %vm402_vm0, %v11247_v56  ;;  %v1634_v47 = vsel %vm402_vm0, %v546_v25, %v1202_v60 }
  0xe4   :  { %v10126_v9 = vpack.i.bf16 %v2340_v63, %v2339_v21  ;;  %1763 = vst.msk [vmem:[#allocation3 + $0x80] sm:$0xff] %vm1748_vm12, %v1698_v59  ;;  %v3084_v20 = vunpack.c.l.b16 %v3070_v0  ;;  %v291_v52 = vshra.s32 %v10893_v3, 4  ;;  %v226_v21 = vand.u32 15, %v162_v39  ;;  %v871_v0 = vld [vmem:[#allocation2 + $0xa9] sm:$0xff]  ;;  %v11269_v3 = vld [vmem:[%s16492_s0 + $0xe0] sm:$0xff] }
  0xe5   :  { %1217 = vrot.lane.b32.xlu2 %v11049_v14, %s10653_s16  ;;  %431 = vst.msk [vmem:[#allocation2 + $0xe8] sm:$0xff] %vm402_vm0, %v11269_v3  ;;  %vm1813_vm5 = vcmp.gt.s32.totalorder %v10943_v49, 0  ;;  %vm2149_vm7 = vcmp.lt.s32.totalorder %v11251_v41, 15  ;;  %v11397_v41 = vld [vmem:[%s16492_s0 + $0x178] sm:$0xff] }
  0xe6   :  { %10127 = vrot.lane.b32.xlu0 %v10126_v9, %s10656_s18  ;;  %v3087_v14 = vpack.c.b16 %v3084_v20, %v3084_v20  ;;  %v11271_v60 = vand.u32 15, %v291_v52  ;;  %vm11273_vm10 = vcmp.gt.s32.totalorder %v226_v21, 0  ;;  %450 = vst.msk [vmem:[#allocation2 + $0x180] sm:$0xff] %vm402_vm0, %v11397_v41 }
  0xe7   :  { %1251 = vrot.lane.b32.xlu1 %v121_v57, %s10653_s16  ;;  %v547_v57 = vld [vmem:[#allocation2 + $0x87] sm:$0xff] }
  0xe8   :  { %v3189_v58 = vsel %vm16543_vm9, %v3087_v14, 0  ;;  %v739_v52 = vsel %vm11273_vm10, %v547_v57, 0.0  ;;  %vm1830_vm14 = vcmp.gt.s32.totalorder %v11271_v60, 0  ;;  %vm2150_vm10 = vcmp.lt.s32.totalorder %v11271_v60, 15  ;;  %v11402_v60 = vld [vmem:[%s16492_s0 + $0x180] sm:$0xff] }
  0xe9   :  { %v1458_v40 = vpop.permute.xlu1 %1457  ;;  %3196 = vmatpush.bf16.msra.mxu0 %v3189_v58  ;;  %10050 = vmatpush.bf16.msra.mxu2 %v3189_v58  ;;  %451 = vst.msk [vmem:[#allocation2 + $0x188] sm:$0xff] %vm402_vm0, %v11402_v60 }
  0xea   :  { %v1699_v63 = vsel %vm1683_vm11, %v1634_v47, %v1458_v40  ;;  %v891_v20 = vld [vmem:[#allocation2 + $0x149] sm:$0xff]  ;;  %10049 = vmatpush.bf16.msra.mxu1 %v3189_v58  ;;  %10051 = vmatpush.bf16.msra.mxu3 %v3189_v58  ;;  %v9933_v47 = vld [vmem:[%s16493_s1 + $0x8] sm:$0xff]  ;;  %v1460_v58 = vpop.permute.xlu0 %1459  ;;  %v9932_v40 = vld [vmem:[%s16493_s1] sm:$0xff] }
  0xeb   :  { %1764 = vst.msk [vmem:[#allocation3 + $0x88] sm:$0xff] %vm1748_vm12, %v1699_v63  ;;  %v10141_v9 = vpack.i.bf16 %v1699_v63, %v1698_v59  ;;  %v1893_v44 = vld [vmem:[#allocation3 + $0x80] sm:$0xff]  ;;  %v11282_v59 = vpop.permute.xlu2 %1209 }
  0xec   :  { %v11277_v25 = vsel %vm1829_vm8, %v1893_v44, 0.0  ;;  %v2341_v14 = vsel %vm2145_vm13, %v1893_v44, 0.0  ;;  %v11303_v44 = vadd.s32 144, %v10741_v4  ;;  %v878_v50 = vld [vmem:[#allocation2 + $0xe1] sm:$0xff]  ;;  %vm2969_vm13 = vcmask 195584  }
  0xed   :  { %10142 = vrot.lane.b32.xlu2 %v10141_v9, %s10655_s17  ;;  %3197 = vmatpush.bf16.msra.mxu0 %v9933_v47 }
  0xee   :  { %1467 = vrot.lane.b32.xlu0 %v871_v0, %s10654_s29  ;;  %10053 = vmatpush.bf16.msra.mxu2 %v9933_v47 }
  0xef   :  { %1507 = vrot.lane.b32.xlu1 %v891_v20, %s10654_s29  ;;  %10052 = vmatpush.bf16.msra.mxu1 %v9933_v47  ;;  %v1636_v20 = vsel %vm402_vm0, %v548_v61, %v11239_v54 }
  0xf0   :  { %10054 = vmatpush.bf16.msra.mxu3 %v9933_v47 }
  0xf1   :  { %v1204_v21 = vpop.permute.xlu1 %1203  ;;  %3198 = vmatpush.bf16.msra.mxu0 %v9932_v40 }
  0xf2   :  { %v1635_v62 = vsel %vm402_vm0, %v739_v52, %v1204_v21  ;;  %v1894_v63 = vld [vmem:[#allocation3 + $0x88] sm:$0xff]  ;;  %10056 = vmatpush.bf16.msra.mxu2 %v9932_v40  ;;  %v228_v52 = vand.u32 15, %v11303_v44  ;;  %v1464_v61 = vpop.permute.xlu0 %1463 }
  0xf3   :  { %v11298_v9 = vsel %vm1830_vm14, %v1894_v63, 0.0  ;;  %v2342_v0 = vsel %vm2146_vm15, %v1894_v63, 0.0  ;;  %v1700_v39 = vsel %vm1683_vm11, %v1635_v62, %v1460_v58  ;;  %10055 = vmatpush.bf16.msra.mxu1 %v9932_v40  ;;  %v126_v58 = vld [vmem:[%s16492_s0 + $0x168] sm:$0xff]  ;;  %v549_v62 = vld [vmem:[#allocation2 + $0x97] sm:$0xff]  ;;  %vm16548_vm14 = vcmask 293888  }
  0xf4   :  { %v10136_v57 = vpack.i.bf16 %v2342_v0, %v2341_v14  ;;  %1765 = vst.msk [vmem:[#allocation3 + $0x90] sm:$0xff] %vm1748_vm12, %v1700_v39  ;;  %10057 = vmatpush.bf16.msra.mxu3 %v9932_v40  ;;  %v873_v40 = vld [vmem:[#allocation2 + $0xb9] sm:$0xff]  ;;  %vm11320_vm1 = vcmp.gt.s32.totalorder %v228_v52, 0 }
  0xf5   :  { %1221 = vrot.lane.b32.xlu2 %v11103_v11, %s10653_s16  ;;  %448 = vst.msk [vmem:[#allocation2 + $0x170] sm:$0xff] %vm402_vm0, %v126_v58  ;;  %v741_v0 = vsel %vm11320_vm1, %v549_v62, 0.0  ;;  %v11337_v52 = vld [vmem:[%s16492_s0 + $0xe8] sm:$0xff]  ;;  %v11363_v62 = vadd.s32 216, %v10741_v4  ;;  %vm1815_vm1 = vcmp.gt.s32.totalorder %v11023_v48, 0  ;;  %v117_v48 = vld [vmem:[%s16492_s0 + $0x120] sm:$0xff] }
  0xf6   :  { %10137 = vrot.lane.b32.xlu0 %v10136_v57, %s10656_s18  ;;  %432 = vst.msk [vmem:[#allocation2 + $0xf0] sm:$0xff] %vm402_vm0, %v11337_v52 }
  0xf7   :  { %v11310_v47 = vpop.permute.xlu2 %10072  ;;  %1261 = vrot.lane.b32.xlu1 %v126_v58, %s10653_s16  ;;  %16705 = vst [vmem:[#allocation37_spill] sm:$0xff] %v11363_v62 }
  0xf8   :  { %439 = vst.msk [vmem:[#allocation2 + $0x128] sm:$0xff] %vm402_vm0, %v117_v48 }
  0xf9   :  { %v1462_v21 = vpop.permute.xlu1 %1461 }
  0xfa   :  { %v1701_v11 = vsel %vm1683_vm11, %v1636_v20, %v1462_v21 }
  0xfb   :  { %1766 = vst.msk [vmem:[#allocation3 + $0x98] sm:$0xff] %vm1748_vm12, %v1701_v11  ;;  %v10151_v14 = vpack.i.bf16 %v1701_v11, %v1700_v39  ;;  %v1895_v63 = vld [vmem:[#allocation3 + $0x90] sm:$0xff] }
  0xfc   :  { %v2343_v20 = vsel %vm2147_vm2, %v1895_v63, 0.0  ;;  %vm1816_vm2 = vcmp.gt.s32.totalorder %v11025_v53, 0 }
  0xfd   :  { %10152 = vrot.lane.b32.xlu2 %v10151_v14, %s10655_s17 }
  0xfe   :  { %1471 = vrot.lane.b32.xlu0 %v873_v40, %s10654_s29  ;;  %v11357_v40 = vadd.s32 232, %v10741_v4 }
  0xff   :  { %v11330_v39 = vpop.permute.xlu2 %10077  ;;  %1227 = vrot.lane.b32.xlu1 %v11269_v3, %s10653_s16  ;;  %v550_v3 = vld [vmem:[#allocation2 + $0x9f] sm:$0xff] }
 0x100   :  { %16704 = vst [vmem:[#allocation36_spill] sm:$0xff] %v11357_v40  ;;  %v1638_v54 = vsel %vm402_vm0, %v550_v3, %v11282_v59  ;;  %v239_v63 = vand.u32 15, %v11357_v40  ;;  %v10075_v3 = vunpack.i.h.bf16 %v11310_v47 }
 0x101   :  { %v1208_v57 = vpop.permute.xlu1 %1207 }
 0x102   :  { %v1637_v5 = vsel %vm402_vm0, %v741_v0, %v1208_v57  ;;  %v1896_v58 = vld [vmem:[#allocation3 + $0x98] sm:$0xff]  ;;  %vm816_vm4 = vcmp.lt.s32.totalorder %v239_v63, 15  ;;  %v880_v57 = vld [vmem:[#allocation2 + $0xf1] sm:$0xff] }
 0x103   :  { %v2344_v21 = vsel %vm2148_vm3, %v1896_v58, 0.0  ;;  %v11348_v11 = vsel %vm1683_vm11, %v1637_v5, %v1464_v61  ;;  %v237_v5 = vand.u32 15, %v11363_v62  ;;  %v1072_v59 = vsel %vm816_vm4, %v880_v57, 0.0  ;;  %v1877_v58 = vld [vmem:[#allocation3] sm:$0xff] }
 0x104   :  { %v10146_v14 = vpack.i.bf16 %v2344_v21, %v2343_v20  ;;  %1767 = vst.msk [vmem:[#allocation3 + $0xa0] sm:$0xff] %vm1748_vm12, %v11348_v11  ;;  %v875_v20 = vld [vmem:[#allocation2 + $0xc9] sm:$0xff]  ;;  %v1878_v21 = vld [vmem:[#allocation3 + $0x8] sm:$0xff]  ;;  %v2069_v63 = vsel %vm1813_vm5, %v1877_v58, 0.0 }
 0x105   :  { %1257 = vrot.lane.b32.xlu2 %v11158_v38, %s10653_s16  ;;  %vm11383_vm8 = vcmp.lt.s32.totalorder %v237_v5, 15 }
 0x106   :  { %10147 = vrot.lane.b32.xlu0 %v10146_v14, %s10656_s18  ;;  %v10074_v14 = vunpack.i.l.bf16 %v11310_v47  ;;  %v1070_v5 = vsel %vm11383_vm8, %v878_v50, 0.0 }
 0x107   :  { %v11369_v38 = vpop.permute.xlu2 %10082  ;;  %1485 = vrot.lane.b32.xlu1 %v1072_v59, %s10654_s29 }
 0x109   :  { %v1466_v0 = vpop.permute.xlu1 %1465 }
 0x10a   :  { %v11367_v61 = vsel %vm1683_vm11, %v1638_v54, %v1466_v0  ;;  %v2070_v0 = vsel %vm1814_vm6, %v1878_v21, 0.0  ;;  %v2905_v21 = vsel %vm1748_vm12, %v2069_v63, %v10074_v14  ;;  %v11424_v14 = vadd.s32 328, %v10741_v4 }
 0x10b   :  { %1768 = vst.msk [vmem:[#allocation3 + $0xa8] sm:$0xff] %vm1748_vm12, %v11367_v61  ;;  %v1897_v54 = vld [vmem:[#allocation3 + $0xa0] sm:$0xff] }
 0x10c   :  { %v2345_v59 = vsel %vm2149_vm7, %v1897_v54, 0.0  ;;  %v2906_v54 = vsel %vm1748_vm12, %v2070_v0, %v10075_v3  ;;  %v11419_v3 = vadd.s32 376, %v10741_v4 }
 0x10d   :  { %1223 = vrot.lane.b32.xlu2 %v11108_v13, %s10653_s16  ;;  %v127_v13 = vld [vmem:[%s16492_s0 + $0x170] sm:$0xff] }
 0x10e   :  { %1475 = vrot.lane.b32.xlu0 %v875_v20, %s10654_s29  ;;  %449 = vst.msk [vmem:[#allocation2 + $0x178] sm:$0xff] %vm402_vm0, %v127_v13  ;;  %v257_v63 = vand.u32 15, %v11419_v3 }
 0x10f   :  { %1263 = vrot.lane.b32.xlu1 %v127_v13, %s10653_s16  ;;  %v11415_v50 = vpop.permute.xlu2 %10087  ;;  %16708 = vst [vmem:[#allocation38_spill] sm:$0xff] %v11419_v3  ;;  %v251_v13 = vand.u32 15, %v11424_v14 }
 0x110   :  { %v10103_v57 = vpop.permute.xlu0 %10102  ;;  %vm834_vm15 = vcmp.lt.s32.totalorder %v257_v63, 15 }
 0x111   :  { %v10105_v47 = vunpack.i.h.bf16 %v10103_v57  ;;  %v10104_v20 = vunpack.i.l.bf16 %v10103_v57  ;;  %v11391_v51 = vpop.permute.xlu1 %1211  ;;  %vm11438_vm3 = vcmp.lt.s32.totalorder %v251_v13, 15 }
 0x112   :  { %v1898_v58 = vld [vmem:[#allocation3 + $0xa8] sm:$0xff] }
 0x113   :  { %v2346_v57 = vsel %vm2150_vm10, %v1898_v58, 0.0  ;;  %v2970_v37 = vsel %vm2969_vm13, %v2905_v21, %v10104_v20  ;;  %v2971_v43 = vsel %vm2969_vm13, %v2906_v54, %v10105_v47  ;;  %v10079_v20 = vunpack.i.l.bf16 %v11330_v39  ;;  %v892_v54 = vld [vmem:[#allocation2 + $0x151] sm:$0xff] }
 0x114   :  { %v10156_v36 = vpack.i.bf16 %v2346_v57, %v2345_v59  ;;  %v3034_v49 = vpack.c.bf16 %v2971_v43, %v2970_v37  ;;  %v898_v43 = vld [vmem:[#allocation2 + $0x181] sm:$0xff]  ;;  %v893_v37 = vld [vmem:[#allocation2 + $0x159] sm:$0xff] }
 0x115   :  { %1481 = vrot.lane.b32.xlu2 %v1070_v5, %s10654_s29  ;;  %v1090_v47 = vsel %vm834_vm15, %v898_v43, 0.0  ;;  %v1879_v59 = vld [vmem:[#allocation3 + $0x10] sm:$0xff]  ;;  %v1880_v5 = vld [vmem:[#allocation3 + $0x18] sm:$0xff]  ;;  %v1084_v43 = vsel %vm11438_vm3, %v892_v54, 0.0 }
 0x116   :  { %10157 = vrot.lane.b32.xlu0 %v10156_v36, %s10656_s18  ;;  %9416 = vmatmul.msk.bf16.vlgmr.msra.gmra.mxu0 %vm16548_vm14, %v3034_v49  ;;  %v10080_v36 = vunpack.i.h.bf16 %v11330_v39  ;;  %v2071_v49 = vsel %vm1815_vm1, %v1879_v59, 0.0  ;;  %v2072_v39 = vsel %vm1816_vm2, %v1880_v5, 0.0  ;;  %v10085_v59 = vunpack.i.h.bf16 %v11369_v38 }
 0x117   :  { %1521 = vrot.lane.b32.xlu1 %v1090_v47, %s10654_s29  ;;  %v11436_v58 = vpop.permute.xlu2 %10092 }
 0x118   :  { %v2908_v13 = vsel %vm1748_vm12, %v2072_v39, %v10080_v36 }
 0x119   :  { %v1470_v0 = vpop.permute.xlu1 %1469 }
 0x11d   :  { %1253 = vrot.lane.b32.xlu2 %v11247_v56, %s10653_s16 }
 0x11e   :  { %1511 = vrot.lane.b32.xlu0 %v893_v37, %s10654_s29  ;;  %v2907_v37 = vsel %vm1748_vm12, %v2071_v49, %v10079_v20  ;;  %v10084_v20 = vunpack.i.l.bf16 %v11369_v38  ;;  %v2910_v38 = vsel %vm1748_vm12, %v10971_v12, %v10085_v59  ;;  %v552_v49 = vld [vmem:[#allocation2 + $0xaf] sm:$0xff]  ;;  %v10089_v59 = vunpack.i.l.bf16 %v11415_v50 }
 0x11f   :  { %1243 = vrot.lane.b32.xlu1 %v117_v48, %s10653_s16  ;;  %v10161_v48 = vpack.i.bf16 %v11367_v61, %v11348_v11  ;;  %v895_v12 = vld [vmem:[#allocation2 + $0x169] sm:$0xff]  ;;  %v11495_v61 = vadd.s32 312, %v10741_v4 }
 0x120   :  { %v10108_v56 = vpop.permute.xlu0 %10107 }
 0x121   :  { %v10110_v53 = vunpack.i.h.bf16 %v10108_v56  ;;  %v10109_v57 = vunpack.i.l.bf16 %v10108_v56  ;;  %v11445_v63 = vpop.permute.xlu1 %1215  ;;  %16711 = vst [vmem:[#allocation39_spill] sm:$0xff] %v11495_v61 }
 0x123   :  { %v2972_v47 = vsel %vm2969_vm13, %v2907_v37, %v10109_v57  ;;  %v2973_v33 = vsel %vm2969_vm13, %v2908_v13, %v10110_v53 }
 0x124   :  { %v3035_v31 = vpack.c.bf16 %v2973_v33, %v2972_v47  ;;  %v120_v33 = vld [vmem:[%s16492_s0 + $0x138] sm:$0xff]  ;;  %v10090_v47 = vunpack.i.h.bf16 %v11415_v50 }
 0x125   :  { %1509 = vrot.lane.b32.xlu2 %v1084_v43, %s10654_s29  ;;  %442 = vst.msk [vmem:[#allocation2 + $0x140] sm:$0xff] %vm402_vm0, %v120_v33 }
 0x126   :  { %1225 = vrot.lane.b32.xlu0 %v11201_v30, %s10653_s16  ;;  %9417 = vmatmul.msk.bf16.gmra.mxu0 %vm16548_vm14, %v3035_v31  ;;  %v11470_v31 = vld [vmem:[%s16492_s0 + $0x128] sm:$0xff]  ;;  %v2909_v30 = vsel %vm1748_vm12, %v10939_v46, %v10084_v20  ;;  %v249_v20 = vand.u32 15, %v11495_v61  ;;  %v2912_v50 = vsel %vm1748_vm12, %v11029_v55, %v10090_v47  ;;  %v11521_v55 = vld [vmem:[%s16492_s0 + $0x118] sm:$0xff]  ;;  %v10094_v47 = vunpack.i.l.bf16 %v11436_v58 }
 0x127   :  { %v11461_v5 = vpop.permute.xlu2 %10097  ;;  %440 = vst.msk [vmem:[#allocation2 + $0x130] sm:$0xff] %vm402_vm0, %v11470_v31  ;;  %1249 = vrot.lane.b32.xlu1 %v120_v33, %s10653_s16 }
 0x128   :  { %vm826_vm4 = vcmp.lt.s32.totalorder %v249_v20, 15  ;;  %438 = vst.msk [vmem:[#allocation2 + $0x120] sm:$0xff] %vm402_vm0, %v11521_v55 }
 0x129   :  { %v10113_v36 = vpop.permute.xlu0 %10112  ;;  %v1474_v21 = vpop.permute.xlu1 %1473 }
 0x12a   :  { %v10115_v54 = vunpack.i.h.bf16 %v10113_v36  ;;  %v10114_v56 = vunpack.i.l.bf16 %v10113_v36 }
 0x12c   :  { %v2974_v53 = vsel %vm2969_vm13, %v2909_v30, %v10114_v56  ;;  %v2975_v57 = vsel %vm2969_vm13, %v2910_v38, %v10115_v54  ;;  %v890_v30 = vld [vmem:[#allocation2 + $0x141] sm:$0xff]  ;;  %v2911_v38 = vsel %vm1748_vm12, %v11044_v10, %v10089_v59 }
 0x12d   :  { %v3036_v39 = vpack.c.bf16 %v2975_v57, %v2974_v53  ;;  %1515 = vrot.lane.b32.xlu2 %v895_v12, %s10654_s29  ;;  %v115_v10 = vld [vmem:[%s16492_s0 + $0x110] sm:$0xff] }
 0x12e   :  { %10162 = vrot.lane.b32.xlu0 %v10161_v48, %s10655_s17  ;;  %v887_v11 = vld [vmem:[#allocation2 + $0x129] sm:$0xff]  ;;  %v1082_v48 = vsel %vm826_vm4, %v890_v30, 0.0  ;;  %437 = vst.msk [vmem:[#allocation2 + $0x118] sm:$0xff] %vm402_vm0, %v115_v10 }
 0x12f   :  { %v1214_v46 = vpop.permute.xlu2 %1213  ;;  %1499 = vrot.lane.b32.xlu1 %v887_v11, %s10654_s29  ;;  %v10095_v11 = vunpack.i.h.bf16 %v11436_v58 }
 0x130   :  { %v1640_v43 = vsel %vm402_vm0, %v552_v49, %v1214_v46 }
 0x131   :  { %v11486_v37 = vsel %vm1683_vm11, %v1640_v43, %v1470_v0  ;;  %v11488_v13 = vpop.permute.xlu1 %1219 }
 0x132   :  { %1770 = vst.msk [vmem:[#allocation3 + $0xb8] sm:$0xff] %vm1748_vm12, %v11486_v37 }
 0x135   :  { %1229 = vrot.lane.b32.xlu2 %v11337_v52, %s10653_s16 }
 0x136   :  { %9418 = vmatmul.msk.bf16.gmra.mxu0 %vm16548_vm14, %v3036_v39  ;;  %v554_v39 = vld [vmem:[#allocation2 + $0xbf] sm:$0xff] }
 0x137   :  { %v11500_v0 = vpop.permute.xlu2 %10132  ;;  %1505 = vrot.lane.b32.xlu1 %v1082_v48, %s10654_s29 }
 0x138   :  { %v10118_v36 = vpop.permute.xlu0 %10117 }
 0x139   :  { %v10120_v33 = vunpack.i.h.bf16 %v10118_v36  ;;  %v10119_v54 = vunpack.i.l.bf16 %v10118_v36  ;;  %v1478_v56 = vpop.permute.xlu1 %1477 }
 0x13b   :  { %v2976_v53 = vsel %vm2969_vm13, %v2911_v38, %v10119_v54  ;;  %v2977_v57 = vsel %vm2969_vm13, %v2912_v50, %v10120_v33  ;;  %v2913_v38 = vsel %vm1748_vm12, %v11059_v27, %v10094_v47  ;;  %v2914_v50 = vsel %vm1748_vm12, %v11087_v24, %v10095_v11  ;;  %v11559_v24 = vld [vmem:[%s16492_s0 + $0x188] sm:$0xff]  ;;  %v137_v11 = vld [vmem:[%s16492_s0 + $0x1c0] sm:$0xff]  ;;  %v11569_v47 = vld [vmem:[%s16492_s0 + $0x190] sm:$0xff] }
 0x13c   :  { %v3037_v49 = vpack.c.bf16 %v2977_v57, %v2976_v53  ;;  %v886_v53 = vld [vmem:[#allocation2 + $0x121] sm:$0xff]  ;;  %459 = vst.msk [vmem:[#allocation2 + $0x1c8] sm:$0xff] %vm402_vm0, %v137_v11 }
 0x13d   :  { %452 = vst.msk [vmem:[#allocation2 + $0x190] sm:$0xff] %vm402_vm0, %v11559_v24 }
 0x13e   :  { %453 = vst.msk [vmem:[#allocation2 + $0x198] sm:$0xff] %vm402_vm0, %v11569_v47 }
 0x13f   :  { %v1218_v46 = vpop.permute.xlu2 %1217  ;;  %1239 = vrot.lane.b32.xlu1 %v115_v10, %s10653_s16 }
 0x140   :  { %v1642_v43 = vsel %vm402_vm0, %v554_v39, %v1218_v46  ;;  %v556_v39 = vld [vmem:[#allocation2 + $0xcf] sm:$0xff] }
 0x141   :  { %v11514_v52 = vsel %vm1683_vm11, %v1642_v43, %v1474_v21  ;;  %v11516_v12 = vpop.permute.xlu1 %1255  ;;  %v11533_v21 = vadd.s32 280, %v10741_v4 }
 0x142   :  { %1772 = vst.msk [vmem:[#allocation3 + $0xc8] sm:$0xff] %vm1748_vm12, %v11514_v52 }
 0x143   :  { %16712 = vst [vmem:[#allocation40_spill] sm:$0xff] %v11533_v21  ;;  %v245_v20 = vand.u32 15, %v11533_v21 }
 0x145   :  { %vm822_vm5 = vcmp.lt.s32.totalorder %v245_v20, 15  ;;  %v10099_v20 = vunpack.i.l.bf16 %v11461_v5 }
 0x146   :  { %9419 = vmatmul.msk.bf16.gmra.mxu0 %vm16548_vm14, %v3037_v49  ;;  %v1078_v49 = vsel %vm822_vm5, %v886_v53, 0.0 }
 0x147   :  { %v11538_v59 = vpop.permute.xlu2 %10142  ;;  %1497 = vrot.lane.b32.xlu1 %v1078_v49, %s10654_s29 }
 0x148   :  { %v10123_v36 = vpop.permute.xlu0 %10122 }
 0x149   :  { %v10125_v33 = vunpack.i.h.bf16 %v10123_v36  ;;  %v10124_v54 = vunpack.i.l.bf16 %v10123_v36  ;;  %v11541_v30 = vpop.permute.xlu1 %1513 }
 0x14b   :  { %v2978_v58 = vsel %vm2969_vm13, %v2913_v38, %v10124_v54  ;;  %v2979_v48 = vsel %vm2969_vm13, %v2914_v50, %v10125_v33  ;;  %v11581_v33 = vadd.s32 392, %v10741_v4  ;;  %v10100_v54 = vunpack.i.h.bf16 %v11461_v5 }
 0x14c   :  { %v3038_v57 = vpack.c.bf16 %v2979_v48, %v2978_v58  ;;  %v11588_v38 = vadd.s32 320, %v10741_v4  ;;  %v2915_v5 = vsel %vm1748_vm12, %v11116_v34, %v10099_v20  ;;  %v11614_v34 = vld [vmem:[%s16492_s0 + $0xf8] sm:$0xff] }
 0x14d   :  { %16713 = vst [vmem:[#allocation41_spill] sm:$0xff] %v11581_v33  ;;  %v259_v58 = vand.u32 15, %v11581_v33 }
 0x14e   :  { %v250_v53 = vand.u32 15, %v11588_v38  ;;  %434 = vst.msk [vmem:[#allocation2 + $0x100] sm:$0xff] %vm402_vm0, %v11614_v34 }
 0x14f   :  { %v1222_v46 = vpop.permute.xlu2 %1221  ;;  %1283 = vrot.lane.b32.xlu1 %v137_v11, %s10653_s16  ;;  %v2916_v11 = vsel %vm1748_vm12, %v11139_v19, %v10100_v54  ;;  %vm836_vm8 = vcmp.lt.s32.totalorder %v259_v58, 15  ;;  %v900_v19 = vld [vmem:[#allocation2 + $0x191] sm:$0xff] }
 0x150   :  { %v1644_v43 = vsel %vm402_vm0, %v556_v39, %v1222_v46  ;;  %vm11605_vm7 = vcmp.gt.s32.totalorder %v250_v53, 0  ;;  %v574_v53 = vld [vmem:[#allocation2 + $0x15f] sm:$0xff] }
 0x151   :  { %v11552_v10 = vsel %vm1683_vm11, %v1644_v43, %v1478_v56  ;;  %v11554_v27 = vpop.permute.xlu1 %1479  ;;  %v11572_v56 = vadd.s32 160, %v10741_v4  ;;  %v551_v43 = vld [vmem:[#allocation2 + $0xa7] sm:$0xff] }
 0x152   :  { %1774 = vst.msk [vmem:[#allocation3 + $0xd8] sm:$0xff] %vm1748_vm12, %v11552_v10 }
 0x153   :  { %v230_v36 = vand.u32 15, %v11572_v56 }
 0x155   :  { %vm11594_vm6 = vcmp.gt.s32.totalorder %v230_v36, 0  ;;  %v571_v36 = vld [vmem:[#allocation2 + $0x147] sm:$0xff] }
 0x156   :  { %9420 = vmatmul.msk.bf16.gmra.mxu0 %vm16548_vm14, %v3038_v57  ;;  %v743_v54 = vsel %vm11594_vm6, %v551_v43, 0.0  ;;  %v763_v58 = vsel %vm11605_vm7, %v571_v36, 0.0  ;;  %v292_v43 = vshra.s32 %v11303_v44, 4 }
 0x157   :  { %v11590_v50 = vpop.permute.xlu2 %10152 }
 0x158   :  { %v10128_v48 = vpop.permute.xlu0 %10127 }
 0x159   :  { %v10130_v39 = vunpack.i.h.bf16 %v10128_v48  ;;  %v10129_v46 = vunpack.i.l.bf16 %v10128_v48  ;;  %v1252_v57 = vpop.permute.xlu1 %1251 }
 0x15a   :  { %v1659_v49 = vsel %vm402_vm0, %v763_v58, %v1252_v57  ;;  %v557_v57 = vld [vmem:[#allocation2 + $0xd7] sm:$0xff] }
 0x15b   :  { %v2980_v22 = vsel %vm2969_vm13, %v2915_v5, %v10129_v46  ;;  %v2981_v48 = vsel %vm2969_vm13, %v2916_v11, %v10130_v39  ;;  %v1092_v46 = vsel %vm836_vm8, %v900_v19, 0.0  ;;  %v236_v39 = vand.u32 15, %v11603_v28 }
 0x15c   :  { %v3039_v20 = vpack.c.bf16 %v2981_v48, %v2980_v22  ;;  %1525 = vrot.lane.b32.xlu1 %v1092_v46, %s10654_s29  ;;  %v293_v5 = vshra.s32 %v10906_v23, 4  ;;  %v1639_v22 = vsel %vm402_vm0, %v743_v54, %v11391_v51  ;;  %v1900_v46 = vld [vmem:[#allocation3 + $0xb8] sm:$0xff] }
 0x15d   :  { %vm11640_vm10 = vcmp.gt.s32.totalorder %v236_v39, 0  ;;  %v11664_v39 = vld [vmem:[%s16492_s0 + $0x130] sm:$0xff] }
 0x15e   :  { %v11644_v44 = vand.u32 15, %v293_v5  ;;  %v749_v58 = vsel %vm11640_vm10, %v557_v57, 0.0  ;;  %v10134_v5 = vunpack.i.l.bf16 %v11500_v0  ;;  %441 = vst.msk [vmem:[#allocation2 + $0x138] sm:$0xff] %vm402_vm0, %v11664_v39 }
 0x15f   :  { %v1258_v11 = vpop.permute.xlu2 %1257 }
 0x160   :  { %v1662_v48 = vsel %vm402_vm0, %v574_v53, %v1258_v11  ;;  %v1468_v15 = vpop.permute.xlu0 %1467  ;;  %v232_v53 = vand.u32 15, %v11631_v45  ;;  %vm2152_vm15 = vcmp.lt.s32.totalorder %v11644_v44, 15 }
 0x161   :  { %v1704_v36 = vsel %vm1683_vm11, %v1639_v22, %v1468_v15  ;;  %v11636_v19 = vsel %vm1683_vm11, %v1662_v48, %v11541_v30  ;;  %v1508_v23 = vpop.permute.xlu1 %1507  ;;  %v299_v30 = vshra.s32 %v11131_v26, 4  ;;  %v10135_v26 = vunpack.i.h.bf16 %v11500_v0  ;;  %v553_v22 = vld [vmem:[#allocation2 + $0xb7] sm:$0xff] }
 0x162   :  { %16719 = vst [vmem:[#allocation43_spill] sm:$0xff] %v11636_v19  ;;  %v10171_v51 = vpack.i.bf16 %v11486_v37, %v1704_v36  ;;  %v11650_v15 = vsel %vm1683_vm11, %v1659_v49, %v1508_v23  ;;  %v11656_v37 = vand.u32 15, %v292_v43  ;;  %vm11671_vm1 = vcmp.gt.s32.totalorder %v232_v53, 0 }
 0x163   :  { %1769 = vst.msk [vmem:[#allocation3 + $0xb0] sm:$0xff] %vm1748_vm12, %v1704_v36  ;;  %v11676_v49 = vand.u32 15, %v299_v30  ;;  %v2348_v23 = vsel %vm2152_vm15, %v1900_v46, 0.0  ;;  %v745_v57 = vsel %vm11671_vm1, %v553_v22, 0.0  ;;  %v2917_v30 = vsel %vm1748_vm12, %v11166_v29, %v10134_v5  ;;  %v11694_v46 = vld [vmem:[%s16492_s0 + $0x108] sm:$0xff] }
 0x164   :  { %1792 = vst.msk [vmem:[#allocation3 + $0x168] sm:$0xff] %vm1748_vm12, %v11636_v19  ;;  %10172 = vrot.lane.b32.xlu2 %v10171_v51, %s10655_s17  ;;  %vm2151_vm2 = vcmp.lt.s32.totalorder %v11656_v37, 15  ;;  %v1641_v5 = vsel %vm402_vm0, %v745_v57, %v11445_v63  ;;  %v10145_v63 = vunpack.i.h.bf16 %v11538_v59  ;;  %v10144_v57 = vunpack.i.l.bf16 %v11538_v59  ;;  %v572_v59 = vld [vmem:[#allocation2 + $0x14f] sm:$0xff] }
 0x165   :  { %1789 = vst.msk [vmem:[#allocation3 + $0x150] sm:$0xff] %vm1748_vm12, %v11650_v15  ;;  %vm1838_vm3 = vcmp.gt.s32.totalorder %v11676_v49, 0  ;;  %vm3872_vm1 = vcmask 25600  }
 0x166   :  { %9421 = vmatmul.msk.bf16.gmra.mxu0 %vm16548_vm14, %v3039_v20  ;;  %436 = vst.msk [vmem:[#allocation2 + $0x110] sm:$0xff] %vm402_vm0, %v11694_v46 }
 0x167   :  { %v1224_v48 = vpop.permute.xlu2 %1223 }
 0x168   :  { %v1645_v43 = vsel %vm402_vm0, %v749_v58, %v1224_v48  ;;  %v10138_v36 = vpop.permute.xlu0 %10137  ;;  %v2918_v58 = vsel %vm1748_vm12, %v11195_v1, %v10135_v26  ;;  %v11704_v1 = vld [vmem:[#allocation3 + $0xc8] sm:$0xff] }
 0x169   :  { %v10140_v0 = vunpack.i.h.bf16 %v10138_v36  ;;  %v10139_v51 = vunpack.i.l.bf16 %v10138_v36  ;;  %v11681_v54 = vsel %vm1683_vm11, %v1645_v43, %v11554_v27  ;;  %v170_v27 = vadd.s32 192, %v10741_v4 }
 0x16a   :  { %v1899_v20 = vld [vmem:[#allocation3 + $0xb0] sm:$0xff]  ;;  %1775 = vst.msk [vmem:[#allocation3 + $0xe0] sm:$0xff] %vm1748_vm12, %v11681_v54  ;;  %v11708_v26 = vsel %vm1838_vm3, %v11704_v1, 0.0 }
 0x16b   :  { %v2347_v53 = vsel %vm2151_vm2, %v1899_v20, 0.0  ;;  %v2982_v11 = vsel %vm2969_vm13, %v2917_v30, %v10139_v51  ;;  %v2983_v22 = vsel %vm2969_vm13, %v2918_v58, %v10140_v0  ;;  %16724 = vst [vmem:[#allocation44_spill] sm:$0xff] %v11708_v26  ;;  %v298_v43 = vshra.s32 %v170_v27, 4 }
 0x16c   :  { %v10166_v48 = vpack.i.bf16 %v2348_v23, %v2347_v53  ;;  %1265 = vrot.lane.b32.xlu2 %v11397_v41, %s10653_s16  ;;  %v3040_v29 = vpack.c.bf16 %v2983_v22, %v2982_v11  ;;  %v11715_v23 = vadd.s32 360, %v10741_v4  ;;  %v234_v53 = vand.u32 15, %v170_v27 }
 0x16d   :  { %v11723_v20 = vand.u32 15, %v298_v43  ;;  %v2919_v43 = vsel %vm1748_vm12, %v11223_v6, %v10144_v57  ;;  %v294_v57 = vshra.s32 %v11572_v56, 4 }
 0x16e   :  { %10167 = vrot.lane.b32.xlu0 %v10166_v48, %s10656_s18  ;;  %16725 = vst [vmem:[#allocation45_spill] sm:$0xff] %v11715_v23  ;;  %v255_v51 = vand.u32 15, %v11715_v23  ;;  %v896_v48 = vld [vmem:[#allocation2 + $0x171] sm:$0xff]  ;;  %vm11737_vm6 = vcmp.gt.s32.totalorder %v234_v53, 0 }
 0x16f   :  { %v11712_v36 = vpop.permute.xlu2 %1481  ;;  %vm1837_vm5 = vcmp.gt.s32.totalorder %v11723_v20, 0  ;;  %vm2157_vm3 = vcmp.lt.s32.totalorder %v11723_v20, 15 }
 0x170   :  { %v1472_v41 = vpop.permute.xlu0 %1471  ;;  %vm11732_vm4 = vcmp.lt.s32.totalorder %v255_v51, 15 }
 0x171   :  { %v11718_v0 = vsel %vm1683_vm11, %v1641_v5, %v1472_v41  ;;  %v2920_v41 = vsel %vm1748_vm12, %v11237_v17, %v10145_v63  ;;  %v11760_v17 = vadd.s32 296, %v10741_v4  ;;  %v295_v63 = vshra.s32 %v11005_v32, 4  ;;  %v1905_v33 = vld [vmem:[#allocation3 + $0xe0] sm:$0xff] }
 0x172   :  { %1771 = vst.msk [vmem:[#allocation3 + $0xc0] sm:$0xff] %vm1748_vm12, %v11718_v0  ;;  %v2353_v20 = vsel %vm2157_vm3, %v1905_v33, 0.0 }
 0x173   :  { %16731 = vst [vmem:[#allocation47_spill] sm:$0xff] %v11760_v17  ;;  %v247_v32 = vand.u32 15, %v11760_v17  ;;  %v11773_v56 = vand.u32 15, %v295_v63 }
 0x174   :  { %1231 = vrot.lane.b32.xlu2 %v11342_v7, %s10653_s16  ;;  %v555_v7 = vld [vmem:[#allocation2 + $0xc7] sm:$0xff] }
 0x175   :  { %v747_v53 = vsel %vm11737_vm6, %v555_v7, 0.0  ;;  %v11765_v7 = vadd.s32 336, %v10741_v4  ;;  %vm2154_vm8 = vcmp.lt.s32.totalorder %v11773_v56, 15  ;;  %vm11786_vm10 = vcmp.lt.s32.totalorder %v247_v32, 15 }
 0x176   :  { %1259 = vrot.lane.b32.xlu0 %v11172_v18, %s10653_s16  ;;  %9422 = vmatmul.msk.bf16.gmra.mxu0 %vm16548_vm14, %v3040_v29  ;;  %v1088_v29 = vsel %vm11732_vm4, %v896_v48, 0.0  ;;  %v1643_v6 = vsel %vm402_vm0, %v747_v53, %v11488_v13  ;;  %v888_v53 = vld [vmem:[#allocation2 + $0x131] sm:$0xff]  ;;  %vm2158_vm4 = vcmp.lt.s32.totalorder %v11676_v49, 15  ;;  %vm6227_vm6 = vcmask 1042434  }
 0x177   :  { %v1254_v30 = vpop.permute.xlu2 %1253 }
 0x178   :  { %v10148_v18 = vpop.permute.xlu0 %10147  ;;  %v1660_v48 = vsel %vm402_vm0, %v572_v59, %v1254_v30  ;;  %v11775_v59 = vand.u32 15, %v294_v57  ;;  %v2350_v57 = vsel %vm2154_vm8, %v11704_v1, 0.0  ;;  %vm16591_vm8 = vcmask 1044484  }
 0x179   :  { %v10150_v11 = vunpack.i.h.bf16 %v10148_v18  ;;  %v10149_v22 = vunpack.i.l.bf16 %v10148_v18  ;;  %v1901_v5 = vld [vmem:[#allocation3 + $0xc0] sm:$0xff] }
 0x17a   :  { %v11747_v51 = vsel %vm1837_vm5, %v1901_v5, 0.0  ;;  %vm2153_vm7 = vcmp.lt.s32.totalorder %v11775_v59, 15  ;;  %vm6225_vm5 = vcmask 1041409  }
 0x17b   :  { %16730 = vst [vmem:[#allocation46_spill] sm:$0xff] %v11747_v51  ;;  %v2984_v8 = vsel %vm2969_vm13, %v2919_v43, %v10149_v22  ;;  %v2985_v18 = vsel %vm2969_vm13, %v2920_v41, %v10150_v11  ;;  %v881_v11 = vld [vmem:[#allocation2 + $0xf9] sm:$0xff]  ;;  %v879_v22 = vld [vmem:[#allocation2 + $0xe9] sm:$0xff]  ;;  %v10154_v43 = vunpack.i.l.bf16 %v11590_v50  ;;  %v2349_v63 = vsel %vm2153_vm7, %v1901_v5, 0.0  ;;  %v11832_v41 = vpop.permute.xlu1 %1261 }
 0x17c   :  { %1245 = vrot.lane.b32.xlu2 %v11470_v31, %s10653_s16  ;;  %v3041_v58 = vpack.c.bf16 %v2985_v18, %v2984_v8  ;;  %v10176_v5 = vpack.i.bf16 %v2350_v57, %v2349_v63  ;;  %vm16592_vm7 = vcmask 1043459  }
 0x17e   :  { %1517 = vrot.lane.b32.xlu0 %v1088_v29, %s10654_s29  ;;  %v252_v29 = vand.u32 15, %v11765_v7 }
 0x17f   :  { %v1510_v27 = vpop.permute.xlu2 %1509 }
 0x180   :  { %v1725_v8 = vsel %vm1683_vm11, %v1660_v48, %v1510_v27  ;;  %v1476_v31 = vpop.permute.xlu0 %1475  ;;  %vm11790_vm15 = vcmp.gt.s32.totalorder %v252_v29, 0  ;;  %v573_v48 = vld [vmem:[#allocation2 + $0x157] sm:$0xff] }
 0x181   :  { %v10191_v30 = vpack.i.bf16 %v1725_v8, %v11650_v15  ;;  %1790 = vst.msk [vmem:[#allocation3 + $0x158] sm:$0xff] %vm1748_vm12, %v1725_v8  ;;  %v1708_v13 = vsel %vm1683_vm11, %v1643_v6, %v1476_v31  ;;  %v10155_v15 = vunpack.i.h.bf16 %v11590_v50  ;;  %v1080_v50 = vsel %vm11786_vm10, %v888_v53, 0.0 }
 0x182   :  { %1773 = vst.msk [vmem:[#allocation3 + $0xd0] sm:$0xff] %vm1748_vm12, %v1708_v13  ;;  %vm16571_vm10 = vcmask 1045509  }
 0x183   :  { %10192 = vrot.lane.b32.xlu1 %v10191_v30, %s10655_s17  ;;  %v2922_v31 = vsel %vm1748_vm12, %v11298_v9, %v10155_v15  ;;  %v765_v30 = vsel %vm11790_vm15, %v573_v48, 0.0  ;;  %v10201_v9 = vpack.i.bf16 %v11552_v10, %v1708_v13  ;;  %v10181_v15 = vpack.i.bf16 %v11514_v52, %v11718_v0  ;;  %v11830_v13 = vld [vmem:[%s16492_s0 + $0x100] sm:$0xff] }
 0x184   :  { %1487 = vrot.lane.b32.xlu2 %v881_v11, %s10654_s29  ;;  %435 = vst.msk [vmem:[#allocation2 + $0x108] sm:$0xff] %vm402_vm0, %v11830_v13  ;;  %v558_v0 = vld [vmem:[#allocation2 + $0xdf] sm:$0xff]  ;;  %vm16570_vm15 = vcmask 1046534  }
 0x186   :  { %1483 = vrot.lane.b32.xlu0 %v879_v22, %s10654_s29  ;;  %9423 = vmatmul.msk.bf16.gmra.mxu0 %vm16548_vm14, %v3041_v58  ;;  %v2921_v58 = vsel %vm1748_vm12, %v11277_v25, %v10154_v43  ;;  %v1661_v25 = vsel %vm402_vm0, %v765_v30, %v11516_v12  ;;  %v897_v43 = vld [vmem:[#allocation2 + $0x179] sm:$0xff] }
 0x188   :  { %v10158_v6 = vpop.permute.xlu0 %10157 }
 0x189   :  { %v10160_v27 = vunpack.i.h.bf16 %v10158_v6  ;;  %v10159_v8 = vunpack.i.l.bf16 %v10158_v6 }
 0x18b   :  { %1237 = vrot.lane.b32.xlu1 %v11694_v46, %s10653_s16  ;;  %v2986_v1 = vsel %vm2969_vm13, %v2921_v58, %v10159_v8  ;;  %v2987_v11 = vsel %vm2969_vm13, %v2922_v31, %v10160_v27  ;;  %v11815_v46 = vld [vmem:[%s16494_s2] ss:$0 sm:$0xff] }
 0x18c   :  { %1501 = vrot.lane.b32.xlu2 %v1080_v50, %s10654_s29  ;;  %v3042_v22 = vpack.c.bf16 %v2987_v11, %v2986_v1  ;;  %v138_v11 = vld [vmem:[%s16492_s0 + $0x1c8] sm:$0xff] }
 0x18d   :  { %460 = vst.msk [vmem:[#allocation2 + $0x1d0] sm:$0xff] %vm402_vm0, %v138_v11 }
 0x18e   :  { %10177 = vrot.lane.b32.xlu0 %v10176_v5, %s10656_s18 }
 0x190   :  { %v1512_v32 = vpop.permute.xlu0 %1511 }
 0x191   :  { %v11818_v29 = vsel %vm1683_vm11, %v1661_v25, %v1512_v32  ;;  %v11861_v32 = vadd.s32 248, %v10741_v4 }
 0x192   :  { %16736 = vst [vmem:[#allocation48_spill] sm:$0xff] %v11818_v29 }
 0x193   :  { %1791 = vst.msk [vmem:[#allocation3 + $0x160] sm:$0xff] %vm1748_vm12, %v11818_v29  ;;  %10202 = vrot.lane.b32.xlu1 %v10201_v9, %s10655_s17  ;;  %v3200_v10 = vpop.f32.mrf.mxu0 }
 0x194   :  { %v3201_v53 = vadd.f32 %v11815_v46, %v3200_v10  ;;  %10182 = vrot.lane.b32.xlu2 %v10181_v15, %s10655_s17  ;;  %16737 = vst [vmem:[#allocation49_spill] sm:$0xff] %v11861_v32  ;;  %v11863_v15 = vpop.permute.xlu1 %1227 }
 0x196   :  { %1519 = vrot.lane.b32.xlu0 %v897_v43, %s10654_s29  ;;  %v3360_v52 = vmax.f32 %v3201_v53, 0.0  ;;  %9424 = vmatmul.msk.bf16.gmra.mxu0 %vm16548_vm14, %v3042_v22 }
 0x198   :  { %v3488_v18 = vrot.slane %v3360_v52, 2  ;;  %v3489_v48 = vrot.slane %v3360_v52, 4  ;;  %v3490_v6 = vrot.slane %v3360_v52, 6  ;;  %v3873_v63 = vsel %vm3872_vm1, %v3360_v52, -inf  ;;  %v1226_v57 = vpop.permute.xlu0 %1225 }
 0x199   :  { %v3874_v27 = vrot.slane %v3873_v63, 4  ;;  %v1646_v8 = vsel %vm402_vm0, %v558_v0, %v1226_v57 }
 0x19a   :  { %v3880_v50 = vsel %vm3872_vm1, %v3488_v18, -inf  ;;  %v3887_v58 = vsel %vm3872_vm1, %v3489_v48, -inf  ;;  %v3894_v31 = vsel %vm3872_vm1, %v3490_v6, -inf  ;;  %v11847_v30 = vsel %vm1683_vm11, %v1646_v8, %v11712_v36 }
 0x19b   :  { %v3881_v5 = vrot.slane %v3880_v50, 4  ;;  %1776 = vst.msk [vmem:[#allocation3 + $0xe8] sm:$0xff] %vm1748_vm12, %v11847_v30  ;;  %v3202_v1 = vpop.f32.mrf.mxu0  ;;  %v3875_v25 = vmax.f32 %v3873_v63, %v3874_v27  ;;  %v3888_v9 = vrot.slane %v3887_v58, 4  ;;  %v3895_v36 = vrot.slane %v3894_v31, 4 }
 0x19c   :  { %v3203_v22 = vadd.f32 %v11815_v46, %v3202_v1  ;;  %1241 = vrot.lane.b32.xlu2 %v11521_v55, %s10653_s16  ;;  %v241_v63 = vand.u32 15, %v11861_v32 }
 0x19d   :  { %v3882_v10 = vmax.f32 %v3880_v50, %v3881_v5  ;;  %v3876_v18 = vrot.slane %v3875_v25, 2  ;;  %v3889_v48 = vmax.f32 %v3887_v58, %v3888_v9  ;;  %v3896_v6 = vmax.f32 %v3894_v31, %v3895_v36 }
 0x19e   :  { %1233 = vrot.lane.b32.xlu0 %v11614_v34, %s10653_s16  ;;  %v3361_v43 = vmax.f32 %v3203_v22, 0.0  ;;  %vm11874_vm2 = vcmp.lt.s32.totalorder %v241_v63, 15 }
 0x19f   :  { %v3883_v1 = vrot.slane %v3882_v10, 2  ;;  %v3877_v31 = vmax.f32 %v3875_v25, %v3876_v18  ;;  %v3890_v9 = vrot.slane %v3889_v48, 2  ;;  %v3897_v36 = vrot.slane %v3896_v6, 2 }
 0x1a0   :  { %v3491_v53 = vrot.slane %v3361_v43, 2  ;;  %v3492_v52 = vrot.slane %v3361_v43, 4  ;;  %v3493_v0 = vrot.slane %v3361_v43, 6  ;;  %v3901_v55 = vsel %vm3872_vm1, %v3361_v43, -inf }
 0x1a1   :  { %v3902_v57 = vrot.slane %v3901_v55, 4  ;;  %v3878_v25 = vrot.slane %v3877_v31, 1  ;;  %v3891_v18 = vmax.f32 %v3889_v48, %v3890_v9  ;;  %v3898_v17 = vmax.f32 %v3896_v6, %v3897_v36 }
 0x1a2   :  { %v3908_v34 = vsel %vm3872_vm1, %v3491_v53, -inf  ;;  %v3915_v27 = vsel %vm3872_vm1, %v3492_v52, -inf  ;;  %v3922_v8 = vsel %vm3872_vm1, %v3493_v0, -inf  ;;  %v882_v52 = vld [vmem:[#allocation2 + $0x101] sm:$0xff]  ;;  %v3884_v0 = vmax.f32 %v3882_v10, %v3883_v1 }
 0x1a3   :  { %v3909_v22 = vrot.slane %v3908_v34, 4  ;;  %v3916_v50 = vrot.slane %v3915_v27, 4  ;;  %v3923_v5 = vrot.slane %v3922_v8, 4  ;;  %v3903_v43 = vmax.f32 %v3901_v55, %v3902_v57  ;;  %v3205_v53 = vpop.f32.mrf.mxu0 }
 0x1a4   :  { %1267 = vrot.lane.b32.xlu2 %v11402_v60, %s10653_s16  ;;  %v11879_v60 = vpop.permute.xlu1 %1485  ;;  %v1074_v63 = vsel %vm11874_vm2, %v882_v52, 0.0  ;;  %v3885_v10 = vrot.slane %v3884_v0, 1  ;;  %v3879_v48 = vmax.f32 %v3877_v31, %v3878_v25  ;;  %v3892_v6 = vrot.slane %v3891_v18, 1  ;;  %v907_v31 = vld [vmem:[#allocation2 + $0x1c9] sm:$0xff] }
 0x1a5   :  { %v3910_v12 = vmax.f32 %v3908_v34, %v3909_v22  ;;  %v3917_v2 = vmax.f32 %v3915_v27, %v3916_v50  ;;  %v3924_v16 = vmax.f32 %v3922_v8, %v3923_v5  ;;  %v3904_v55 = vrot.slane %v3903_v43, 2 }
 0x1a6   :  { %1247 = vrot.lane.b32.xlu0 %v11664_v39, %s10653_s16  ;;  %v3206_v39 = vadd.f32 %v11815_v46, %v3205_v53  ;;  %v3899_v58 = vrot.slane %v3898_v17, 1  ;;  %v3893_v25 = vmax.f32 %v3891_v18, %v3892_v6  ;;  %v5665_v49 = vsel %vm402_vm0, %v3879_v48, -inf }
 0x1a7   :  { %v3911_v34 = vrot.slane %v3910_v12, 2  ;;  %v3918_v27 = vrot.slane %v3917_v2, 2  ;;  %v3925_v8 = vrot.slane %v3924_v16, 2  ;;  %v3905_v9 = vmax.f32 %v3903_v43, %v3904_v55 }
 0x1a8   :  { %v3362_v57 = vmax.f32 %v3206_v39, 0.0  ;;  %v1906_v39 = vld [vmem:[#allocation3 + $0xe8] sm:$0xff]  ;;  %v3900_v62 = vmax.f32 %v3898_v17, %v3899_v58  ;;  %v11902_v58 = vsel %vm402_vm0, %v3893_v25, -inf  ;;  %vm16561_vm2 = vcmask 1047559  }
 0x1a9   :  { %v3912_v61 = vmax.f32 %v3910_v12, %v3911_v34  ;;  %v3919_v32 = vmax.f32 %v3917_v2, %v3918_v27  ;;  %v3926_v40 = vmax.f32 %v3924_v16, %v3925_v8 }
 0x1aa   :  { %v3494_v1 = vrot.slane %v3362_v57, 2  ;;  %v3495_v22 = vrot.slane %v3362_v57, 4  ;;  %v3496_v50 = vrot.slane %v3362_v57, 6  ;;  %v3929_v5 = vsel %vm3872_vm1, %v3362_v57, -inf }
 0x1ab   :  { %v3930_v36 = vrot.slane %v3929_v5, 4  ;;  %v3207_v2 = vpop.f32.mrf.mxu0  ;;  %v3920_v16 = vrot.slane %v3919_v32, 1  ;;  %v3927_v18 = vrot.slane %v3926_v40, 1 }
 0x1ac   :  { %1285 = vrot.lane.b32.xlu2 %v138_v11, %s10653_s16  ;;  %v3936_v33 = vsel %vm3872_vm1, %v3494_v1, -inf  ;;  %v3943_v53 = vsel %vm3872_vm1, %v3495_v22, -inf  ;;  %v3950_v52 = vsel %vm3872_vm1, %v3496_v50, -inf  ;;  %v3886_v11 = vmax.f32 %v3884_v0, %v3885_v10  ;;  %v11891_v55 = vpop.permute.xlu1 %1263  ;;  %v889_v22 = vld [vmem:[#allocation2 + $0x139] sm:$0xff] }
 0x1ad   :  { %v3937_v3 = vrot.slane %v3936_v33, 4  ;;  %v3931_v57 = vmax.f32 %v3929_v5, %v3930_v36  ;;  %v3944_v28 = vrot.slane %v3943_v53, 4  ;;  %v2354_v1 = vsel %vm2158_vm4, %v1906_v39, 0.0 }
 0x1ae   :  { %1489 = vrot.lane.b32.xlu0 %v1074_v63, %s10654_s29  ;;  %v3951_v63 = vrot.slane %v3950_v52, 4  ;;  %v3906_v50 = vrot.slane %v3905_v9, 1  ;;  %v3913_v10 = vrot.slane %v3912_v61, 1  ;;  %v10206_v27 = vpack.i.bf16 %v2354_v1, %v2353_v20 }
 0x1af   :  { %v3938_v43 = vmax.f32 %v3936_v33, %v3937_v3  ;;  %v3932_v21 = vrot.slane %v3931_v57, 2  ;;  %v3945_v0 = vmax.f32 %v3943_v53, %v3944_v28  ;;  %v5668_v5 = vsel %vm402_vm0, %v3886_v11, -inf }
 0x1b0   :  { %v3952_v12 = vmax.f32 %v3950_v52, %v3951_v63  ;;  %10207 = vrot.lane.b32.xlu1 %v10206_v27, %s10656_s18  ;;  %v3208_v28 = vadd.f32 %v11815_v46, %v3207_v2  ;;  %v3907_v20 = vmax.f32 %v3905_v9, %v3906_v50  ;;  %v3914_v39 = vmax.f32 %v3912_v61, %v3913_v10 }
 0x1b1   :  { %v3939_v34 = vrot.slane %v3938_v43, 2  ;;  %v3933_v17 = vmax.f32 %v3931_v57, %v3932_v21  ;;  %v3946_v3 = vrot.slane %v3945_v0, 2  ;;  %v11905_v21 = vsel %vm402_vm0, %v3900_v62, -inf }
 0x1b2   :  { %v3953_v8 = vrot.slane %v3952_v12, 2  ;;  %v3363_v48 = vmax.f32 %v3208_v28, 0.0  ;;  %v3921_v11 = vmax.f32 %v3919_v32, %v3920_v16  ;;  %v3928_v57 = vmax.f32 %v3926_v40, %v3927_v18 }
 0x1b3   :  { %v3940_v6 = vmax.f32 %v3938_v43, %v3939_v34  ;;  %v3934_v36 = vrot.slane %v3933_v17, 1  ;;  %v3947_v33 = vmax.f32 %v3945_v0, %v3946_v3  ;;  %v11908_v25 = vsel %vm402_vm0, %v3907_v20, -inf }
 0x1b4   :  { %1539 = vrot.lane.b32.xlu2 %v907_v31, %s10654_s29  ;;  %v3954_v52 = vmax.f32 %v3952_v12, %v3953_v8  ;;  %v3497_v1 = vrot.slane %v3363_v48, 2  ;;  %v3499_v50 = vrot.slane %v3363_v48, 6  ;;  %v3957_v62 = vsel %vm3872_vm1, %v3363_v48, -inf  ;;  %v11913_v40 = vpop.permute.xlu1 %1521  ;;  %v3210_v8 = vpop.f32.mrf.mxu0 }
 0x1b5   :  { %v3941_v53 = vrot.slane %v3940_v6, 1  ;;  %v3948_v63 = vrot.slane %v3947_v33, 1  ;;  %v3935_v31 = vmax.f32 %v3933_v17, %v3934_v36  ;;  %v3958_v2 = vrot.slane %v3957_v62, 4  ;;  %16740 = vst [vmem:[#allocation50_spill] sm:$0xff] %v11913_v40 }
 0x1b6   :  { %1503 = vrot.lane.b32.xlu0 %v889_v22, %s10654_s29  ;;  %v3498_v22 = vrot.slane %v3363_v48, 4  ;;  %v3955_v0 = vrot.slane %v3954_v52, 1  ;;  %v3964_v61 = vsel %vm3872_vm1, %v3497_v1, -inf  ;;  %v11916_v32 = vsel %vm402_vm0, %v3914_v39, -inf }
 0x1b7   :  { %v3942_v43 = vmax.f32 %v3940_v6, %v3941_v53  ;;  %v3949_v9 = vmax.f32 %v3947_v33, %v3948_v63  ;;  %v11919_v10 = vsel %vm402_vm0, %v3921_v11, -inf  ;;  %v11922_v16 = vsel %vm402_vm0, %v3928_v57, -inf }
 0x1b8   :  { %v3965_v34 = vrot.slane %v3964_v61, 4  ;;  %v5666_v27 = vsel %vm402_vm0, %v3935_v31, -inf  ;;  %v3959_v17 = vmax.f32 %v3957_v62, %v3958_v2  ;;  %v3971_v3 = vsel %vm3872_vm1, %v3498_v22, -inf  ;;  %1271 = vrot.lane.b32.xlu1 %v11569_v47, %s10653_s16 }
 0x1b9   :  { %v5669_v12 = vsel %vm402_vm0, %v3942_v43, -inf  ;;  %v5672_v6 = vsel %vm402_vm0, %v3949_v9, -inf  ;;  %v3972_v20 = vrot.slane %v3971_v3, 4  ;;  %v3978_v36 = vsel %vm3872_vm1, %v3499_v50, -inf }
 0x1ba   :  { %v5670_v18 = vmax.f32 %v5668_v5, %v5669_v12  ;;  %v3966_v28 = vmax.f32 %v3964_v61, %v3965_v34  ;;  %v3956_v33 = vmax.f32 %v3954_v52, %v3955_v0  ;;  %v3960_v53 = vrot.slane %v3959_v17, 2 }
 0x1bb   :  { %v3979_v48 = vrot.slane %v3978_v36, 4  ;;  %v5667_v39 = vmax.f32 %v5665_v49, %v5666_v27  ;;  %v3973_v11 = vmax.f32 %v3971_v3, %v3972_v20  ;;  %v3211_v57 = vadd.f32 %v11815_v46, %v3210_v8  ;;  %v11938_v8 = vpop.permute.xlu2 %1515 }
 0x1bc   :  { %v3967_v5 = vrot.slane %v3966_v28, 2  ;;  %v5673_v63 = vmax.f32 %v11902_v58, %v5672_v6  ;;  %v3961_v31 = vmax.f32 %v3959_v17, %v3960_v53  ;;  %v5675_v52 = vsel %vm402_vm0, %v3956_v33, -inf }
 0x1bd   :  { %v3980_v47 = vmax.f32 %v3978_v36, %v3979_v48  ;;  %v6226_v43 = vsel %vm6225_vm5, %v5670_v18, %v5667_v39  ;;  %v3974_v22 = vrot.slane %v3973_v11, 2  ;;  %v3364_v9 = vmax.f32 %v3211_v57, 0.0  ;;  %v11936_v18 = vpop.permute.xlu1 %1243  ;;  %v3212_v57 = vpop.f32.mrf.mxu0 }
 0x1be   :  { %v3968_v1 = vmax.f32 %v3966_v28, %v3967_v5  ;;  %v3962_v50 = vrot.slane %v3961_v31, 1  ;;  %v6228_v58 = vsel %vm6227_vm6, %v5673_v63, %v6226_v43  ;;  %v5676_v20 = vmax.f32 %v11905_v21, %v5675_v52 }
 0x1bf   :  { %v3981_v62 = vrot.slane %v3980_v47, 2  ;;  %v3975_v0 = vmax.f32 %v3973_v11, %v3974_v22  ;;  %v3500_v12 = vrot.slane %v3364_v9, 2  ;;  %v3501_v2 = vrot.slane %v3364_v9, 4 }
 0x1c0   :  { %v3969_v49 = vrot.slane %v3968_v1, 1  ;;  %v3963_v61 = vmax.f32 %v3961_v31, %v3962_v50  ;;  %v3985_v27 = vsel %vm3872_vm1, %v3364_v9, -inf  ;;  %v3502_v6 = vrot.slane %v3364_v9, 6 }
 0x1c1   :  { %v3982_v34 = vmax.f32 %v3980_v47, %v3981_v62  ;;  %v3976_v3 = vrot.slane %v3975_v0, 1  ;;  %v3992_v28 = vsel %vm3872_vm1, %v3500_v12, -inf  ;;  %v3999_v53 = vsel %vm3872_vm1, %v3501_v2, -inf }
 0x1c2   :  { %v3970_v17 = vmax.f32 %v3968_v1, %v3969_v49  ;;  %v5678_v33 = vsel %vm402_vm0, %v3963_v61, -inf  ;;  %v3986_v11 = vrot.slane %v3985_v27, 4  ;;  %v6230_v63 = vsel %vm16592_vm7, %v5676_v20, %v6228_v58 }
 0x1c3   :  { %v3983_v36 = vrot.slane %v3982_v34, 1  ;;  %v3977_v48 = vmax.f32 %v3975_v0, %v3976_v3  ;;  %v5679_v39 = vmax.f32 %v11908_v25, %v5678_v33  ;;  %v3993_v43 = vrot.slane %v3992_v28, 4 }
 0x1c4   :  { %v5681_v5 = vsel %vm402_vm0, %v3970_v17, -inf  ;;  %v4000_v22 = vrot.slane %v3999_v53, 4  ;;  %v4006_v9 = vsel %vm3872_vm1, %v3502_v6, -inf  ;;  %v3213_v62 = vadd.f32 %v11815_v46, %v3212_v57 }
 0x1c5   :  { %v3984_v31 = vmax.f32 %v3982_v34, %v3983_v36  ;;  %v5682_v47 = vmax.f32 %v11916_v32, %v5681_v5  ;;  %v5684_v21 = vsel %vm402_vm0, %v3977_v48, -inf  ;;  %v6232_v1 = vsel %vm16591_vm8, %v5679_v39, %v6230_v63  ;;  %v11963_v3 = vpop.permute.xlu1 %1249 }
 0x1c6   :  { %v5685_v52 = vmax.f32 %v11919_v10, %v5684_v21  ;;  %v3987_v0 = vmax.f32 %v3985_v27, %v3986_v11  ;;  %v4007_v32 = vrot.slane %v4006_v9, 4  ;;  %v3994_v2 = vmax.f32 %v3992_v28, %v3993_v43  ;;  %v11968_v27 = vpop.permute.xlu2 %1229 }
 0x1c7   :  { %v5687_v25 = vsel %vm402_vm0, %v3984_v31, -inf  ;;  %v6234_v50 = vsel %vm16571_vm10, %v5682_v47, %v6232_v1  ;;  %v297_v58 = vshra.s32 %v11077_v35, 4  ;;  %v4001_v34 = vmax.f32 %v3999_v53, %v4000_v22 }
 0x1c8   :  { %v5688_v49 = vmax.f32 %v11922_v16, %v5687_v25  ;;  %v6236_v12 = vsel %vm16570_vm15, %v5685_v52, %v6234_v50  ;;  %v4008_v10 = vmax.f32 %v4006_v9, %v4007_v32  ;;  %v3365_v17 = vmax.f32 %v3213_v62, 0.0 }
 0x1c9   :  { %v3988_v6 = vrot.slane %v3987_v0, 2  ;;  %v11966_v16 = vadd.s32 288, %v10741_v4  ;;  %v3995_v28 = vrot.slane %v3994_v2, 2  ;;  %v11970_v33 = vand.u32 15, %v297_v58 }
 0x1ca   :  { %v11959_v61 = vsel %vm16561_vm2, %v5688_v49, %v6236_v12  ;;  %v3503_v20 = vrot.slane %v3365_v17, 2  ;;  %v3504_v35 = vrot.slane %v3365_v17, 4  ;;  %v3505_v36 = vrot.slane %v3365_v17, 6  ;;  %v3215_v49 = vpop.f32.mrf.mxu0 }
 0x1cb   :  { %16741 = vst [vmem:[#allocation51_spill] sm:$0xff] %v11959_v61  ;;  %v315_v53 = vshra.s32 %v11424_v14, 4  ;;  %v4002_v48 = vrot.slane %v4001_v34, 2  ;;  %v4013_v39 = vsel %vm3872_vm1, %v3365_v17, -inf  ;;  %v4009_v5 = vrot.slane %v4008_v10, 2 }
 0x1cc   :  { %6360 = vst.msk [vmem:[#allocation4 + $0x8] sm:$0xff] %vm402_vm0, %v11959_v61  ;;  %v4014_v11 = vrot.slane %v4013_v39, 4  ;;  %v4020_v57 = vsel %vm3872_vm1, %v3503_v20, -inf  ;;  %v4027_v63 = vsel %vm3872_vm1, %v3504_v35, -inf  ;;  %v3989_v31 = vmax.f32 %v3987_v0, %v3988_v6  ;;  %v570_v61 = vld [vmem:[#allocation2 + $0x13f] sm:$0xff] }
 0x1cd   :  { %16742 = vst [vmem:[#allocation52_spill] sm:$0xff] %v11966_v16  ;;  %v246_v47 = vand.u32 15, %v11966_v16  ;;  %v4021_v43 = vrot.slane %v4020_v57, 4  ;;  %v4028_v21 = vrot.slane %v4027_v63, 4  ;;  %v3996_v1 = vmax.f32 %v3994_v2, %v3995_v28  ;;  %v1904_v16 = vld [vmem:[#allocation3 + $0xd8] sm:$0xff] }
 0x1ce   :  { %v4015_v22 = vmax.f32 %v4013_v39, %v4014_v11  ;;  %v4034_v9 = vsel %vm3872_vm1, %v3505_v36, -inf  ;;  %v314_v14 = vshra.s32 %v11588_v38, 4  ;;  %v11979_v52 = vand.u32 15, %v315_v53  ;;  %v1921_v38 = vld [vmem:[#allocation3 + $0x160] sm:$0xff]  ;;  %v1922_v53 = vld [vmem:[#allocation3 + $0x168] sm:$0xff]  ;;  %v567_v39 = vld [vmem:[#allocation2 + $0x127] sm:$0xff] }
 0x1cf   :  { %v4003_v25 = vmax.f32 %v4001_v34, %v4002_v48  ;;  %v4022_v50 = vmax.f32 %v4020_v57, %v4021_v43  ;;  %v4029_v62 = vmax.f32 %v4027_v63, %v4028_v21  ;;  %v4010_v32 = vmax.f32 %v4008_v10, %v4009_v5  ;;  %v1500_v48 = vpop.permute.xlu1 %1499 }
 0x1d0   :  { %16743 = vst [vmem:[#allocation53_spill] sm:$0xff] %v11979_v52  ;;  %v4016_v12 = vrot.slane %v4015_v22, 2  ;;  %v4035_v58 = vrot.slane %v4034_v9, 4  ;;  %v11981_v0 = vand.u32 15, %v314_v14  ;;  %v296_v17 = vshra.s32 %v11631_v45, 4  ;;  %v11989_v45 = vpop.permute.xlu2 %10172 }
 0x1d1   :  { %vm11984_vm3 = vcmp.gt.s32.totalorder %v246_v47, 0  ;;  %v4023_v6 = vrot.slane %v4022_v50, 2  ;;  %v4030_v28 = vrot.slane %v4029_v62, 2  ;;  %v3990_v20 = vrot.slane %v3989_v31, 1 }
 0x1d2   :  { %16744 = vst [vmem:[#allocation54_spill] sm:$0xff] %v11981_v0  ;;  %v3997_v35 = vrot.slane %v3996_v1, 1  ;;  %v4017_v34 = vmax.f32 %v4015_v22, %v4016_v12  ;;  %v4036_v36 = vmax.f32 %v4034_v9, %v4035_v58  ;;  %v4004_v10 = vrot.slane %v4003_v25, 1  ;;  %v1903_v58 = vld [vmem:[#allocation3 + $0xd0] sm:$0xff] }
 0x1d3   :  { %v4024_v5 = vmax.f32 %v4022_v50, %v4023_v6  ;;  %v4031_v11 = vmax.f32 %v4029_v62, %v4030_v28  ;;  %vm2173_vm4 = vcmp.lt.s32.totalorder %v11981_v0, 15  ;;  %v4011_v57 = vrot.slane %v4010_v32, 1 }
 0x1d4   :  { %v4037_v63 = vrot.slane %v4036_v36, 2  ;;  %vm2174_vm9 = vcmp.lt.s32.totalorder %v11979_v52, 15  ;;  %v2369_v47 = vsel %vm2173_vm4, %v1921_v38, 0.0  ;;  %v11992_v43 = vand.u32 15, %v296_v17  ;;  %v12002_v17 = vld [vmem:[%s16492_s0 + $0x1b0] sm:$0xff] }
 0x1d5   :  { %v4018_v21 = vrot.slane %v4017_v34, 1  ;;  %v4025_v22 = vrot.slane %v4024_v5, 1  ;;  %v2370_v9 = vsel %vm2174_vm9, %v1922_v53, 0.0  ;;  %v759_v14 = vsel %vm11984_vm3, %v567_v39, 0.0  ;;  %457 = vst.msk [vmem:[#allocation2 + $0x1b8] sm:$0xff] %vm402_vm0, %v12002_v17 }
 0x1d6   :  { %v4032_v12 = vrot.slane %v4031_v11, 1  ;;  %v4038_v50 = vmax.f32 %v4036_v36, %v4037_v63  ;;  %v10196_v62 = vpack.i.bf16 %v2370_v9, %v2369_v47  ;;  %v3991_v6 = vmax.f32 %v3989_v31, %v3990_v20  ;;  %v3217_v20 = vpop.f32.mrf.mxu0 }
 0x1d7   :  { %v3998_v28 = vmax.f32 %v3996_v1, %v3997_v35  ;;  %v4005_v0 = vmax.f32 %v4003_v25, %v4004_v10  ;;  %v4012_v26 = vmax.f32 %v4010_v32, %v4011_v57  ;;  %vm2155_vm4 = vcmp.lt.s32.totalorder %v11992_v43, 15  ;;  %v12011_v25 = vld [vmem:[%s16492_s0 + $0x1b8] sm:$0xff] }
 0x1d8   :  { %10197 = vrot.lane.b32.xlu2 %v10196_v62, %s10656_s18  ;;  %vm2156_vm14 = vcmp.lt.s32.totalorder %v11970_v33, 15  ;;  %v1655_v2 = vsel %vm402_vm0, %v759_v14, %v11936_v18  ;;  %v4019_v31 = vmax.f32 %v4017_v34, %v4018_v21  ;;  %v4026_v1 = vmax.f32 %v4024_v5, %v4025_v22  ;;  %458 = vst.msk [vmem:[#allocation2 + $0x1c0] sm:$0xff] %vm402_vm0, %v12011_v25 }
 0x1d9   :  { %v2351_v38 = vsel %vm2155_vm4, %v1903_v58, 0.0  ;;  %v4033_v32 = vmax.f32 %v4031_v11, %v4032_v12  ;;  %v4039_v35 = vrot.slane %v4038_v50, 1  ;;  %v1658_v36 = vsel %vm402_vm0, %v570_v61, %v11963_v3 }
 0x1da   :  { %v2352_v53 = vsel %vm2156_vm14, %v1904_v16, 0.0  ;;  %v12018_v18 = vsel %vm402_vm0, %v3991_v6, -inf  ;;  %v12021_v34 = vsel %vm402_vm0, %v3998_v28, -inf  ;;  %v3216_v39 = vadd.f32 %v11815_v46, %v3215_v49  ;;  %v1506_v16 = vpop.permute.xlu1 %1505 }
 0x1db   :  { %v10186_v10 = vpack.i.bf16 %v2352_v53, %v2351_v38  ;;  %v12025_v5 = vsel %vm402_vm0, %v4005_v0, -inf  ;;  %v12028_v11 = vsel %vm402_vm0, %v4012_v26, -inf  ;;  %v12031_v61 = vsel %vm1683_vm11, %v1655_v2, %v1500_v48  ;;  %v883_v0 = vld [vmem:[#allocation2 + $0x109] sm:$0xff]  ;;  %v12043_v26 = vpop.permute.xlu2 %1265 }
 0x1dc   :  { %16747 = vst [vmem:[#allocation55_spill] sm:$0xff] %v12031_v61  ;;  %v3218_v3 = vadd.f32 %v11815_v46, %v3217_v20  ;;  %v12035_v57 = vsel %vm402_vm0, %v4019_v31, -inf  ;;  %v12038_v63 = vsel %vm402_vm0, %v4026_v1, -inf  ;;  %v3366_v49 = vmax.f32 %v3216_v39, 0.0  ;;  %v12063_v31 = vld [vmem:[%s16492_s0 + $0x1d0] sm:$0xff]  ;;  %v885_v39 = vld [vmem:[#allocation2 + $0x119] sm:$0xff] }
 0x1dd   :  { %10187 = vrot.lane.b32.xlu0 %v10186_v10, %s10656_s18  ;;  %1785 = vst.msk [vmem:[#allocation3 + $0x130] sm:$0xff] %vm1748_vm12, %v12031_v61  ;;  %v12046_v48 = vsel %vm1683_vm11, %v1658_v36, %v1506_v16  ;;  %v12048_v47 = vmax.f32 %v4038_v50, %v4039_v35  ;;  %v12051_v21 = vsel %vm402_vm0, %v4033_v32, -inf  ;;  %v12056_v9 = vadd.s32 240, %v10741_v4 }
 0x1de   :  { %16748 = vst [vmem:[#allocation56_spill] sm:$0xff] %v12043_v26  ;;  %v3367_v22 = vmax.f32 %v3218_v3, 0.0  ;;  %v3506_v14 = vrot.slane %v3366_v49, 2  ;;  %v3507_v12 = vrot.slane %v3366_v49, 4  ;;  %v3508_v62 = vrot.slane %v3366_v49, 6 }
 0x1df   :  { %16749 = vst [vmem:[#allocation57_spill] sm:$0xff] %v12046_v48  ;;  %v4041_v58 = vsel %vm3872_vm1, %v3366_v49, -inf  ;;  %vm1831_vm14 = vcmp.gt.s32.totalorder %v11656_v37, 0  ;;  %vm1832_vm3 = vcmp.gt.s32.totalorder %v11644_v44, 0  ;;  %vm1835_vm4 = vcmp.gt.s32.totalorder %v11992_v43, 0  ;;  %v12184_v43 = vld [vmem:[#allocation2 + $0xe7] sm:$0xff] }
 0x1e0   :  { %1788 = vst.msk [vmem:[#allocation3 + $0x148] sm:$0xff] %vm1748_vm12, %v12046_v48  ;;  %v4042_v6 = vrot.slane %v4041_v58, 4  ;;  %1491 = vrot.lane.b32.xlu2 %v883_v0, %s10654_s29  ;;  %v3509_v50 = vrot.slane %v3367_v22, 2  ;;  %v3510_v28 = vrot.slane %v3367_v22, 4  ;;  %v3511_v2 = vrot.slane %v3367_v22, 6 }
 0x1e1   :  { %16750 = vst [vmem:[#allocation58_spill] sm:$0xff] %v12063_v31  ;;  %v4048_v1 = vsel %vm3872_vm1, %v3506_v14, -inf  ;;  %v4055_v38 = vsel %vm3872_vm1, %v3507_v12, -inf  ;;  %v4062_v20 = vsel %vm3872_vm1, %v3508_v62, -inf  ;;  %v4069_v32 = vsel %vm3872_vm1, %v3367_v22, -inf }
 0x1e2   :  { %v4043_v35 = vmax.f32 %v4041_v58, %v4042_v6  ;;  %v4049_v36 = vrot.slane %v4048_v1, 4  ;;  %v4056_v53 = vrot.slane %v4055_v38, 4  ;;  %v4063_v10 = vrot.slane %v4062_v20, 4  ;;  %461 = vst.msk [vmem:[#allocation2 + $0x1d8] sm:$0xff] %vm402_vm0, %v12063_v31 }
 0x1e3   :  { %v4070_v3 = vrot.slane %v4069_v32, 4  ;;  %v4076_v16 = vsel %vm3872_vm1, %v3509_v50, -inf  ;;  %v4083_v49 = vsel %vm3872_vm1, %v3510_v28, -inf  ;;  %v4090_v0 = vsel %vm3872_vm1, %v3511_v2, -inf  ;;  %v12075_v26 = vpop.permute.xlu2 %1231 }
 0x1e4   :  { %v4044_v14 = vrot.slane %v4043_v35, 2  ;;  %v4050_v12 = vmax.f32 %v4048_v1, %v4049_v36  ;;  %v4057_v62 = vmax.f32 %v4055_v38, %v4056_v53  ;;  %v4064_v48 = vmax.f32 %v4062_v20, %v4063_v10 }
 0x1e5   :  { %1495 = vrot.lane.b32.xlu0 %v885_v39, %s10654_s29  ;;  %v4071_v22 = vmax.f32 %v4069_v32, %v4070_v3  ;;  %v4077_v58 = vrot.slane %v4076_v16, 4  ;;  %v4084_v6 = vrot.slane %v4083_v49, 4  ;;  %v4091_v52 = vrot.slane %v4090_v0, 4  ;;  %v12082_v32 = vld [vmem:[%s16492_s0 + $0x198] sm:$0xff] }
 0x1e6   :  { %v4045_v29 = vmax.f32 %v4043_v35, %v4044_v14  ;;  %v4051_v19 = vrot.slane %v4050_v12, 2  ;;  %v4058_v51 = vrot.slane %v4057_v62, 2  ;;  %v4065_v23 = vrot.slane %v4064_v48, 2  ;;  %454 = vst.msk [vmem:[#allocation2 + $0x1a0] sm:$0xff] %vm402_vm0, %v12082_v32 }
 0x1e7   :  { %v4072_v31 = vrot.slane %v4071_v22, 2  ;;  %v4078_v50 = vmax.f32 %v4076_v16, %v4077_v58  ;;  %v4085_v40 = vmax.f32 %v4083_v49, %v4084_v6  ;;  %v4092_v28 = vmax.f32 %v4090_v0, %v4091_v52  ;;  %v905_v58 = vld [vmem:[#allocation2 + $0x1b9] sm:$0xff] }
 0x1e8   :  { %v4046_v2 = vrot.slane %v4045_v29, 1  ;;  %v4052_v1 = vmax.f32 %v4050_v12, %v4051_v19  ;;  %v4059_v38 = vmax.f32 %v4057_v62, %v4058_v51  ;;  %v4066_v20 = vmax.f32 %v4064_v48, %v4065_v23  ;;  %1279 = vrot.lane.b32.xlu2 %v12002_v17, %s10653_s16  ;;  %v3220_v23 = vpop.f32.mrf.mxu0 }
 0x1e9   :  { %v4073_v35 = vmax.f32 %v4071_v22, %v4072_v31  ;;  %v4079_v36 = vrot.slane %v4078_v50, 2  ;;  %v4086_v53 = vrot.slane %v4085_v40, 2  ;;  %v4093_v10 = vrot.slane %v4092_v28, 2 }
 0x1ea   :  { %v4047_v52 = vmax.f32 %v4045_v29, %v4046_v2  ;;  %v4053_v39 = vrot.slane %v4052_v1, 1  ;;  %v4060_v19 = vrot.slane %v4059_v38, 1  ;;  %v4067_v51 = vrot.slane %v4066_v20, 1 }
 0x1eb   :  { %v4074_v48 = vrot.slane %v4073_v35, 1  ;;  %v4080_v3 = vmax.f32 %v4078_v50, %v4079_v36  ;;  %v4087_v17 = vmax.f32 %v4085_v40, %v4086_v53  ;;  %v4094_v16 = vmax.f32 %v4092_v28, %v4093_v10 }
 0x1ec   :  { %v4054_v49 = vmax.f32 %v4052_v1, %v4053_v39  ;;  %v4061_v0 = vmax.f32 %v4059_v38, %v4060_v19  ;;  %v4068_v14 = vmax.f32 %v4066_v20, %v4067_v51  ;;  %v5690_v31 = vsel %vm402_vm0, %v4047_v52, -inf }
 0x1ed   :  { %v4075_v12 = vmax.f32 %v4073_v35, %v4074_v48  ;;  %v4081_v62 = vrot.slane %v4080_v3, 1  ;;  %v4088_v22 = vrot.slane %v4087_v17, 1  ;;  %1269 = vrot.lane.b32.xlu0 %v11559_v24, %s10653_s16  ;;  %v3221_v29 = vadd.f32 %v11815_v46, %v3220_v23  ;;  %v899_v48 = vld [vmem:[#allocation2 + $0x189] sm:$0xff] }
 0x1ee   :  { %v5693_v6 = vsel %vm402_vm0, %v4054_v49, -inf  ;;  %v5696_v50 = vsel %vm402_vm0, %v4061_v0, -inf  ;;  %v5699_v40 = vsel %vm402_vm0, %v4068_v14, -inf  ;;  %v4095_v28 = vrot.slane %v4094_v16, 1  ;;  %v10509_v49 = vld [vmem:[#allocation3 + $0xb8] sm:$0xff] }
 0x1ef   :  { %v5691_v2 = vmax.f32 %v12018_v18, %v5690_v31  ;;  %v5694_v1 = vmax.f32 %v12021_v34, %v5693_v6  ;;  %v5697_v38 = vmax.f32 %v12025_v5, %v5696_v50  ;;  %v4082_v20 = vmax.f32 %v4080_v3, %v4081_v62  ;;  %v12103_v34 = vpop.permute.xlu2 %1245  ;;  %v10507_v6 = vld [vmem:[#allocation3 + $0x90] sm:$0xff] }
 0x1f0   :  { %v4089_v35 = vmax.f32 %v4087_v17, %v4088_v22  ;;  %v4096_v36 = vmax.f32 %v4094_v16, %v4095_v28  ;;  %v5702_v24 = vsel %vm402_vm0, %v4075_v12, -inf  ;;  %v240_v53 = vand.u32 15, %v12056_v9  ;;  %1535 = vrot.lane.b32.xlu2 %v905_v58, %s10654_s29  ;;  %v561_v17 = vld [vmem:[#allocation2 + $0xf7] sm:$0xff]  ;;  %v3222_v0 = vpop.f32.mrf.mxu0 }
 0x1f1   :  { %v5700_v10 = vmax.f32 %v12028_v11, %v5699_v40  ;;  %v6239_v52 = vsel %vm6225_vm5, %v5694_v1, %v5691_v2  ;;  %v5703_v39 = vmax.f32 %v12035_v57, %v5702_v24  ;;  %v5705_v18 = vsel %vm402_vm0, %v4082_v20, -inf }
 0x1f2   :  { %v6240_v5 = vsel %vm6227_vm6, %v5697_v38, %v6239_v52  ;;  %v5706_v19 = vmax.f32 %v12038_v63, %v5705_v18  ;;  %v5708_v51 = vsel %vm402_vm0, %v4089_v35, -inf  ;;  %v5711_v23 = vsel %vm402_vm0, %v4096_v36, -inf }
 0x1f3   :  { %v6241_v3 = vsel %vm16592_vm7, %v5700_v10, %v6240_v5  ;;  %v5709_v11 = vmax.f32 %v12051_v21, %v5708_v51  ;;  %v5710_v57 = vsel %vm402_vm0, %v12048_v47, -inf  ;;  %vm12114_vm9 = vcmp.gt.s32.totalorder %v240_v53, 0  ;;  %v901_v51 = vld [vmem:[#allocation2 + $0x199] sm:$0xff] }
 0x1f4   :  { %v6242_v16 = vsel %vm16591_vm8, %v5703_v39, %v6241_v3  ;;  %v3368_v63 = vmax.f32 %v3221_v29, 0.0  ;;  %v5712_v14 = vmax.f32 %v5710_v57, %v5711_v23  ;;  %v753_v47 = vsel %vm12114_vm9, %v561_v17, 0.0  ;;  %v140_v17 = vld [vmem:[%s16492_s0 + $0x1d8] sm:$0xff]  ;;  %v10508_v57 = vld [vmem:[#allocation3 + $0x98] sm:$0xff] }
 0x1f5   :  { %v6243_v31 = vsel %vm16571_vm10, %v5706_v19, %v6242_v16  ;;  %1523 = vrot.lane.b32.xlu0 %v899_v48, %s10654_s29  ;;  %v3223_v58 = vadd.f32 %v11815_v46, %v3222_v0  ;;  %v12130_v50 = vsel %vm1831_vm14, %v10507_v6, 0.0  ;;  %v1649_v1 = vsel %vm402_vm0, %v753_v47, %v12075_v26  ;;  %v12147_v26 = vpop.permute.xlu0 %10162  ;;  %462 = vst.msk [vmem:[#allocation2 + $0x1e0] sm:$0xff] %vm402_vm0, %v140_v17 }
 0x1f6   :  { %v6244_v21 = vsel %vm16570_vm15, %v5709_v11, %v6243_v31  ;;  %v3512_v12 = vrot.slane %v3368_v63, 2  ;;  %v3513_v62 = vrot.slane %v3368_v63, 4  ;;  %v3514_v29 = vrot.slane %v3368_v63, 6  ;;  %v12167_v31 = vld [vmem:[%s16492_s0 + $0x1e0] sm:$0xff]  ;;  %1289 = vrot.lane.b32.xlu1 %v140_v17, %s10653_s16 }
 0x1f7   :  { %v12126_v22 = vsel %vm16561_vm2, %v5712_v14, %v6244_v21  ;;  %v4097_v37 = vsel %vm3872_vm1, %v3368_v63, -inf  ;;  %v12143_v35 = vadd.s32 224, %v10741_v4  ;;  %vm1836_vm9 = vcmp.gt.s32.totalorder %v11970_v33, 0  ;;  %v10510_v21 = vld [vmem:[#allocation3 + $0xb0] sm:$0xff]  ;;  %463 = vst.msk [vmem:[#allocation2 + $0x1e8] sm:$0xff] %vm402_vm0, %v12167_v31 }
 0x1f8   :  { %16753 = vst [vmem:[#allocation59_spill] sm:$0xff] %v12126_v22  ;;  %v4098_v40 = vrot.slane %v4097_v37, 4  ;;  %v4104_v28 = vsel %vm3872_vm1, %v3512_v12, -inf  ;;  %v4111_v2 = vsel %vm3872_vm1, %v3513_v62, -inf  ;;  %1273 = vrot.lane.b32.xlu2 %v12082_v32, %s10653_s16  ;;  %v4118_v46 = vsel %vm3872_vm1, %v3514_v29, -inf  ;;  %v1488_v32 = vpop.permute.xlu2 %1487  ;;  %v576_v62 = vld [vmem:[#allocation2 + $0x16f] sm:$0xff] }
 0x1f9   :  { %6361 = vst.msk [vmem:[#allocation4 + $0x10] sm:$0xff] %vm402_vm0, %v12126_v22  ;;  %v4105_v38 = vrot.slane %v4104_v28, 4  ;;  %v4112_v20 = vrot.slane %v4111_v2, 4  ;;  %v4119_v24 = vrot.slane %v4118_v46, 4  ;;  %v3369_v52 = vmax.f32 %v3223_v58, 0.0 }
 0x1fa   :  { %v4099_v36 = vmax.f32 %v4097_v37, %v4098_v40  ;;  %v238_v39 = vand.u32 15, %v12143_v35  ;;  %v12150_v19 = vsel %vm1683_vm11, %v1649_v1, %v1488_v32  ;;  %v2088_v16 = vsel %vm1832_vm3, %v10508_v57, 0.0 }
 0x1fb   :  { %v4106_v53 = vmax.f32 %v4104_v28, %v4105_v38  ;;  %v4113_v10 = vmax.f32 %v4111_v2, %v4112_v20  ;;  %v4120_v5 = vmax.f32 %v4118_v46, %v4119_v24  ;;  %16754 = vst [vmem:[#allocation60_spill] sm:$0xff] %v12150_v19  ;;  %v3515_v3 = vrot.slane %v3369_v52, 2 }
 0x1fc   :  { %v4100_v18 = vrot.slane %v4099_v36, 2  ;;  %v3516_v11 = vrot.slane %v3369_v52, 4  ;;  %1779 = vst.msk [vmem:[#allocation3 + $0x100] sm:$0xff] %vm1748_vm12, %v12150_v19  ;;  %v12161_v63 = vsel %vm1836_vm9, %v10509_v49, 0.0  ;;  %v3517_v0 = vrot.slane %v3369_v52, 6 }
 0x1fd   :  { %v4107_v23 = vrot.slane %v4106_v53, 2  ;;  %v4114_v48 = vrot.slane %v4113_v10, 2  ;;  %v4125_v14 = vsel %vm3872_vm1, %v3369_v52, -inf  ;;  %v12173_v44 = vsel %vm1835_vm4, %v10510_v21, 0.0 }
 0x1fe   :  { %v4101_v33 = vmax.f32 %v4099_v36, %v4100_v18  ;;  %v4126_v47 = vrot.slane %v4125_v14, 4  ;;  %v4132_v12 = vsel %vm3872_vm1, %v3515_v3, -inf  ;;  %vm12178_vm14 = vcmp.gt.s32.totalorder %v238_v39, 0 }
 0x1ff   :  { %v4121_v37 = vrot.slane %v4120_v5, 2  ;;  %v4133_v58 = vrot.slane %v4132_v12, 4  ;;  %v4139_v6 = vsel %vm3872_vm1, %v3516_v11, -inf  ;;  %v4108_v40 = vmax.f32 %v4106_v53, %v4107_v23  ;;  %v10168_v23 = vpop.permute.xlu0 %10167 }
 0x200   :  { %1527 = vrot.lane.b32.xlu2 %v901_v51, %s10654_s29  ;;  %v4115_v28 = vmax.f32 %v4113_v10, %v4114_v48  ;;  %v4127_v2 = vmax.f32 %v4125_v14, %v4126_v47  ;;  %v4140_v1 = vrot.slane %v4139_v6, 4  ;;  %v10164_v38 = vunpack.i.l.bf16 %v12147_v26  ;;  %v3225_v14 = vpop.f32.mrf.mxu0  ;;  %v568_v47 = vld [vmem:[#allocation2 + $0x12f] sm:$0xff] }
 0x201   :  { %v4134_v20 = vmax.f32 %v4132_v12, %v4133_v58  ;;  %v4146_v46 = vsel %vm3872_vm1, %v3517_v0, -inf  ;;  %v12189_v36 = vadd.s32 456, %v10741_v4  ;;  %v12193_v24 = vsel %vm402_vm0, %v576_v62, %v11832_v41  ;;  %v908_v0 = vld [vmem:[#allocation2 + $0x1d1] sm:$0xff] }
 0x202   :  { %v4102_v52 = vrot.slane %v4101_v33, 1  ;;  %v4128_v32 = vrot.slane %v4127_v2, 2  ;;  %v4141_v39 = vmax.f32 %v4139_v6, %v4140_v1  ;;  %v4122_v10 = vmax.f32 %v4120_v5, %v4121_v37 }
 0x203   :  { %16757 = vst [vmem:[#allocation61_spill] sm:$0xff] %v12189_v36  ;;  %v4135_v18 = vrot.slane %v4134_v20, 2  ;;  %v4147_v51 = vrot.slane %v4146_v46, 4  ;;  %v10165_v48 = vunpack.i.h.bf16 %v12147_v26  ;;  %v4109_v3 = vrot.slane %v4108_v40, 1 }
 0x204   :  { %v4116_v11 = vrot.slane %v4115_v28, 1  ;;  %v4142_v17 = vrot.slane %v4141_v39, 2  ;;  %v12200_v57 = vadd.s32 352, %v10741_v4  ;;  %v4129_v41 = vmax.f32 %v4127_v2, %v4128_v32 }
 0x205   :  { %v267_v49 = vand.u32 15, %v12189_v36  ;;  %v2923_v21 = vsel %vm1748_vm12, %v12130_v50, %v10164_v38  ;;  %v4103_v5 = vmax.f32 %v4101_v33, %v4102_v52  ;;  %v4136_v12 = vmax.f32 %v4134_v20, %v4135_v18  ;;  %v12212_v50 = vld [vmem:[%s16494_s2] ss:$0 sm:$0xff] }
 0x206   :  { %v4148_v62 = vmax.f32 %v4146_v46, %v4147_v51  ;;  %v10170_v37 = vunpack.i.h.bf16 %v10168_v23  ;;  %v4123_v26 = vrot.slane %v4122_v10, 1  ;;  %v4143_v58 = vmax.f32 %v4141_v39, %v4142_v17  ;;  %v1502_v39 = vpop.permute.xlu2 %1501 }
 0x207   :  { %vm844_vm3 = vcmp.lt.s32.totalorder %v267_v49, 15  ;;  %v10169_v6 = vunpack.i.l.bf16 %v10168_v23  ;;  %v4110_v1 = vmax.f32 %v4108_v40, %v4109_v3  ;;  %v4117_v53 = vmax.f32 %v4115_v28, %v4116_v11 }
 0x208   :  { %v1100_v22 = vsel %vm844_vm3, %v908_v0, 0.0  ;;  %v2924_v2 = vsel %vm1748_vm12, %v2088_v16, %v10165_v48  ;;  %v1656_v32 = vsel %vm402_vm0, %v568_v47, %v12103_v34  ;;  %v4130_v19 = vrot.slane %v4129_v41, 1  ;;  %v3227_v47 = vpop.f32.mrf.mxu0 }
 0x209   :  { %1541 = vrot.lane.b32.xlu0 %v1100_v22, %s10654_s29  ;;  %v3226_v33 = vadd.f32 %v12212_v50, %v3225_v14  ;;  %v4137_v28 = vrot.slane %v4136_v12, 1  ;;  %v4149_v38 = vrot.slane %v4148_v62, 2  ;;  %v2988_v16 = vsel %vm2969_vm13, %v2923_v21, %v10169_v6 }
 0x20a   :  { %v2989_v20 = vsel %vm2969_vm13, %v2924_v2, %v10170_v37  ;;  %v4124_v34 = vmax.f32 %v4122_v10, %v4123_v26  ;;  %v12220_v46 = vsel %vm402_vm0, %v4103_v5, -inf  ;;  %v4144_v22 = vrot.slane %v4143_v58, 1 }
 0x20b   :  { %v3370_v52 = vmax.f32 %v3226_v33, 0.0  ;;  %v12223_v18 = vsel %vm402_vm0, %v4110_v1, -inf  ;;  %v12226_v51 = vsel %vm402_vm0, %v4117_v53, -inf  ;;  %v3043_v23 = vpack.c.bf16 %v2989_v20, %v2988_v16  ;;  %v909_v16 = vld [vmem:[#allocation2 + $0x1d9] sm:$0xff] }
 0x20c   :  { %v12229_v48 = vsel %vm1683_vm11, %v1656_v32, %v1502_v39  ;;  %v4131_v3 = vmax.f32 %v4129_v41, %v4130_v19  ;;  %v4138_v49 = vmax.f32 %v4136_v12, %v4137_v28  ;;  %v12233_v0 = vmax.f32 %v4148_v62, %v4149_v38  ;;  %1543 = vrot.lane.b32.xlu1 %v909_v16, %s10654_s29 }
 0x20d   :  { %16758 = vst [vmem:[#allocation62_spill] sm:$0xff] %v12229_v48  ;;  %v3518_v11 = vrot.slane %v3370_v52, 2  ;;  %v3519_v17 = vrot.slane %v3370_v52, 4  ;;  %v3520_v10 = vrot.slane %v3370_v52, 6  ;;  %v4153_v14 = vsel %vm3872_vm1, %v3370_v52, -inf }
 0x20e   :  { %1786 = vst.msk [vmem:[#allocation3 + $0x138] sm:$0xff] %vm1748_vm12, %v12229_v48  ;;  %vm16759_vm4 = vcmask 293888   ;;  %v4145_v21 = vmax.f32 %v4143_v58, %v4144_v22  ;;  %v4154_v5 = vrot.slane %v4153_v14, 4  ;;  %v12242_v37 = vsel %vm402_vm0, %v4124_v34, -inf }
 0x20f   :  { %9425 = vmatmul.msk.bf16.gmra.mxu0 %vm16759_vm4, %v3043_v23  ;;  %v4160_v19 = vsel %vm3872_vm1, %v3518_v11, -inf  ;;  %v4167_v41 = vsel %vm3872_vm1, %v3519_v17, -inf  ;;  %v4174_v26 = vsel %vm3872_vm1, %v3520_v10, -inf  ;;  %v12246_v6 = vsel %vm402_vm0, %v4131_v3, -inf  ;;  %v12294_v10 = vpop.permute.xlu1 %1239 }
 0x210   :  { %v4161_v12 = vrot.slane %v4160_v19, 4  ;;  %v4168_v62 = vrot.slane %v4167_v41, 4  ;;  %v4155_v1 = vmax.f32 %v4153_v14, %v4154_v5  ;;  %v4175_v2 = vrot.slane %v4174_v26, 4 }
 0x211   :  { %1235 = vrot.lane.b32.xlu0 %v11830_v13, %s10653_s16  ;;  %v254_v58 = vand.u32 15, %v12200_v57  ;;  %v4151_v32 = vrot.slane %v12233_v0, 1  ;;  %v3228_v38 = vadd.f32 %v12212_v50, %v3227_v47  ;;  %v12254_v20 = vsel %vm402_vm0, %v4138_v49, -inf  ;;  %v1260_v49 = vpop.permute.xlu0 %1259 }
 0x212   :  { %v4162_v33 = vmax.f32 %v4160_v19, %v4161_v12  ;;  %v4169_v28 = vmax.f32 %v4167_v41, %v4168_v62  ;;  %v12257_v34 = vsel %vm402_vm0, %v4145_v21, -inf  ;;  %v4156_v22 = vrot.slane %v4155_v1, 2 }
 0x213   :  { %v4176_v52 = vmax.f32 %v4174_v26, %v4175_v2  ;;  %v3371_v23 = vmax.f32 %v3228_v38, 0.0  ;;  %v12261_v3 = vadd.s32 472, %v10741_v4  ;;  %vm12263_vm9 = vcmp.gt.s32.totalorder %v254_v58, 0 }
 0x214   :  { %v4163_v13 = vrot.slane %v4162_v33, 2  ;;  %v4170_v39 = vrot.slane %v4169_v28, 2  ;;  %v4157_v11 = vmax.f32 %v4155_v1, %v4156_v22  ;;  %v12268_v14 = vadd.s32 264, %v10741_v4 }
 0x215   :  { %16760 = vst [vmem:[#allocation63_spill] sm:$0xff] %v12261_v3  ;;  %v4177_v17 = vrot.slane %v4176_v52, 2  ;;  %v3521_v19 = vrot.slane %v3371_v23, 2  ;;  %v3522_v41 = vrot.slane %v3371_v23, 4  ;;  %v3523_v62 = vrot.slane %v3371_v23, 6 }
 0x216   :  { %16763 = vst [vmem:[#allocation64_spill] sm:$0xff] %v12268_v14  ;;  %v4164_v21 = vmax.f32 %v4162_v33, %v4163_v13  ;;  %v4171_v5 = vmax.f32 %v4169_v28, %v4170_v39  ;;  %v4158_v47 = vrot.slane %v4157_v11, 1  ;;  %v4181_v26 = vsel %vm3872_vm1, %v3371_v23, -inf }
 0x217   :  { %v4178_v12 = vmax.f32 %v4176_v52, %v4177_v17  ;;  %v4182_v38 = vrot.slane %v4181_v26, 4  ;;  %v4188_v58 = vsel %vm3872_vm1, %v3521_v19, -inf  ;;  %v4195_v40 = vsel %vm3872_vm1, %v3522_v41, -inf  ;;  %v575_v52 = vld [vmem:[#allocation2 + $0x167] sm:$0xff] }
 0x218   :  { %v4165_v2 = vrot.slane %v4164_v21, 1  ;;  %v4172_v1 = vrot.slane %v4171_v5, 1  ;;  %v4159_v16 = vmax.f32 %v4157_v11, %v4158_v47  ;;  %v4189_v53 = vrot.slane %v4188_v58, 4 }
 0x219   :  { %v4179_v22 = vrot.slane %v4178_v12, 1  ;;  %v4183_v28 = vmax.f32 %v4181_v26, %v4182_v38  ;;  %v4196_v13 = vrot.slane %v4195_v40, 4  ;;  %v4202_v23 = vsel %vm3872_vm1, %v3523_v62, -inf  ;;  %v910_v38 = vld [vmem:[#allocation2 + $0x1e1] sm:$0xff] }
 0x21a   :  { %v4166_v36 = vmax.f32 %v4164_v21, %v4165_v2  ;;  %v4173_v33 = vmax.f32 %v4171_v5, %v4172_v1  ;;  %v5714_v39 = vsel %vm402_vm0, %v4159_v16, -inf  ;;  %v4190_v17 = vmax.f32 %v4188_v58, %v4189_v53 }
 0x21b   :  { %v269_v61 = vand.u32 15, %v12261_v3  ;;  %v4180_v48 = vmax.f32 %v4178_v12, %v4179_v22  ;;  %v4184_v47 = vrot.slane %v4183_v28, 2  ;;  %v5715_v41 = vmax.f32 %v12220_v46, %v5714_v39  ;;  %v1518_v46 = vpop.permute.xlu0 %1517 }
 0x21c   :  { %v5717_v19 = vsel %vm402_vm0, %v4166_v36, -inf  ;;  %v5720_v11 = vsel %vm402_vm0, %v4173_v33, -inf  ;;  %v4191_v26 = vrot.slane %v4190_v17, 2  ;;  %v767_v53 = vsel %vm12263_vm9, %v575_v52, 0.0  ;;  %v10183_v33 = vpop.permute.xlu2 %10182 }
 0x21d   :  { %v5718_v21 = vmax.f32 %v12223_v18, %v5717_v19  ;;  %v5721_v5 = vmax.f32 %v12226_v51, %v5720_v11  ;;  %v4185_v2 = vmax.f32 %v4183_v28, %v4184_v47  ;;  %v4197_v62 = vmax.f32 %v4195_v40, %v4196_v13  ;;  %v3230_v18 = vpop.f32.mrf.mxu0  ;;  %v12292_v51 = vld [vmem:[%s16492_s0 + $0x1a8] sm:$0xff] }
 0x21e   :  { %v4203_v1 = vrot.slane %v4202_v23, 4  ;;  %v4152_v12 = vmax.f32 %v12233_v0, %v4151_v32  ;;  %v4192_v58 = vmax.f32 %v4190_v17, %v4191_v26  ;;  %vm12285_vm3 = vcmp.lt.s32.totalorder %v269_v61, 15  ;;  %456 = vst.msk [vmem:[#allocation2 + $0x1b0] sm:$0xff] %vm402_vm0, %v12292_v51 }
 0x21f   :  { %v6246_v36 = vsel %vm6225_vm5, %v5718_v21, %v5715_v41  ;;  %v5723_v40 = vsel %vm402_vm0, %v4180_v48, -inf  ;;  %v4186_v22 = vrot.slane %v4185_v2, 1  ;;  %v4198_v0 = vrot.slane %v4197_v62, 2 }
 0x220   :  { %v4204_v32 = vmax.f32 %v4202_v23, %v4203_v1  ;;  %v6247_v61 = vsel %vm6227_vm6, %v5721_v5, %v6246_v36  ;;  %v1663_v28 = vsel %vm402_vm0, %v767_v53, %v1260_v49  ;;  %v4193_v13 = vrot.slane %v4192_v58, 1  ;;  %v884_v23 = vld [vmem:[#allocation2 + $0x111] sm:$0xff] }
 0x221   :  { %v1102_v39 = vsel %vm12285_vm3, %v910_v38, 0.0  ;;  %v4187_v52 = vmax.f32 %v4185_v2, %v4186_v22  ;;  %v4199_v17 = vmax.f32 %v4197_v62, %v4198_v0  ;;  %v243_v48 = vand.u32 15, %v12268_v14  ;;  %v560_v38 = vld [vmem:[#allocation2 + $0xef] sm:$0xff] }
 0x222   :  { %v4205_v19 = vrot.slane %v4204_v32, 2  ;;  %1545 = vrot.lane.b32.xlu2 %v1102_v39, %s10654_s29  ;;  %v5724_v11 = vmax.f32 %v12242_v37, %v5723_v40  ;;  %v4194_v47 = vmax.f32 %v4192_v58, %v4193_v13  ;;  %v10185_v41 = vunpack.i.h.bf16 %v10183_v33  ;;  %v12342_v13 = vpop.permute.xlu1 %1497 }
 0x223   :  { %v10184_v21 = vunpack.i.l.bf16 %v10183_v33  ;;  %v4200_v5 = vrot.slane %v4199_v17, 1  ;;  %v5726_v49 = vsel %vm402_vm0, %v4187_v52, -inf  ;;  %vm820_vm4 = vcmp.lt.s32.totalorder %v243_v48, 15 }
 0x224   :  { %v4206_v26 = vmax.f32 %v4204_v32, %v4205_v19  ;;  %v6248_v53 = vsel %vm16592_vm7, %v5724_v11, %v6247_v61  ;;  %v5727_v2 = vmax.f32 %v12246_v6, %v5726_v49  ;;  %v5729_v62 = vsel %vm402_vm0, %v4194_v47, -inf }
 0x225   :  { %v1076_v1 = vsel %vm820_vm4, %v884_v23, 0.0  ;;  %v4201_v36 = vmax.f32 %v4199_v17, %v4200_v5  ;;  %v5730_v37 = vmax.f32 %v12254_v20, %v5729_v62  ;;  %v12314_v58 = vsel %vm1748_vm12, %v12161_v63, %v10185_v41  ;;  %v3232_v61 = vpop.f32.mrf.mxu0 }
 0x226   :  { %v4207_v16 = vrot.slane %v4206_v26, 1  ;;  %1493 = vrot.lane.b32.xlu0 %v1076_v1, %s10654_s29  ;;  %v6249_v40 = vsel %vm16591_vm8, %v5727_v2, %v6248_v53  ;;  %v12319_v22 = vsel %vm1748_vm12, %v12173_v44, %v10184_v21  ;;  %v12323_v6 = vsel %vm1683_vm11, %v1663_v28, %v11938_v8  ;;  %v12382_v2 = vpop.permute.xlu2 %1241 }
 0x227   :  { %v12327_v0 = vsel %vm1683_vm11, %v12193_v24, %v1518_v46  ;;  %v5732_v32 = vsel %vm402_vm0, %v4201_v36, -inf  ;;  %v6250_v63 = vsel %vm16571_vm10, %v5730_v37, %v6249_v40  ;;  %v1648_v33 = vsel %vm402_vm0, %v560_v38, %v11968_v27  ;;  %1793 = vst.msk [vmem:[#allocation3 + $0x170] sm:$0xff] %vm1748_vm12, %v12323_v6  ;;  %v1484_v46 = vpop.permute.xlu0 %1483 }
 0x228   :  { %v4208_v20 = vmax.f32 %v4206_v26, %v4207_v16  ;;  %1794 = vst.msk [vmem:[#allocation3 + $0x178] sm:$0xff] %vm1748_vm12, %v12327_v0  ;;  %v5733_v8 = vmax.f32 %v12257_v34, %v5732_v32  ;;  %v3231_v24 = vadd.f32 %v12212_v50, %v3230_v18  ;;  %v5734_v28 = vsel %vm402_vm0, %v4152_v12, -inf }
 0x229   :  { %v16766_v52 = vpack.i.bf16 %v11847_v30, %v11681_v54  ;;  %v16767_v27 = vsel %vm12178_vm14, %v12184_v43, 0.0  ;;  %v12361_v48 = vsel %vm1683_vm11, %v1648_v33, %v11879_v60  ;;  %v3233_v54 = vadd.f32 %v12212_v50, %v3232_v61 }
 0x22a   :  { %v5735_v39 = vsel %vm402_vm0, %v4208_v20, -inf  ;;  %v1647_v34 = vsel %vm402_vm0, %v16767_v27, %v11863_v15  ;;  %v6251_v17 = vsel %vm16570_vm15, %v5733_v8, %v6250_v63  ;;  %v3372_v12 = vmax.f32 %v3231_v24, 0.0  ;;  %1778 = vst.msk [vmem:[#allocation3 + $0xf8] sm:$0xff] %vm1748_vm12, %v12361_v48  ;;  %v12391_v32 = vpop.permute.xlu1 %1283  ;;  %v12404_v27 = vld [vmem:[%s16492_s0 + $0x1a0] sm:$0xff] }
 0x22b   :  { %10222 = vrot.lane.b32.xlu2 %v16766_v52, %s10655_s17  ;;  %v5736_v18 = vmax.f32 %v5734_v28, %v5735_v39  ;;  %v12357_v19 = vsel %vm1683_vm11, %v1647_v34, %v1484_v46  ;;  %v3373_v60 = vmax.f32 %v3233_v54, 0.0  ;;  %v12380_v5 = vadd.s32 368, %v10741_v4  ;;  %v577_v34 = vld [vmem:[#allocation2 + $0x177] sm:$0xff]  ;;  %455 = vst.msk [vmem:[#allocation2 + $0x1a8] sm:$0xff] %vm402_vm0, %v12404_v27 }
 0x22c   :  { %v3524_v29 = vrot.slane %v3372_v12, 2  ;;  %v3525_v43 = vrot.slane %v3372_v12, 4  ;;  %v3526_v23 = vrot.slane %v3372_v12, 6  ;;  %1777 = vst.msk [vmem:[#allocation3 + $0xf0] sm:$0xff] %vm1748_vm12, %v12357_v19  ;;  %v4209_v15 = vsel %vm3872_vm1, %v3372_v12, -inf }
 0x22d   :  { %v12365_v30 = vsel %vm16561_vm2, %v5736_v18, %v6251_v17  ;;  %v4210_v11 = vrot.slane %v4209_v15, 4  ;;  %v4237_v62 = vsel %vm3872_vm1, %v3373_v60, -inf  ;;  %v256_v1 = vand.u32 15, %v12380_v5 }
 0x22e   :  { %16768 = vst [vmem:[#allocation65_spill] sm:$0xff] %v12365_v30  ;;  %1281 = vrot.lane.b32.xlu0 %v12011_v25, %s10653_s16  ;;  %v4216_v47 = vsel %vm3872_vm1, %v3524_v29, -inf  ;;  %v4223_v41 = vsel %vm3872_vm1, %v3525_v43, -inf  ;;  %v4230_v21 = vsel %vm3872_vm1, %v3526_v23, -inf  ;;  %v3527_v38 = vrot.slane %v3373_v60, 2 }
 0x22f   :  { %6362 = vst.msk [vmem:[#allocation4 + $0x18] sm:$0xff] %vm402_vm0, %v12365_v30  ;;  %v4217_v26 = vrot.slane %v4216_v47, 4  ;;  %v4224_v49 = vrot.slane %v4223_v41, 4  ;;  %v4231_v53 = vrot.slane %v4230_v21, 4  ;;  %v4211_v25 = vmax.f32 %v4209_v15, %v4210_v11  ;;  %v12408_v54 = vpop.permute.xlu0 %10177 }
 0x230   :  { %v3528_v37 = vrot.slane %v3373_v60, 4  ;;  %v3529_v40 = vrot.slane %v3373_v60, 6  ;;  %v12389_v20 = vadd.s32 448, %v10741_v4  ;;  %v4238_v33 = vrot.slane %v4237_v62, 4  ;;  %v12414_v60 = vpop.permute.xlu2 %1267 }
 0x231   :  { %v4218_v36 = vmax.f32 %v4216_v47, %v4217_v26  ;;  %v4225_v16 = vmax.f32 %v4223_v41, %v4224_v49  ;;  %v4232_v63 = vmax.f32 %v4230_v21, %v4231_v53  ;;  %v4212_v8 = vrot.slane %v4211_v25, 2  ;;  %v587_v26 = vld [vmem:[#allocation2 + $0x1c7] sm:$0xff] }
 0x232   :  { %16769 = vst [vmem:[#allocation66_spill] sm:$0xff] %v12389_v20  ;;  %v317_v24 = vshra.s32 %v11186_v42, 4  ;;  %vm12394_vm14 = vcmp.gt.s32.totalorder %v256_v1, 0  ;;  %v4251_v39 = vsel %vm3872_vm1, %v3528_v37, -inf  ;;  %v4258_v52 = vsel %vm3872_vm1, %v3529_v40, -inf  ;;  %v10513_v1 = vld [vmem:[#allocation3 + $0xa0] sm:$0xff] }
 0x233   :  { %1277 = vrot.lane.b32.xlu2 %v12292_v51, %s10653_s16  ;;  %v4244_v51 = vsel %vm3872_vm1, %v3527_v38, -inf  ;;  %v4219_v61 = vrot.slane %v4218_v36, 2  ;;  %v4226_v28 = vrot.slane %v4225_v16, 2  ;;  %v266_v42 = vand.u32 15, %v12389_v20 }
 0x234   :  { %v4233_v18 = vrot.slane %v4232_v63, 2  ;;  %v4239_v17 = vmax.f32 %v4237_v62, %v4238_v33  ;;  %v316_v12 = vshra.s32 %v11765_v7, 4  ;;  %v4213_v29 = vmax.f32 %v4211_v25, %v4212_v8  ;;  %v1923_v33 = vld [vmem:[#allocation3 + $0x170] sm:$0xff] }
 0x235   :  { %v4245_v43 = vrot.slane %v4244_v51, 4  ;;  %vm1833_vm9 = vcmp.gt.s32.totalorder %v11775_v59, 0  ;;  %vm1834_vm3 = vcmp.gt.s32.totalorder %v11773_v56, 0  ;;  %v4252_v23 = vrot.slane %v4251_v39, 4  ;;  %v10512_v56 = vld [vmem:[#allocation3 + $0xa8] sm:$0xff] }
 0x236   :  { %v4259_v15 = vrot.slane %v4258_v52, 4  ;;  %v12416_v11 = vand.u32 15, %v317_v24  ;;  %v769_v7 = vsel %vm12394_vm14, %v577_v34, 0.0  ;;  %v4220_v47 = vmax.f32 %v4218_v36, %v4219_v61  ;;  %v1924_v36 = vld [vmem:[#allocation3 + $0x178] sm:$0xff] }
 0x237   :  { %v4227_v41 = vmax.f32 %v4225_v16, %v4226_v28  ;;  %vm12420_vm4 = vcmp.gt.s32.totalorder %v266_v42, 0  ;;  %v4234_v49 = vmax.f32 %v4232_v63, %v4233_v18  ;;  %v4240_v53 = vrot.slane %v4239_v17, 2  ;;  %v12428_v16 = vpop.permute.xlu1 %1525  ;;  %v578_v28 = vld [vmem:[#allocation2 + $0x17f] sm:$0xff]  ;;  %v3235_v18 = vpop.f32.mrf.mxu0 }
 0x238   :  { %16772 = vst [vmem:[#allocation67_spill] sm:$0xff] %v12416_v11  ;;  %v12424_v25 = vand.u32 15, %v316_v12  ;;  %v2090_v62 = vsel %vm1834_vm3, %v10512_v56, 0.0  ;;  %v2089_v38 = vsel %vm1833_vm9, %v10513_v1, 0.0  ;;  %v4214_v37 = vrot.slane %v4213_v29, 1  ;;  %v1520_v56 = vpop.permute.xlu0 %1519 }
 0x239   :  { %v4246_v40 = vmax.f32 %v4244_v51, %v4245_v43  ;;  %v4253_v8 = vmax.f32 %v4251_v39, %v4252_v23  ;;  %v4260_v24 = vmax.f32 %v4258_v52, %v4259_v15  ;;  %vm2176_vm2 = vcmp.lt.s32.totalorder %v12416_v11, 15  ;;  %v903_v51 = vld [vmem:[#allocation2 + $0x1a9] sm:$0xff] }
 0x23a   :  { %16775 = vst [vmem:[#allocation68_spill] sm:$0xff] %v12424_v25  ;;  %vm2175_vm14 = vcmp.lt.s32.totalorder %v12424_v25, 15  ;;  %v12434_v63 = vsel %vm402_vm0, %v769_v7, %v11891_v55  ;;  %v779_v59 = vsel %vm12420_vm4, %v587_v26, 0.0  ;;  %v4221_v46 = vrot.slane %v4220_v47, 1 }
 0x23b   :  { %v4228_v61 = vrot.slane %v4227_v41, 1  ;;  %v4235_v34 = vrot.slane %v4234_v49, 1  ;;  %v12438_v42 = vmax.f32 %v4239_v17, %v4240_v53  ;;  %v2371_v39 = vsel %vm2175_vm14, %v1923_v33, 0.0  ;;  %1531 = vrot.lane.b32.xlu2 %v903_v51, %s10654_s29  ;;  %v16776_v17 = vld [vmem:[#allocation56_spill] sm:$0xff] }
 0x23c   :  { %v2372_v52 = vsel %vm2176_vm2, %v1924_v36, 0.0  ;;  %v10175_v12 = vunpack.i.h.bf16 %v11989_v45  ;;  %v4215_v43 = vmax.f32 %v4213_v29, %v4214_v37  ;;  %v4247_v55 = vrot.slane %v4246_v40, 2 }
 0x23d   :  { %v10216_v23 = vpack.i.bf16 %v2372_v52, %v2371_v39  ;;  %v10174_v15 = vunpack.i.l.bf16 %v11989_v45  ;;  %v4254_v7 = vrot.slane %v4253_v8, 2  ;;  %v4261_v21 = vrot.slane %v4260_v24, 2  ;;  %v906_v39 = vld [vmem:[#allocation2 + $0x1c1] sm:$0xff]  ;;  %v12456_v52 = vpop.permute.xlu2 %1285 }
 0x23e   :  { %v12444_v26 = vadd.s32 440, %v10741_v4  ;;  %v1666_v53 = vsel %vm402_vm0, %v578_v28, %v16776_v17  ;;  %v12450_v1 = vsel %vm402_vm0, %v779_v59, %v12391_v32  ;;  %v4222_v33 = vmax.f32 %v4220_v47, %v4221_v46 }
 0x23f   :  { %10217 = vrot.lane.b32.xlu1 %v10216_v23, %s10656_s18  ;;  %v3236_v29 = vadd.f32 %v12212_v50, %v3235_v18  ;;  %v4229_v37 = vmax.f32 %v4227_v41, %v4228_v61  ;;  %v4236_v45 = vmax.f32 %v4234_v49, %v4235_v34  ;;  %v4242_v36 = vrot.slane %v12438_v42, 1 }
 0x240   :  { %v265_v51 = vand.u32 15, %v12444_v26  ;;  %v12459_v28 = vsel %vm402_vm0, %v4215_v43, -inf  ;;  %v12461_v17 = vmax.f32 %v4246_v40, %v4247_v55  ;;  %v10179_v32 = vunpack.i.l.bf16 %v12408_v54  ;;  %v12472_v43 = vpop.permute.xlu1 %10192 }
 0x241   :  { %v3374_v47 = vmax.f32 %v3236_v29, 0.0  ;;  %v12464_v59 = vmax.f32 %v4253_v8, %v4254_v7  ;;  %v12466_v46 = vmax.f32 %v4260_v24, %v4261_v21  ;;  %v10180_v41 = vunpack.i.h.bf16 %v12408_v54  ;;  %v12487_v29 = vld [vmem:[%s16492_s0 + $0x1f0] sm:$0xff] }
 0x242   :  { %vm842_vm2 = vcmp.lt.s32.totalorder %v265_v51, 15  ;;  %v12470_v49 = vsel %vm402_vm0, %v4222_v33, -inf  ;;  %v2925_v8 = vsel %vm1748_vm12, %v2089_v38, %v10174_v15  ;;  %v2926_v24 = vsel %vm1748_vm12, %v2090_v62, %v10175_v12  ;;  %v142_v33 = vld [vmem:[%s16492_s0 + $0x1e8] sm:$0xff]  ;;  %v3237_v15 = vpop.f32.mrf.mxu0  ;;  %465 = vst.msk [vmem:[#allocation2 + $0x1f8] sm:$0xff] %vm402_vm0, %v12487_v29 }
 0x243   :  { %v1098_v61 = vsel %vm842_vm2, %v906_v39, 0.0  ;;  %v3530_v34 = vrot.slane %v3374_v47, 2  ;;  %v3531_v18 = vrot.slane %v3374_v47, 4  ;;  %v3532_v40 = vrot.slane %v3374_v47, 6  ;;  %464 = vst.msk [vmem:[#allocation2 + $0x1f0] sm:$0xff] %vm402_vm0, %v142_v33 }
 0x244   :  { %1537 = vrot.lane.b32.xlu0 %v1098_v61, %s10654_s29  ;;  %v4265_v55 = vsel %vm3872_vm1, %v3374_v47, -inf  ;;  %v2990_v21 = vsel %vm2969_vm13, %v2925_v8, %v10179_v32  ;;  %v2991_v12 = vsel %vm2969_vm13, %v2926_v24, %v10180_v41  ;;  %v12493_v39 = vsel %vm402_vm0, %v4229_v37, -inf  ;;  %v12507_v37 = vpop.permute.xlu0 %1233 }
 0x245   :  { %v4266_v23 = vrot.slane %v4265_v55, 4  ;;  %v4272_v54 = vsel %vm3872_vm1, %v3530_v34, -inf  ;;  %v4279_v7 = vsel %vm3872_vm1, %v3531_v18, -inf  ;;  %v4286_v62 = vsel %vm3872_vm1, %v3532_v40, -inf  ;;  %v16777_v40 = vld [vmem:[#allocation50_spill] sm:$0xff] }
 0x246   :  { %v4273_v51 = vrot.slane %v4272_v54, 4  ;;  %v4280_v38 = vrot.slane %v4279_v7, 4  ;;  %v4287_v47 = vrot.slane %v4286_v62, 4  ;;  %v3044_v61 = vpack.c.bf16 %v2991_v12, %v2990_v21 }
 0x247   :  { %v4267_v32 = vmax.f32 %v4265_v55, %v4266_v23  ;;  %1275 = vrot.lane.b32.xlu1 %v12404_v27, %s10653_s16  ;;  %v12501_v41 = vsel %vm1683_vm11, %v12434_v63, %v1520_v56  ;;  %v12505_v8 = vsel %vm1683_vm11, %v1666_v53, %v16777_v40  ;;  %vm16778_vm9 = vcmask 293888  }
 0x248   :  { %v4274_v34 = vmax.f32 %v4272_v54, %v4273_v51  ;;  %v4281_v18 = vmax.f32 %v4279_v7, %v4280_v38  ;;  %v4288_v24 = vmax.f32 %v4286_v62, %v4287_v47  ;;  %9426 = vmatmul.msk.bf16.gmra.mxu0 %vm16778_vm9, %v3044_v61  ;;  %1795 = vst.msk [vmem:[#allocation3 + $0x180] sm:$0xff] %vm1748_vm12, %v12501_v41  ;;  %v12516_v63 = vsel %vm402_vm0, %v4236_v45, -inf  ;;  %v1540_v7 = vpop.permute.xlu2 %1539 }
 0x249   :  { %v4268_v55 = vrot.slane %v4267_v32, 2  ;;  %v3238_v23 = vadd.f32 %v12212_v50, %v3237_v15  ;;  %v12519_v56 = vmax.f32 %v12438_v42, %v4242_v36  ;;  %1796 = vst.msk [vmem:[#allocation3 + $0x188] sm:$0xff] %vm1748_vm12, %v12505_v8  ;;  %v12525_v62 = vsel %vm1683_vm11, %v12450_v1, %v1540_v7  ;;  %v16780_v42 = vld [vmem:[#allocation58_spill] sm:$0xff] }
 0x24a   :  { %v4275_v53 = vrot.slane %v4274_v34, 2  ;;  %v4282_v54 = vrot.slane %v4281_v18, 2  ;;  %v4289_v51 = vrot.slane %v4288_v24, 2  ;;  %16779 = vst [vmem:[#allocation56_spill] sm:$0xff] %v12525_v62  ;;  %v4249_v12 = vrot.slane %v12461_v17, 1 }
 0x24b   :  { %v4269_v21 = vmax.f32 %v4267_v32, %v4268_v55  ;;  %v3375_v38 = vmax.f32 %v3238_v23, 0.0  ;;  %v12531_v36 = vadd.s32 488, %v10741_v4  ;;  %1805 = vst.msk [vmem:[#allocation3 + $0x1d0] sm:$0xff] %vm1748_vm12, %v12525_v62  ;;  %v12535_v55 = vpop.permute.xlu1 %1237  ;;  %v4263_v3 = vrot.slane %v12466_v46, 1 }
 0x24c   :  { %v4276_v45 = vmax.f32 %v4274_v34, %v4275_v53  ;;  %v4283_v15 = vmax.f32 %v4281_v18, %v4282_v54  ;;  %1287 = vrot.lane.b32.xlu0 %v16780_v42, %s10653_s16  ;;  %v4290_v47 = vmax.f32 %v4288_v24, %v4289_v51  ;;  %v4256_v51 = vrot.slane %v12464_v59, 1  ;;  %v12546_v14 = vpop.permute.xlu0 %1247 }
 0x24d   :  { %16781 = vst [vmem:[#allocation50_spill] sm:$0xff] %v12531_v36  ;;  %v4270_v32 = vrot.slane %v4269_v21, 1  ;;  %v3533_v61 = vrot.slane %v3375_v38, 2  ;;  %v3534_v40 = vrot.slane %v3375_v38, 4  ;;  %v3535_v7 = vrot.slane %v3375_v38, 6 }
 0x24e   :  { %v4277_v1 = vrot.slane %v4276_v45, 1  ;;  %v4284_v23 = vrot.slane %v4283_v15, 1  ;;  %v4293_v34 = vsel %vm3872_vm1, %v3375_v38, -inf  ;;  %v4291_v53 = vrot.slane %v4290_v47, 1 }
 0x24f   :  { %v4271_v18 = vmax.f32 %v4269_v21, %v4270_v32  ;;  %v4294_v54 = vrot.slane %v4293_v34, 4  ;;  %v4300_v42 = vsel %vm3872_vm1, %v3533_v61, -inf  ;;  %1293 = vrot.lane.b32.xlu1 %v142_v33, %s10653_s16  ;;  %v4307_v24 = vsel %vm3872_vm1, %v3534_v40, -inf }
 0x250   :  { %v4278_v27 = vmax.f32 %v4276_v45, %v4277_v1  ;;  %v4285_v44 = vmax.f32 %v4283_v15, %v4284_v23  ;;  %v4301_v30 = vrot.slane %v4300_v42, 4  ;;  %v4308_v25 = vrot.slane %v4307_v24, 4 }
 0x251   :  { %v4295_v11 = vmax.f32 %v4293_v34, %v4294_v54  ;;  %v5738_v38 = vsel %vm402_vm0, %v4271_v18, -inf  ;;  %v271_v61 = vand.u32 15, %v12531_v36  ;;  %v12551_v40 = vadd.s32 408, %v10741_v4  ;;  %v912_v54 = vld [vmem:[#allocation2 + $0x1f1] sm:$0xff] }
 0x252   :  { %v5741_v21 = vsel %vm402_vm0, %v4278_v27, -inf  ;;  %v4302_v32 = vmax.f32 %v4300_v42, %v4301_v30  ;;  %v5744_v45 = vsel %vm402_vm0, %v4285_v44, -inf  ;;  %v4292_v1 = vmax.f32 %v4290_v47, %v4291_v53  ;;  %v911_v27 = vld [vmem:[#allocation2 + $0x1e9] sm:$0xff] }
 0x253   :  { %v5742_v33 = vmax.f32 %v12470_v49, %v5741_v21  ;;  %v4296_v15 = vrot.slane %v4295_v11, 2  ;;  %16782 = vst [vmem:[#allocation58_spill] sm:$0xff] %v12551_v40  ;;  %v4309_v34 = vmax.f32 %v4307_v24, %v4308_v25  ;;  %v4314_v18 = vsel %vm3872_vm1, %v3535_v7, -inf  ;;  %v10203_v24 = vpop.permute.xlu1 %10202 }
 0x254   :  { %v4303_v23 = vrot.slane %v4302_v32, 2  ;;  %v4250_v30 = vmax.f32 %v12461_v17, %v4249_v12  ;;  %v5739_v42 = vmax.f32 %v12459_v28, %v5738_v38  ;;  %v4315_v20 = vrot.slane %v4314_v18, 4  ;;  %v902_v28 = vld [vmem:[#allocation2 + $0x1a1] sm:$0xff] }
 0x255   :  { %v4297_v36 = vmax.f32 %v4295_v11, %v4296_v15  ;;  %v5745_v49 = vmax.f32 %v12493_v39, %v5744_v45  ;;  %v4310_v21 = vrot.slane %v4309_v34, 2  ;;  %vm848_vm3 = vcmp.lt.s32.totalorder %v271_v61, 15 }
 0x256   :  { %v4304_v44 = vmax.f32 %v4302_v32, %v4303_v23  ;;  %v6253_v62 = vsel %vm6225_vm5, %v5742_v33, %v5739_v42  ;;  %v4316_v53 = vmax.f32 %v4314_v18, %v4315_v20  ;;  %v1104_v25 = vsel %vm848_vm3, %v912_v54, 0.0  ;;  %v12568_v18 = vpop.permute.xlu2 %10197 }
 0x257   :  { %v4298_v47 = vrot.slane %v4297_v36, 1  ;;  %1547 = vrot.lane.b32.xlu1 %v911_v27, %s10654_s29  ;;  %v5747_v7 = vsel %vm402_vm0, %v4292_v1, -inf  ;;  %v4311_v12 = vmax.f32 %v4309_v34, %v4310_v21  ;;  %1549 = vrot.lane.b32.xlu2 %v1104_v25, %s10654_s29  ;;  %v261_v11 = vand.u32 15, %v12551_v40 }
 0x258   :  { %v4305_v17 = vrot.slane %v4304_v44, 1  ;;  %v4257_v39 = vmax.f32 %v12464_v59, %v4256_v51  ;;  %v5749_v38 = vsel %vm402_vm0, %v12519_v56, -inf  ;;  %v4317_v20 = vrot.slane %v4316_v53, 2 }
 0x259   :  { %v4299_v32 = vmax.f32 %v4297_v36, %v4298_v47  ;;  %v6254_v61 = vsel %vm6227_vm6, %v5745_v49, %v6253_v62  ;;  %v4312_v45 = vrot.slane %v4311_v12, 1  ;;  %vm838_vm4 = vcmp.lt.s32.totalorder %v261_v11, 15  ;;  %v12573_v62 = vpop.permute.xlu0 %1489 }
 0x25a   :  { %v4306_v33 = vmax.f32 %v4304_v44, %v4305_v17  ;;  %v5748_v15 = vmax.f32 %v12516_v63, %v5747_v7  ;;  %v4318_v1 = vmax.f32 %v4316_v53, %v4317_v20  ;;  %v1094_v34 = vsel %vm838_vm4, %v902_v28, 0.0 }
 0x25b   :  { %v5750_v23 = vsel %vm402_vm0, %v4299_v32, -inf  ;;  %v5752_v59 = vsel %vm402_vm0, %v4250_v30, -inf  ;;  %v4313_v51 = vmax.f32 %v4311_v12, %v4312_v45  ;;  %1529 = vrot.lane.b32.xlu0 %v1094_v34, %s10654_s29  ;;  %v4264_v36 = vmax.f32 %v12466_v46, %v4263_v3  ;;  %v10208_v46 = vpop.permute.xlu1 %10207  ;;  %v16783_v32 = vld [vmem:[#allocation45_spill] sm:$0xff] }
 0x25c   :  { %v5751_v54 = vmax.f32 %v5749_v38, %v5750_v23  ;;  %v5753_v56 = vsel %vm402_vm0, %v4306_v33, -inf  ;;  %v6255_v63 = vsel %vm16592_vm7, %v5748_v15, %v6254_v61  ;;  %v4319_v27 = vrot.slane %v4318_v1, 1  ;;  %v16784_v61 = vld [vmem:[#allocation46_spill] sm:$0xff]  ;;  %v16787_v15 = vld [vmem:[#allocation43_spill] sm:$0xff] }
 0x25d   :  { %v5754_v42 = vmax.f32 %v5752_v59, %v5753_v56  ;;  %v10241_v49 = vpack.i.bf16 %v12361_v48, %v12357_v19  ;;  %v5755_v44 = vsel %vm402_vm0, %v4257_v39, -inf  ;;  %v5756_v30 = vsel %vm402_vm0, %v4313_v51, -inf  ;;  %v16790_v59 = vld [vmem:[#allocation44_spill] sm:$0xff] }
 0x25e   :  { %v6256_v21 = vsel %vm16591_vm8, %v5751_v54, %v6255_v63  ;;  %v4320_v47 = vmax.f32 %v4318_v1, %v4319_v27  ;;  %v5757_v53 = vmax.f32 %v5755_v44, %v5756_v30  ;;  %v180_v7 = vadd.s32 272, %v10741_v4  ;;  %v12608_v54 = vpop.permute.xlu2 %1491  ;;  %v16791_v56 = vld [vmem:[#allocation40_spill] sm:$0xff]  ;;  %v12617_v27 = vld [vmem:[%s16492_s0 + $0x1f8] sm:$0xff] }
 0x25f   :  { %v6257_v25 = vsel %vm16571_vm10, %v5754_v42, %v6256_v21  ;;  %v10204_v3 = vunpack.i.l.bf16 %v10203_v24  ;;  %10242 = vrot.lane.b32.xlu2 %v10241_v49, %s10655_s17  ;;  %v5758_v17 = vsel %vm402_vm0, %v4264_v36, -inf  ;;  %v10205_v12 = vunpack.i.h.bf16 %v10203_v24  ;;  %v16788_v24 = vld [vmem:[#allocation48_spill] sm:$0xff]  ;;  %v1925_v49 = vld [vmem:[#allocation3 + $0x180] sm:$0xff]  ;;  %466 = vst.msk [vmem:[#allocation2 + $0x200] sm:$0xff] %vm402_vm0, %v12617_v27 }
 0x260   :  { %v5759_v19 = vsel %vm402_vm0, %v4320_v47, -inf  ;;  %v6258_v48 = vsel %vm16570_vm15, %v5757_v53, %v6257_v25  ;;  %v318_v28 = vshra.s32 %v12200_v57, 4  ;;  %v10210_v39 = vunpack.i.h.bf16 %v10208_v46  ;;  %v1926_v47 = vld [vmem:[#allocation3 + $0x188] sm:$0xff]  ;;  %v3240_v25 = vpop.f32.mrf.mxu0 }
 0x261   :  { %v5760_v11 = vmax.f32 %v5758_v17, %v5759_v19  ;;  %v10209_v38 = vunpack.i.l.bf16 %v10208_v46  ;;  %v319_v20 = vshra.s32 %v16783_v32, 4  ;;  %v2929_v33 = vsel %vm1748_vm12, %v16784_v61, %v10204_v3  ;;  %v12599_v23 = vpop.permute.xlu0 %1503  ;;  %v16798_v61 = vld [vmem:[#allocation36_spill] sm:$0xff] }
 0x262   :  { %vm16785_vm14 = vcmask 1047559   ;;  %v16789_v1 = vpack.i.bf16 %v16787_v15, %v16788_v24  ;;  %v308_v34 = vshra.s32 %v180_v7, 4  ;;  %v2930_v57 = vsel %vm1748_vm12, %v16790_v59, %v10205_v12  ;;  %v16796_v12 = vld [vmem:[#allocation37_spill] sm:$0xff]  ;;  %v1915_v15 = vld [vmem:[#allocation3 + $0x130] sm:$0xff] }
 0x263   :  { %v12593_v45 = vsel %vm16785_vm14, %v5760_v11, %v6258_v48  ;;  %v12606_v51 = vsel %vm2969_vm13, %v2929_v33, %v10209_v38  ;;  %v309_v36 = vshra.s32 %v16791_v56, 4  ;;  %v12612_v63 = vsel %vm2969_vm13, %v2930_v57, %v10210_v39  ;;  %v16797_v48 = vld [vmem:[#allocation42_spill] sm:$0xff] }
 0x264   :  { %16786 = vst [vmem:[#allocation45_spill] sm:$0xff] %v12593_v45  ;;  %10212 = vrot.lane.b32.xlu0 %v16789_v1, %s10655_s17  ;;  %v12619_v42 = vand.u32 15, %v318_v28  ;;  %v12623_v44 = vand.u32 15, %v319_v20  ;;  %v12626_v30 = vadd.s32 304, %v10741_v4  ;;  %v12630_v53 = vand.u32 15, %v308_v34 }
 0x265   :  { %6363 = vst.msk [vmem:[#allocation4 + $0x20] sm:$0xff] %vm402_vm0, %v12593_v45  ;;  %v12633_v3 = vand.u32 15, %v309_v36  ;;  %v301_v19 = vshra.s32 %v16796_v12, 4  ;;  %v300_v11 = vshra.s32 %v16797_v48, 4  ;;  %v244_v28 = vand.u32 15, %v180_v7  ;;  %v569_v7 = vld [vmem:[#allocation2 + $0x137] sm:$0xff] }
 0x266   :  { %16792 = vst [vmem:[#allocation46_spill] sm:$0xff] %v12619_v42  ;;  %vm2177_vm2 = vcmp.lt.s32.totalorder %v12619_v42, 15  ;;  %v248_v46 = vand.u32 15, %v12626_v30  ;;  %vm2178_vm9 = vcmp.lt.s32.totalorder %v12623_v44, 15  ;;  %v3241_v38 = vadd.f32 %v12212_v50, %v3240_v25  ;;  %v1916_v50 = vld [vmem:[#allocation3 + $0x138] sm:$0xff]  ;;  %v562_v36 = vld [vmem:[#allocation2 + $0xff] sm:$0xff] }
 0x267   :  { %16793 = vst [vmem:[#allocation43_spill] sm:$0xff] %v12623_v44  ;;  %v2373_v17 = vsel %vm2177_vm2, %v1925_v49, 0.0  ;;  %v2374_v39 = vsel %vm2178_vm9, %v1926_v47, 0.0  ;;  %v303_v33 = vshra.s32 %v16798_v61, 4  ;;  %vm2167_vm3 = vcmp.lt.s32.totalorder %v12630_v53, 15  ;;  %v1280_v49 = vpop.permute.xlu2 %1279  ;;  %v16804_v47 = vld [vmem:[#allocation53_spill] sm:$0xff] }
 0x268   :  { %16794 = vst [vmem:[#allocation48_spill] sm:$0xff] %v12630_v53  ;;  %v10236_v32 = vpack.i.bf16 %v2374_v39, %v2373_v17  ;;  %v302_v24 = vshra.s32 %v12143_v35, 4  ;;  %v12646_v1 = vadd.s32 384, %v10741_v4  ;;  %vm12648_vm4 = vcmp.gt.s32.totalorder %v248_v46, 0  ;;  %v565_v35 = vld [vmem:[#allocation2 + $0x117] sm:$0xff]  ;;  %v1907_v12 = vld [vmem:[#allocation3 + $0xf0] sm:$0xff]  ;;  %v3242_v21 = vpop.f32.mrf.mxu0 }
 0x269   :  { %16795 = vst [vmem:[#allocation44_spill] sm:$0xff] %v12633_v3  ;;  %v12640_v20 = vpop.permute.xlu0 %10187  ;;  %vm2168_vm14 = vcmp.lt.s32.totalorder %v12633_v3, 15  ;;  %v12654_v59 = vand.u32 15, %v301_v19  ;;  %v12656_v57 = vand.u32 15, %v300_v11  ;;  %vm12658_vm2 = vcmp.gt.s32.totalorder %v244_v28, 0  ;;  %v12666_v19 = vld [vmem:[#allocation3 + $0xf8] sm:$0xff] }
 0x26a   :  { %10237 = vrot.lane.b32.xlu1 %v10236_v32, %s10656_s18  ;;  %vm1854_vm9 = vcmp.gt.s32.totalorder %v16804_v47, 0  ;;  %v258_v25 = vand.u32 15, %v12646_v1  ;;  %v3376_v46 = vmax.f32 %v3241_v38, 0.0  ;;  %v2363_v17 = vsel %vm2167_vm3, %v1915_v15, 0.0  ;;  %v12668_v48 = vld [vmem:[#allocation3 + $0x148] sm:$0xff] }
 0x26b   :  { %16801 = vst [vmem:[#allocation40_spill] sm:$0xff] %v12654_v59  ;;  %v761_v11 = vsel %vm12648_vm4, %v569_v7, 0.0  ;;  %v2364_v28 = vsel %vm2168_vm14, %v1916_v50, 0.0  ;;  %vm2159_vm15 = vcmp.lt.s32.totalorder %v12656_v57, 15  ;;  %vm2160_vm10 = vcmp.lt.s32.totalorder %v12654_v59, 15 }
 0x26c   :  { %v12674_v39 = vand.u32 15, %v303_v33  ;;  %v12676_v32 = vand.u32 15, %v302_v24  ;;  %v1650_v38 = vsel %vm402_vm0, %v562_v36, %v12507_v37  ;;  %v10256_v61 = vpack.i.bf16 %v2364_v28, %v2363_v17  ;;  %v12700_v36 = vld [vmem:[#allocation2 + $0x187] sm:$0xff] }
 0x26d   :  { %v757_v15 = vsel %vm12658_vm2, %v565_v35, 0.0  ;;  %v2355_v45 = vsel %vm2159_vm15, %v1907_v12, 0.0  ;;  %v2356_v34 = vsel %vm2160_vm10, %v12666_v19, 0.0  ;;  %v12685_v7 = vsel %vm1683_vm11, %v1650_v38, %v12573_v62  ;;  %v566_v35 = vld [vmem:[#allocation2 + $0x11f] sm:$0xff] }
 0x26e   :  { %16805 = vst [vmem:[#allocation37_spill] sm:$0xff] %v12674_v39  ;;  %v2110_v33 = vsel %vm1854_vm9, %v12668_v48, 0.0  ;;  %v10195_v24 = vunpack.i.h.bf16 %v12472_v43  ;;  %v1657_v37 = vsel %vm402_vm0, %v761_v11, %v12546_v14  ;;  %10257 = vrot.lane.b32.xlu2 %v10256_v61, %s10656_s18  ;;  %v10226_v50 = vpack.i.bf16 %v2356_v34, %v2355_v45  ;;  %v16809_v45 = vld [vmem:[#allocation54_spill] sm:$0xff] }
 0x26f   :  { %16806 = vst [vmem:[#allocation42_spill] sm:$0xff] %v12676_v32  ;;  %vm12696_vm10 = vcmp.gt.s32.totalorder %v258_v25, 0  ;;  %v3536_v47 = vrot.slane %v3376_v46, 2  ;;  %v12703_v17 = vadd.s32 432, %v10741_v4  ;;  %v12707_v14 = vsel %vm1683_vm11, %v1657_v37, %v12599_v23  ;;  %v12715_v25 = vld [vmem:[%s16494_s2] ss:$0 sm:$0xff]  ;;  %v1536_v3 = vpop.permute.xlu2 %1535 }
 0x270   :  { %1780 = vst.msk [vmem:[#allocation3 + $0x108] sm:$0xff] %vm1748_vm12, %v12685_v7  ;;  %vm1853_vm15 = vcmp.gt.s32.totalorder %v16809_v45, 0  ;;  %v1653_v12 = vsel %vm402_vm0, %v757_v15, %v12294_v10  ;;  %v3537_v11 = vrot.slane %v3376_v46, 4  ;;  %v3243_v28 = vadd.f32 %v12715_v25, %v3242_v21  ;;  %10227 = vrot.lane.b32.xlu0 %v10226_v50, %s10656_s18  ;;  %v585_v37 = vld [vmem:[#allocation2 + $0x1b7] sm:$0xff] }
 0x271   :  { %v1496_v56 = vpop.permute.xlu0 %1495  ;;  %v10194_v38 = vunpack.i.l.bf16 %v12472_v43  ;;  %v3538_v61 = vrot.slane %v3376_v46, 6  ;;  %v4321_v23 = vsel %vm3872_vm1, %v3376_v46, -inf  ;;  %v264_v34 = vand.u32 15, %v12703_v17  ;;  %1787 = vst.msk [vmem:[#allocation3 + $0x140] sm:$0xff] %vm1748_vm12, %v12707_v14  ;;  %v1909_v46 = vld [vmem:[#allocation3 + $0x100] sm:$0xff] }
 0x272   :  { %v2946_v10 = vsel %vm1748_vm12, %v2110_v33, %v10195_v24  ;;  %v1654_v15 = vsel %vm402_vm0, %v566_v35, %v12382_v2  ;;  %v771_v21 = vsel %vm12696_vm10, %v12700_v36, 0.0  ;;  %v10200_v43 = vunpack.i.h.bf16 %v12568_v18 }
 0x273   :  { %v4328_v50 = vsel %vm3872_vm1, %v3536_v47, -inf  ;;  %vm521_vm3 = vcmp.gt.s32.totalorder %v264_v34, 0  ;;  %vm2161_vm4 = vcmp.lt.s32.totalorder %v12676_v32, 15  ;;  %vm2162_vm14 = vcmp.lt.s32.totalorder %v12674_v39, 15 }
 0x274   :  { %v4322_v53 = vrot.slane %v4321_v23, 4  ;;  %v4335_v33 = vsel %vm3872_vm1, %v3537_v11, -inf  ;;  %v3377_v24 = vmax.f32 %v3243_v28, 0.0  ;;  %v777_v2 = vsel %vm521_vm3, %v585_v37, 0.0 }
 0x275   :  { %v4342_v35 = vsel %vm3872_vm1, %v3538_v61, -inf  ;;  %v1673_v62 = vsel %vm402_vm0, %v777_v2, %v1280_v49  ;;  %v12738_v40 = vadd.s32 424, %v10741_v4  ;;  %v10190_v47 = vunpack.i.h.bf16 %v12640_v20 }
 0x276   :  { %v4329_v34 = vrot.slane %v4328_v50, 4  ;;  %v10199_v44 = vunpack.i.l.bf16 %v12568_v18  ;;  %v2357_v42 = vsel %vm2161_vm4, %v1909_v46, 0.0  ;;  %v4336_v59 = vrot.slane %v4335_v33, 4 }
 0x277   :  { %v1910_v36 = vld [vmem:[#allocation3 + $0x108] sm:$0xff]  ;;  %16810 = vst [vmem:[#allocation36_spill] sm:$0xff] %v12738_v40  ;;  %v263_v28 = vand.u32 15, %v12738_v40  ;;  %v12744_v61 = vsel %vm1683_vm11, %v1673_v62, %v1536_v3  ;;  %v4343_v49 = vrot.slane %v4342_v35, 4  ;;  %v3539_v37 = vrot.slane %v3377_v24, 2 }
 0x278   :  { %v2358_v39 = vsel %vm2162_vm14, %v1910_v36, 0.0  ;;  %1291 = vrot.lane.b32.xlu0 %v12167_v31, %s10653_s16  ;;  %1803 = vst.msk [vmem:[#allocation3 + $0x1c0] sm:$0xff] %vm1748_vm12, %v12744_v61  ;;  %v10189_v18 = vunpack.i.l.bf16 %v12640_v20  ;;  %v2993_v46 = vsel %vm2969_vm13, %v12314_v58, %v10190_v47  ;;  %v12753_v2 = vld [vmem:[#allocation3 + $0x140] sm:$0xff]  ;;  %v3011_v31 = vsel %vm2969_vm13, %v2946_v10, %v10200_v43 }
 0x279   :  { %v1270_v32 = vpop.permute.xlu0 %1269  ;;  %v10251_v11 = vpack.i.bf16 %v2358_v39, %v2357_v42  ;;  %v580_v42 = vld [vmem:[#allocation2 + $0x18f] sm:$0xff]  ;;  %v3540_v39 = vrot.slane %v3377_v24, 4  ;;  %v2109_v3 = vsel %vm1853_vm15, %v12753_v2, 0.0  ;;  %v12761_v62 = vsel %vm1683_vm11, %v1653_v12, %v1496_v56 }
 0x27a   :  { %vm12763_vm2 = vcmp.lt.s32.totalorder %v263_v28, 15  ;;  %v904_v58 = vld [vmem:[#allocation2 + $0x1b1] sm:$0xff]  ;;  %v2992_v36 = vsel %vm2969_vm13, %v12319_v22, %v10189_v18  ;;  %v2945_v47 = vsel %vm1748_vm12, %v2109_v3, %v10194_v38  ;;  %1783 = vst.msk [vmem:[#allocation3 + $0x120] sm:$0xff] %vm1748_vm12, %v12761_v62  ;;  %v1668_v22 = vsel %vm402_vm0, %v580_v42, %v1270_v32  ;;  %v12790_v18 = vpop.permute.xlu2 %1273 }
 0x27b   :  { %10252 = vrot.lane.b32.xlu1 %v10251_v11, %s10656_s18  ;;  %v12772_v11 = vsel %vm1683_vm11, %v1654_v15, %v12342_v13  ;;  %v3045_v45 = vpack.c.bf16 %v2993_v46, %v2992_v36  ;;  %v3010_v56 = vsel %vm2969_vm13, %v2945_v47, %v10199_v44  ;;  %v3541_v10 = vrot.slane %v3377_v24, 6  ;;  %v16816_v3 = vld [vmem:[#allocation49_spill] sm:$0xff] }
 0x27c   :  { %1784 = vst.msk [vmem:[#allocation3 + $0x128] sm:$0xff] %vm1748_vm12, %v12772_v11  ;;  %v4349_v38 = vsel %vm3872_vm1, %v3377_v24, -inf  ;;  %v3054_v43 = vpack.c.bf16 %v3011_v31, %v3010_v56  ;;  %v12785_v13 = vsel %vm1683_vm11, %v1668_v22, %v12428_v16  ;;  %v4323_v15 = vmax.f32 %v4321_v23, %v4322_v53  ;;  %v16817_v56 = vld [vmem:[#allocation52_spill] sm:$0xff] }
 0x27d   :  { %v4330_v28 = vmax.f32 %v4328_v50, %v4329_v34  ;;  %v1096_v44 = vsel %vm12763_vm2, %v904_v58, 0.0  ;;  %vm16813_vm9 = vcmask 293888   ;;  %1798 = vst.msk [vmem:[#allocation3 + $0x198] sm:$0xff] %vm1748_vm12, %v12785_v13  ;;  %v1667_v32 = vsel %vm402_vm0, %v771_v21, %v12414_v60  ;;  %v16815_v34 = vld [vmem:[#allocation38_spill] sm:$0xff] }
 0x27e   :  { %9427 = vmatmul.msk.bf16.gmra.mxu0 %vm16813_vm9, %v3045_v45  ;;  %v4337_v24 = vmax.f32 %v4335_v33, %v4336_v59  ;;  %v4344_v46 = vmax.f32 %v4342_v35, %v4343_v49  ;;  %vm16814_vm10 = vmmov %vm16813_vm9  ;;  %v4350_v53 = vrot.slane %v4349_v38, 4  ;;  %v4356_v23 = vsel %vm3872_vm1, %v3539_v37, -inf  ;;  %v588_v21 = vld [vmem:[#allocation2 + $0x1cf] sm:$0xff] }
 0x27f   :  { %9436 = vmatmul.msk.bf16.vlgmr.msra.gmra.mxu2 %vm16814_vm10, %v3054_v43  ;;  %v321_v42 = vshra.s32 %v16815_v34, 4  ;;  %v305_v31 = vshra.s32 %v16816_v3, 4  ;;  %v4363_v20 = vsel %vm3872_vm1, %v3540_v39, -inf  ;;  %v4370_v58 = vsel %vm3872_vm1, %v3541_v10, -inf  ;;  %vm16827_vm4 = vmmov %vm16813_vm9 }
 0x280   :  { %1533 = vrot.lane.b32.xlu0 %v1096_v44, %s10654_s29  ;;  %v4324_v60 = vrot.slane %v4323_v15, 2  ;;  %v4331_v59 = vrot.slane %v4330_v28, 2  ;;  %v4338_v33 = vrot.slane %v4337_v24, 2  ;;  %v4345_v35 = vrot.slane %v4344_v46, 2 }
 0x281   :  { %v1524_v16 = vpop.permute.xlu0 %1523  ;;  %v4357_v49 = vrot.slane %v4356_v23, 4  ;;  %v4351_v37 = vmax.f32 %v4349_v38, %v4350_v53  ;;  %v4364_v36 = vrot.slane %v4363_v20, 4  ;;  %v4371_v47 = vrot.slane %v4370_v58, 4 }
 0x282   :  { %v12799_v50 = vsel %vm1683_vm11, %v1667_v32, %v1524_v16  ;;  %v12810_v39 = vand.u32 15, %v321_v42  ;;  %v12812_v45 = vand.u32 15, %v305_v31  ;;  %v310_v22 = vshra.s32 %v16817_v56, 4  ;;  %v12822_v56 = vpop.permute.xlu2 %1527 }
 0x283   :  { %1797 = vst.msk [vmem:[#allocation3 + $0x190] sm:$0xff] %vm1748_vm12, %v12799_v50  ;;  %1297 = vrot.lane.b32.xlu1 %v12617_v27, %s10653_s16  ;;  %v329_v10 = vshra.s32 %v12444_v26, 4  ;;  %v1676_v43 = vsel %vm402_vm0, %v588_v21, %v12456_v52  ;;  %v4325_v44 = vmax.f32 %v4323_v15, %v4324_v60  ;;  %v4332_v27 = vmax.f32 %v4330_v28, %v4331_v59 }
 0x284   :  { %v328_v32 = vshra.s32 %v12703_v17, 4  ;;  %v4339_v16 = vmax.f32 %v4337_v24, %v4338_v33  ;;  %v4346_v34 = vmax.f32 %v4344_v46, %v4345_v35  ;;  %v4358_v38 = vmax.f32 %v4356_v23, %v4357_v49  ;;  %v12837_v24 = vpop.permute.xlu1 %1271 }
 0x285   :  { %v12820_v42 = vadd.s32 256, %v10741_v4  ;;  %v4352_v3 = vrot.slane %v4351_v37, 2  ;;  %v4365_v31 = vmax.f32 %v4363_v20, %v4364_v36  ;;  %v4372_v12 = vmax.f32 %v4370_v58, %v4371_v47 }
 0x286   :  { %v320_v52 = vshra.s32 %v12380_v5, 4  ;;  %v12828_v15 = vand.u32 15, %v310_v22  ;;  %v304_v17 = vshra.s32 %v12056_v9, 4  ;;  %v16818_v28 = vpack.i.bf16 %v12327_v0, %v12323_v6  ;;  %v563_v6 = vld [vmem:[#allocation2 + $0x107] sm:$0xff]  ;;  %v564_v0 = vld [vmem:[#allocation2 + $0x10f] sm:$0xff] }
 0x287   :  { %v242_v46 = vand.u32 15, %v12820_v42  ;;  %v12840_v23 = vand.u32 15, %v329_v10  ;;  %v4326_v20 = vrot.slane %v4325_v44, 1  ;;  %v4333_v5 = vrot.slane %v4332_v27, 1 }
 0x288   :  { %10232 = vrot.lane.b32.xlu0 %v16818_v28, %s10655_s17  ;;  %v12842_v58 = vand.u32 15, %v328_v32  ;;  %v16821_v9 = vpack.i.bf16 %v12505_v8, %v12501_v41  ;;  %v4340_v60 = vrot.slane %v4339_v16, 1  ;;  %v4347_v59 = vrot.slane %v4346_v34, 1  ;;  %v1935_v32 = vld [vmem:[#allocation3 + $0x1d0] sm:$0xff] }
 0x289   :  { %v1542_v53 = vpop.permute.xlu0 %1541  ;;  %16819 = vst [vmem:[#allocation53_spill] sm:$0xff] %v12840_v23  ;;  %v4359_v21 = vrot.slane %v4358_v38, 2  ;;  %vm12848_vm15 = vcmp.gt.s32.totalorder %v242_v46, 0  ;;  %v4353_v35 = vmax.f32 %v4351_v37, %v4352_v3  ;;  %v4366_v49 = vrot.slane %v4365_v31, 2 }
 0x28a   :  { %v12825_v26 = vsel %vm1683_vm11, %v1676_v43, %v1542_v53  ;;  %16820 = vst [vmem:[#allocation54_spill] sm:$0xff] %v12842_v58  ;;  %v4373_v36 = vrot.slane %v4372_v12, 2  ;;  %vm1844_vm3 = vcmp.gt.s32.totalorder %v12812_v45, 0  ;;  %v12853_v47 = vand.u32 15, %v304_v17 }
 0x28b   :  { %1806 = vst.msk [vmem:[#allocation3 + $0x1d8] sm:$0xff] %vm1748_vm12, %v12825_v26  ;;  %10262 = vrot.lane.b32.xlu1 %v16821_v9, %s10655_s17  ;;  %v12856_v22 = vadd.s32 504, %v10741_v4  ;;  %v755_v41 = vsel %vm12848_vm15, %v563_v6, 0.0  ;;  %v12861_v8 = vsel %vm1844_vm3, %v12666_v19, 0.0  ;;  %v1652_v10 = vsel %vm402_vm0, %v564_v0, %v12535_v55  ;;  %v1546_v0 = vpop.permute.xlu2 %1545 }
 0x28c   :  { %16825 = vst [vmem:[#allocation49_spill] sm:$0xff] %v12861_v8  ;;  %v4327_v43 = vmax.f32 %v4325_v44, %v4326_v20  ;;  %v16826_v37 = vpack.c.bf16 %v12612_v63, %v12606_v51  ;;  %vm2187_vm14 = vcmp.lt.s32.totalorder %v12842_v58, 15  ;;  %vm2188_vm2 = vcmp.lt.s32.totalorder %v12840_v23, 15 }
 0x28d   :  { %16824 = vst [vmem:[#allocation38_spill] sm:$0xff] %v12856_v22  ;;  %v4334_v53 = vmax.f32 %v4332_v27, %v4333_v5  ;;  %v4341_v3 = vmax.f32 %v4339_v16, %v4340_v60  ;;  %v4348_v17 = vmax.f32 %v4346_v34, %v4347_v59  ;;  %v4360_v28 = vmax.f32 %v4358_v38, %v4359_v21  ;;  %v590_v16 = vld [vmem:[#allocation2 + $0x1df] sm:$0xff]  ;;  %v1290_v34 = vpop.permute.xlu1 %1289 }
 0x28e   :  { %9428 = vmatmul.msk.bf16.gmra.mxu0 %vm16827_vm4, %v16826_v37  ;;  %v4354_v46 = vrot.slane %v4353_v35, 1  ;;  %v4367_v9 = vmax.f32 %v4365_v31, %v4366_v49  ;;  %v12871_v6 = vmax.f32 %v4372_v12, %v4373_v36  ;;  %v16828_v51 = vpack.i.bf16 %v12772_v11, %v12761_v62  ;;  %v3245_v12 = vpop.f32.mrf.mxu0  ;;  %v913_v31 = vld [vmem:[#allocation2 + $0x1f9] sm:$0xff] }
 0x28f   :  { %v273_v63 = vand.u32 15, %v12856_v22  ;;  %v2383_v20 = vsel %vm2187_vm14, %v1935_v32, 0.0  ;;  %v12883_v5 = vand.u32 15, %v320_v52  ;;  %v1678_v59 = vsel %vm402_vm0, %v590_v16, %v1290_v34  ;;  %1551 = vrot.lane.b32.xlu2 %v913_v31, %s10654_s29  ;;  %v1927_v36 = vld [vmem:[#allocation3 + $0x190] sm:$0xff] }
 0x290   :  { %10247 = vrot.lane.b32.xlu0 %v16828_v51, %s10655_s17  ;;  %v3246_v62 = vadd.f32 %v12715_v25, %v3245_v12  ;;  %v12891_v11 = vsel %vm402_vm0, %v4327_v43, -inf  ;;  %v12897_v52 = vsel %vm402_vm0, %v4341_v3, -inf  ;;  %v12900_v21 = vsel %vm1683_vm11, %v1678_v59, %v1546_v0  ;;  %v914_v12 = vld [vmem:[#allocation2 + $0x201] sm:$0xff] }
 0x291   :  { %v1236_v19 = vpop.permute.xlu0 %1235  ;;  %v12903_v33 = vsel %vm402_vm0, %v4348_v17, -inf  ;;  %v4361_v49 = vrot.slane %v4360_v28, 1  ;;  %vm2179_vm9 = vcmp.lt.s32.totalorder %v12883_v5, 15  ;;  %1808 = vst.msk [vmem:[#allocation3 + $0x1e8] sm:$0xff] %vm1748_vm12, %v12900_v21  ;;  %v12909_v43 = vmax.f32 %v4353_v35, %v4354_v46 }
 0x292   :  { %v1651_v55 = vsel %vm402_vm0, %v755_v41, %v1236_v19  ;;  %v1936_v44 = vld [vmem:[#allocation3 + $0x1d8] sm:$0xff]  ;;  %v3378_v41 = vmax.f32 %v3246_v62, 0.0  ;;  %v4368_v37 = vrot.slane %v4367_v9, 1  ;;  %vm12912_vm10 = vcmp.lt.s32.totalorder %v273_v63, 15 }
 0x293   :  { %v2384_v27 = vsel %vm2188_vm2, %v1936_v44, 0.0  ;;  %v12881_v38 = vsel %vm1683_vm11, %v1651_v55, %v12608_v54  ;;  %v12894_v54 = vsel %vm402_vm0, %v4334_v53, -inf  ;;  %vm2180_vm15 = vcmp.lt.s32.totalorder %v12810_v39, 15 }
 0x294   :  { %v10276_v60 = vpack.i.bf16 %v2384_v27, %v2383_v20  ;;  %1781 = vst.msk [vmem:[#allocation3 + $0x110] sm:$0xff] %vm1748_vm12, %v12881_v38  ;;  %v3542_v3 = vrot.slane %v3378_v41, 2  ;;  %v3543_v17 = vrot.slane %v3378_v41, 4  ;;  %v3544_v19 = vrot.slane %v3378_v41, 6  ;;  %v1928_v20 = vld [vmem:[#allocation3 + $0x198] sm:$0xff] }
 0x295   :  { %v4377_v55 = vsel %vm3872_vm1, %v3378_v41, -inf  ;;  %v12918_v44 = vsel %vm2179_vm9, %v1927_v36, 0.0  ;;  %v12921_v51 = vadd.s32 400, %v10741_v4  ;;  %v12934_v62 = vmax.f32 %v4360_v28, %v4361_v49  ;;  %v12957_v58 = vpop.permute.xlu1 %1543 }
 0x296   :  { %10277 = vrot.lane.b32.xlu1 %v10276_v60, %s10656_s18  ;;  %v4378_v46 = vrot.slane %v4377_v55, 4  ;;  %v4384_v27 = vsel %vm3872_vm1, %v3542_v3, -inf  ;;  %v4391_v16 = vsel %vm3872_vm1, %v3543_v17, -inf  ;;  %v4398_v34 = vsel %vm3872_vm1, %v3544_v19, -inf }
 0x297   :  { %16831 = vst [vmem:[#allocation52_spill] sm:$0xff] %v12921_v51  ;;  %v260_v31 = vand.u32 15, %v12921_v51  ;;  %v4385_v60 = vrot.slane %v4384_v27, 4  ;;  %v4392_v59 = vrot.slane %v4391_v16, 4  ;;  %v12936_v36 = vmax.f32 %v4367_v9, %v4368_v37 }
 0x298   :  { %1295 = vrot.lane.b32.xlu0 %v12487_v29, %s10653_s16  ;;  %v4379_v0 = vmax.f32 %v4377_v55, %v4378_v46  ;;  %v4399_v41 = vrot.slane %v4398_v34, 4  ;;  %v12941_v29 = vsel %vm2180_vm15, %v1928_v20, 0.0  ;;  %v1106_v55 = vsel %vm12912_vm10, %v914_v12, 0.0 }
 0x299   :  { %v1494_v35 = vpop.permute.xlu0 %1493  ;;  %v4386_v19 = vmax.f32 %v4384_v27, %v4385_v60  ;;  %v10271_v46 = vpack.i.bf16 %v12941_v29, %v12918_v44  ;;  %vm12947_vm3 = vcmp.gt.s32.totalorder %v260_v31, 0  ;;  %vm2163_vm4 = vcmp.lt.s32.totalorder %v12853_v47, 15 }
 0x29a   :  { %v12924_v63 = vsel %vm1683_vm11, %v1652_v10, %v1494_v35  ;;  %v3247_v10 = vpop.f32.mrf.mxu0  ;;  %v4380_v17 = vrot.slane %v4379_v0, 2  ;;  %v4393_v35 = vmax.f32 %v4391_v16, %v4392_v59  ;;  %v4400_v28 = vmax.f32 %v4398_v34, %v4399_v41  ;;  %v12951_v16 = vpop.permute.xlu2 %10222 }
 0x29b   :  { %1782 = vst.msk [vmem:[#allocation3 + $0x118] sm:$0xff] %vm1748_vm12, %v12924_v63  ;;  %v3248_v3 = vadd.f32 %v12715_v25, %v3247_v10  ;;  %v4387_v10 = vrot.slane %v4386_v19, 2  ;;  %vm2164_vm14 = vcmp.lt.s32.totalorder %v12812_v45, 15  ;;  %vm2169_vm2 = vcmp.lt.s32.totalorder %v12828_v15, 15 }
 0x29c   :  { %v4381_v37 = vmax.f32 %v4379_v0, %v4380_v17  ;;  %v4394_v32 = vrot.slane %v4393_v35, 2  ;;  %v4401_v20 = vrot.slane %v4400_v28, 2  ;;  %vm16838_vm9 = vcmask 1045509  }
 0x29d   :  { %v3379_v49 = vmax.f32 %v3248_v3, 0.0  ;;  %v4388_v12 = vmax.f32 %v4386_v19, %v4387_v10  ;;  %vm16841_vm10 = vcmask 1046534  }
 0x29e   :  { %v4382_v53 = vrot.slane %v4381_v37, 1  ;;  %v4395_v60 = vmax.f32 %v4393_v35, %v4394_v32  ;;  %v4402_v34 = vmax.f32 %v4400_v28, %v4401_v20  ;;  %v581_v35 = vld [vmem:[#allocation2 + $0x197] sm:$0xff] }
 0x29f   :  { %v3545_v8 = vrot.slane %v3379_v49, 2  ;;  %v3546_v23 = vrot.slane %v3379_v49, 4  ;;  %v3547_v27 = vrot.slane %v3379_v49, 6  ;;  %v4405_v44 = vsel %vm3872_vm1, %v3379_v49, -inf }
 0x2a0   :  { %v4406_v59 = vrot.slane %v4405_v44, 4  ;;  %1553 = vrot.lane.b32.xlu0 %v1106_v55, %s10654_s29  ;;  %v4383_v0 = vmax.f32 %v4381_v37, %v4382_v53  ;;  %v4389_v41 = vrot.slane %v4388_v12, 1  ;;  %v4396_v3 = vrot.slane %v4395_v60, 1 }
 0x2a1   :  { %v4412_v31 = vsel %vm3872_vm1, %v3545_v8, -inf  ;;  %v4403_v17 = vrot.slane %v4402_v34, 1  ;;  %v4419_v32 = vsel %vm3872_vm1, %v3546_v23, -inf  ;;  %v4426_v19 = vsel %vm3872_vm1, %v3547_v27, -inf  ;;  %v12965_v23 = vld [vmem:[#allocation3 + $0x110] sm:$0xff] }
 0x2a2   :  { %v4413_v29 = vrot.slane %v4412_v31, 4  ;;  %v4407_v51 = vmax.f32 %v4405_v44, %v4406_v59  ;;  %v4390_v28 = vmax.f32 %v4388_v12, %v4389_v41  ;;  %v4397_v49 = vmax.f32 %v4395_v60, %v4396_v3  ;;  %v12967_v27 = vld [vmem:[#allocation3 + $0x118] sm:$0xff]  ;;  %v1282_v41 = vpop.permute.xlu0 %1281 }
 0x2a3   :  { %v5762_v8 = vsel %vm402_vm0, %v4383_v0, -inf  ;;  %v4404_v20 = vmax.f32 %v4402_v34, %v4403_v17  ;;  %v4420_v37 = vrot.slane %v4419_v32, 4  ;;  %v4427_v59 = vrot.slane %v4426_v19, 4 }
 0x2a4   :  { %v4414_v10 = vmax.f32 %v4412_v31, %v4413_v29  ;;  %v4408_v55 = vrot.slane %v4407_v51, 2  ;;  %v5765_v53 = vsel %vm402_vm0, %v4390_v28, -inf  ;;  %v5768_v22 = vsel %vm402_vm0, %v4397_v49, -inf }
 0x2a5   :  { %v773_v12 = vsel %vm12947_vm3, %v581_v35, 0.0  ;;  %v5763_v60 = vmax.f32 %v12891_v11, %v5762_v8  ;;  %v5766_v34 = vmax.f32 %v12894_v54, %v5765_v53  ;;  %v5769_v0 = vmax.f32 %v12897_v52, %v5768_v22  ;;  %v12982_v54 = vpop.permute.xlu2 %1277 }
 0x2a6   :  { %v4415_v44 = vrot.slane %v4414_v10, 2  ;;  %v4409_v31 = vmax.f32 %v4407_v51, %v4408_v55  ;;  %v4421_v29 = vmax.f32 %v4419_v32, %v4420_v37  ;;  %v4428_v17 = vmax.f32 %v4426_v19, %v4427_v59 }
 0x2a7   :  { %v6260_v28 = vsel %vm6225_vm5, %v5766_v34, %v5763_v60  ;;  %v2359_v40 = vsel %vm2163_vm4, %v12965_v23, 0.0  ;;  %v2360_v11 = vsel %vm2164_vm14, %v12967_v27, 0.0  ;;  %v5771_v22 = vsel %vm402_vm0, %v4404_v20, -inf }
 0x2a8   :  { %v4416_v3 = vmax.f32 %v4414_v10, %v4415_v44  ;;  %v4410_v49 = vrot.slane %v4409_v31, 1  ;;  %10272 = vrot.lane.b32.xlu0 %v10271_v46, %s10656_s18  ;;  %v4422_v51 = vrot.slane %v4421_v29, 2  ;;  %v4429_v9 = vrot.slane %v4428_v17, 2 }
 0x2a9   :  { %v16834_v32 = vrot.slane %v12871_v6, 1  ;;  %v5773_v35 = vsel %vm402_vm0, %v12909_v43, -inf  ;;  %v10291_v10 = vpack.i.bf16 %v2360_v11, %v2359_v40  ;;  %v6261_v45 = vsel %vm6227_vm6, %v5769_v0, %v6260_v28  ;;  %v586_v0 = vld [vmem:[#allocation2 + $0x1bf] sm:$0xff]  ;;  %v16835_v11 = vld [vmem:[#allocation62_spill] sm:$0xff] }
 0x2aa   :  { %v4417_v52 = vrot.slane %v4416_v3, 1  ;;  %v4411_v8 = vmax.f32 %v4409_v31, %v4410_v49  ;;  %v4423_v46 = vmax.f32 %v4421_v29, %v4422_v51  ;;  %v4430_v37 = vmax.f32 %v4428_v17, %v4429_v9 }
 0x2ab   :  { %v4376_v19 = vmax.f32 %v12871_v6, %v16834_v32  ;;  %v5776_v20 = vsel %vm402_vm0, %v12934_v62, -inf  ;;  %v1669_v53 = vsel %vm402_vm0, %v773_v12, %v12837_v24  ;;  %v5772_v44 = vmax.f32 %v12903_v33, %v5771_v22  ;;  %10292 = vrot.lane.b32.xlu1 %v10291_v10, %s10656_s18  ;;  %v16836_v22 = vld [vmem:[#allocation55_spill] sm:$0xff] }
 0x2ac   :  { %v4418_v55 = vmax.f32 %v4416_v3, %v4417_v52  ;;  %v5774_v6 = vsel %vm402_vm0, %v4411_v8, -inf  ;;  %v4424_v40 = vrot.slane %v4423_v46, 1  ;;  %v4431_v59 = vrot.slane %v4430_v37, 1 }
 0x2ad   :  { %v5775_v60 = vmax.f32 %v5773_v35, %v5774_v6  ;;  %v6262_v31 = vsel %vm16592_vm7, %v5772_v44, %v6261_v45  ;;  %v13003_v3 = vadd.s32 464, %v10741_v4  ;;  %v5779_v24 = vsel %vm402_vm0, %v12936_v36, -inf  ;;  %v589_v6 = vld [vmem:[#allocation2 + $0x1d7] sm:$0xff] }
 0x2ae   :  { %v5777_v34 = vsel %vm402_vm0, %v4418_v55, -inf  ;;  %v4425_v33 = vmax.f32 %v4423_v46, %v4424_v40  ;;  %v4432_v12 = vmax.f32 %v4430_v37, %v4431_v59  ;;  %v5782_v17 = vsel %vm402_vm0, %v4376_v19, -inf  ;;  %v13029_v55 = vpop.permute.xlu2 %1531  ;;  %v16840_v37 = vld [vmem:[#allocation39_spill] sm:$0xff] }
 0x2af   :  { %v5778_v62 = vmax.f32 %v5776_v20, %v5777_v34  ;;  %v6263_v29 = vsel %vm16591_vm8, %v5775_v60, %v6262_v31  ;;  %v268_v28 = vand.u32 15, %v13003_v3  ;;  %v13012_v49 = vsel %vm1683_vm11, %v1669_v53, %v12822_v56  ;;  %v16839_v56 = vld [vmem:[#allocation56_spill] sm:$0xff] }
 0x2b0   :  { %v16837_v52 = vpack.i.bf16 %v16835_v11, %v16836_v22  ;;  %v1674_v36 = vsel %vm402_vm0, %v586_v0, %v1282_v41  ;;  %v5780_v51 = vsel %vm402_vm0, %v4425_v33, -inf  ;;  %v5783_v9 = vsel %vm402_vm0, %v4432_v12, -inf  ;;  %1799 = vst.msk [vmem:[#allocation3 + $0x1a0] sm:$0xff] %vm1748_vm12, %v13012_v49  ;;  %v16844_v0 = vld [vmem:[#allocation61_spill] sm:$0xff] }
 0x2b1   :  { %v12998_v43 = vpop.permute.xlu1 %10217  ;;  %v6264_v32 = vsel %vm16838_vm9, %v5778_v62, %v6263_v29  ;;  %v10306_v35 = vpack.i.bf16 %v12825_v26, %v16839_v56  ;;  %v5781_v8 = vmax.f32 %v5779_v24, %v5780_v51  ;;  %v2365_v45 = vsel %vm2169_vm2, %v12753_v2, 0.0  ;;  %v592_v12 = vld [vmem:[#allocation2 + $0x1ef] sm:$0xff]  ;;  %v1938_v56 = vld [vmem:[#allocation3 + $0x1e8] sm:$0xff] }
 0x2b2   :  { %10287 = vrot.lane.b32.xlu0 %v16837_v52, %s10655_s17  ;;  %v5784_v41 = vmax.f32 %v5782_v17, %v5783_v9  ;;  %v313_v20 = vshra.s32 %v16840_v37, 4  ;;  %v312_v53 = vshra.s32 %v12626_v30, 4  ;;  %vm525_vm15 = vcmp.gt.s32.totalorder %v268_v28, 0  ;;  %v16845_v17 = vld [vmem:[#allocation66_spill] sm:$0xff]  ;;  %v1920_v22 = vld [vmem:[#allocation3 + $0x158] sm:$0xff] }
 0x2b3   :  { %v6265_v44 = vsel %vm16841_vm10, %v5781_v8, %v6264_v32  ;;  %10307 = vrot.lane.b32.xlu1 %v10306_v35, %s10655_s17  ;;  %vm16842_vm3 = vcmask 1047559   ;;  %v10301_v30 = vpack.i.bf16 %v12785_v13, %v12799_v50  ;;  %v781_v59 = vsel %vm525_vm15, %v589_v6, 0.0  ;;  %v16846_v50 = vld [vmem:[#allocation60_spill] sm:$0xff] }
 0x2b4   :  { %v13040_v2 = vsel %vm16842_vm3, %v5784_v41, %v6265_v44  ;;  %v13048_v60 = vand.u32 15, %v313_v20  ;;  %v13050_v34 = vand.u32 15, %v312_v53  ;;  %v331_v62 = vshra.s32 %v16844_v0, 4  ;;  %v582_v6 = vld [vmem:[#allocation2 + $0x19f] sm:$0xff] }
 0x2b5   :  { %6364 = vst.msk [vmem:[#allocation4 + $0x28] sm:$0xff] %vm402_vm0, %v13040_v2  ;;  %v10321_v24 = vpack.i.bf16 %v12924_v63, %v12881_v38  ;;  %v330_v13 = vshra.s32 %v16845_v17, 4  ;;  %v10281_v28 = vpack.i.bf16 %v12685_v7, %v16846_v50  ;;  %v1919_v63 = vld [vmem:[#allocation3 + $0x150] sm:$0xff]  ;;  %vm16864_vm8 = vcmask 293888  }
 0x2b6   :  { %v1538_v19 = vpop.permute.xlu0 %1537  ;;  %vm2171_vm4 = vcmp.lt.s32.totalorder %v13050_v34, 15  ;;  %vm2172_vm14 = vcmp.lt.s32.totalorder %v13048_v60, 15  ;;  %v1550_v52 = vpop.permute.xlu2 %1549  ;;  %v583_v50 = vld [vmem:[#allocation2 + $0x1a7] sm:$0xff] }
 0x2b7   :  { %v1739_v10 = vsel %vm1683_vm11, %v1674_v36, %v1538_v19  ;;  %v13073_v36 = vand.u32 15, %v331_v62  ;;  %v13078_v51 = vand.u32 15, %v330_v13  ;;  %v2367_v9 = vsel %vm2171_vm4, %v1919_v63, 0.0  ;;  %v10516_v13 = vld [vmem:[#allocation3 + $0xd8] sm:$0xff] }
 0x2b8   :  { %1804 = vst.msk [vmem:[#allocation3 + $0x1c8] sm:$0xff] %vm1748_vm12, %v1739_v10  ;;  %v10266_v46 = vpack.i.bf16 %v1739_v10, %v12744_v61  ;;  %v16843_v61 = vld [vmem:[#allocation47_spill] sm:$0xff]  ;;  %v2368_v32 = vsel %vm2172_vm14, %v1920_v22, 0.0  ;;  %v306_v19 = vshra.s32 %v12820_v42, 4  ;;  %v16848_v10 = vld [vmem:[#allocation64_spill] sm:$0xff] }
 0x2b9   :  { %v13037_v26 = vpop.permute.xlu1 %1275  ;;  %v311_v40 = vshra.s32 %v16843_v61, 4  ;;  %16847 = vst [vmem:[#allocation62_spill] sm:$0xff] %v13073_v36  ;;  %vm2189_vm9 = vcmp.lt.s32.totalorder %v13078_v51, 15  ;;  %vm2190_vm10 = vcmp.lt.s32.totalorder %v13073_v36, 15  ;;  %v10336_v8 = vpack.i.bf16 %v2368_v32, %v2367_v9 }
 0x2ba   :  { %10267 = vrot.lane.b32.xlu2 %v10266_v46, %s10655_s17  ;;  %10302 = vrot.lane.b32.xlu0 %v10301_v30, %s10655_s17  ;;  %v307_v41 = vshra.s32 %v16848_v10, 4  ;;  %v2386_v53 = vsel %vm2190_vm10, %v1938_v56, 0.0  ;;  %v13089_v44 = vand.u32 15, %v306_v19 }
 0x2bb   :  { %v13057_v29 = vand.u32 15, %v311_v40  ;;  %10322 = vrot.lane.b32.xlu1 %v10321_v24, %s10655_s17  ;;  %v13099_v40 = vadd.s32 416, %v10741_v4 }
 0x2bc   :  { %v13092_v61 = vand.u32 15, %v307_v41  ;;  %vm2165_vm15 = vcmp.lt.s32.totalorder %v13089_v44, 15 }
 0x2bd   :  { %vm2170_vm2 = vcmp.lt.s32.totalorder %v13057_v29, 15  ;;  %v262_v62 = vand.u32 15, %v13099_v40 }
 0x2be   :  { %v1288_v31 = vpop.permute.xlu0 %1287  ;;  %v2366_v35 = vsel %vm2170_vm2, %v12668_v48, 0.0  ;;  %v1913_v48 = vld [vmem:[#allocation3 + $0x120] sm:$0xff]  ;;  %vm2166_vm3 = vcmp.lt.s32.totalorder %v13092_v61, 15 }
 0x2bf   :  { %v1677_v33 = vsel %vm402_vm0, %v781_v59, %v1288_v31  ;;  %v10296_v46 = vpack.i.bf16 %v2366_v35, %v2365_v45  ;;  %v1670_v45 = vsel %vm402_vm0, %v582_v6, %v12790_v18  ;;  %v13101_v59 = vld [vmem:[#allocation3 + $0x128] sm:$0xff]  ;;  %v2361_v0 = vsel %vm2165_vm15, %v1913_v48, 0.0  ;;  %v16849_v18 = vld [vmem:[#allocation41_spill] sm:$0xff] }
 0x2c0   :  { %v13064_v11 = vsel %vm1683_vm11, %v1677_v33, %v12957_v58  ;;  %v2362_v24 = vsel %vm2166_vm3, %v13101_v59, 0.0  ;;  %v323_v33 = vshra.s32 %v16849_v18, 4  ;;  %vm13113_vm4 = vcmp.gt.s32.totalorder %v262_v62, 0  ;;  %v1929_v35 = vld [vmem:[#allocation3 + $0x1a0] sm:$0xff] }
 0x2c1   :  { %1807 = vst.msk [vmem:[#allocation3 + $0x1e0] sm:$0xff] %vm1748_vm12, %v13064_v11  ;;  %v1294_v38 = vpop.permute.xlu1 %1293  ;;  %v10331_v17 = vpack.i.bf16 %v2362_v24, %v2361_v0  ;;  %vm1849_vm15 = vcmp.gt.s32.totalorder %v12828_v15, 0  ;;  %vm16854_vm3 = vcmask 293888   ;;  %v16856_v24 = vld [vmem:[#allocation40_spill] sm:$0xff]  ;;  %v10225_v18 = vunpack.i.h.bf16 %v12951_v16 }
 0x2c2   :  { %10282 = vrot.lane.b32.xlu2 %v10281_v28, %s10655_s17  ;;  %v1680_v7 = vsel %vm402_vm0, %v592_v12, %v1294_v38  ;;  %v322_v12 = vshra.s32 %v12646_v1, 4  ;;  %v16852_v28 = vld [vmem:[#allocation68_spill] sm:$0xff]  ;;  %v13119_v38 = vand.u32 15, %v323_v33  ;;  %v775_v1 = vsel %vm13113_vm4, %v583_v50, 0.0 }
 0x2c3   :  { %v13076_v58 = vsel %vm1683_vm11, %v1680_v7, %v1550_v52  ;;  %10337 = vrot.lane.b32.xlu1 %v10336_v8, %s10656_s18  ;;  %vm1855_vm14 = vcmp.gt.s32.totalorder %v16852_v28, 0  ;;  %v16853_v7 = vld [vmem:[#allocation67_spill] sm:$0xff]  ;;  %vm1839_vm4 = vcmp.gt.s32.totalorder %v12656_v57, 0  ;;  %v10224_v33 = vunpack.i.l.bf16 %v12951_v16  ;;  %v16857_v57 = vld [vmem:[#allocation42_spill] sm:$0xff] }
 0x2c4   :  { %1810 = vst.msk [vmem:[#allocation3 + $0x1f8] sm:$0xff] %vm1748_vm12, %v13076_v58  ;;  %v13121_v52 = vand.u32 15, %v322_v12  ;;  %vm1856_vm2 = vcmp.gt.s32.totalorder %v16853_v7, 0  ;;  %v2111_v56 = vsel %vm1855_vm14, %v1919_v63, 0.0  ;;  %vm2182_vm10 = vcmp.lt.s32.totalorder %v13119_v38, 15  ;;  %v10515_v12 = vld [vmem:[#allocation3 + $0xd0] sm:$0xff] }
 0x2c5   :  { %v2112_v10 = vsel %vm1856_vm2, %v1920_v22, 0.0  ;;  %v10220_v63 = vunpack.i.h.bf16 %v12998_v43  ;;  %vm1840_vm14 = vcmp.gt.s32.totalorder %v16856_v24, 0  ;;  %vm1841_vm2 = vcmp.gt.s32.totalorder %v16857_v57, 0  ;;  %v16865_v24 = vld [vmem:[#allocation50_spill] sm:$0xff]  ;;  %v16868_v57 = vld [vmem:[#allocation36_spill] sm:$0xff] }
 0x2c8   :  { %v1937_v37 = vld [vmem:[#allocation3 + $0x1e0] sm:$0xff] }
 0x2c9   :  { %v2385_v20 = vsel %vm2189_vm9, %v1937_v37, 0.0  ;;  %vm2181_vm9 = vcmp.lt.s32.totalorder %v13121_v52, 15  ;;  %v1671_v37 = vsel %vm402_vm0, %v775_v1, %v13037_v26  ;;  %v13150_v26 = vsel %vm1849_vm15, %v1913_v48, 0.0 }
 0x2ca   :  { %10297 = vrot.lane.b32.xlu2 %v10296_v46, %s10656_s18  ;;  %v10316_v42 = vpack.i.bf16 %v2386_v53, %v2385_v20  ;;  %v10219_v46 = vunpack.i.l.bf16 %v12998_v43  ;;  %v10346_v20 = vpack.i.bf16 %v12900_v21, %v13064_v11  ;;  %v13141_v0 = vsel %vm1683_vm11, %v1671_v37, %v13029_v55  ;;  %v13146_v43 = vpop.permute.xlu1 %1547  ;;  %v16855_v11 = vld [vmem:[#allocation57_spill] sm:$0xff] }
 0x2cb   :  { %1801 = vst.msk [vmem:[#allocation3 + $0x1b0] sm:$0xff] %vm1748_vm12, %v13141_v0  ;;  %v10326_v62 = vpack.i.bf16 %v16855_v11, %v12707_v14  ;;  %v13155_v55 = vadd.s32 480, %v10741_v4  ;;  %v2096_v14 = vsel %vm1840_vm14, %v10516_v13, 0.0  ;;  %vm1860_vm14 = vcmp.gt.s32.totalorder %v12810_v39, 0  ;;  %v10520_v11 = vld [vmem:[#allocation3 + $0x168] sm:$0xff]  ;;  %v584_v39 = vld [vmem:[#allocation2 + $0x1af] sm:$0xff] }
 0x2cc   :  { %10317 = vrot.lane.b32.xlu0 %v10316_v42, %s10656_s18  ;;  %v2377_v42 = vsel %vm2181_vm9, %v1929_v35, 0.0  ;;  %v2932_v1 = vsel %vm1748_vm12, %v2096_v14, %v10225_v18  ;;  %v335_v18 = vshra.s32 %v16865_v24, 4  ;;  %v16867_v14 = vld [vmem:[#allocation58_spill] sm:$0xff] }
 0x2cd   :  { %v1530_v30 = vpop.permute.xlu0 %1529  ;;  %v270_v15 = vand.u32 15, %v13155_v55 }
 0x2ce   :  { %v13105_v31 = vsel %vm1683_vm11, %v1670_v45, %v1530_v30 }
 0x2cf   :  { %1800 = vst.msk [vmem:[#allocation3 + $0x1a8] sm:$0xff] %vm1748_vm12, %v13105_v31  ;;  %vm13172_vm15 = vcmp.gt.s32.totalorder %v270_v15, 0 }
 0x2d4   :  { %10332 = vrot.lane.b32.xlu0 %v10331_v17, %s10656_s18  ;;  %v2095_v17 = vsel %vm1839_vm4, %v10515_v12, 0.0  ;;  %vm1859_vm4 = vcmp.gt.s32.totalorder %v12883_v5, 0  ;;  %v10521_v12 = vld [vmem:[#allocation3 + $0x178] sm:$0xff] }
 0x2d5   :  { %v2931_v16 = vsel %vm1748_vm12, %v2095_v17, %v10224_v33  ;;  %v10522_v17 = vld [vmem:[#allocation3 + $0x170] sm:$0xff] }
 0x2d6   :  { %v10213_v9 = vpop.permute.xlu0 %10212  ;;  %v1930_v8 = vld [vmem:[#allocation3 + $0x1a8] sm:$0xff]  ;;  %v13208_v13 = vsel %vm1859_vm4, %v10522_v17, 0.0  ;;  %vm1862_vm4 = vcmp.gt.s32.totalorder %v13119_v38, 0 }
 0x2d7   :  { %v10215_v32 = vunpack.i.h.bf16 %v10213_v9  ;;  %v10214_v19 = vunpack.i.l.bf16 %v10213_v9  ;;  %v2378_v6 = vsel %vm2182_vm10, %v1930_v8, 0.0  ;;  %v16858_v9 = vld [vmem:[#allocation37_spill] sm:$0xff] }
 0x2d8   :  { %v10311_v45 = vpack.i.bf16 %v2378_v6, %v2377_v42  ;;  %vm1842_vm9 = vcmp.gt.s32.totalorder %v16858_v9, 0  ;;  %v10517_v42 = vld [vmem:[#allocation3 + $0xe0] sm:$0xff]  ;;  %v327_v9 = vshra.s32 %v16868_v57, 4 }
 0x2d9   :  { %v2947_v41 = vsel %vm1748_vm12, %v2111_v56, %v10214_v19  ;;  %v2948_v53 = vsel %vm1748_vm12, %v2112_v10, %v10215_v32  ;;  %v16859_v32 = vld [vmem:[#allocation46_spill] sm:$0xff]  ;;  %v3250_v19 = vpop.f32.mrf.mxu0  ;;  %v591_v10 = vld [vmem:[#allocation2 + $0x1e7] sm:$0xff]  ;;  %v2097_v6 = vsel %vm1841_vm2, %v10517_v42, 0.0 }
 0x2da   :  { %v3012_v30 = vsel %vm2969_vm13, %v2947_v41, %v10219_v46  ;;  %v3013_v22 = vsel %vm2969_vm13, %v2948_v53, %v10220_v63  ;;  %10312 = vrot.lane.b32.xlu2 %v10311_v45, %s10656_s18  ;;  %vm1857_vm10 = vcmp.gt.s32.totalorder %v16859_v32, 0  ;;  %v16862_v41 = vld [vmem:[#allocation43_spill] sm:$0xff]  ;;  %v10341_v53 = vpack.i.bf16 %v13105_v31, %v13012_v49 }
 0x2db   :  { %v3055_v21 = vpack.c.bf16 %v3013_v22, %v3012_v30  ;;  %v16863_v46 = vld [vmem:[#allocation63_spill] sm:$0xff]  ;;  %v10519_v22 = vld [vmem:[#allocation3 + $0x160] sm:$0xff]  ;;  %v3251_v49 = vadd.f32 %v12715_v25, %v3250_v19  ;;  %v783_v31 = vsel %vm13172_vm15, %v591_v10, 0.0  ;;  %v13204_v25 = vsel %vm1860_vm14, %v10521_v12, 0.0 }
 0x2dc   :  { %10347 = vrot.lane.b32.xlu0 %v10346_v20, %s10655_s17  ;;  %v13163_v50 = vpop.permute.xlu1 %10237  ;;  %v333_v37 = vshra.s32 %v16863_v46, 4  ;;  %v10243_v20 = vpop.permute.xlu2 %10242  ;;  %v10518_v45 = vld [vmem:[#allocation3 + $0xe8] sm:$0xff]  ;;  %v16594_v19 = vand.u32 7, %v10741_v4  ;;  %v13219_v10 = vand.u32 15, %v335_v18  ;;  %v1940_v18 = vld [vmem:[#allocation3 + $0x1f8] sm:$0xff]  ;;  %vm1843_vm15 = vcmp.gt.s32.totalorder %v12853_v47, 0 }
 0x2dd   :  { %9437 = vmatmul.msk.bf16.gmra.mxu2 %vm16854_vm3, %v3055_v21  ;;  %vm1858_vm3 = vcmp.gt.s32.totalorder %v16862_v41, 0  ;;  %v2098_v30 = vsel %vm1842_vm9, %v10518_v45, 0.0  ;;  %v13188_v21 = vsel %vm1857_vm10, %v10519_v22, 0.0  ;;  %v10245_v33 = vunpack.i.h.bf16 %v10243_v20  ;;  %v16870_v41 = vld [vmem:[#allocation38_spill] sm:$0xff] }
 0x2de   :  { %v10244_v15 = vunpack.i.l.bf16 %v10243_v20  ;;  %16869 = vst [vmem:[#allocation56_spill] sm:$0xff] %v13219_v10  ;;  %v337_v46 = vshra.s32 %v16870_v41, 4  ;;  %v13236_v42 = vld [vmem:[#allocation4 + $0x9] sm:$0xff]  ;;  %v13238_v45 = vand.u32 15, %v327_v9  ;;  %v1672_v22 = vsel %vm402_vm0, %v584_v39, %v12982_v54 }
 0x2df   :  { %v16878_v12 = vld [vmem:[#allocation22_spill] sm:$0xff] }
 0x2e0   :  { %16874 = vst [vmem:[#allocation47_spill] sm:$0xff] %v13238_v45  ;;  %v16593_v17 = vand.u32 7, %v16878_v12 }
 0x2e1   :  { %v3252_v39 = vpop.f32.mrf.mxu0 }
 0x2e2   :  { %10327 = vrot.lane.b32.xlu2 %v10326_v62, %s10655_s17  ;;  %v10228_v48 = vpop.permute.xlu0 %10227  ;;  %v13197_v62 = vsel %vm1858_vm3, %v10520_v11, 0.0  ;;  %vm13267_vm10 = vcmp.lt.s32.totalorder %v16593_v17, 7  ;;  %vm1861_vm3 = vcmp.gt.s32.totalorder %v13121_v52, 0  ;;  %v10240_v17 = vunpack.i.h.bf16 %v13163_v50 }
 0x2e3   :  { %v10230_v28 = vunpack.i.h.bf16 %v10228_v48  ;;  %v10229_v7 = vunpack.i.l.bf16 %v10228_v48  ;;  %v13200_v48 = vand.u32 15, %v333_v37  ;;  %v2934_v37 = vsel %vm1748_vm12, %v2098_v30, %v10245_v33 }
 0x2e4   :  { %v13248_v33 = vand.u32 15, %v337_v46 }
 0x2e5   :  { %v2996_v56 = vsel %vm2969_vm13, %v2931_v16, %v10229_v7  ;;  %v2997_v35 = vsel %vm2969_vm13, %v2932_v1, %v10230_v28  ;;  %16866 = vst [vmem:[#allocation55_spill] sm:$0xff] %v13200_v48  ;;  %v325_v28 = vshra.s32 %v16867_v14, 4  ;;  %v332_v1 = vshra.s32 %v13003_v3, 4 }
 0x2e6   :  { %v3047_v63 = vpack.c.bf16 %v2997_v35, %v2996_v56  ;;  %v3380_v56 = vmax.f32 %v3251_v49, 0.0  ;;  %v2933_v3 = vsel %vm1748_vm12, %v2097_v6, %v10244_v15  ;;  %v16875_v6 = vld [vmem:[#allocation52_spill] sm:$0xff]  ;;  %vm2192_vm2 = vcmp.lt.s32.totalorder %v13200_v48, 15  ;;  %16877 = vst [vmem:[#allocation66_spill] sm:$0xff] %v13248_v33 }
 0x2e7   :  { %v13226_v20 = vand.u32 15, %v325_v28  ;;  %v324_v30 = vshra.s32 %v16875_v6, 4  ;;  %v13244_v11 = vand.u32 15, %v332_v1  ;;  %v2200_v48 = vld [vmem:[#allocation3 + $0x218] sm:$0xff] }
 0x2e8   :  { %9429 = vmatmul.msk.bf16.gmra.mxu0 %vm16864_vm8, %v3047_v63  ;;  %vm13232_vm8 = vcmp.lt.s32.totalorder %v16594_v19, 7  ;;  %v4433_v24 = vsel %vm3872_vm1, %v3380_v56, -inf  ;;  %v3548_v15 = vrot.slane %v3380_v56, 2  ;;  %v3549_v54 = vrot.slane %v3380_v56, 4 }
 0x2e9   :  { %16871 = vst [vmem:[#allocation39_spill] sm:$0xff] %v13226_v20  ;;  %v3550_v28 = vrot.slane %v3380_v56, 6  ;;  %vm2191_vm9 = vcmp.lt.s32.totalorder %v13244_v11, 15  ;;  %v13258_v57 = vand.u32 15, %v324_v30  ;;  %v4434_v9 = vrot.slane %v4433_v24, 4 }
 0x2ea   :  { %10342 = vrot.lane.b32.xlu2 %v10341_v53, %s10655_s17  ;;  %v1292_v7 = vpop.permute.xlu0 %1291  ;;  %16876 = vst [vmem:[#allocation61_spill] sm:$0xff] %v13244_v11  ;;  %v4440_v41 = vsel %vm3872_vm1, %v3548_v15, -inf  ;;  %v13286_v30 = vld [vmem:[%s16494_s2] ss:$0 sm:$0xff]  ;;  %v10524_v15 = vld [vmem:[#allocation3 + $0xf0] sm:$0xff]  ;;  %v10239_v19 = vunpack.i.l.bf16 %v13163_v50 }
 0x2eb   :  { %v1679_v16 = vsel %vm402_vm0, %v783_v31, %v1292_v7  ;;  %v326_v31 = vshra.s32 %v13099_v40, 4  ;;  %v13256_v40 = vadd.s32 496, %v10741_v4  ;;  %16879 = vst [vmem:[#allocation60_spill] sm:$0xff] %v13258_v57  ;;  %v13281_v6 = vmax.f32 %v4433_v24, %v4434_v9  ;;  %v10526_v9 = vld [vmem:[#allocation3 + $0x188] sm:$0xff]  ;;  %v2199_v50 = vld [vmem:[#allocation3 + $0x210] sm:$0xff] }
 0x2ec   :  { %v13217_v35 = vsel %vm1683_vm11, %v1679_v16, %v13146_v43  ;;  %v2388_v16 = vsel %vm2192_vm2, %v1940_v18, 0.0  ;;  %vm2183_vm14 = vcmp.lt.s32.totalorder %v13258_v57, 15  ;;  %v13292_v18 = vld [vmem:[#allocation3 + $0x1c8] sm:$0xff]  ;;  %vm2186_vm2 = vcmp.lt.s32.totalorder %v13238_v45, 15  ;;  %v10258_v45 = vpop.permute.xlu2 %10257 }
 0x2ed   :  { %v10253_v32 = vpop.permute.xlu1 %10252  ;;  %1809 = vst.msk [vmem:[#allocation3 + $0x1f0] sm:$0xff] %vm1748_vm12, %v13217_v35  ;;  %v2382_v38 = vsel %vm2186_vm2, %v13292_v18, 0.0 }
 0x2ee   :  { %v10255_v5 = vunpack.i.h.bf16 %v10253_v32  ;;  %v10254_v8 = vunpack.i.l.bf16 %v10253_v32  ;;  %v13261_v32 = vand.u32 15, %v326_v31  ;;  %v13289_v31 = vld [vmem:[#allocation3 + $0x1b0] sm:$0xff]  ;;  %16883 = vst [vmem:[#allocation41_spill] sm:$0xff] %v13292_v18 }
 0x2ef   :  { %v2379_v52 = vsel %vm2183_vm14, %v13289_v31, 0.0 }
 0x2f0   :  { %v2998_v53 = vsel %vm2969_vm13, %v2933_v3, %v10254_v8  ;;  %v2999_v43 = vsel %vm2969_vm13, %v2934_v37, %v10255_v5  ;;  %16880 = vst [vmem:[#allocation64_spill] sm:$0xff] %v13261_v32  ;;  %v13273_v37 = vld [vmem:[#allocation4 + $0x11] sm:$0xff]  ;;  %v4454_v3 = vsel %vm3872_vm1, %v3550_v28, -inf  ;;  %v10525_v28 = vld [vmem:[#allocation3 + $0x180] sm:$0xff]  ;;  %vm2185_vm7 = vcmp.lt.s32.totalorder %v13261_v32, 15 }
 0x2f1   :  { %v3048_v49 = vpack.c.bf16 %v2999_v43, %v2998_v53  ;;  %v336_v43 = vshra.s32 %v13256_v40, 4  ;;  %v4455_v47 = vrot.slane %v4454_v3, 4 }
 0x2f2   :  { %v1534_v7 = vpop.permute.xlu0 %1533 }
 0x2f3   :  { %v1737_v1 = vsel %vm1683_vm11, %v1672_v22, %v1534_v7  ;;  %v3253_v22 = vadd.f32 %v13286_v30, %v3252_v39  ;;  %v13306_v7 = vsel %vm1861_vm3, %v10525_v28, 0.0  ;;  %v13313_v39 = vld [vmem:[#allocation3 + $0x1c0] sm:$0xff]  ;;  %vm2196_vm3 = vcmp.lt.s32.totalorder %v13248_v33, 15 }
 0x2f4   :  { %1802 = vst.msk [vmem:[#allocation3 + $0x1b8] sm:$0xff] %vm1748_vm12, %v1737_v1  ;;  %v10361_v5 = vpack.i.bf16 %v1737_v1, %v13141_v0  ;;  %v1939_v56 = vld [vmem:[#allocation3 + $0x1f0] sm:$0xff]  ;;  %v4447_v0 = vsel %vm3872_vm1, %v3549_v54, -inf  ;;  %v13302_v54 = vsel %vm1843_vm15, %v10524_v15, 0.0  ;;  %v13310_v1 = vsel %vm1862_vm4, %v10526_v9, 0.0  ;;  %v1552_v8 = vpop.permute.xlu2 %1551 }
 0x2f5   :  { %v2387_v46 = vsel %vm2191_vm9, %v1939_v56, 0.0  ;;  %vm16884_vm9 = vcmask 293888   ;;  %16885 = vst [vmem:[#allocation68_spill] sm:$0xff] %v13306_v7  ;;  %v13322_v56 = vand.u32 15, %v336_v43  ;;  %v2381_v24 = vsel %vm2185_vm7, %v13313_v39, 0.0  ;;  %v10530_v7 = vld [vmem:[#allocation3 + $0x108] sm:$0xff] }
 0x2f6   :  { %10362 = vrot.lane.b32.xlu0 %v10361_v5, %s10655_s17  ;;  %v10356_v53 = vpack.i.bf16 %v2388_v16, %v2387_v46  ;;  %v4448_v16 = vrot.slane %v4447_v0, 4  ;;  %16886 = vst [vmem:[#allocation67_spill] sm:$0xff] %v13313_v39  ;;  %v4436_v46 = vrot.slane %v13281_v6, 2  ;;  %v10371_v12 = vpack.i.bf16 %v2382_v38, %v2381_v24  ;;  %v16890_v38 = vld [vmem:[#allocation48_spill] sm:$0xff] }
 0x2f7   :  { %16887 = vst [vmem:[#allocation57_spill] sm:$0xff] %v13322_v56  ;;  %vm2195_vm15 = vcmp.lt.s32.totalorder %v13322_v56, 15  ;;  %v4456_v24 = vmax.f32 %v4454_v3, %v4455_v47  ;;  %vm16889_vm7 = vcmask 293888   ;;  %vm1847_vm4 = vcmp.gt.s32.totalorder %v16890_v38, 0 }
 0x2f8   :  { %10357 = vrot.lane.b32.xlu2 %v10356_v53, %s10656_s18  ;;  %9430 = vmatmul.msk.bf16.gmra.mxu0 %vm16884_vm9, %v3048_v49  ;;  %v4441_v49 = vrot.slane %v4440_v41, 4  ;;  %vm2184_vm9 = vcmp.lt.s32.totalorder %v13226_v20, 15  ;;  %v13325_v53 = vmax.f32 %v3253_v22, 0.0  ;;  %v4449_v39 = vmax.f32 %v4447_v0, %v4448_v16 }
 0x2f9   :  { %v2391_v0 = vsel %vm2195_vm15, %v2199_v50, 0.0 }
 0x2fa   :  { %v10233_v5 = vpop.permute.xlu0 %10232  ;;  %v4442_v11 = vmax.f32 %v4440_v41, %v4441_v49  ;;  %v16891_v41 = vld [vmem:[#allocation44_spill] sm:$0xff]  ;;  %v4450_v47 = vrot.slane %v4449_v39, 2 }
 0x2fb   :  { %v10235_v15 = vunpack.i.h.bf16 %v10233_v5  ;;  %v10234_v28 = vunpack.i.l.bf16 %v10233_v5  ;;  %v13327_v9 = vld [vmem:[#allocation3 + $0x1b8] sm:$0xff]  ;;  %v3255_v5 = vpop.f32.mrf.mxu0  ;;  %vm1848_vm14 = vcmp.gt.s32.totalorder %v16891_v41, 0 }
 0x2fc   :  { %v2380_v14 = vsel %vm2184_vm9, %v13327_v9, 0.0  ;;  %v4443_v16 = vrot.slane %v4442_v11, 2  ;;  %vm16895_vm9 = vmmov %vm16889_vm7 }
 0x2fd   :  { %v2950_v43 = vsel %vm1748_vm12, %v13197_v62, %v10235_v15  ;;  %v2949_v22 = vsel %vm1748_vm12, %v13188_v21, %v10234_v28  ;;  %v10351_v32 = vpack.i.bf16 %v2380_v14, %v2379_v52  ;;  %v4461_v62 = vsel %vm3872_vm1, %v13325_v53, -inf }
 0x2fe   :  { %v3014_v20 = vsel %vm2969_vm13, %v2949_v22, %v10239_v19  ;;  %v3015_v57 = vsel %vm2969_vm13, %v2950_v43, %v10240_v17  ;;  %v10260_v14 = vunpack.i.h.bf16 %v10258_v45  ;;  %v3256_v19 = vadd.f32 %v13286_v30, %v3255_v5  ;;  %v16888_v17 = vld [vmem:[#allocation29_spill] sm:$0xff] }
 0x2ff   :  { %10352 = vrot.lane.b32.xlu1 %v10351_v32, %s10656_s18  ;;  %v3056_v21 = vpack.c.bf16 %v3015_v57, %v3014_v20  ;;  %v16607_v52 = vand.u32 7, %v16888_v17  ;;  %v2392_v20 = vsel %vm2196_vm3, %v2200_v48, 0.0  ;;  %v10259_v57 = vunpack.i.l.bf16 %v10258_v45  ;;  %v1298_v17 = vpop.permute.xlu1 %1297 }
 0x300   :  { %10372 = vrot.lane.b32.xlu2 %v10371_v12, %s10656_s18  ;;  %v4437_v32 = vmax.f32 %v13281_v6, %v4436_v46  ;;  %v3551_v12 = vrot.slane %v13325_v53, 2  ;;  %v4462_v3 = vrot.slane %v4461_v62, 4  ;;  %v2104_v43 = vsel %vm1848_vm14, %v12967_v27, 0.0 }
 0x301   :  { %9438 = vmatmul.msk.bf16.gmra.mxu2 %vm16889_vm7, %v3056_v21  ;;  %v2103_v22 = vsel %vm1847_vm4, %v12965_v23, 0.0  ;;  %v13358_v5 = vmax.f32 %v3256_v19, 0.0  ;;  %v10386_v50 = vpack.i.bf16 %v2392_v20, %v2391_v0  ;;  %v4457_v21 = vrot.slane %v4456_v24, 2 }
 0x302   :  { %v10248_v49 = vpop.permute.xlu0 %10247  ;;  %v10366_v48 = vpack.i.bf16 %v13076_v58, %v13217_v35  ;;  %v3552_v46 = vrot.slane %v13325_v53, 4  ;;  %v4463_v38 = vmax.f32 %v4461_v62, %v4462_v3  ;;  %v4468_v41 = vsel %vm3872_vm1, %v3551_v12, -inf  ;;  %v3300_v58 = vpop.f32.mrf.mxu2 }
 0x303   :  { %v10250_v15 = vunpack.i.h.bf16 %v10248_v49  ;;  %v10249_v28 = vunpack.i.l.bf16 %v10248_v49  ;;  %v4438_v49 = vrot.slane %v4437_v32, 1  ;;  %v4444_v23 = vmax.f32 %v4442_v11, %v4443_v16  ;;  %v13378_v11 = vld [vmem:[#allocation4 + $0x19] sm:$0xff] }
 0x304   :  { %v3553_v19 = vrot.slane %v13325_v53, 6  ;;  %v4451_v35 = vmax.f32 %v4449_v39, %v4450_v47  ;;  %v3554_v20 = vrot.slane %v13358_v5, 2  ;;  %vm13374_vm2 = vcmp.lt.s32.totalorder %v16607_v52, 7 }
 0x305   :  { %v2940_v45 = vsel %vm1748_vm12, %v2104_v43, %v10250_v15  ;;  %v2939_v6 = vsel %vm1748_vm12, %v2103_v22, %v10249_v28  ;;  %v4458_v53 = vmax.f32 %v4456_v24, %v4457_v21  ;;  %v3555_v12 = vrot.slane %v13358_v5, 4 }
 0x306   :  { %v3004_v27 = vsel %vm2969_vm13, %v2939_v6, %v10259_v57  ;;  %v3005_v0 = vsel %vm2969_vm13, %v2940_v45, %v10260_v14  ;;  %v4469_v57 = vrot.slane %v4468_v41, 4  ;;  %v16894_v14 = vld [vmem:[#allocation21_spill] sm:$0xff]  ;;  %v4464_v39 = vrot.slane %v4463_v38, 2 }
 0x307   :  { %10367 = vrot.lane.b32.xlu1 %v10366_v48, %s10655_s17  ;;  %v3051_v15 = vpack.c.bf16 %v3005_v0, %v3004_v27  ;;  %v4475_v16 = vsel %vm3872_vm1, %v3552_v46, -inf  ;;  %v334_v47 = vshra.s32 %v13155_v55, 4  ;;  %v3301_v28 = vadd.f32 %v13286_v30, %v3300_v58 }
 0x308   :  { %10387 = vrot.lane.b32.xlu2 %v10386_v50, %s10656_s18  ;;  %v4439_v43 = vmax.f32 %v4437_v32, %v4438_v49  ;;  %v4445_v22 = vrot.slane %v4444_v23, 1  ;;  %v4482_v50 = vsel %vm3872_vm1, %v3553_v19, -inf  ;;  %v4452_v21 = vrot.slane %v4451_v35, 1  ;;  %v3257_v49 = vpop.f32.mrf.mxu0 }
 0x309   :  { %9433 = vmatmul.msk.bf16.vlgmr.msra.gmra.mxu1 %vm16895_vm9, %v3051_v15  ;;  %v4489_v45 = vsel %vm3872_vm1, %v13358_v5, -inf  ;;  %v4496_v6 = vsel %vm3872_vm1, %v3554_v20, -inf  ;;  %v272_v55 = vand.u32 15, %v13256_v40  ;;  %v4459_v46 = vrot.slane %v4458_v53, 1 }
 0x30a   :  { %v1296_v48 = vpop.permute.xlu0 %1295  ;;  %v4470_v27 = vmax.f32 %v4468_v41, %v4469_v57  ;;  %v4476_v0 = vrot.slane %v4475_v16, 4  ;;  %v4503_v32 = vsel %vm3872_vm1, %v3555_v12, -inf  ;;  %v4465_v19 = vmax.f32 %v4463_v38, %v4464_v39  ;;  %v593_v57 = vld [vmem:[#allocation2 + $0x1f7] sm:$0xff] }
 0x30b   :  { %v4483_v58 = vrot.slane %v4482_v50, 4  ;;  %v13395_v15 = vand.u32 15, %v334_v47  ;;  %v13397_v52 = vmax.f32 %v3301_v28, 0.0  ;;  %v4446_v24 = vmax.f32 %v4444_v23, %v4445_v22  ;;  %v594_v22 = vld [vmem:[#allocation2 + $0x1ff] sm:$0xff] }
 0x30c   :  { %v3556_v3 = vrot.slane %v13358_v5, 6  ;;  %v4490_v33 = vrot.slane %v4489_v45, 4  ;;  %v4497_v56 = vrot.slane %v4496_v6, 4  ;;  %v4453_v20 = vmax.f32 %v4451_v35, %v4452_v21 }
 0x30d   :  { %16896 = vst [vmem:[#allocation40_spill] sm:$0xff] %v13395_v15  ;;  %v4504_v40 = vrot.slane %v4503_v32, 4  ;;  %vm13400_vm15 = vcmp.gt.s32.totalorder %v272_v55, 0  ;;  %v3258_v38 = vadd.f32 %v13286_v30, %v3257_v49  ;;  %v16899_v12 = vsel %vm13267_vm10, %v13273_v37, 0.0 }
 0x30e   :  { %v13410_v23 = vmax.f32 %v4458_v53, %v4459_v46  ;;  %v13413_v5 = vsel %vm402_vm0, %v4439_v43, -inf  ;;  %v4471_v35 = vrot.slane %v4470_v27, 2  ;;  %v4477_v39 = vmax.f32 %v4475_v16, %v4476_v0 }
 0x30f   :  { %v4466_v47 = vrot.slane %v4465_v19, 1  ;;  %v13415_v28 = vmax.f32 %v4482_v50, %v4483_v58  ;;  %v3608_v21 = vrot.slane %v13397_v52, 2  ;;  %v4993_v55 = vsel %vm3872_vm1, %v13397_v52, -inf }
 0x310   :  { %6602 = vrot.lane.b32.xlu2 %v16899_v12, %s10654_s29  ;;  %vm1850_vm10 = vcmp.gt.s32.totalorder %v13057_v29, 0  ;;  %v4491_v37 = vmax.f32 %v4489_v45, %v4490_v33  ;;  %v4498_v53 = vmax.f32 %v4496_v6, %v4497_v56  ;;  %v4510_v46 = vsel %vm3872_vm1, %v3556_v3, -inf }
 0x311   :  { %v785_v43 = vsel %vm13400_vm15, %v593_v57, 0.0  ;;  %v13425_v16 = vsel %vm402_vm0, %v4446_v24, -inf  ;;  %v4505_v50 = vmax.f32 %v4503_v32, %v4504_v40  ;;  %v3609_v0 = vrot.slane %v13397_v52, 4 }
 0x312   :  { %v13428_v49 = vmax.f32 %v3258_v38, 0.0  ;;  %v13431_v58 = vsel %vm402_vm0, %v4453_v20, -inf  ;;  %v4478_v12 = vrot.slane %v4477_v39, 2  ;;  %v1682_v33 = vsel %vm402_vm0, %v594_v22, %v1298_v17  ;;  %v1554_v45 = vpop.permute.xlu0 %1553 }
 0x313   :  { %v4994_v56 = vrot.slane %v4993_v55, 4  ;;  %v13434_v3 = vmax.f32 %v4470_v27, %v4471_v35  ;;  %v4511_v6 = vrot.slane %v4510_v46, 4  ;;  %v1681_v41 = vsel %vm402_vm0, %v785_v43, %v1296_v48  ;;  %v13454_v43 = vpop.permute.xlu1 %10262 }
 0x314   :  { %v5000_v24 = vsel %vm3872_vm1, %v3608_v21, -inf  ;;  %v13438_v32 = vmax.f32 %v4465_v19, %v4466_v47  ;;  %v4492_v57 = vrot.slane %v4491_v37, 2  ;;  %v4499_v38 = vrot.slane %v4498_v53, 2  ;;  %v13458_v63 = vpop.permute.xlu2 %10267 }
 0x315   :  { %v4506_v20 = vrot.slane %v4505_v50, 2  ;;  %v5007_v18 = vsel %vm3872_vm1, %v3609_v0, -inf  ;;  %v3557_v17 = vrot.slane %v13428_v49, 2  ;;  %v1747_v22 = vsel %vm1683_vm11, %v1682_v33, %v1554_v45 }
 0x316   :  { %v16900_v48 = vsel %vm13232_vm8, %v13236_v42, 0.0  ;;  %v13449_v27 = vmax.f32 %v4477_v39, %v4478_v12  ;;  %v4995_v19 = vmax.f32 %v4993_v55, %v4994_v56  ;;  %v5001_v35 = vrot.slane %v5000_v24, 4  ;;  %1812 = vst.msk [vmem:[#allocation3 + $0x208] sm:$0xff] %vm1748_vm12, %v1747_v22 }
 0x317   :  { %v1746_v47 = vsel %vm1683_vm11, %v1681_v41, %v1552_v8  ;;  %v4512_v0 = vmax.f32 %v4510_v46, %v4511_v6  ;;  %v3610_v33 = vrot.slane %v13397_v52, 6  ;;  %v4493_v42 = vmax.f32 %v4491_v37, %v4492_v57 }
 0x318   :  { %6600 = vrot.lane.b32.xlu2 %v16900_v48, %s10654_s29  ;;  %v10381_v45 = vpack.i.bf16 %v1747_v22, %v1746_v47  ;;  %1811 = vst.msk [vmem:[#allocation3 + $0x200] sm:$0xff] %vm1748_vm12, %v1746_v47  ;;  %v5008_v39 = vrot.slane %v5007_v18, 4  ;;  %v4517_v55 = vsel %vm3872_vm1, %v13428_v49, -inf  ;;  %vm1845_vm8 = vcmp.gt.s32.totalorder %v13089_v44, 0  ;;  %v3260_v47 = vpop.f32.mrf.mxu0 }
 0x319   :  { %v4500_v8 = vmax.f32 %v4498_v53, %v4499_v38  ;;  %v4507_v12 = vmax.f32 %v4505_v50, %v4506_v20  ;;  %v3558_v56 = vrot.slane %v13428_v49, 4  ;;  %v4524_v46 = vsel %vm3872_vm1, %v3557_v17, -inf  ;;  %v10527_v50 = vld [vmem:[#allocation3 + $0x100] sm:$0xff] }
 0x31a   :  { %10382 = vrot.lane.b32.xlu1 %v10381_v45, %s10655_s17  ;;  %v4996_v52 = vrot.slane %v4995_v19, 2  ;;  %v5002_v6 = vmax.f32 %v5000_v24, %v5001_v35  ;;  %v13469_v37 = vsel %vm1850_vm10, %v13101_v59, 0.0  ;;  %vm1851_vm3 = vcmp.gt.s32.totalorder %v13050_v34, 0  ;;  %v10528_v45 = vld [vmem:[#allocation3 + $0x130] sm:$0xff] }
 0x31b   :  { %v4513_v41 = vrot.slane %v4512_v0, 2  ;;  %v5014_v44 = vsel %vm3872_vm1, %v3610_v33, -inf  ;;  %v4518_v53 = vrot.slane %v4517_v55, 4  ;;  %v13473_v57 = vsel %vm1845_vm8, %v10527_v50, 0.0  ;;  %v13478_v33 = vpop.permute.xlu0 %10272  ;;  %v13485_v21 = vpop.permute.xlu1 %10277 }
 0x31c   :  { %16901 = vst [vmem:[#allocation42_spill] sm:$0xff] %v13473_v57  ;;  %v5009_v38 = vmax.f32 %v5007_v18, %v5008_v39  ;;  %v4525_v20 = vrot.slane %v4524_v46, 4  ;;  %vm1846_vm7 = vcmp.gt.s32.totalorder %v13092_v61, 0  ;;  %vm1852_vm4 = vcmp.gt.s32.totalorder %v13048_v60, 0  ;;  %v10529_v57 = vld [vmem:[#allocation3 + $0x138] sm:$0xff] }
 0x31d   :  { %v4494_v24 = vrot.slane %v4493_v42, 1  ;;  %v4501_v17 = vrot.slane %v4500_v8, 1  ;;  %v4508_v29 = vrot.slane %v4507_v12, 1  ;;  %v4531_v59 = vsel %vm3872_vm1, %v3558_v56, -inf }
 0x31e   :  { %v4997_v22 = vmax.f32 %v4995_v19, %v4996_v52  ;;  %v5003_v48 = vrot.slane %v5002_v6, 2  ;;  %v5015_v35 = vrot.slane %v5014_v44, 4  ;;  %v13482_v18 = vsel %vm1851_vm3, %v10528_v45, 0.0 }
 0x31f   :  { %v4514_v39 = vmax.f32 %v4512_v0, %v4513_v41  ;;  %v3559_v50 = vrot.slane %v13428_v49, 6  ;;  %v4519_v40 = vmax.f32 %v4517_v55, %v4518_v53  ;;  %v13489_v19 = vsel %vm1852_vm4, %v10529_v57, 0.0  ;;  %v16903_v49 = vld [vmem:[#allocation65_spill] sm:$0xff]  ;;  %v13497_v55 = vpop.permute.xlu2 %10282 }
 0x320   :  { %v5010_v56 = vrot.slane %v5009_v38, 2  ;;  %v4526_v52 = vmax.f32 %v4524_v46, %v4525_v20  ;;  %v4532_v36 = vrot.slane %v4531_v59, 4  ;;  %v13493_v34 = vsel %vm1846_vm7, %v10530_v7, 0.0  ;;  %v13505_v46 = vld [vmem:[#allocation4 + $0x7] sm:$0xff] }
 0x321   :  { %16902 = vst [vmem:[#allocation37_spill] sm:$0xff] %v13493_v34  ;;  %v4495_v45 = vmax.f32 %v4493_v42, %v4494_v24  ;;  %v4502_v0 = vmax.f32 %v4500_v8, %v4501_v17  ;;  %v4509_v41 = vmax.f32 %v4507_v12, %v4508_v29  ;;  %v16904_v60 = vand.u32 7, %v10741_v4  ;;  %v3302_v8 = vpop.f32.mrf.mxu2 }
 0x322   :  { %6540 = vrot.lane.b32.xlu1 %v16903_v49, %s10653_s16  ;;  %v16905_v53 = vmov 0  ;;  %16908 = vst [vmem:[#allocation43_spill] sm:$0xff] %v13505_v46  ;;  %v10265_v61 = vunpack.i.h.bf16 %v13454_v43  ;;  %v4998_v7 = vrot.slane %v4997_v22, 1  ;;  %v5004_v57 = vmax.f32 %v5002_v6, %v5003_v48 }
 0x323   :  { %vm13501_vm14 = vcmp.gt.s32.totalorder %v16904_v60, 0  ;;  %v5016_v42 = vmax.f32 %v5014_v44, %v5015_v35  ;;  %v10264_v12 = vunpack.i.l.bf16 %v13454_v43  ;;  %v4515_v20 = vrot.slane %v4514_v39, 1 }
 0x324   :  { %v16906_v53 = vsel %vm13501_vm14, 4294967295, %v16905_v53  ;;  %v4520_v24 = vrot.slane %v4519_v40, 2  ;;  %v4538_v17 = vsel %vm3872_vm1, %v3559_v50, -inf  ;;  %v5011_v29 = vmax.f32 %v5009_v38, %v5010_v56  ;;  %v13535_v46 = vpop.permute.xlu0 %10287 }
 0x325   :  { %16907 = vst [vmem:[#allocation46_spill] sm:$0xff] %v16906_v53  ;;  %v4527_v49 = vrot.slane %v4526_v52, 2  ;;  %v4533_v60 = vmax.f32 %v4531_v59, %v4532_v36  ;;  %v13514_v34 = vsel %vm402_vm0, %v4495_v45, -inf  ;;  %v13517_v6 = vsel %vm402_vm0, %v4502_v0, -inf  ;;  %v13529_v0 = vpop.permute.xlu1 %10292  ;;  %v16912_v53 = vld [vmem:[#allocation53_spill] sm:$0xff] }
 0x326   :  { %v13520_v44 = vsel %vm402_vm0, %v4509_v41, -inf  ;;  %v3303_v43 = vadd.f32 %v13286_v30, %v3302_v8  ;;  %v4999_v48 = vmax.f32 %v4997_v22, %v4998_v7  ;;  %v5005_v35 = vrot.slane %v5004_v57, 1  ;;  %v3262_v7 = vpop.f32.mrf.mxu0 }
 0x327   :  { %v5017_v38 = vrot.slane %v5016_v42, 2  ;;  %v4539_v50 = vrot.slane %v4538_v17, 4  ;;  %v2952_v36 = vsel %vm1748_vm12, %v13204_v25, %v10265_v61  ;;  %v2951_v59 = vsel %vm1748_vm12, %v13208_v13, %v10264_v12  ;;  %v16909_v61 = vld [vmem:[#allocation51_spill] sm:$0xff]  ;;  %v13558_v13 = vpop.permute.xlu2 %10297 }
 0x328   :  { %v13527_v56 = vmax.f32 %v4514_v39, %v4515_v20  ;;  %v4521_v45 = vmax.f32 %v4519_v40, %v4520_v24  ;;  %v5012_v4 = vrot.slane %v5011_v29, 1  ;;  %v13533_v8 = vmax.f32 %v4526_v52, %v4527_v49 }
 0x329   :  { %v4534_v22 = vrot.slane %v4533_v60, 2  ;;  %v13541_v39 = vmax.f32 %v3303_v43, 0.0  ;;  %v3261_v40 = vadd.f32 %v13286_v30, %v3260_v47  ;;  %v13546_v12 = vmax.f32 %v5004_v57, %v5005_v35  ;;  %v2197_v47 = vld [vmem:[#allocation3 + $0x200] sm:$0xff]  ;;  %v2198_v43 = vld [vmem:[#allocation3 + $0x208] sm:$0xff] }
 0x32a   :  { %6536 = vrot.lane.b32.xlu1 %v16909_v61, %s10653_s16  ;;  %v13548_v52 = vmax.f32 %v5016_v42, %v5017_v38  ;;  %v13551_v20 = vsel %vm402_vm0, %v4999_v48, -inf  ;;  %v13553_v24 = vmax.f32 %v4538_v17, %v4539_v50  ;;  %v4522_v49 = vrot.slane %v4521_v45, 1 }
 0x32b   :  { %16910 = vst [vmem:[#allocation63_spill] sm:$0xff] %v13551_v20  ;;  %v3263_v25 = vadd.f32 %v13286_v30, %v3262_v7  ;;  %vm2193_vm9 = vcmp.lt.s32.totalorder %v13395_v15, 15  ;;  %vm2194_vm15 = vcmp.lt.s32.totalorder %v13219_v10, 15  ;;  %v13560_v57 = vmax.f32 %v5011_v29, %v5012_v4  ;;  %v16911_v7 = vld [vmem:[#allocation54_spill] sm:$0xff] }
 0x32c   :  { %v13563_v35 = vmax.f32 %v4533_v60, %v4534_v22  ;;  %v10275_v17 = vunpack.i.h.bf16 %v13478_v33  ;;  %v5021_v48 = vsel %vm3872_vm1, %v13541_v39, -inf  ;;  %v13568_v38 = vmax.f32 %v3261_v40, 0.0 }
 0x32d   :  { %v10274_v50 = vunpack.i.l.bf16 %v13478_v33  ;;  %vm1867_vm10 = vcmp.gt.s32.totalorder %v16911_v7, 0  ;;  %v2389_v61 = vsel %vm2193_vm9, %v2197_v47, 0.0  ;;  %v2390_v41 = vsel %vm2194_vm15, %v2198_v43, 0.0  ;;  %v6475_v47 = vld [vmem:[#allocation4 + $0x21] sm:$0xff]  ;;  %v13598_v7 = vpop.permute.xlu0 %10302 }
 0x32e   :  { %vm1868_vm8 = vcmp.gt.s32.totalorder %v16912_v53, 0  ;;  %v10270_v4 = vunpack.i.h.bf16 %v13458_v63  ;;  %v13574_v29 = vmax.f32 %v4521_v45, %v4522_v49  ;;  %v4541_v60 = vrot.slane %v13553_v24, 2 }
 0x32f   :  { %v3611_v22 = vrot.slane %v13541_v39, 2  ;;  %v13578_v42 = vmax.f32 %v3263_v25, 0.0  ;;  %v5022_v15 = vrot.slane %v5021_v48, 4  ;;  %v10376_v33 = vpack.i.bf16 %v2390_v41, %v2389_v61  ;;  %v13590_v25 = vpop.permute.xlu1 %10307 }
 0x330   :  { %v10269_v10 = vunpack.i.l.bf16 %v13458_v63  ;;  %v3560_v43 = vrot.slane %v13568_v38, 2  ;;  %v2123_v45 = vsel %vm1867_vm10, %v13289_v31, 0.0  ;;  %v2124_v49 = vsel %vm1868_vm8, %v13327_v9, 0.0 }
 0x331   :  { %10377 = vrot.lane.b32.xlu0 %v10376_v33, %s10656_s18  ;;  %v2960_v63 = vsel %vm1748_vm12, %v2124_v49, %v10270_v4  ;;  %v3016_v41 = vsel %vm2969_vm13, %v2951_v59, %v10274_v50  ;;  %v3017_v61 = vsel %vm2969_vm13, %v2952_v36, %v10275_v17  ;;  %v16913_v40 = vand.u32 7, %v16894_v14 }
 0x332   :  { %6544 = vrot.lane.b32.xlu1 %v13040_v2, %s10653_s16  ;;  %v2959_v31 = vsel %vm1748_vm12, %v2123_v45, %v10269_v10  ;;  %v3057_v9 = vpack.c.bf16 %v3017_v61, %v3016_v41  ;;  %v10280_v2 = vunpack.i.h.bf16 %v13485_v21  ;;  %v10279_v33 = vunpack.i.l.bf16 %v13485_v21 }
 0x333   :  { %vm6459_vm3 = vcmp.lt.s32.totalorder %v16913_v40, 7  ;;  %v10290_v4 = vunpack.i.h.bf16 %v13535_v46  ;;  %v10289_v59 = vunpack.i.l.bf16 %v13535_v46  ;;  %v10285_v36 = vunpack.i.h.bf16 %v13497_v55 }
 0x334   :  { %v6523_v53 = vsel %vm6459_vm3, %v6475_v47, 0.0  ;;  %v13608_v17 = vsel %vm3872_vm1, %v3611_v22, -inf  ;;  %v3562_v50 = vrot.slane %v13568_v38, 6  ;;  %vm16914_vm7 = vcmask 293888   ;;  %v13614_v47 = vpop.permute.xlu2 %10312 }
 0x335   :  { %6606 = vrot.lane.b32.xlu2 %v6523_v53, %s10654_s29  ;;  %9439 = vmatmul.msk.bf16.gmra.mxu2 %vm16914_vm7, %v3057_v9  ;;  %v3025_v10 = vsel %vm2969_vm13, %v2960_v63, %v10280_v2  ;;  %v10284_v40 = vunpack.i.l.bf16 %v13497_v55  ;;  %v13616_v21 = vmax.f32 %v5021_v48, %v5022_v15  ;;  %v13620_v46 = vsel %vm3872_vm1, %v13568_v38, -inf  ;;  %v16915_v63 = vld [vmem:[#allocation49_spill] sm:$0xff]  ;;  %vm16916_vm4 = vmmov %vm16914_vm7 }
 0x336   :  { %v2942_v22 = vsel %vm1748_vm12, %v13469_v37, %v10290_v4  ;;  %v3024_v53 = vsel %vm2969_vm13, %v2959_v31, %v10279_v33  ;;  %v2941_v45 = vsel %vm1748_vm12, %v13150_v26, %v10289_v59  ;;  %v2936_v55 = vsel %vm1748_vm12, %v16915_v63, %v10285_v36  ;;  %v16920_v4 = vld [vmem:[#allocation59_spill] sm:$0xff]  ;;  %vm16921_vm9 = vmmov %vm16916_vm4 }
 0x337   :  { %v3061_v49 = vpack.c.bf16 %v3025_v10, %v3024_v53  ;;  %v2935_v15 = vsel %vm1748_vm12, %v13302_v54, %v10284_v40  ;;  %v10300_v48 = vunpack.i.h.bf16 %v13558_v13  ;;  %v10299_v41 = vunpack.i.l.bf16 %v13558_v13  ;;  %v13655_v63 = vpop.permute.xlu1 %10322  ;;  %vm16922_vm15 = vmmov %vm16916_vm4 }
 0x338   :  { %v10295_v61 = vunpack.i.h.bf16 %v13529_v0  ;;  %v10294_v37 = vunpack.i.l.bf16 %v13529_v0  ;;  %v16917_v31 = vrot.slane %v13434_v3, 1  ;;  %v4480_v9 = vrot.slane %v13449_v27, 1 }
 0x339   :  { %9443 = vmatmul.msk.bf16.vlgmr.msra.gmra.mxu3 %vm16916_vm4, %v3061_v49  ;;  %v16918_v2 = vrot.slane %v13415_v28, 2  ;;  %v16919_v33 = vrot.slane %v13533_v8, 1  ;;  %6538 = vrot.lane.b32.xlu0 %v16920_v4, %s10653_s16  ;;  %v3006_v36 = vsel %vm2969_vm13, %v2941_v45, %v10299_v41  ;;  %vm1869_vm10 = vcmp.gt.s32.totalorder %v13078_v51, 0 }
 0x33a   :  { %v4474_v26 = vmax.f32 %v13434_v3, %v16917_v31  ;;  %v3000_v0 = vsel %vm2969_vm13, %v2935_v15, %v10294_v37  ;;  %v3001_v59 = vsel %vm2969_vm13, %v2936_v55, %v10295_v61  ;;  %v3007_v3 = vsel %vm2969_vm13, %v2942_v22, %v10300_v48 }
 0x33b   :  { %v4486_v54 = vmax.f32 %v13415_v28, %v16918_v2  ;;  %v4530_v13 = vmax.f32 %v13533_v8, %v16919_v33  ;;  %v3049_v40 = vpack.c.bf16 %v3001_v59, %v3000_v0  ;;  %v3052_v53 = vpack.c.bf16 %v3007_v3, %v3006_v36 }
 0x33c   :  { %v4481_v28 = vmax.f32 %v13449_v27, %v4480_v9  ;;  %v10305_v8 = vunpack.i.h.bf16 %v13598_v7  ;;  %v4536_v31 = vrot.slane %v13563_v35, 1  ;;  %v4542_v55 = vmax.f32 %v13553_v24, %v4541_v60 }
 0x33d   :  { %v4487_v49 = vrot.slane %v4486_v54, 1  ;;  %v5795_v22 = vsel %vm402_vm0, %v13527_v56, -inf  ;;  %9434 = vmatmul.msk.bf16.gmra.mxu1 %vm16921_vm9, %v3052_v53  ;;  %v5794_v27 = vsel %vm402_vm0, %v13410_v23, -inf  ;;  %v5797_v15 = vsel %vm402_vm0, %v13438_v32, -inf  ;;  %9431 = vmatmul.msk.bf16.gmra.mxu0 %vm16922_vm15, %v3049_v40 }
 0x33e   :  { %v13652_v10 = vpop.permute.xlu0 %10317  ;;  %v5798_v48 = vsel %vm402_vm0, %v13574_v29, -inf  ;;  %v4537_v41 = vmax.f32 %v13563_v35, %v4536_v31  ;;  %v4543_v24 = vrot.slane %v4542_v55, 1  ;;  %v5796_v60 = vmax.f32 %v5794_v27, %v5795_v22  ;;  %v10328_v35 = vpop.permute.xlu2 %10327 }
 0x33f   :  { %v4488_v45 = vmax.f32 %v4486_v54, %v4487_v49  ;;  %v5799_v61 = vmax.f32 %v5797_v15, %v5798_v48  ;;  %v5800_v56 = vsel %vm402_vm0, %v4474_v26, -inf  ;;  %v5801_v37 = vsel %vm402_vm0, %v4530_v13, -inf  ;;  %v10338_v15 = vpop.permute.xlu1 %10337 }
 0x340   :  { %v5803_v23 = vsel %vm402_vm0, %v4481_v28, -inf  ;;  %v16923_v32 = vmax.f32 %v13413_v5, %v13514_v34  ;;  %v16924_v29 = vmax.f32 %v13425_v16, %v13517_v6  ;;  %v4544_v2 = vmax.f32 %v4542_v55, %v4543_v24 }
 0x341   :  { %v5802_v54 = vmax.f32 %v5800_v56, %v5801_v37  ;;  %v5804_v33 = vsel %vm402_vm0, %v4537_v41, -inf  ;;  %v16925_v26 = vmax.f32 %v13431_v58, %v13520_v44  ;;  %v5029_v4 = vrot.slane %v13608_v17, 4  ;;  %v16935_v37 = vld [vmem:[#allocation41_spill] sm:$0xff] }
 0x342   :  { %v6267_v9 = vsel %vm6225_vm5, %v16924_v29, %v16923_v32  ;;  %v10304_v0 = vunpack.i.l.bf16 %v13598_v7  ;;  %v5805_v5 = vmax.f32 %v5803_v23, %v5804_v33  ;;  %vm16926_vm8 = vcmask 1043459  }
 0x343   :  { %v6268_v13 = vsel %vm6227_vm6, %v16925_v26, %v6267_v9  ;;  %v4546_v16 = vrot.slane %v13620_v46, 4  ;;  %v16927_v6 = vsel %vm13374_vm2, %v13378_v11, 0.0  ;;  %v5806_v59 = vsel %vm402_vm0, %v4488_v45, -inf  ;;  %v16934_v45 = vld [vmem:[#allocation62_spill] sm:$0xff] }
 0x344   :  { %v6269_v34 = vsel %vm16926_vm8, %v5796_v60, %v6268_v13  ;;  %6604 = vrot.lane.b32.xlu0 %v16927_v6, %s10654_s29  ;;  %v5807_v58 = vsel %vm402_vm0, %v4544_v2, -inf  ;;  %vm16928_vm3 = vcmask 1044484   ;;  %v13704_v7 = vsel %vm3872_vm1, %v3560_v43, -inf  ;;  %v16932_v43 = vld [vmem:[#allocation68_spill] sm:$0xff]  ;;  %v16936_v2 = vld [vmem:[#allocation67_spill] sm:$0xff]  ;;  %vm16943_vm8 = vmmov %vm16922_vm15 }
 0x345   :  { %v6270_v44 = vsel %vm16928_vm3, %v5799_v61, %v6269_v34  ;;  %v16929_v36 = vrot.slane %v13568_v38, 4  ;;  %v5808_v62 = vmax.f32 %v5806_v59, %v5807_v58  ;;  %vm16930_vm7 = vcmask 1045509   ;;  %vm16945_vm3 = vmmov %vm16943_vm8 }
 0x346   :  { %v6271_v11 = vsel %vm16930_vm7, %v5802_v54, %v6270_v44  ;;  %v2954_v40 = vsel %vm1748_vm12, %v13310_v1, %v10305_v8  ;;  %vm16931_vm2 = vcmask 1046534   ;;  %v10315_v28 = vunpack.i.h.bf16 %v13614_v47  ;;  %v10333_v31 = vpop.permute.xlu0 %10332  ;;  %v16937_v54 = vld [vmem:[#allocation45_spill] sm:$0xff] }
 0x347   :  { %v13709_v3 = vsel %vm3872_vm1, %v16929_v36, -inf  ;;  %v6272_v53 = vsel %vm16931_vm2, %v5805_v5, %v6271_v11  ;;  %v10314_v49 = vunpack.i.l.bf16 %v13614_v47  ;;  %v2953_v55 = vsel %vm1748_vm12, %v16932_v43, %v10304_v0  ;;  %v16938_v5 = vld [vmem:[#allocation30_spill] sm:$0xff]  ;;  %v16939_v36 = vld [vmem:[#allocation37_spill] sm:$0xff] }
 0x348   :  { %vm16933_vm4 = vcmask 1047559   ;;  %vm1870_vm9 = vcmp.gt.s32.totalorder %v16934_v45, 0  ;;  %v10310_v27 = vunpack.i.h.bf16 %v13590_v25  ;;  %v3019_v8 = vsel %vm2969_vm13, %v2954_v40, %v10315_v28 }
 0x349   :  { %v6273_v22 = vsel %vm16933_vm4, %v5808_v62, %v6272_v53  ;;  %v3018_v1 = vsel %vm2969_vm13, %v2953_v55, %v10314_v49  ;;  %v10330_v47 = vunpack.i.h.bf16 %v10328_v35  ;;  %v10329_v48 = vunpack.i.l.bf16 %v10328_v35  ;;  %v16942_v49 = vld [vmem:[#allocation42_spill] sm:$0xff]  ;;  %vm16949_vm4 = vmmov %vm16945_vm3 }
 0x34a   :  { %6365 = vst.msk [vmem:[#allocation4 + $0x30] sm:$0xff] %vm402_vm0, %v6273_v22  ;;  %6546 = vrot.lane.b32.xlu1 %v6273_v22, %s10653_s16  ;;  %v4553_v41 = vrot.slane %v13704_v7, 4  ;;  %v4566_v24 = vsel %vm3872_vm1, %v3562_v50, -inf  ;;  %v10309_v60 = vunpack.i.l.bf16 %v13590_v25  ;;  %v3058_v61 = vpack.c.bf16 %v3019_v8, %v3018_v1  ;;  %v13740_v25 = vpop.permute.xlu2 %10342 }
 0x34b   :  { %v4560_v56 = vrot.slane %v13709_v3, 4  ;;  %v2126_v23 = vsel %vm1870_vm9, %v16935_v37, 0.0  ;;  %v10340_v32 = vunpack.i.h.bf16 %v10338_v15  ;;  %v10339_v29 = vunpack.i.l.bf16 %v10338_v15  ;;  %vm16956_vm9 = vmmov %vm16945_vm3 }
 0x34c   :  { %v2962_v9 = vsel %vm1748_vm12, %v2126_v23, %v10310_v27  ;;  %v2125_v35 = vsel %vm1869_vm10, %v16936_v2, 0.0  ;;  %9440 = vmatmul.msk.bf16.gmra.mxu2 %vm16922_vm15, %v3058_v61  ;;  %v10325_v38 = vunpack.i.h.bf16 %v13655_v63  ;;  %v10324_v50 = vunpack.i.l.bf16 %v13655_v63  ;;  %6542 = vrot.lane.b32.xlu0 %v16937_v54, %s10653_s16 }
 0x34d   :  { %v2944_v33 = vsel %vm1748_vm12, %v13489_v19, %v10330_v47  ;;  %v2943_v26 = vsel %vm1748_vm12, %v13482_v18, %v10329_v48  ;;  %v10320_v51 = vunpack.i.h.bf16 %v13652_v10  ;;  %v10319_v13 = vunpack.i.l.bf16 %v13652_v10  ;;  %v16946_v47 = vld [vmem:[#allocation61_spill] sm:$0xff] }
 0x34e   :  { %v2961_v0 = vsel %vm1748_vm12, %v2125_v35, %v10309_v60  ;;  %v16620_v34 = vand.u32 7, %v16938_v5  ;;  %v3008_v63 = vsel %vm2969_vm13, %v2943_v26, %v10339_v29  ;;  %v3009_v6 = vsel %vm2969_vm13, %v2944_v33, %v10340_v32  ;;  %v16947_v60 = vld [vmem:[#allocation55_spill] sm:$0xff] }
 0x34f   :  { %v3053_v59 = vpack.c.bf16 %v3009_v6, %v3008_v63  ;;  %v3026_v58 = vsel %vm2969_vm13, %v2961_v0, %v10319_v13  ;;  %v3027_v19 = vsel %vm2969_vm13, %v2962_v9, %v10320_v51  ;;  %v10335_v44 = vunpack.i.h.bf16 %v10333_v31  ;;  %v10531_v35 = vld [vmem:[#allocation3 + $0x1d0] sm:$0xff] }
 0x350   :  { %v4547_v18 = vmax.f32 %v13620_v46, %v4546_v16  ;;  %v2938_v62 = vsel %vm1748_vm12, %v16939_v36, %v10325_v38  ;;  %v3062_v10 = vpack.c.bf16 %v3027_v19, %v3026_v58  ;;  %v10334_v11 = vunpack.i.l.bf16 %v10333_v31  ;;  %v10348_v16 = vpop.permute.xlu0 %10347 }
 0x351   :  { %v4567_v40 = vrot.slane %v4566_v24, 4  ;;  %vm13761_vm10 = vcmp.lt.s32.totalorder %v16620_v34, 7  ;;  %v6476_v28 = vld [vmem:[#allocation4 + $0x29] sm:$0xff]  ;;  %v2937_v43 = vsel %vm1748_vm12, %v16942_v49, %v10324_v50  ;;  %9435 = vmatmul.msk.bf16.gmra.mxu1 %vm16943_vm8, %v3053_v59  ;;  %v3003_v46 = vsel %vm2969_vm13, %v2938_v62, %v10335_v44 }
 0x352   :  { %v3613_v55 = vrot.slane %v13541_v39, 6  ;;  %v5024_v31 = vrot.slane %v13616_v21, 2  ;;  %v16944_v22 = vrot.slane %v13541_v39, 4  ;;  %9444 = vmatmul.msk.bf16.gmra.mxu3 %vm16945_vm3, %v3062_v10  ;;  %v3002_v27 = vsel %vm2969_vm13, %v2937_v43, %v10334_v11  ;;  %v10358_v9 = vpop.permute.xlu2 %10357 }
 0x353   :  { %v4554_v15 = vmax.f32 %v13704_v7, %v4553_v41  ;;  %v4561_v1 = vmax.f32 %v13709_v3, %v4560_v56  ;;  %v3050_v8 = vpack.c.bf16 %v3003_v46, %v3002_v27  ;;  %vm1871_vm7 = vcmp.gt.s32.totalorder %v16946_v47, 0 }
 0x354   :  { %v5035_v45 = vsel %vm3872_vm1, %v16944_v22, -inf  ;;  %v6524_v48 = vsel %vm13761_vm10, %v6476_v28, 0.0  ;;  %vm1872_vm2 = vcmp.gt.s32.totalorder %v16947_v60, 0  ;;  %v10350_v61 = vunpack.i.h.bf16 %v10348_v16 }
 0x355   :  { %v10349_v39 = vunpack.i.l.bf16 %v10348_v16  ;;  %v13784_v37 = vsel %vm402_vm0, %v13546_v12, -inf  ;;  %v5030_v7 = vmax.f32 %v13608_v17, %v5029_v4  ;;  %v4548_v41 = vrot.slane %v4547_v18, 2  ;;  %6608 = vrot.lane.b32.xlu0 %v6524_v48, %s10654_s29  ;;  %9432 = vmatmul.msk.bf16.gmra.mxu0 %vm16949_vm4, %v3050_v8  ;;  %v10532_v4 = vld [vmem:[#allocation3 + $0x1d8] sm:$0xff] }
 0x356   :  { %16948 = vst [vmem:[#allocation50_spill] sm:$0xff] %v13784_v37  ;;  %v4568_v3 = vmax.f32 %v4566_v24, %v4567_v40  ;;  %v5025_v56 = vmax.f32 %v13616_v21, %v5024_v31  ;;  %v5036_v23 = vrot.slane %v5035_v45, 4  ;;  %v5042_v32 = vsel %vm3872_vm1, %v3613_v55, -inf }
 0x357   :  { %v3563_v29 = vrot.slane %v13578_v42, 2  ;;  %v10360_v12 = vunpack.i.h.bf16 %v10358_v9  ;;  %v10359_v2 = vunpack.i.l.bf16 %v10358_v9  ;;  %v2127_v17 = vsel %vm1871_vm7, %v10531_v35, 0.0 }
 0x358   :  { %v2128_v24 = vsel %vm1872_vm2, %v10532_v4, 0.0  ;;  %v4555_v38 = vrot.slane %v4554_v15, 2  ;;  %v4562_v50 = vrot.slane %v4561_v1, 2  ;;  %v2963_v54 = vsel %vm1748_vm12, %v2127_v17, %v10349_v39 }
 0x359   :  { %v2964_v21 = vsel %vm1748_vm12, %v2128_v24, %v10350_v61  ;;  %v5019_v33 = vrot.slane %v13548_v52, 1  ;;  %v5031_v26 = vrot.slane %v5030_v7, 2  ;;  %v4549_v51 = vmax.f32 %v4547_v18, %v4548_v41 }
 0x35a   :  { %v4569_v13 = vrot.slane %v4568_v3, 2  ;;  %v13803_v0 = vsel %vm402_vm0, %v13560_v57, -inf  ;;  %v13805_v63 = vmax.f32 %v5035_v45, %v5036_v23  ;;  %v5043_v6 = vrot.slane %v5042_v32, 4 }
 0x35b   :  { %16950 = vst [vmem:[#allocation58_spill] sm:$0xff] %v13803_v0  ;;  %v4573_v59 = vsel %vm3872_vm1, %v13578_v42, -inf  ;;  %v5026_v58 = vrot.slane %v5025_v56, 1  ;;  %v3564_v19 = vrot.slane %v13578_v42, 4  ;;  %v3028_v44 = vsel %vm2969_vm13, %v2963_v54, %v10359_v2  ;;  %v13841_v54 = vld [vmem:[%s16494_s2] ss:$0 sm:$0xff] }
 0x35c   :  { %16951 = vst [vmem:[#allocation36_spill] sm:$0xff] %v13805_v63  ;;  %v3029_v36 = vsel %vm2969_vm13, %v2964_v21, %v10360_v12  ;;  %v4556_v62 = vmax.f32 %v4554_v15, %v4555_v38  ;;  %v4563_v18 = vmax.f32 %v4561_v1, %v4562_v50  ;;  %v3565_v10 = vrot.slane %v13578_v42, 6 }
 0x35d   :  { %v4580_v57 = vsel %vm3872_vm1, %v3563_v29, -inf  ;;  %v13814_v11 = vmax.f32 %v5030_v7, %v5031_v26  ;;  %v4550_v40 = vrot.slane %v4549_v51, 1  ;;  %v4570_v53 = vmax.f32 %v4568_v3, %v4569_v13 }
 0x35e   :  { %v4574_v28 = vrot.slane %v4573_v59, 4  ;;  %v13817_v43 = vmax.f32 %v13548_v52, %v5019_v33  ;;  %v13819_v46 = vmax.f32 %v5042_v32, %v5043_v6  ;;  %v3063_v16 = vpack.c.bf16 %v3029_v36, %v3028_v44 }
 0x35f   :  { %16952 = vst [vmem:[#allocation38_spill] sm:$0xff] %v13814_v11  ;;  %v13822_v31 = vmax.f32 %v5025_v56, %v5026_v58  ;;  %v4581_v22 = vrot.slane %v4580_v57, 4  ;;  %v4587_v45 = vsel %vm3872_vm1, %v3564_v19, -inf  ;;  %v4557_v27 = vrot.slane %v4556_v62, 1 }
 0x360   :  { %v3305_v49 = vpop.f32.mrf.mxu2  ;;  %16953 = vst [vmem:[#allocation52_spill] sm:$0xff] %v13817_v43  ;;  %v4564_v15 = vrot.slane %v4563_v18, 1  ;;  %v4594_v1 = vsel %vm3872_vm1, %v3565_v10, -inf  ;;  %v4551_v47 = vmax.f32 %v4549_v51, %v4550_v40  ;;  %v4571_v48 = vrot.slane %v4570_v53, 1 }
 0x361   :  { %16954 = vst [vmem:[#allocation48_spill] sm:$0xff] %v13819_v46  ;;  %v3306_v55 = vadd.f32 %v13286_v30, %v3305_v49  ;;  %v4575_v60 = vmax.f32 %v4573_v59, %v4574_v28  ;;  %v4582_v41 = vmax.f32 %v4580_v57, %v4581_v22  ;;  %v4588_v3 = vrot.slane %v4587_v45, 4 }
 0x362   :  { %16955 = vst [vmem:[#allocation44_spill] sm:$0xff] %v13822_v31  ;;  %9445 = vmatmul.msk.bf16.gmra.mxu3 %vm16956_vm9, %v3063_v16  ;;  %v4595_v56 = vrot.slane %v4594_v1, 4  ;;  %v4558_v32 = vmax.f32 %v4556_v62, %v4557_v27  ;;  %v4565_v29 = vmax.f32 %v4563_v18, %v4564_v15  ;;  %v13833_v38 = vmax.f32 %v4570_v53, %v4571_v48 }
 0x363   :  { %v3402_v8 = vmax.f32 %v3306_v55, 0.0  ;;  %v13836_v50 = vsel %vm402_vm0, %v4551_v47, -inf  ;;  %v4576_v21 = vrot.slane %v4575_v60, 2  ;;  %v4583_v26 = vrot.slane %v4582_v41, 2 }
 0x364   :  { %v4589_v59 = vmax.f32 %v4587_v45, %v4588_v3  ;;  %v13844_v58 = vmax.f32 %v4594_v1, %v4595_v56  ;;  %v13847_v36 = vsel %vm402_vm0, %v4558_v32, -inf  ;;  %v13851_v49 = vsel %vm402_vm0, %v4565_v29, -inf }
 0x365   :  { %v3614_v30 = vrot.slane %v3402_v8, 2  ;;  %v3615_v61 = vrot.slane %v3402_v8, 4  ;;  %v3616_v39 = vrot.slane %v3402_v8, 6  ;;  %v5049_v7 = vsel %vm3872_vm1, %v3402_v8, -inf  ;;  %v3265_v24 = vpop.f32.mrf.mxu0 }
 0x366   :  { %v5050_v23 = vrot.slane %v5049_v7, 4  ;;  %v3266_v33 = vadd.f32 %v13841_v54, %v3265_v24  ;;  %v4577_v45 = vmax.f32 %v4575_v60, %v4576_v21  ;;  %v13854_v8 = vmax.f32 %v4582_v41, %v4583_v26  ;;  %v13870_v24 = vpop.permute.xlu2 %10372 }
 0x367   :  { %v5056_v9 = vsel %vm3872_vm1, %v3614_v30, -inf  ;;  %v5063_v12 = vsel %vm3872_vm1, %v3615_v61, -inf  ;;  %v5070_v4 = vsel %vm3872_vm1, %v3616_v39, -inf  ;;  %v16957_v61 = vld [vmem:[#allocation29_spill] sm:$0xff]  ;;  %v4590_v32 = vrot.slane %v4589_v59, 2 }
 0x368   :  { %v5051_v2 = vmax.f32 %v5049_v7, %v5050_v23  ;;  %v5057_v35 = vrot.slane %v5056_v9, 4  ;;  %v5064_v17 = vrot.slane %v5063_v12, 4  ;;  %v5071_v19 = vrot.slane %v5070_v4, 4 }
 0x369   :  { %v3386_v44 = vmax.f32 %v3266_v33, 0.0  ;;  %v16958_v39 = vand.u32 7, %v16957_v61 }
 0x36a   :  { %v5052_v51 = vrot.slane %v5051_v2, 2  ;;  %v5058_v13 = vmax.f32 %v5056_v9, %v5057_v35  ;;  %v5065_v6 = vmax.f32 %v5063_v12, %v5064_v17  ;;  %v5072_v27 = vmax.f32 %v5070_v4, %v5071_v19  ;;  %v3307_v4 = vpop.f32.mrf.mxu2 }
 0x36b   :  { %v3566_v57 = vrot.slane %v3386_v44, 2  ;;  %v3567_v40 = vrot.slane %v3386_v44, 4  ;;  %v3568_v53 = vrot.slane %v3386_v44, 6  ;;  %v4601_v28 = vsel %vm3872_vm1, %v3386_v44, -inf }
 0x36c   :  { %v5053_v62 = vmax.f32 %v5051_v2, %v5052_v51  ;;  %v5059_v18 = vrot.slane %v5058_v13, 2  ;;  %v5066_v10 = vrot.slane %v5065_v6, 2  ;;  %v4602_v15 = vrot.slane %v4601_v28, 4  ;;  %v16962_v2 = vld [vmem:[#allocation60_spill] sm:$0xff] }
 0x36d   :  { %v4608_v1 = vsel %vm3872_vm1, %v3566_v57, -inf  ;;  %vm13858_vm15 = vcmp.gt.s32.totalorder %v16958_v39, 0  ;;  %v4615_v23 = vsel %vm3872_vm1, %v3567_v40, -inf  ;;  %v4622_v60 = vsel %vm3872_vm1, %v3568_v53, -inf }
 0x36e   :  { %v5054_v16 = vrot.slane %v5053_v62, 1  ;;  %v5060_v55 = vmax.f32 %v5058_v13, %v5059_v18  ;;  %v5067_v22 = vmax.f32 %v5065_v6, %v5066_v10  ;;  %v4603_v3 = vmax.f32 %v4601_v28, %v4602_v15  ;;  %v3267_v13 = vpop.f32.mrf.mxu0  ;;  %v16965_v18 = vld [vmem:[#allocation39_spill] sm:$0xff] }
 0x36f   :  { %v4609_v56 = vrot.slane %v4608_v1, 4  ;;  %v4578_v12 = vrot.slane %v4577_v45, 1  ;;  %vm1863_vm10 = vcmp.gt.s32.totalorder %v16962_v2, 0  ;;  %v5073_v35 = vrot.slane %v5072_v27, 2 }
 0x370   :  { %v5055_v47 = vmax.f32 %v5053_v62, %v5054_v16  ;;  %v5061_v48 = vrot.slane %v5060_v55, 1  ;;  %v5068_v30 = vrot.slane %v5067_v22, 1  ;;  %v4616_v26 = vrot.slane %v4615_v23, 4 }
 0x371   :  { %v4623_v51 = vrot.slane %v4622_v60, 4  ;;  %v4604_v44 = vrot.slane %v4603_v3, 2  ;;  %v4610_v62 = vmax.f32 %v4608_v1, %v4609_v56  ;;  %vm1864_vm8 = vcmp.gt.s32.totalorder %v16965_v18, 0  ;;  %v13892_v1 = vld [vmem:[#allocation4 + $0x17] sm:$0xff] }
 0x372   :  { %v5062_v29 = vmax.f32 %v5060_v55, %v5061_v48  ;;  %v5069_v9 = vmax.f32 %v5067_v22, %v5068_v30  ;;  %v13865_v41 = vsel %vm402_vm0, %v5055_v47, -inf  ;;  %v10345_v10 = vunpack.i.h.bf16 %v13740_v25  ;;  %v16966_v48 = vld [vmem:[#allocation22_spill] sm:$0xff]  ;;  %v10534_v56 = vld [vmem:[#allocation3 + $0x190] sm:$0xff] }
 0x373   :  { %16961 = vst [vmem:[#allocation65_spill] sm:$0xff] %v13865_v41  ;;  %v10344_v57 = vunpack.i.l.bf16 %v13740_v25  ;;  %v3308_v40 = vadd.f32 %v13841_v54, %v3307_v4  ;;  %v13887_v28 = vmax.f32 %v4589_v59, %v4590_v32  ;;  %v5074_v55 = vmax.f32 %v5072_v27, %v5073_v35  ;;  %v13900_v25 = vld [vmem:[#allocation4 + $0xf] sm:$0xff]  ;;  %v10535_v32 = vld [vmem:[#allocation3 + $0x198] sm:$0xff] }
 0x374   :  { %v13873_v21 = vsel %vm402_vm0, %v5062_v29, -inf  ;;  %v13876_v33 = vsel %vm402_vm0, %v5069_v9, -inf  ;;  %v13890_v22 = vmax.f32 %v4577_v45, %v4578_v12  ;;  %v4617_v15 = vmax.f32 %v4615_v23, %v4616_v26  ;;  %v16970_v12 = vld [vmem:[#allocation64_spill] sm:$0xff]  ;;  %v16971_v26 = vld [vmem:[#allocation47_spill] sm:$0xff] }
 0x375   :  { %16963 = vst [vmem:[#allocation51_spill] sm:$0xff] %v13873_v21  ;;  %v4624_v47 = vmax.f32 %v4622_v60, %v4623_v51  ;;  %v16967_v30 = vand.u32 7, %v16966_v48  ;;  %v2119_v59 = vsel %vm1863_vm10, %v10534_v56, 0.0  ;;  %v2120_v45 = vsel %vm1864_vm8, %v10535_v32, 0.0  ;;  %v10363_v60 = vpop.permute.xlu0 %10362  ;;  %v10536_v56 = vld [vmem:[#allocation3 + $0x1a0] sm:$0xff]  ;;  %v13922_v32 = vpop.permute.xlu2 %10387  ;;  %v16973_v41 = vld [vmem:[#allocation56_spill] sm:$0xff]  ;;  %vm16984_vm8 = vmmov %vm16956_vm9 }
 0x376   :  { %16964 = vst [vmem:[#allocation54_spill] sm:$0xff] %v13876_v33  ;;  %v4605_v27 = vmax.f32 %v4603_v3, %v4604_v44  ;;  %v4611_v23 = vrot.slane %v4610_v62, 2  ;;  %v13907_v29 = vsel %vm1748_vm12, %v2120_v45, %v10345_v10  ;;  %v13910_v9 = vsel %vm1748_vm12, %v2119_v59, %v10344_v57  ;;  %v10537_v45 = vld [vmem:[#allocation3 + $0x1a8] sm:$0xff]  ;;  %v3270_v17 = vpop.f32.mrf.mxu0 }
 0x377   :  { %vm13896_vm3 = vcmp.gt.s32.totalorder %v16967_v30, 0  ;;  %vm1865_vm7 = vcmp.gt.s32.totalorder %v16970_v12, 0  ;;  %v3403_v35 = vmax.f32 %v3308_v40, 0.0  ;;  %v5075_v4 = vrot.slane %v5074_v55, 1 }
 0x378   :  { %vm1866_vm2 = vcmp.gt.s32.totalorder %v16971_v26, 0  ;;  %v4618_v44 = vrot.slane %v4617_v15, 2  ;;  %v4625_v18 = vrot.slane %v4624_v47, 2  ;;  %v10365_v10 = vunpack.i.h.bf16 %v10363_v60 }
 0x379   :  { %v4606_v30 = vrot.slane %v4605_v27, 1  ;;  %v4612_v40 = vmax.f32 %v4610_v62, %v4611_v23  ;;  %v2121_v59 = vsel %vm1865_vm7, %v10536_v56, 0.0  ;;  %v2122_v12 = vsel %vm1866_vm2, %v10537_v45, 0.0 }
 0x37a   :  { %v10364_v26 = vunpack.i.l.bf16 %v10363_v60  ;;  %v3617_v19 = vrot.slane %v3403_v35, 2  ;;  %v3268_v6 = vadd.f32 %v13841_v54, %v3267_v13  ;;  %v13927_v34 = vmax.f32 %v5074_v55, %v5075_v4 }
 0x37b   :  { %v5077_v3 = vsel %vm3872_vm1, %v3403_v35, -inf  ;;  %v4619_v62 = vmax.f32 %v4617_v15, %v4618_v44  ;;  %v4626_v23 = vmax.f32 %v4624_v47, %v4625_v18  ;;  %v13931_v56 = vsel %vm1748_vm12, %v2122_v12, %v10365_v10  ;;  %v10353_v47 = vpop.permute.xlu1 %10352 }
 0x37c   :  { %16972 = vst [vmem:[#allocation53_spill] sm:$0xff] %v13927_v34  ;;  %v3387_v2 = vmax.f32 %v3268_v6, 0.0  ;;  %v4607_v45 = vmax.f32 %v4605_v27, %v4606_v30  ;;  %v4613_v60 = vrot.slane %v4612_v40, 1  ;;  %v3618_v53 = vrot.slane %v3403_v35, 4 }
 0x37d   :  { %v3271_v13 = vadd.f32 %v13841_v54, %v3270_v17  ;;  %v13935_v16 = vsel %vm1748_vm12, %v2121_v59, %v10364_v26  ;;  %v5078_v42 = vrot.slane %v5077_v3, 4  ;;  %v5084_v55 = vsel %vm3872_vm1, %v3617_v19, -inf }
 0x37e   :  { %v3569_v4 = vrot.slane %v3387_v2, 2  ;;  %v3619_v52 = vrot.slane %v3403_v35, 6  ;;  %v3570_v51 = vrot.slane %v3387_v2, 4  ;;  %v4629_v15 = vsel %vm3872_vm1, %v3387_v2, -inf }
 0x37f   :  { %v3388_v44 = vmax.f32 %v3271_v13, 0.0  ;;  %v4620_v18 = vrot.slane %v4619_v62, 1  ;;  %v4627_v6 = vrot.slane %v4626_v23, 1  ;;  %v4630_v27 = vrot.slane %v4629_v15, 4 }
 0x380   :  { %v4636_v10 = vsel %vm3872_vm1, %v3569_v4, -inf  ;;  %v4614_v30 = vmax.f32 %v4612_v40, %v4613_v60  ;;  %v13941_v17 = vsel %vm402_vm0, %v4607_v45, -inf  ;;  %v5085_v59 = vrot.slane %v5084_v55, 4 }
 0x381   :  { %v3572_v12 = vrot.slane %v3388_v44, 2  ;;  %v5079_v26 = vmax.f32 %v5077_v3, %v5078_v42  ;;  %v5091_v19 = vsel %vm3872_vm1, %v3618_v53, -inf  ;;  %v3571_v35 = vrot.slane %v3387_v2, 6 }
 0x382   :  { %v10354_v57 = vunpack.i.l.bf16 %v10353_v47  ;;  %v4631_v61 = vmax.f32 %v4629_v15, %v4630_v27  ;;  %v4637_v48 = vrot.slane %v4636_v10, 4  ;;  %v4643_v13 = vsel %vm3872_vm1, %v3570_v51, -inf }
 0x383   :  { %v4657_v33 = vsel %vm3872_vm1, %v3388_v44, -inf  ;;  %v4621_v0 = vmax.f32 %v4619_v62, %v4620_v18  ;;  %v5098_v4 = vsel %vm3872_vm1, %v3619_v52, -inf  ;;  %v10355_v40 = vunpack.i.h.bf16 %v10353_v47 }
 0x384   :  { %v4664_v45 = vsel %vm3872_vm1, %v3572_v12, -inf  ;;  %v13948_v60 = vmax.f32 %v4626_v23, %v4627_v6  ;;  %v3573_v21 = vrot.slane %v3388_v44, 4  ;;  %v3574_v42 = vrot.slane %v3388_v44, 6  ;;  %v3310_v52 = vpop.f32.mrf.mxu2 }
 0x385   :  { %v4658_v3 = vrot.slane %v4657_v33, 4  ;;  %v5080_v53 = vrot.slane %v5079_v26, 2  ;;  %v5086_v2 = vmax.f32 %v5084_v55, %v5085_v59  ;;  %v4644_v37 = vrot.slane %v4643_v13, 4 }
 0x386   :  { %v3020_v15 = vsel %vm2969_vm13, %v13910_v9, %v10354_v57  ;;  %v4632_v51 = vrot.slane %v4631_v61, 2  ;;  %v4638_v27 = vmax.f32 %v4636_v10, %v4637_v48  ;;  %v4650_v62 = vsel %vm3872_vm1, %v3571_v35, -inf  ;;  %v3272_v48 = vpop.f32.mrf.mxu0 }
 0x387   :  { %v4665_v18 = vrot.slane %v4664_v45, 4  ;;  %v13956_v23 = vsel %vm402_vm0, %v4614_v30, -inf  ;;  %v5092_v47 = vrot.slane %v5091_v19, 4  ;;  %v3021_v44 = vsel %vm2969_vm13, %v13907_v29, %v10355_v40 }
 0x388   :  { %v4659_v55 = vmax.f32 %v4657_v33, %v4658_v3  ;;  %v4671_v6 = vsel %vm3872_vm1, %v3573_v21, -inf  ;;  %v4678_v9 = vsel %vm3872_vm1, %v3574_v42, -inf  ;;  %v3059_v57 = vpack.c.bf16 %v3021_v44, %v3020_v15 }
 0x389   :  { %v5081_v10 = vmax.f32 %v5079_v26, %v5080_v53  ;;  %v5087_v59 = vrot.slane %v5086_v2, 2  ;;  %v4645_v12 = vmax.f32 %v4643_v13, %v4644_v37  ;;  %v4651_v35 = vrot.slane %v4650_v62, 4 }
 0x38a   :  { %vm1874_vm4 = vcmp.gt.s32.totalorder %v16973_v41, 0  ;;  %v5099_v30 = vrot.slane %v5098_v4, 4  ;;  %v4633_v20 = vmax.f32 %v4631_v61, %v4632_v51  ;;  %v4639_v31 = vrot.slane %v4638_v27, 2  ;;  %9441 = vmatmul.msk.bf16.gmra.mxu2 %vm16956_vm9, %v3059_v57 }
 0x38b   :  { %v4666_v34 = vmax.f32 %v4664_v45, %v4665_v18  ;;  %v4672_v33 = vrot.slane %v4671_v6, 4  ;;  %v4679_v29 = vrot.slane %v4678_v9, 4  ;;  %v3273_v40 = vadd.f32 %v13841_v54, %v3272_v48 }
 0x38c   :  { %v13968_v26 = vsel %vm402_vm0, %v4621_v0, -inf  ;;  %v13970_v37 = vmax.f32 %v5091_v19, %v5092_v47  ;;  %v4660_v13 = vrot.slane %v4659_v55, 2  ;;  %v3311_v42 = vadd.f32 %v13841_v54, %v3310_v52 }
 0x38d   :  { %v5082_v61 = vrot.slane %v5081_v10, 1  ;;  %v13973_v3 = vmax.f32 %v5086_v2, %v5087_v59  ;;  %v4646_v45 = vrot.slane %v4645_v12, 2  ;;  %v13975_v53 = vmax.f32 %v4650_v62, %v4651_v35  ;;  %v16977_v59 = vld [vmem:[#allocation40_spill] sm:$0xff] }
 0x38e   :  { %16974 = vst [vmem:[#allocation49_spill] sm:$0xff] %v13970_v37  ;;  %v4634_v15 = vrot.slane %v4633_v20, 1  ;;  %v13977_v51 = vmax.f32 %v4638_v27, %v4639_v31  ;;  %v4667_v18 = vrot.slane %v4666_v34, 2  ;;  %v3404_v44 = vmax.f32 %v3311_v42, 0.0  ;;  %v10368_v42 = vpop.permute.xlu1 %10367 }
 0x38f   :  { %16975 = vst [vmem:[#allocation59_spill] sm:$0xff] %v13973_v3  ;;  %v4673_v57 = vmax.f32 %v4671_v6, %v4672_v33  ;;  %v4680_v19 = vmax.f32 %v4678_v9, %v4679_v29  ;;  %v3389_v47 = vmax.f32 %v3273_v40, 0.0  ;;  %v13982_v52 = vmax.f32 %v5098_v4, %v5099_v30  ;;  %v3285_v4 = vpop.f32.mrf.mxu1  ;;  %v10538_v29 = vld [vmem:[#allocation3 + $0x1e0] sm:$0xff] }
 0x390   :  { %v4661_v2 = vmax.f32 %v4659_v55, %v4660_v13  ;;  %vm1873_vm10 = vcmp.gt.s32.totalorder %v16977_v59, 0  ;;  %v13985_v62 = vmax.f32 %v5081_v10, %v5082_v61  ;;  %v13988_v27 = vmax.f32 %v4645_v12, %v4646_v45  ;;  %v10539_v61 = vld [vmem:[#allocation3 + $0x1e8] sm:$0xff] }
 0x391   :  { %16976 = vst [vmem:[#allocation68_spill] sm:$0xff] %v13982_v52  ;;  %v13991_v0 = vmax.f32 %v4633_v20, %v4634_v15  ;;  %v4668_v9 = vmax.f32 %v4666_v34, %v4667_v18  ;;  %v3620_v33 = vrot.slane %v3404_v44, 2  ;;  %v4674_v30 = vrot.slane %v4673_v57, 2 }
 0x392   :  { %16978 = vst [vmem:[#allocation62_spill] sm:$0xff] %v13985_v62  ;;  %v4681_v55 = vrot.slane %v4680_v19, 2  ;;  %v2129_v40 = vsel %vm1873_vm10, %v10538_v29, 0.0  ;;  %v3575_v10 = vrot.slane %v3389_v47, 2  ;;  %v4662_v13 = vrot.slane %v4661_v2, 1 }
 0x393   :  { %v2130_v12 = vsel %vm1874_vm4, %v10539_v61, 0.0  ;;  %v10370_v45 = vunpack.i.h.bf16 %v10368_v42  ;;  %v3576_v59 = vrot.slane %v3389_v47, 4  ;;  %v3577_v48 = vrot.slane %v3389_v47, 6 }
 0x394   :  { %v4685_v20 = vsel %vm3872_vm1, %v3389_v47, -inf  ;;  %v5105_v15 = vsel %vm3872_vm1, %v3404_v44, -inf  ;;  %v3286_v34 = vadd.f32 %v13841_v54, %v3285_v4  ;;  %v4669_v18 = vrot.slane %v4668_v9, 1 }
 0x395   :  { %v10369_v31 = vunpack.i.l.bf16 %v10368_v42  ;;  %v3621_v21 = vrot.slane %v3404_v44, 4  ;;  %v5112_v29 = vsel %vm3872_vm1, %v3620_v33, -inf  ;;  %v4675_v6 = vmax.f32 %v4673_v57, %v4674_v30 }
 0x396   :  { %v4682_v35 = vmax.f32 %v4680_v19, %v4681_v55  ;;  %v4692_v62 = vsel %vm3872_vm1, %v3575_v10, -inf  ;;  %v3622_v41 = vrot.slane %v3404_v44, 6  ;;  %v14002_v61 = vsel %vm1748_vm12, %v2130_v12, %v10370_v45 }
 0x397   :  { %v4686_v43 = vrot.slane %v4685_v20, 4  ;;  %v4699_v47 = vsel %vm3872_vm1, %v3576_v59, -inf  ;;  %v5106_v52 = vrot.slane %v5105_v15, 4  ;;  %v4663_v37 = vmax.f32 %v4661_v2, %v4662_v13 }
 0x398   :  { %v4706_v4 = vsel %vm3872_vm1, %v3577_v48, -inf  ;;  %v5113_v3 = vrot.slane %v5112_v29, 4  ;;  %v3394_v42 = vmax.f32 %v3286_v34, 0.0  ;;  %v4670_v46 = vmax.f32 %v4668_v9, %v4669_v18 }
 0x399   :  { %v14007_v33 = vsel %vm1748_vm12, %v2129_v40, %v10369_v31  ;;  %v4693_v57 = vrot.slane %v4692_v62, 4  ;;  %v5119_v19 = vsel %vm3872_vm1, %v3621_v21, -inf  ;;  %v4676_v44 = vrot.slane %v4675_v6, 1 }
 0x39a   :  { %v4700_v30 = vrot.slane %v4699_v47, 4  ;;  %v5126_v55 = vsel %vm3872_vm1, %v3622_v41, -inf  ;;  %v3590_v10 = vrot.slane %v3394_v42, 2  ;;  %v4683_v12 = vrot.slane %v4682_v35, 1 }
 0x39b   :  { %v4687_v45 = vmax.f32 %v4685_v20, %v4686_v43  ;;  %v4707_v59 = vrot.slane %v4706_v4, 4  ;;  %v5107_v2 = vmax.f32 %v5105_v15, %v5106_v52  ;;  %v5114_v13 = vmax.f32 %v5112_v29, %v5113_v3 }
 0x39c   :  { %v5120_v48 = vrot.slane %v5119_v19, 4  ;;  %v4825_v34 = vsel %vm3872_vm1, %v3394_v42, -inf  ;;  %v4832_v9 = vsel %vm3872_vm1, %v3590_v10, -inf  ;;  %v14014_v31 = vsel %vm402_vm0, %v4663_v37, -inf }
 0x39d   :  { %16979 = vst [vmem:[#allocation41_spill] sm:$0xff] %v14014_v31  ;;  %v4694_v40 = vmax.f32 %v4692_v62, %v4693_v57  ;;  %v5127_v21 = vrot.slane %v5126_v55, 4  ;;  %v3591_v18 = vrot.slane %v3394_v42, 4  ;;  %v4677_v63 = vmax.f32 %v4675_v6, %v4676_v44 }
 0x39e   :  { %v14017_v41 = vsel %vm402_vm0, %v4670_v46, -inf  ;;  %v14019_v11 = vmax.f32 %v4699_v47, %v4700_v30  ;;  %v4826_v43 = vrot.slane %v4825_v34, 4  ;;  %v4688_v52 = vrot.slane %v4687_v45, 2 }
 0x39f   :  { %v5108_v3 = vrot.slane %v5107_v2, 2  ;;  %v3592_v20 = vrot.slane %v3394_v42, 6  ;;  %v4833_v15 = vrot.slane %v4832_v9, 4  ;;  %v14021_v29 = vmax.f32 %v4682_v35, %v4683_v12 }
 0x3a0   :  { %v14023_v10 = vmax.f32 %v4706_v4, %v4707_v59  ;;  %v5115_v37 = vrot.slane %v5114_v13, 2  ;;  %v5121_v31 = vmax.f32 %v5119_v19, %v5120_v48  ;;  %v4695_v62 = vrot.slane %v4694_v40, 2 }
 0x3a1   :  { %v5128_v57 = vmax.f32 %v5126_v55, %v5127_v21  ;;  %v4839_v6 = vsel %vm3872_vm1, %v3591_v18, -inf  ;;  %v16980_v46 = vunpack.i.l.bf16 %v13870_v24  ;;  %v14031_v44 = vsel %vm402_vm0, %v4677_v63, -inf }
 0x3a2   :  { %16981 = vst [vmem:[#allocation67_spill] sm:$0xff] %v14031_v44  ;;  %v4827_v35 = vmax.f32 %v4825_v34, %v4826_v43  ;;  %v16982_v4 = vunpack.i.h.bf16 %v13870_v24  ;;  %v14038_v30 = vmax.f32 %v4687_v45, %v4688_v52  ;;  %v14040_v55 = vmax.f32 %v5107_v2, %v5108_v3 }
 0x3a3   :  { %v3022_v47 = vsel %vm2969_vm13, %v13935_v16, %v16980_v46  ;;  %v4834_v12 = vmax.f32 %v4832_v9, %v4833_v15  ;;  %v4846_v59 = vsel %vm3872_vm1, %v3592_v20, -inf  ;;  %v14043_v48 = vmax.f32 %v5114_v13, %v5115_v37  ;;  %v14067_v52 = vpop.permute.xlu0 %10377 }
 0x3a4   :  { %v3023_v19 = vsel %vm2969_vm13, %v13931_v56, %v16982_v4  ;;  %v5122_v16 = vrot.slane %v5121_v31, 2  ;;  %v4840_v63 = vrot.slane %v4839_v6, 4  ;;  %v14045_v18 = vmax.f32 %v4694_v40, %v4695_v62 }
 0x3a5   :  { %v3060_v21 = vpack.c.bf16 %v3023_v19, %v3022_v47  ;;  %v5129_v24 = vrot.slane %v5128_v57, 2  ;;  %v16983_v43 = vrot.slane %v13844_v58, 2  ;;  %v4828_v45 = vrot.slane %v4827_v35, 2 }
 0x3a6   :  { %v4847_v2 = vrot.slane %v4846_v59, 4  ;;  %v4592_v9 = vrot.slane %v13887_v28, 1  ;;  %v4648_v13 = vrot.slane %v13988_v27, 1  ;;  %v5110_v40 = vrot.slane %v14040_v55, 1 }
 0x3a7   :  { %v4598_v56 = vmax.f32 %v13844_v58, %v16983_v43  ;;  %9442 = vmatmul.msk.bf16.gmra.mxu2 %vm16984_vm8, %v3060_v21  ;;  %v4835_v3 = vrot.slane %v4834_v12, 2  ;;  %v16985_v20 = vrot.slane %v13975_v53, 2  ;;  %v5117_v37 = vrot.slane %v14043_v48, 1 }
 0x3a8   :  { %v5123_v58 = vmax.f32 %v5121_v31, %v5122_v16  ;;  %v4841_v62 = vmax.f32 %v4839_v6, %v4840_v63  ;;  %v16986_v46 = vrot.slane %v13977_v51, 1  ;;  %v16987_v4 = vrot.slane %v13854_v8, 1 }
 0x3a9   :  { %v4654_v15 = vmax.f32 %v13975_v53, %v16985_v20  ;;  %v4599_v21 = vrot.slane %v4598_v56, 1  ;;  %v4649_v43 = vmax.f32 %v13988_v27, %v4648_v13  ;;  %v5130_v42 = vmax.f32 %v5128_v57, %v5129_v24 }
 0x3aa   :  { %v4642_v47 = vmax.f32 %v13977_v51, %v16986_v46  ;;  %v4586_v19 = vmax.f32 %v13854_v8, %v16987_v4  ;;  %v4829_v53 = vmax.f32 %v4827_v35, %v4828_v45  ;;  %v4848_v20 = vmax.f32 %v4846_v59, %v4847_v2 }
 0x3ab   :  { %v4655_v34 = vrot.slane %v4654_v15, 1  ;;  %v4593_v31 = vmax.f32 %v13887_v28, %v4592_v9  ;;  %v4836_v6 = vmax.f32 %v4834_v12, %v4835_v3  ;;  %v5819_v51 = vsel %vm402_vm0, %v13948_v60, -inf  ;;  %v3312_v60 = vpop.f32.mrf.mxu2 }
 0x3ac   :  { %v5822_v63 = vsel %vm402_vm0, %v13991_v0, -inf  ;;  %v4842_v8 = vrot.slane %v4841_v62, 2  ;;  %v5818_v27 = vsel %vm402_vm0, %v13833_v38, -inf  ;;  %v5821_v13 = vsel %vm402_vm0, %v13890_v22, -inf }
 0x3ad   :  { %v4656_v16 = vmax.f32 %v4654_v15, %v4655_v34  ;;  %v5825_v57 = vsel %vm402_vm0, %v4642_v47, -inf  ;;  %v4600_v35 = vmax.f32 %v4598_v56, %v4599_v21  ;;  %v5823_v59 = vmax.f32 %v5821_v13, %v5822_v63  ;;  %v14081_v34 = vpop.permute.xlu1 %10382 }
 0x3ae   :  { %v5824_v28 = vsel %vm402_vm0, %v4586_v19, -inf  ;;  %v5828_v12 = vsel %vm402_vm0, %v4649_v43, -inf  ;;  %v5820_v24 = vmax.f32 %v5818_v27, %v5819_v51  ;;  %v5827_v45 = vsel %vm402_vm0, %v4593_v31, -inf }
 0x3af   :  { %v5826_v0 = vmax.f32 %v5824_v28, %v5825_v57  ;;  %v16988_v38 = vmax.f32 %v13836_v50, %v13941_v17  ;;  %v16989_v22 = vmax.f32 %v13847_v36, %v13956_v23  ;;  %v5124_v2 = vrot.slane %v5123_v58, 1  ;;  %v3287_v17 = vpop.f32.mrf.mxu1  ;;  %v14105_v57 = vpop.permute.xlu0 %6538 }
 0x3b0   :  { %v5829_v9 = vmax.f32 %v5827_v45, %v5828_v12  ;;  %v5831_v3 = vsel %vm402_vm0, %v4656_v16, -inf  ;;  %v16990_v15 = vmax.f32 %v13851_v49, %v13968_v26  ;;  %v5131_v47 = vrot.slane %v5130_v42, 1 }
 0x3b1   :  { %v6274_v56 = vsel %vm6225_vm5, %v16989_v22, %v16988_v38  ;;  %v4849_v4 = vrot.slane %v4848_v20, 2  ;;  %vm16991_vm7 = vcmask 1043459   ;;  %v3313_v50 = vadd.f32 %v13841_v54, %v3312_v60 }
 0x3b2   :  { %v6275_v46 = vsel %vm6227_vm6, %v16990_v15, %v6274_v56  ;;  %v4830_v21 = vrot.slane %v4829_v53, 1  ;;  %v4837_v36 = vrot.slane %v4836_v6, 1  ;;  %v5830_v23 = vsel %vm402_vm0, %v4600_v35, -inf }
 0x3b3   :  { %v6276_v19 = vsel %vm16991_vm7, %v5820_v24, %v6275_v46  ;;  %vm16992_vm2 = vcmask 1044484   ;;  %v4843_v31 = vmax.f32 %v4841_v62, %v4842_v8  ;;  %v5832_v16 = vmax.f32 %v5830_v23, %v5831_v3 }
 0x3b4   :  { %v6277_v43 = vsel %vm16992_vm2, %v5823_v59, %v6276_v19  ;;  %vm16993_vm4 = vcmask 1045509   ;;  %v3405_v49 = vmax.f32 %v3313_v50, 0.0  ;;  %v5111_v26 = vmax.f32 %v14040_v55, %v5110_v40  ;;  %v17001_v50 = vld [vmem:[#allocation66_spill] sm:$0xff] }
 0x3b5   :  { %v6278_v51 = vsel %vm16993_vm4, %v5826_v0, %v6277_v43  ;;  %v5118_v63 = vmax.f32 %v14043_v48, %v5117_v37  ;;  %vm16994_vm9 = vcmask 1046534   ;;  %v3288_v13 = vadd.f32 %v13841_v54, %v3287_v17  ;;  %v14110_v48 = vpop.permute.xlu2 %6602  ;;  %v6541_v38 = vpop.permute.xlu1 %6540 }
 0x3b6   :  { %v6279_v27 = vsel %vm16994_vm9, %v5829_v9, %v6278_v51  ;;  %v5125_v28 = vmax.f32 %v5123_v58, %v5124_v2  ;;  %v5132_v12 = vmax.f32 %v5130_v42, %v5131_v47  ;;  %vm16995_vm10 = vcmask 1047559   ;;  %v17000_v47 = vld [vmem:[#allocation57_spill] sm:$0xff] }
 0x3b7   :  { %v6280_v35 = vsel %vm16995_vm10, %v5832_v16, %v6279_v27  ;;  %v3623_v59 = vrot.slane %v3405_v49, 2  ;;  %v4831_v62 = vmax.f32 %v4829_v53, %v4830_v21  ;;  %v4838_v8 = vmax.f32 %v4836_v6, %v4837_v36 }
 0x3b8   :  { %v4850_v60 = vmax.f32 %v4848_v20, %v4849_v4  ;;  %6366 = vst.msk [vmem:[#allocation4 + $0x38] sm:$0xff] %vm402_vm0, %v6280_v35  ;;  %6548 = vrot.lane.b32.xlu2 %v6280_v35, %s10653_s16  ;;  %v3624_v55 = vrot.slane %v3405_v49, 4  ;;  %v16996_v37 = vrot.slane %v14019_v11, 2  ;;  %v4844_v42 = vrot.slane %v4843_v31, 1 }
 0x3b9   :  { %v3625_v24 = vrot.slane %v3405_v49, 6  ;;  %v16997_v53 = vrot.slane %v14038_v30, 1  ;;  %v14124_v6 = vsel %vm402_vm0, %v5111_v26, -inf  ;;  %v5133_v0 = vsel %vm3872_vm1, %v3405_v49, -inf  ;;  %v10540_v49 = vld [vmem:[#allocation3 + $0x1f0] sm:$0xff] }
 0x3ba   :  { %v14116_v58 = vmax.f32 %v14019_v11, %v16996_v37  ;;  %v14127_v45 = vmax.f32 %v3288_v13, 0.0  ;;  %v14130_v22 = vsel %vm402_vm0, %v5118_v63, -inf  ;;  %v14133_v11 = vsel %vm402_vm0, %v5125_v28, -inf  ;;  %v6605_v13 = vpop.permute.xlu0 %6604  ;;  %v10541_v28 = vld [vmem:[#allocation3 + $0x1f8] sm:$0xff] }
 0x3bb   :  { %v14121_v20 = vmax.f32 %v14038_v30, %v16997_v53  ;;  %v14136_v56 = vsel %vm402_vm0, %v5132_v12, -inf  ;;  %v5140_v30 = vsel %vm3872_vm1, %v3623_v59, -inf  ;;  %v4851_v2 = vrot.slane %v4850_v60, 1  ;;  %v17003_v59 = vld [vmem:[#allocation23_spill] sm:$0xff] }
 0x3bc   :  { %v14140_v9 = vsel %vm402_vm0, %v4831_v62, -inf  ;;  %v14143_v3 = vsel %vm402_vm0, %v4838_v8, -inf  ;;  %v5147_v15 = vsel %vm3872_vm1, %v3624_v55, -inf  ;;  %v4845_v46 = vmax.f32 %v4843_v31, %v4844_v42 }
 0x3bd   :  { %16998 = vst [vmem:[#allocation45_spill] sm:$0xff] %v14140_v9  ;;  %vm1875_vm8 = vcmp.gt.s32.totalorder %v17000_v47, 0  ;;  %v5134_v4 = vrot.slane %v5133_v0, 4  ;;  %v5154_v19 = vsel %vm3872_vm1, %v3625_v24, -inf  ;;  %vm1876_vm7 = vcmp.gt.s32.totalorder %v17001_v50, 0  ;;  %v6601_v53 = vpop.permute.xlu2 %6600  ;;  %v6537_v50 = vpop.permute.xlu1 %6536 }
 0x3be   :  { %16999 = vst [vmem:[#allocation37_spill] sm:$0xff] %v14143_v3  ;;  %v10385_v17 = vunpack.i.h.bf16 %v14081_v34  ;;  %v5141_v21 = vrot.slane %v5140_v30, 4  ;;  %v3593_v36 = vrot.slane %v14127_v45, 2  ;;  %v5148_v23 = vrot.slane %v5147_v15, 4 }
 0x3bf   :  { %v3594_v43 = vrot.slane %v14127_v45, 4  ;;  %v4853_v16 = vsel %vm3872_vm1, %v14127_v45, -inf  ;;  %v10379_v31 = vunpack.i.l.bf16 %v14067_v52  ;;  %v14155_v51 = vmax.f32 %v4850_v60, %v4851_v2  ;;  %v6477_v24 = vld [vmem:[#allocation4 + $0x31] sm:$0xff] }
 0x3c0   :  { %v2131_v26 = vsel %vm1875_vm8, %v10540_v49, 0.0  ;;  %v10384_v63 = vunpack.i.l.bf16 %v14081_v34  ;;  %v5155_v27 = vrot.slane %v5154_v19, 4  ;;  %v2132_v12 = vsel %vm1876_vm7, %v10541_v28, 0.0 }
 0x3c1   :  { %17002 = vst [vmem:[#allocation42_spill] sm:$0xff] %v14155_v51  ;;  %v5135_v35 = vmax.f32 %v5133_v0, %v5134_v4  ;;  %v16638_v62 = vand.u32 7, %v17003_v59  ;;  %v10380_v8 = vunpack.i.h.bf16 %v14067_v52  ;;  %v14161_v55 = vsel %vm1748_vm12, %v2132_v12, %v10385_v17 }
 0x3c2   :  { %v5142_v37 = vmax.f32 %v5140_v30, %v5141_v21  ;;  %v4854_v42 = vrot.slane %v4853_v16, 4  ;;  %v4860_v60 = vsel %vm3872_vm1, %v3593_v36, -inf  ;;  %v5149_v2 = vmax.f32 %v5147_v15, %v5148_v23 }
 0x3c3   :  { %v4867_v34 = vsel %vm3872_vm1, %v3594_v43, -inf  ;;  %vm6461_vm2 = vcmp.lt.s32.totalorder %v16638_v62, 7  ;;  %v3030_v0 = vsel %vm2969_vm13, %v14007_v33, %v10379_v31  ;;  %v14170_v52 = vsel %vm1748_vm12, %v2131_v26, %v10384_v63  ;;  %v3315_v33 = vpop.f32.mrf.mxu2 }
 0x3c4   :  { %v5156_v47 = vmax.f32 %v5154_v19, %v5155_v27  ;;  %v3595_v30 = vrot.slane %v14127_v45, 6  ;;  %v17004_v4 = vsel %vm13858_vm15, %v13892_v1, 0.0  ;;  %v5136_v17 = vrot.slane %v5135_v35, 2  ;;  %v17006_v1 = vld [vmem:[#allocation43_spill] sm:$0xff] }
 0x3c5   :  { %v6650_v15 = vsel %vm402_vm0, %v17004_v4, %v6541_v38  ;;  %v4861_v21 = vrot.slane %v4860_v60, 4  ;;  %v6525_v36 = vsel %vm6461_vm2, %v6477_v24, 0.0  ;;  %v3031_v23 = vsel %vm2969_vm13, %v14002_v61, %v10380_v8  ;;  %v3335_v4 = vpop.f32.mrf.mxu3 }
 0x3c6   :  { %v5143_v43 = vrot.slane %v5142_v37, 2  ;;  %v4855_v31 = vmax.f32 %v4853_v16, %v4854_v42  ;;  %v4868_v49 = vrot.slane %v4867_v34, 4  ;;  %6610 = vrot.lane.b32.xlu0 %v6525_v36, %s10654_s29  ;;  %v3064_v45 = vpack.c.bf16 %v3031_v23, %v3030_v0  ;;  %v6543_v0 = vpop.permute.xlu0 %6542 }
 0x3c7   :  { %v5150_v19 = vrot.slane %v5149_v2, 2  ;;  %v17007_v26 = vsel %vm13501_vm14, %v17006_v1, 0.0  ;;  %v17008_v63 = vsel %vm13896_vm3, %v13900_v25, 0.0  ;;  %v14193_v16 = vsel %vm1683_vm11, %v6650_v15, %v6605_v13  ;;  %v6395_v25 = vld [vmem:[#allocation4 + $0x1f] sm:$0xff] }
 0x3c8   :  { %v6648_v38 = vsel %vm402_vm0, %v17007_v26, %v6537_v50  ;;  %v6649_v61 = vsel %vm402_vm0, %v17008_v63, %v14105_v57  ;;  %17009 = vst [vmem:[#allocation61_spill] sm:$0xff] %v14193_v16  ;;  %v14196_v27 = vsel %vm402_vm0, %v4845_v46, -inf  ;;  %vm17011_vm15 = vcmask 293888  }
 0x3c9   :  { %17010 = vst [vmem:[#allocation55_spill] sm:$0xff] %v14196_v27  ;;  %9446 = vmatmul.msk.bf16.gmra.mxu3 %vm17011_vm15, %v3064_v45  ;;  %v14200_v28 = vsel %vm1683_vm11, %v6648_v38, %v6601_v53  ;;  %v14204_v12 = vsel %vm1683_vm11, %v6649_v61, %v14110_v48  ;;  %v3316_v39 = vadd.f32 %v13841_v54, %v3315_v33  ;;  %v5157_v57 = vrot.slane %v5156_v47, 2  ;;  %vm17024_vm4 = vmmov %vm17011_vm15 }
 0x3ca   :  { %17012 = vst [vmem:[#allocation60_spill] sm:$0xff] %v14200_v28  ;;  %v4862_v13 = vmax.f32 %v4860_v60, %v4861_v21  ;;  %v4874_v46 = vsel %vm3872_vm1, %v3595_v30, -inf  ;;  %v5137_v42 = vmax.f32 %v5135_v35, %v5136_v17  ;;  %v4856_v24 = vrot.slane %v4855_v31, 2  ;;  %v6607_v17 = vpop.permute.xlu2 %6606 }
 0x3cb   :  { %17013 = vst [vmem:[#allocation39_spill] sm:$0xff] %v14204_v12  ;;  %v3406_v48 = vmax.f32 %v3316_v39, 0.0  ;;  %v17014_v53 = vand.u32 7, %v16894_v14  ;;  %v5144_v60 = vmax.f32 %v5142_v37, %v5143_v43  ;;  %v5151_v15 = vmax.f32 %v5149_v2, %v5150_v19 }
 0x3cc   :  { %6682 = vst.msk [vmem:[#allocation5 + $0x18] sm:$0xff] %vm1748_vm12, %v14193_v16  ;;  %v14218_v30 = vmax.f32 %v4867_v34, %v4868_v49  ;;  %v5158_v33 = vmax.f32 %v5156_v47, %v5157_v57  ;;  %v3336_v1 = vadd.f32 %v13841_v54, %v3335_v4  ;;  %v4863_v43 = vrot.slane %v4862_v13, 2 }
 0x3cd   :  { %6680 = vst.msk [vmem:[#allocation5 + $0x8] sm:$0xff] %vm1748_vm12, %v14200_v28  ;;  %vm6379_vm14 = vcmp.gt.s32.totalorder %v17014_v53, 0  ;;  %v3626_v21 = vrot.slane %v3406_v48, 2  ;;  %v3627_v36 = vrot.slane %v3406_v48, 4  ;;  %v3628_v23 = vrot.slane %v3406_v48, 6 }
 0x3ce   :  { %6681 = vst.msk [vmem:[#allocation5 + $0x10] sm:$0xff] %vm1748_vm12, %v14204_v12  ;;  %v6443_v50 = vsel %vm6379_vm14, %v6395_v25, 0.0  ;;  %v5161_v35 = vsel %vm3872_vm1, %v3406_v48, -inf  ;;  %v5138_v47 = vrot.slane %v5137_v42, 1  ;;  %v4875_v63 = vrot.slane %v4874_v46, 4 }
 0x3cf   :  { %17015 = vst [vmem:[#allocation64_spill] sm:$0xff] %v14218_v30  ;;  %v5162_v45 = vrot.slane %v5161_v35, 4  ;;  %v6651_v7 = vsel %vm402_vm0, %v6443_v50, %v6543_v0  ;;  %v5168_v26 = vsel %vm3872_vm1, %v3626_v21, -inf  ;;  %v5175_v37 = vsel %vm3872_vm1, %v3627_v36, -inf  ;;  %v6545_v21 = vpop.permute.xlu1 %6544 }
 0x3d0   :  { %v5182_v2 = vsel %vm3872_vm1, %v3628_v23, -inf  ;;  %v14227_v34 = vsel %vm1683_vm11, %v6651_v7, %v6607_v17  ;;  %v5169_v19 = vrot.slane %v5168_v26, 4  ;;  %v5176_v38 = vrot.slane %v5175_v37, 4 }
 0x3d1   :  { %17016 = vst [vmem:[#allocation47_spill] sm:$0xff] %v14227_v34  ;;  %v5163_v49 = vmax.f32 %v5161_v35, %v5162_v45  ;;  %v5183_v61 = vrot.slane %v5182_v2, 4  ;;  %v4857_v25 = vmax.f32 %v4855_v31, %v4856_v24  ;;  %v5145_v0 = vrot.slane %v5144_v60, 1 }
 0x3d2   :  { %6683 = vst.msk [vmem:[#allocation5 + $0x20] sm:$0xff] %vm1748_vm12, %v14227_v34  ;;  %v5170_v48 = vmax.f32 %v5168_v26, %v5169_v19  ;;  %v5177_v53 = vmax.f32 %v5175_v37, %v5176_v38  ;;  %v5152_v4 = vrot.slane %v5151_v15, 1  ;;  %v5159_v50 = vrot.slane %v5158_v33, 1 }
 0x3d3   :  { %v5164_v57 = vrot.slane %v5163_v49, 2  ;;  %v3414_v36 = vmax.f32 %v3336_v1, 0.0  ;;  %v14233_v23 = vmax.f32 %v4862_v13, %v4863_v43  ;;  %v17018_v17 = vunpack.i.l.bf16 %v13922_v32 }
 0x3d4   :  { %v5171_v35 = vrot.slane %v5170_v48, 2  ;;  %v17019_v7 = vunpack.i.h.bf16 %v13922_v32  ;;  %v14244_v26 = vmax.f32 %v4874_v46, %v4875_v63  ;;  %v5178_v37 = vrot.slane %v5177_v53, 2  ;;  %v6396_v46 = vld [vmem:[#allocation4 + $0x27] sm:$0xff] }
 0x3d5   :  { %17017 = vst [vmem:[#allocation56_spill] sm:$0xff] %v14233_v23  ;;  %v3032_v45 = vsel %vm2969_vm13, %v14170_v52, %v17018_v17  ;;  %v5184_v19 = vmax.f32 %v5182_v2, %v5183_v61  ;;  %v5139_v1 = vmax.f32 %v5137_v42, %v5138_v47  ;;  %v4858_v13 = vrot.slane %v4857_v25, 1  ;;  %v3317_v52 = vpop.f32.mrf.mxu2 }
 0x3d6   :  { %v3033_v31 = vsel %vm2969_vm13, %v14161_v55, %v17019_v7  ;;  %17020 = vst [vmem:[#allocation40_spill] sm:$0xff] %v14244_v26  ;;  %v5165_v43 = vmax.f32 %v5163_v49, %v5164_v57  ;;  %v5172_v38 = vmax.f32 %v5170_v48, %v5171_v35  ;;  %v5146_v39 = vmax.f32 %v5144_v60, %v5145_v0  ;;  %v3337_v35 = vpop.f32.mrf.mxu3 }
 0x3d7   :  { %v5153_v8 = vmax.f32 %v5151_v15, %v5152_v4  ;;  %v3065_v40 = vpack.c.bf16 %v3033_v31, %v3032_v45  ;;  %v3650_v62 = vrot.slane %v3414_v36, 2  ;;  %v5160_v17 = vmax.f32 %v5158_v33, %v5159_v50 }
 0x3d8   :  { %v17021_v55 = vand.u32 7, %v16938_v5  ;;  %v3651_v2 = vrot.slane %v3414_v36, 4  ;;  %v5179_v42 = vmax.f32 %v5177_v53, %v5178_v37  ;;  %v5185_v47 = vrot.slane %v5184_v19, 2  ;;  %v6547_v37 = vpop.permute.xlu1 %6546 }
 0x3d9   :  { %9447 = vmatmul.msk.bf16.gmra.mxu3 %vm17024_vm4, %v3065_v40  ;;  %v3652_v60 = vrot.slane %v3414_v36, 6  ;;  %v5385_v15 = vsel %vm3872_vm1, %v3414_v36, -inf  ;;  %v14256_v49 = vsel %vm402_vm0, %v5139_v1, -inf  ;;  %v5166_v33 = vrot.slane %v5165_v43, 1 }
 0x3da   :  { %vm14249_vm3 = vcmp.gt.s32.totalorder %v17021_v55, 0  ;;  %v5173_v63 = vrot.slane %v5172_v38, 1  ;;  %v3318_v61 = vadd.f32 %v13841_v54, %v3317_v52  ;;  %v14260_v57 = vsel %vm402_vm0, %v5146_v39, -inf  ;;  %v6397_v54 = vld [vmem:[#allocation4 + $0x2f] sm:$0xff] }
 0x3db   :  { %v14262_v48 = vmax.f32 %v4857_v25, %v4858_v13  ;;  %v6444_v53 = vsel %vm14249_vm3, %v6396_v46, 0.0  ;;  %v5392_v40 = vsel %vm3872_vm1, %v3650_v62, -inf  ;;  %v14268_v0 = vsel %vm402_vm0, %v5153_v8, -inf  ;;  %v6609_v25 = vpop.permute.xlu0 %6608 }
 0x3dc   :  { %v6652_v4 = vsel %vm402_vm0, %v6444_v53, %v6545_v21  ;;  %v17026_v50 = vand.u32 7, %v17003_v59  ;;  %v5386_v39 = vrot.slane %v5385_v15, 4  ;;  %v5180_v45 = vrot.slane %v5179_v42, 1 }
 0x3dd   :  { %17025 = vst [vmem:[#allocation57_spill] sm:$0xff] %v14262_v48  ;;  %v5186_v31 = vmax.f32 %v5184_v19, %v5185_v47  ;;  %v5399_v62 = vsel %vm3872_vm1, %v3651_v2, -inf  ;;  %v5406_v8 = vsel %vm3872_vm1, %v3652_v60, -inf  ;;  %v5167_v1 = vmax.f32 %v5165_v43, %v5166_v33  ;;  %v14290_v19 = vld [vmem:[%s16494_s2] ss:$0 sm:$0xff] }
 0x3de   :  { %vm14273_vm9 = vcmp.gt.s32.totalorder %v17026_v50, 0  ;;  %v5174_v13 = vmax.f32 %v5172_v38, %v5173_v63  ;;  %v5393_v21 = vrot.slane %v5392_v40, 4  ;;  %v3407_v52 = vmax.f32 %v3318_v61, 0.0 }
 0x3df   :  { %v14280_v55 = vsel %vm402_vm0, %v5160_v17, -inf  ;;  %v6445_v7 = vsel %vm14273_vm9, %v6397_v54, 0.0  ;;  %v14285_v46 = vsel %vm1683_vm11, %v6652_v4, %v6609_v25  ;;  %v3338_v2 = vadd.f32 %v14290_v19, %v3337_v35 }
 0x3e0   :  { %17029 = vst [vmem:[#allocation66_spill] sm:$0xff] %v14285_v46  ;;  %v14294_v43 = vsel %vm402_vm0, %v6445_v7, %v6547_v37  ;;  %v14296_v38 = vmax.f32 %v5385_v15, %v5386_v39  ;;  %v5400_v17 = vrot.slane %v5399_v62, 4  ;;  %v5407_v47 = vrot.slane %v5406_v8, 4 }
 0x3e1   :  { %17030 = vst [vmem:[#allocation46_spill] sm:$0xff] %v14294_v43  ;;  %v5181_v60 = vmax.f32 %v5179_v42, %v5180_v45  ;;  %v5187_v33 = vrot.slane %v5186_v31, 1  ;;  %v3629_v63 = vrot.slane %v3407_v52, 2  ;;  %v3630_v61 = vrot.slane %v3407_v52, 4 }
 0x3e2   :  { %6684 = vst.msk [vmem:[#allocation5 + $0x28] sm:$0xff] %vm1748_vm12, %v14285_v46  ;;  %v5930_v53 = vsel %vm402_vm0, %v5167_v1, -inf  ;;  %v5933_v4 = vsel %vm402_vm0, %v5174_v13, -inf  ;;  %v14302_v50 = vmax.f32 %v5392_v40, %v5393_v21  ;;  %v3631_v36 = vrot.slane %v3407_v52, 6 }
 0x3e3   :  { %v5189_v54 = vsel %vm3872_vm1, %v3407_v52, -inf  ;;  %v5196_v15 = vsel %vm3872_vm1, %v3629_v63, -inf  ;;  %v5203_v39 = vsel %vm3872_vm1, %v3630_v61, -inf  ;;  %v3415_v25 = vmax.f32 %v3338_v2, 0.0 }
 0x3e4   :  { %v5190_v35 = vrot.slane %v5189_v54, 4  ;;  %v5197_v37 = vrot.slane %v5196_v15, 4  ;;  %v5204_v42 = vrot.slane %v5203_v39, 4  ;;  %v5210_v45 = vsel %vm3872_vm1, %v3631_v36, -inf }
 0x3e5   :  { %v5188_v7 = vmax.f32 %v5186_v31, %v5187_v33  ;;  %v5936_v1 = vsel %vm402_vm0, %v5181_v60, -inf  ;;  %v5401_v24 = vmax.f32 %v5399_v62, %v5400_v17  ;;  %v5211_v13 = vrot.slane %v5210_v45, 4 }
 0x3e6   :  { %v5934_v40 = vmax.f32 %v14130_v22, %v5933_v4  ;;  %v5191_v21 = vmax.f32 %v5189_v54, %v5190_v35  ;;  %v5198_v32 = vmax.f32 %v5196_v15, %v5197_v37  ;;  %v5205_v52 = vmax.f32 %v5203_v39, %v5204_v42 }
 0x3e7   :  { %v5931_v63 = vmax.f32 %v14124_v6, %v5930_v53  ;;  %v5388_v61 = vrot.slane %v14296_v38, 2  ;;  %v5408_v2 = vmax.f32 %v5406_v8, %v5407_v47  ;;  %v5212_v59 = vmax.f32 %v5210_v45, %v5211_v13 }
 0x3e8   :  { %v5192_v5 = vrot.slane %v5191_v21, 2  ;;  %v5199_v46 = vrot.slane %v5198_v32, 2  ;;  %v5206_v16 = vrot.slane %v5205_v52, 2  ;;  %v3653_v36 = vrot.slane %v3415_v25, 2 }
 0x3e9   :  { %v5937_v31 = vmax.f32 %v14133_v11, %v5936_v1  ;;  %v5939_v62 = vsel %vm402_vm0, %v5188_v7, -inf  ;;  %v5395_v17 = vrot.slane %v14302_v50, 2  ;;  %v5213_v22 = vrot.slane %v5212_v59, 2 }
 0x3ea   :  { %v6309_v60 = vsel %vm6225_vm5, %v5934_v40, %v5931_v63  ;;  %v5193_v33 = vmax.f32 %v5191_v21, %v5192_v5  ;;  %v5200_v4 = vmax.f32 %v5198_v32, %v5199_v46  ;;  %v5207_v6 = vmax.f32 %v5205_v52, %v5206_v16  ;;  %v3290_v63 = vpop.f32.mrf.mxu1 }
 0x3eb   :  { %v5214_v53 = vmax.f32 %v5212_v59, %v5213_v22  ;;  %v3654_v54 = vrot.slane %v3415_v25, 4  ;;  %v3655_v8 = vrot.slane %v3415_v25, 6  ;;  %v5413_v47 = vsel %vm3872_vm1, %v3415_v25, -inf }
 0x3ec   :  { %v5194_v15 = vrot.slane %v5193_v33, 1  ;;  %v5201_v39 = vrot.slane %v5200_v4, 1  ;;  %v5208_v35 = vrot.slane %v5207_v6, 1  ;;  %v5420_v11 = vsel %vm3872_vm1, %v3653_v36, -inf  ;;  %v3275_v36 = vpop.f32.mrf.mxu0 }
 0x3ed   :  { %v5940_v37 = vmax.f32 %v14136_v56, %v5939_v62  ;;  %v5402_v42 = vrot.slane %v5401_v24, 2  ;;  %v5409_v45 = vrot.slane %v5408_v2, 2  ;;  %v5215_v7 = vrot.slane %v5214_v53, 1 }
 0x3ee   :  { %v5195_v1 = vmax.f32 %v5193_v33, %v5194_v15  ;;  %v5202_v13 = vmax.f32 %v5200_v4, %v5201_v39  ;;  %v5209_v5 = vmax.f32 %v5207_v6, %v5208_v35  ;;  %v5414_v32 = vrot.slane %v5413_v47, 4 }
 0x3ef   :  { %v6310_v59 = vsel %vm6227_vm6, %v5937_v31, %v6309_v60  ;;  %v5216_v16 = vmax.f32 %v5214_v53, %v5215_v7  ;;  %v5421_v46 = vrot.slane %v5420_v11, 4  ;;  %v5427_v25 = vsel %vm3872_vm1, %v3654_v54, -inf }
 0x3f0   :  { %v5942_v40 = vsel %vm402_vm0, %v5195_v1, -inf  ;;  %v5945_v21 = vsel %vm402_vm0, %v5202_v13, -inf  ;;  %v5948_v52 = vsel %vm402_vm0, %v5209_v5, -inf  ;;  %v5434_v56 = vsel %vm3872_vm1, %v3655_v8, -inf }
 0x3f1   :  { %v5943_v62 = vmax.f32 %v14256_v49, %v5942_v40  ;;  %v5946_v22 = vmax.f32 %v14260_v57, %v5945_v21  ;;  %v5949_v31 = vmax.f32 %v14268_v0, %v5948_v52  ;;  %v5951_v60 = vsel %vm402_vm0, %v5216_v16, -inf }
 0x3f2   :  { %vm17031_vm10 = vcmask 1043459   ;;  %v5389_v4 = vmax.f32 %v14296_v38, %v5388_v61  ;;  %v5415_v6 = vmax.f32 %v5413_v47, %v5414_v32  ;;  %v5428_v53 = vrot.slane %v5427_v25, 4  ;;  %v3292_v34 = vpop.f32.mrf.mxu1 }
 0x3f3   :  { %v6311_v33 = vsel %vm17031_vm10, %v5940_v37, %v6310_v59  ;;  %vm17032_vm8 = vcmask 1044484   ;;  %v5435_v15 = vrot.slane %v5434_v56, 4  ;;  %v3291_v8 = vadd.f32 %v14290_v19, %v3290_v63  ;;  %vm17048_vm14 = vmmov %vm17031_vm10 }
 0x3f4   :  { %v6312_v54 = vsel %vm17032_vm8, %v5943_v62, %v6311_v33  ;;  %v3276_v39 = vadd.f32 %v14290_v19, %v3275_v36  ;;  %v5396_v49 = vmax.f32 %v14302_v50, %v5395_v17  ;;  %v5403_v57 = vmax.f32 %v5401_v24, %v5402_v42  ;;  %vm17049_vm3 = vmmov %vm17032_vm8 }
 0x3f5   :  { %v5952_v0 = vmax.f32 %v14280_v55, %v5951_v60  ;;  %vm17033_vm7 = vcmask 1045509   ;;  %vm17034_vm2 = vcmask 1046534   ;;  %v5422_v7 = vmax.f32 %v5420_v11, %v5421_v46  ;;  %vm17063_vm8 = vmmov %vm17048_vm14 }
 0x3f6   :  { %v6313_v35 = vsel %vm17033_vm7, %v5946_v22, %v6312_v54  ;;  %v3396_v38 = vmax.f32 %v3291_v8, 0.0  ;;  %v3390_v61 = vmax.f32 %v3276_v39, 0.0  ;;  %v5410_v47 = vmax.f32 %v5408_v2, %v5409_v45  ;;  %vm17050_vm4 = vmmov %vm17033_vm7 }
 0x3f7   :  { %v6314_v37 = vsel %vm17034_vm2, %v5949_v31, %v6313_v35  ;;  %vm17035_vm15 = vcmask 1047559   ;;  %v5416_v13 = vrot.slane %v5415_v6, 2  ;;  %v5429_v5 = vmax.f32 %v5427_v25, %v5428_v53  ;;  %vm17052_vm9 = vmmov %vm17034_vm2 }
 0x3f8   :  { %v14339_v1 = vsel %vm17035_vm15, %v5952_v0, %v6314_v37  ;;  %v5436_v50 = vmax.f32 %v5434_v56, %v5435_v15  ;;  %v3596_v24 = vrot.slane %v3396_v38, 2  ;;  %v3597_v17 = vrot.slane %v3396_v38, 4  ;;  %vm17054_vm10 = vmmov %vm17035_vm15 }
 0x3f9   :  { %17036 = vst [vmem:[#allocation43_spill] sm:$0xff] %v14339_v1  ;;  %v3598_v55 = vrot.slane %v3396_v38, 6  ;;  %v5390_v42 = vrot.slane %v5389_v4, 1  ;;  %v5397_v32 = vrot.slane %v5396_v49, 1  ;;  %v4881_v59 = vsel %vm3872_vm1, %v3396_v38, -inf  ;;  %vm17064_vm7 = vmmov %vm17049_vm3 }
 0x3fa   :  { %6371 = vst.msk [vmem:[#allocation4 + $0x60] sm:$0xff] %vm402_vm0, %v14339_v1  ;;  %v3578_v11 = vrot.slane %v3390_v61, 2  ;;  %v5423_v16 = vrot.slane %v5422_v7, 2  ;;  %v4882_v46 = vrot.slane %v4881_v59, 4  ;;  %v4888_v2 = vsel %vm3872_vm1, %v3596_v24, -inf  ;;  %vm17065_vm2 = vmmov %vm17050_vm4 }
 0x3fb   :  { %v4895_v45 = vsel %vm3872_vm1, %v3597_v17, -inf  ;;  %v5417_v40 = vmax.f32 %v5415_v6, %v5416_v13  ;;  %v5430_v25 = vrot.slane %v5429_v5, 2  ;;  %v4902_v21 = vsel %vm3872_vm1, %v3598_v55, -inf  ;;  %vm17066_vm15 = vmmov %vm17052_vm9 }
 0x3fc   :  { %v4713_v52 = vsel %vm3872_vm1, %v3390_v61, -inf  ;;  %v5437_v56 = vrot.slane %v5436_v50, 2  ;;  %v3579_v63 = vrot.slane %v3390_v61, 4  ;;  %v4720_v62 = vsel %vm3872_vm1, %v3578_v11, -inf }
 0x3fd   :  { %v4714_v36 = vrot.slane %v4713_v52, 4  ;;  %v5404_v22 = vrot.slane %v5403_v57, 1  ;;  %v4889_v31 = vrot.slane %v4888_v2, 4  ;;  %v4896_v60 = vrot.slane %v4895_v45, 4 }
 0x3fe   :  { %v4721_v33 = vrot.slane %v4720_v62, 4  ;;  %v5391_v53 = vmax.f32 %v5389_v4, %v5390_v42  ;;  %v5411_v54 = vrot.slane %v5410_v47, 1  ;;  %v4883_v15 = vmax.f32 %v4881_v59, %v4882_v46 }
 0x3ff   :  { %v4903_v8 = vrot.slane %v4902_v21, 4  ;;  %v5398_v39 = vmax.f32 %v5396_v49, %v5397_v32  ;;  %v5418_v6 = vrot.slane %v5417_v40, 1  ;;  %v5424_v0 = vmax.f32 %v5422_v7, %v5423_v16 }
 0x400   :  { %v5431_v35 = vmax.f32 %v5429_v5, %v5430_v25  ;;  %v5438_v37 = vmax.f32 %v5436_v50, %v5437_v56  ;;  %v3580_v38 = vrot.slane %v3390_v61, 6  ;;  %v4715_v13 = vmax.f32 %v4713_v52, %v4714_v36  ;;  %v3277_v56 = vpop.f32.mrf.mxu0 }
 0x401   :  { %v4727_v24 = vsel %vm3872_vm1, %v3579_v63, -inf  ;;  %v5405_v17 = vmax.f32 %v5403_v57, %v5404_v22  ;;  %v4890_v55 = vmax.f32 %v4888_v2, %v4889_v31  ;;  %v4897_v11 = vmax.f32 %v4895_v45, %v4896_v60 }
 0x402   :  { %v4722_v1 = vmax.f32 %v4720_v62, %v4721_v33  ;;  %v5412_v14 = vmax.f32 %v5410_v47, %v5411_v54  ;;  %v14351_v4 = vsel %vm402_vm0, %v5391_v53, -inf  ;;  %v4884_v42 = vrot.slane %v4883_v15, 2 }
 0x403   :  { %17037 = vst [vmem:[#allocation69_spill] sm:$0xff] %v14351_v4  ;;  %v4904_v59 = vmax.f32 %v4902_v21, %v4903_v8  ;;  %v5419_v49 = vmax.f32 %v5417_v40, %v5418_v6  ;;  %v5425_v32 = vrot.slane %v5424_v0, 1  ;;  %v5432_v7 = vrot.slane %v5431_v35, 1 }
 0x404   :  { %v4728_v5 = vrot.slane %v4727_v24, 4  ;;  %v5439_v50 = vrot.slane %v5438_v37, 1  ;;  %v4716_v61 = vrot.slane %v4715_v13, 2  ;;  %v4734_v16 = vsel %vm3872_vm1, %v3580_v38, -inf }
 0x405   :  { %v3293_v57 = vadd.f32 %v14290_v19, %v3292_v34  ;;  %v14356_v46 = vsel %vm402_vm0, %v5398_v39, -inf  ;;  %v4891_v2 = vrot.slane %v4890_v55, 2  ;;  %v4898_v47 = vrot.slane %v4897_v11, 2 }
 0x406   :  { %17038 = vst [vmem:[#allocation70_spill] sm:$0xff] %v14356_v46  ;;  %v4723_v45 = vrot.slane %v4722_v1, 2  ;;  %v14359_v25 = vsel %vm402_vm0, %v5405_v17, -inf  ;;  %v14362_v40 = vsel %vm402_vm0, %v5412_v14, -inf  ;;  %v4885_v21 = vmax.f32 %v4883_v15, %v4884_v42 }
 0x407   :  { %17039 = vst [vmem:[#allocation71_spill] sm:$0xff] %v14359_v25  ;;  %v4905_v52 = vrot.slane %v4904_v59, 2  ;;  %v5426_v63 = vmax.f32 %v5424_v0, %v5425_v32  ;;  %v5433_v36 = vmax.f32 %v5431_v35, %v5432_v7  ;;  %v4729_v62 = vmax.f32 %v4727_v24, %v4728_v5 }
 0x408   :  { %17040 = vst [vmem:[#allocation72_spill] sm:$0xff] %v14362_v40  ;;  %v4735_v22 = vrot.slane %v4734_v16, 4  ;;  %v5440_v34 = vmax.f32 %v5438_v37, %v5439_v50  ;;  %v14365_v31 = vsel %vm402_vm0, %v5419_v49, -inf  ;;  %v4717_v60 = vmax.f32 %v4715_v13, %v4716_v61  ;;  %v3320_v61 = vpop.f32.mrf.mxu2 }
 0x409   :  { %17041 = vst [vmem:[#allocation73_spill] sm:$0xff] %v14365_v31  ;;  %v3397_v33 = vmax.f32 %v3293_v57, 0.0  ;;  %v4892_v53 = vmax.f32 %v4890_v55, %v4891_v2  ;;  %v4899_v54 = vmax.f32 %v4897_v11, %v4898_v47  ;;  %v4724_v8 = vmax.f32 %v4722_v1, %v4723_v45 }
 0x40a   :  { %v3278_v39 = vadd.f32 %v14290_v19, %v3277_v56  ;;  %v4886_v14 = vrot.slane %v4885_v21, 1  ;;  %v4906_v6 = vmax.f32 %v4904_v59, %v4905_v52  ;;  %v4730_v17 = vrot.slane %v4729_v62, 2 }
 0x40b   :  { %v3599_v15 = vrot.slane %v3397_v33, 2  ;;  %v3600_v38 = vrot.slane %v3397_v33, 4  ;;  %v4736_v0 = vmax.f32 %v4734_v16, %v4735_v22  ;;  %v3601_v35 = vrot.slane %v3397_v33, 6 }
 0x40c   :  { %v4909_v24 = vsel %vm3872_vm1, %v3397_v33, -inf  ;;  %v4718_v37 = vrot.slane %v4717_v60, 1  ;;  %v3391_v49 = vmax.f32 %v3278_v39, 0.0  ;;  %v4893_v55 = vrot.slane %v4892_v53, 1 }
 0x40d   :  { %v4916_v42 = vsel %vm3872_vm1, %v3599_v15, -inf  ;;  %v4923_v13 = vsel %vm3872_vm1, %v3600_v38, -inf  ;;  %v4725_v11 = vrot.slane %v4724_v8, 1  ;;  %v4910_v1 = vrot.slane %v4909_v24, 4 }
 0x40e   :  { %v4930_v32 = vsel %vm3872_vm1, %v3601_v35, -inf  ;;  %v14373_v59 = vsel %vm402_vm0, %v5426_v63, -inf  ;;  %v14376_v7 = vsel %vm402_vm0, %v5433_v36, -inf  ;;  %v4917_v5 = vrot.slane %v4916_v42, 4 }
 0x40f   :  { %17042 = vst [vmem:[#allocation74_spill] sm:$0xff] %v14373_v59  ;;  %v4924_v50 = vrot.slane %v4923_v13, 4  ;;  %v4900_v16 = vrot.slane %v4899_v54, 1  ;;  %v4731_v57 = vmax.f32 %v4729_v62, %v4730_v17  ;;  %v4931_v2 = vrot.slane %v4930_v32, 4 }
 0x410   :  { %17043 = vst [vmem:[#allocation75_spill] sm:$0xff] %v14376_v7  ;;  %v3581_v47 = vrot.slane %v3391_v49, 2  ;;  %v4887_v45 = vmax.f32 %v4885_v21, %v4886_v14  ;;  %v4907_v52 = vrot.slane %v4906_v6, 1  ;;  %v4719_v56 = vmax.f32 %v4717_v60, %v4718_v37 }
 0x411   :  { %v4737_v22 = vrot.slane %v4736_v0, 2  ;;  %v14379_v33 = vsel %vm402_vm0, %v5440_v34, -inf  ;;  %v4894_v39 = vmax.f32 %v4892_v53, %v4893_v55  ;;  %v4726_v63 = vmax.f32 %v4724_v8, %v4725_v11 }
 0x412   :  { %17044 = vst [vmem:[#allocation76_spill] sm:$0xff] %v14379_v33  ;;  %v4911_v15 = vmax.f32 %v4909_v24, %v4910_v1  ;;  %v4918_v38 = vmax.f32 %v4916_v42, %v4917_v5  ;;  %v4925_v36 = vmax.f32 %v4923_v13, %v4924_v50  ;;  %v3582_v35 = vrot.slane %v3391_v49, 4 }
 0x413   :  { %v4741_v7 = vsel %vm3872_vm1, %v3391_v49, -inf  ;;  %v4901_v59 = vmax.f32 %v4899_v54, %v4900_v16  ;;  %v4732_v31 = vrot.slane %v4731_v57, 1  ;;  %v4932_v62 = vmax.f32 %v4930_v32, %v4931_v2  ;;  %v3322_v2 = vpop.f32.mrf.mxu2 }
 0x414   :  { %v4748_v17 = vsel %vm3872_vm1, %v3581_v47, -inf  ;;  %v4908_v21 = vmax.f32 %v4906_v6, %v4907_v52  ;;  %v14384_v60 = vsel %vm402_vm0, %v4887_v45, -inf  ;;  %v4738_v14 = vmax.f32 %v4736_v0, %v4737_v22 }
 0x415   :  { %v14387_v34 = vsel %vm402_vm0, %v4719_v56, -inf  ;;  %v14390_v53 = vsel %vm402_vm0, %v4726_v63, -inf  ;;  %v4912_v8 = vrot.slane %v4911_v15, 2  ;;  %v4742_v24 = vrot.slane %v4741_v7, 4 }
 0x416   :  { %17045 = vst [vmem:[#allocation77_spill] sm:$0xff] %v14390_v53  ;;  %v3321_v37 = vadd.f32 %v14290_v19, %v3320_v61  ;;  %v4919_v54 = vrot.slane %v4918_v38, 2  ;;  %v4926_v42 = vrot.slane %v4925_v36, 2  ;;  %v4749_v13 = vrot.slane %v4748_v17, 4  ;;  %v17046_v61 = vld [vmem:[#allocation41_spill] sm:$0xff] }
 0x417   :  { %v4755_v55 = vsel %vm3872_vm1, %v3582_v35, -inf  ;;  %v14395_v6 = vsel %vm402_vm0, %v4894_v39, -inf  ;;  %v4733_v11 = vmax.f32 %v4731_v57, %v4732_v31  ;;  %v4933_v0 = vrot.slane %v4932_v62, 2 }
 0x418   :  { %v3583_v1 = vrot.slane %v3391_v49, 6  ;;  %v14398_v32 = vsel %vm402_vm0, %v4901_v59, -inf  ;;  %v14401_v5 = vsel %vm402_vm0, %v4908_v21, -inf  ;;  %v4739_v50 = vrot.slane %v4738_v14, 1 }
 0x419   :  { %v4913_v45 = vmax.f32 %v4911_v15, %v4912_v8  ;;  %v4743_v52 = vmax.f32 %v4741_v7, %v4742_v24  ;;  %v4756_v56 = vrot.slane %v4755_v55, 4  ;;  %v4920_v31 = vmax.f32 %v4918_v38, %v4919_v54 }
 0x41a   :  { %v4927_v57 = vmax.f32 %v4925_v36, %v4926_v42  ;;  %v4750_v49 = vmax.f32 %v4748_v17, %v4749_v13  ;;  %v3408_v22 = vmax.f32 %v3321_v37, 0.0  ;;  %v14408_v59 = vsel %vm402_vm0, %v4733_v11, -inf  ;;  %v3295_v11 = vpop.f32.mrf.mxu1 }
 0x41b   :  { %17047 = vst [vmem:[#allocation41_spill] sm:$0xff] %v14408_v59  ;;  %v4934_v39 = vmax.f32 %v4932_v62, %v4933_v0  ;;  %v4762_v63 = vsel %vm3872_vm1, %v3583_v1, -inf  ;;  %v3323_v35 = vadd.f32 %v14290_v19, %v3322_v2  ;;  %v4914_v15 = vrot.slane %v4913_v45, 1 }
 0x41c   :  { %v3632_v21 = vrot.slane %v3408_v22, 2  ;;  %v3633_v16 = vrot.slane %v3408_v22, 4  ;;  %v3634_v33 = vrot.slane %v3408_v22, 6  ;;  %v5217_v47 = vsel %vm3872_vm1, %v3408_v22, -inf }
 0x41d   :  { %v4744_v7 = vrot.slane %v4743_v52, 2  ;;  %v4757_v8 = vmax.f32 %v4755_v55, %v4756_v56  ;;  %v5218_v38 = vrot.slane %v5217_v47, 4  ;;  %v4921_v36 = vrot.slane %v4920_v31, 1 }
 0x41e   :  { %v4928_v17 = vrot.slane %v4927_v57, 1  ;;  %v4751_v24 = vrot.slane %v4750_v49, 2  ;;  %v5224_v37 = vsel %vm3872_vm1, %v3632_v21, -inf  ;;  %v4763_v54 = vrot.slane %v4762_v63, 4 }
 0x41f   :  { %v5231_v62 = vsel %vm3872_vm1, %v3633_v16, -inf  ;;  %v5238_v42 = vsel %vm3872_vm1, %v3634_v33, -inf  ;;  %v3409_v13 = vmax.f32 %v3323_v35, 0.0  ;;  %v14416_v0 = vmax.f32 %v4738_v14, %v4739_v50 }
 0x420   :  { %v4935_v2 = vrot.slane %v4934_v39, 1  ;;  %v5219_v55 = vmax.f32 %v5217_v47, %v5218_v38  ;;  %v4915_v56 = vmax.f32 %v4913_v45, %v4914_v15  ;;  %v4745_v22 = vmax.f32 %v4743_v52, %v4744_v7 }
 0x421   :  { %v4758_v40 = vrot.slane %v4757_v8, 2  ;;  %v5225_v25 = vrot.slane %v5224_v37, 4  ;;  %v4922_v46 = vmax.f32 %v4920_v31, %v4921_v36  ;;  %v5232_v21 = vrot.slane %v5231_v62, 4 }
 0x422   :  { %v5239_v4 = vrot.slane %v5238_v42, 4  ;;  %v3296_v16 = vadd.f32 %v14290_v19, %v3295_v11  ;;  %v4929_v43 = vmax.f32 %v4927_v57, %v4928_v17  ;;  %v14421_v33 = vmax.f32 %v4750_v49, %v4751_v24 }
 0x423   :  { %v14423_v35 = vmax.f32 %v4762_v63, %v4763_v54  ;;  %v5245_v14 = vsel %vm3872_vm1, %v3409_v13, -inf  ;;  %v4936_v50 = vmax.f32 %v4934_v39, %v4935_v2  ;;  %v5220_v1 = vrot.slane %v5219_v55, 2 }
 0x424   :  { %v3635_v28 = vrot.slane %v3409_v13, 2  ;;  %v3636_v47 = vrot.slane %v3409_v13, 4  ;;  %v14427_v45 = vsel %vm402_vm0, %v4915_v56, -inf  ;;  %v4746_v52 = vrot.slane %v4745_v22, 1 }
 0x425   :  { %v5226_v31 = vmax.f32 %v5224_v37, %v5225_v25  ;;  %v3637_v15 = vrot.slane %v3409_v13, 6  ;;  %v5233_v7 = vmax.f32 %v5231_v62, %v5232_v21  ;;  %v5240_v38 = vmax.f32 %v5238_v42, %v5239_v4 }
 0x426   :  { %v5246_v36 = vrot.slane %v5245_v14, 4  ;;  %v3398_v57 = vmax.f32 %v3296_v16, 0.0  ;;  %v14430_v49 = vsel %vm402_vm0, %v4922_v46, -inf  ;;  %v14433_v63 = vsel %vm402_vm0, %v4929_v43, -inf }
 0x427   :  { %v14436_v17 = vmax.f32 %v4757_v8, %v4758_v40  ;;  %v5221_v54 = vmax.f32 %v5219_v55, %v5220_v1  ;;  %v5252_v25 = vsel %vm3872_vm1, %v3635_v28, -inf  ;;  %v5259_v37 = vsel %vm3872_vm1, %v3636_v47, -inf  ;;  %v3340_v55 = vpop.f32.mrf.mxu3 }
 0x428   :  { %v14442_v4 = vsel %vm402_vm0, %v4936_v50, -inf  ;;  %v14444_v62 = vmax.f32 %v4745_v22, %v4746_v52  ;;  %v5227_v46 = vrot.slane %v5226_v31, 2  ;;  %v5266_v43 = vsel %vm3872_vm1, %v3637_v15, -inf }
 0x429   :  { %v5234_v42 = vrot.slane %v5233_v7, 2  ;;  %v5241_v13 = vrot.slane %v5240_v38, 2  ;;  %v5247_v11 = vmax.f32 %v5245_v14, %v5246_v36  ;;  %v3602_v40 = vrot.slane %v3398_v57, 2 }
 0x42a   :  { %v5253_v8 = vrot.slane %v5252_v25, 4  ;;  %v5260_v2 = vrot.slane %v5259_v37, 4  ;;  %v3603_v56 = vrot.slane %v3398_v57, 4  ;;  %v3604_v1 = vrot.slane %v3398_v57, 6 }
 0x42b   :  { %v5222_v28 = vrot.slane %v5221_v54, 1  ;;  %v5267_v21 = vrot.slane %v5266_v43, 4  ;;  %v4937_v16 = vsel %vm3872_vm1, %v3398_v57, -inf  ;;  %v4944_v50 = vsel %vm3872_vm1, %v3602_v40, -inf }
 0x42c   :  { %v4938_v22 = vrot.slane %v4937_v16, 4  ;;  %v4945_v47 = vrot.slane %v4944_v50, 4  ;;  %v4951_v52 = vsel %vm3872_vm1, %v3603_v56, -inf  ;;  %v4958_v15 = vsel %vm3872_vm1, %v3604_v1, -inf  ;;  %v3297_v56 = vpop.f32.mrf.mxu1 }
 0x42d   :  { %v5228_v39 = vmax.f32 %v5226_v31, %v5227_v46  ;;  %v4952_v14 = vrot.slane %v4951_v52, 4  ;;  %v4959_v36 = vrot.slane %v4958_v15, 4  ;;  %v3341_v24 = vadd.f32 %v14290_v19, %v3340_v55 }
 0x42e   :  { %v5235_v12 = vmax.f32 %v5233_v7, %v5234_v42  ;;  %v5242_v48 = vmax.f32 %v5240_v38, %v5241_v13  ;;  %v4939_v51 = vmax.f32 %v4937_v16, %v4938_v22  ;;  %v4946_v26 = vmax.f32 %v4944_v50, %v4945_v47 }
 0x42f   :  { %v5248_v30 = vrot.slane %v5247_v11, 2  ;;  %v4953_v23 = vmax.f32 %v4951_v52, %v4952_v14  ;;  %v4960_v57 = vmax.f32 %v4958_v15, %v4959_v36  ;;  %v3416_v27 = vmax.f32 %v3341_v24, 0.0 }
 0x430   :  { %v5254_v40 = vmax.f32 %v5252_v25, %v5253_v8  ;;  %v5261_v3 = vmax.f32 %v5259_v37, %v5260_v2  ;;  %v4940_v9 = vrot.slane %v4939_v51, 2  ;;  %v4947_v59 = vrot.slane %v4946_v26, 2 }
 0x431   :  { %v14452_v44 = vmax.f32 %v5266_v43, %v5267_v21  ;;  %v4954_v31 = vrot.slane %v4953_v23, 2  ;;  %v4961_v46 = vrot.slane %v4960_v57, 2  ;;  %v3656_v1 = vrot.slane %v3416_v27, 2 }
 0x432   :  { %v5229_v53 = vrot.slane %v5228_v39, 1  ;;  %v4941_v55 = vmax.f32 %v4939_v51, %v4940_v9  ;;  %v4948_v7 = vmax.f32 %v4946_v26, %v4947_v59  ;;  %v5441_v38 = vsel %vm3872_vm1, %v3416_v27, -inf }
 0x433   :  { %v5236_v42 = vrot.slane %v5235_v12, 1  ;;  %v5243_v13 = vrot.slane %v5242_v48, 1  ;;  %v4955_v16 = vmax.f32 %v4953_v23, %v4954_v31  ;;  %v3298_v24 = vadd.f32 %v14290_v19, %v3297_v56 }
 0x434   :  { %v4949_v25 = vrot.slane %v4948_v7, 1  ;;  %v4962_v37 = vmax.f32 %v4960_v57, %v4961_v46  ;;  %v3657_v8 = vrot.slane %v3416_v27, 4  ;;  %v5448_v2 = vsel %vm3872_vm1, %v3656_v1, -inf }
 0x435   :  { %v5223_v43 = vmax.f32 %v5221_v54, %v5222_v28  ;;  %v14457_v21 = vmax.f32 %v5247_v11, %v5248_v30  ;;  %v4942_v50 = vrot.slane %v4941_v55, 1  ;;  %v5442_v22 = vrot.slane %v5441_v38, 4 }
 0x436   :  { %v5255_v47 = vrot.slane %v5254_v40, 2  ;;  %v5262_v9 = vrot.slane %v5261_v3, 2  ;;  %v4956_v26 = vrot.slane %v4955_v16, 1  ;;  %v5230_v59 = vmax.f32 %v5228_v39, %v5229_v53 }
 0x437   :  { %v4950_v52 = vmax.f32 %v4948_v7, %v4949_v25  ;;  %v5449_v23 = vrot.slane %v5448_v2, 4  ;;  %v3399_v15 = vmax.f32 %v3298_v24, 0.0  ;;  %v5237_v14 = vmax.f32 %v5235_v12, %v5236_v42 }
 0x438   :  { %v14460_v36 = vmax.f32 %v5242_v48, %v5243_v13  ;;  %v4963_v57 = vrot.slane %v4962_v37, 1  ;;  %v5455_v56 = vsel %vm3872_vm1, %v3657_v8, -inf  ;;  %v14464_v30 = vsel %vm402_vm0, %v5223_v43, -inf }
 0x439   :  { %v4943_v54 = vmax.f32 %v4941_v55, %v4942_v50  ;;  %v3658_v11 = vrot.slane %v3416_v27, 6  ;;  %v5443_v28 = vmax.f32 %v5441_v38, %v5442_v22  ;;  %v5250_v31 = vrot.slane %v14457_v21, 1 }
 0x43a   :  { %v14467_v46 = vmax.f32 %v5254_v40, %v5255_v47  ;;  %v14469_v53 = vmax.f32 %v5261_v3, %v5262_v9  ;;  %v4957_v39 = vmax.f32 %v4955_v16, %v4956_v26  ;;  %v5885_v12 = vsel %vm402_vm0, %v4950_v52, -inf  ;;  %v3280_v47 = vpop.f32.mrf.mxu0 }
 0x43b   :  { %v5450_v48 = vmax.f32 %v5448_v2, %v5449_v23  ;;  %v5456_v1 = vrot.slane %v5455_v56, 4  ;;  %v3605_v7 = vrot.slane %v3399_v15, 2  ;;  %v14473_v42 = vsel %vm402_vm0, %v5230_v59, -inf }
 0x43c   :  { %v14476_v13 = vsel %vm402_vm0, %v5237_v14, -inf  ;;  %v4964_v27 = vmax.f32 %v4962_v37, %v4963_v57  ;;  %v3606_v55 = vrot.slane %v3399_v15, 4  ;;  %v5882_v38 = vsel %vm402_vm0, %v4943_v54, -inf }
 0x43d   :  { %v5444_v40 = vrot.slane %v5443_v28, 2  ;;  %v5462_v3 = vsel %vm3872_vm1, %v3658_v11, -inf  ;;  %v3607_v24 = vrot.slane %v3399_v15, 6  ;;  %v5886_v16 = vmax.f32 %v14395_v6, %v5885_v12 }
 0x43e   :  { %v5888_v25 = vsel %vm402_vm0, %v4957_v39, -inf  ;;  %v4965_v8 = vsel %vm3872_vm1, %v3399_v15, -inf  ;;  %v4972_v2 = vsel %vm3872_vm1, %v3605_v7, -inf  ;;  %v5451_v43 = vrot.slane %v5450_v48, 2 }
 0x43f   :  { %v14484_v50 = vmax.f32 %v5455_v56, %v5456_v1  ;;  %v4966_v22 = vrot.slane %v4965_v8, 4  ;;  %v4973_v37 = vrot.slane %v4972_v2, 4  ;;  %v5883_v9 = vmax.f32 %v14384_v60, %v5882_v38 }
 0x440   :  { %v5891_v26 = vsel %vm402_vm0, %v4964_v27, -inf  ;;  %v4979_v59 = vsel %vm3872_vm1, %v3606_v55, -inf  ;;  %v4986_v6 = vsel %vm3872_vm1, %v3607_v24, -inf  ;;  %v5889_v52 = vmax.f32 %v14398_v32, %v5888_v25 }
 0x441   :  { %v5463_v23 = vrot.slane %v5462_v3, 4  ;;  %v4967_v15 = vmax.f32 %v4965_v8, %v4966_v22  ;;  %v4974_v14 = vmax.f32 %v4972_v2, %v4973_v37  ;;  %v6295_v57 = vsel %vm6225_vm5, %v5886_v16, %v5883_v9 }
 0x442   :  { %v4980_v56 = vrot.slane %v4979_v59, 4  ;;  %v4987_v54 = vrot.slane %v4986_v6, 4  ;;  %v3281_v11 = vadd.f32 %v14290_v19, %v3280_v47  ;;  %v5892_v39 = vmax.f32 %v14401_v5, %v5891_v26 }
 0x443   :  { %v14494_v60 = vmax.f32 %v5443_v28, %v5444_v40  ;;  %v4968_v12 = vrot.slane %v4967_v15, 2  ;;  %v4975_v1 = vrot.slane %v4974_v14, 2  ;;  %v14496_v7 = vmax.f32 %v5450_v48, %v5451_v43 }
 0x444   :  { %v4981_v27 = vmax.f32 %v4979_v59, %v4980_v56  ;;  %v4988_v55 = vmax.f32 %v4986_v6, %v4987_v54  ;;  %v3392_v32 = vmax.f32 %v3281_v11, 0.0  ;;  %v6296_v38 = vsel %vm6227_vm6, %v5889_v52, %v6295_v57 }
 0x445   :  { %v5458_v24 = vrot.slane %v14484_v50, 2  ;;  %v4969_v16 = vmax.f32 %v4967_v15, %v4968_v12  ;;  %v4976_v25 = vmax.f32 %v4974_v14, %v4975_v1  ;;  %v5464_v11 = vmax.f32 %v5462_v3, %v5463_v23 }
 0x446   :  { %v4982_v8 = vrot.slane %v4981_v27, 2  ;;  %v4989_v2 = vrot.slane %v4988_v55, 2  ;;  %v3584_v22 = vrot.slane %v3392_v32, 2  ;;  %v3585_v37 = vrot.slane %v3392_v32, 4 }
 0x447   :  { %v4970_v5 = vrot.slane %v4969_v16, 1  ;;  %v4977_v28 = vrot.slane %v4976_v25, 1  ;;  %v3586_v40 = vrot.slane %v3392_v32, 6  ;;  %v4769_v47 = vsel %vm3872_vm1, %v3392_v32, -inf }
 0x448   :  { %v4983_v48 = vmax.f32 %v4981_v27, %v4982_v8  ;;  %v4990_v43 = vmax.f32 %v4988_v55, %v4989_v2  ;;  %v4770_v9 = vrot.slane %v4769_v47, 4  ;;  %v4776_v26 = vsel %vm3872_vm1, %v3584_v22, -inf }
 0x449   :  { %v4971_v59 = vmax.f32 %v4969_v16, %v4970_v5  ;;  %v4978_v6 = vmax.f32 %v4976_v25, %v4977_v28  ;;  %v4777_v52 = vrot.slane %v4776_v26, 4  ;;  %v4783_v15 = vsel %vm3872_vm1, %v3585_v37, -inf }
 0x44a   :  { %v4984_v14 = vrot.slane %v4983_v48, 1  ;;  %v4991_v57 = vrot.slane %v4990_v43, 1  ;;  %v4771_v56 = vmax.f32 %v4769_v47, %v4770_v9  ;;  %v4784_v54 = vrot.slane %v4783_v15, 4 }
 0x44b   :  { %v5894_v12 = vsel %vm402_vm0, %v4971_v59, -inf  ;;  %v5897_v1 = vsel %vm402_vm0, %v4978_v6, -inf  ;;  %v4790_v27 = vsel %vm3872_vm1, %v3586_v40, -inf  ;;  %v6297_v25 = vsel %vm17048_vm14, %v5892_v39, %v6296_v38  ;;  %vm17067_vm14 = vmmov %vm17054_vm10 }
 0x44c   :  { %v4985_v55 = vmax.f32 %v4983_v48, %v4984_v14  ;;  %v4992_v32 = vmax.f32 %v4990_v43, %v4991_v57  ;;  %v5895_v8 = vmax.f32 %v14427_v45, %v5894_v12  ;;  %v5898_v16 = vmax.f32 %v14430_v49, %v5897_v1  ;;  %v3342_v14 = vpop.f32.mrf.mxu3 }
 0x44d   :  { %v5446_v2 = vrot.slane %v14494_v60, 1  ;;  %v4772_v22 = vrot.slane %v4771_v56, 2  ;;  %v4778_v37 = vmax.f32 %v4776_v26, %v4777_v52  ;;  %v4785_v28 = vmax.f32 %v4783_v15, %v4784_v54 }
 0x44e   :  { %v5900_v3 = vsel %vm402_vm0, %v4985_v55, -inf  ;;  %v5903_v23 = vsel %vm402_vm0, %v4992_v32, -inf  ;;  %v6298_v5 = vsel %vm17049_vm3, %v5895_v8, %v6297_v25  ;;  %v5453_v40 = vrot.slane %v14496_v7, 1 }
 0x44f   :  { %v5901_v47 = vmax.f32 %v14433_v63, %v5900_v3  ;;  %v6299_v45 = vsel %vm17050_vm4, %v5898_v16, %v6298_v5  ;;  %v4791_v49 = vrot.slane %v4790_v27, 4  ;;  %v14517_v39 = vmax.f32 %v14484_v50, %v5458_v24 }
 0x450   :  { %v5465_v38 = vrot.slane %v5464_v11, 2  ;;  %v5904_v48 = vmax.f32 %v14442_v4, %v5903_v23  ;;  %v17051_v43 = vrot.slane %v14023_v10, 2  ;;  %v4704_v59 = vrot.slane %v14116_v58, 1 }
 0x451   :  { %v6300_v26 = vsel %vm17052_vm9, %v5901_v47, %v6299_v45  ;;  %v4760_v6 = vrot.slane %v14436_v17, 1  ;;  %v17053_v63 = vrot.slane %v14423_v35, 2  ;;  %v4773_v24 = vmax.f32 %v4771_v56, %v4772_v22  ;;  %vm17089_vm9 = vmmov %vm17063_vm8 }
 0x452   :  { %v4710_v9 = vmax.f32 %v14023_v10, %v17051_v43  ;;  %v14530_v50 = vsel %vm17054_vm10, %v5904_v48, %v6300_v26  ;;  %v4779_v15 = vrot.slane %v4778_v37, 2  ;;  %v4786_v4 = vrot.slane %v4785_v28, 2  ;;  %v17060_v43 = vld [vmem:[#allocation67_spill] sm:$0xff]  ;;  %vm17090_vm10 = vmmov %vm17064_vm7 }
 0x453   :  { %v4766_v52 = vmax.f32 %v14423_v35, %v17053_v63  ;;  %v14535_v10 = vmax.f32 %v14457_v21, %v5250_v31  ;;  %6369 = vst.msk [vmem:[#allocation4 + $0x50] sm:$0xff] %vm402_vm0, %v14530_v50  ;;  %v4792_v54 = vmax.f32 %v4790_v27, %v4791_v49  ;;  %v5447_v35 = vmax.f32 %v14494_v60, %v5446_v2 }
 0x454   :  { %v5454_v1 = vmax.f32 %v14496_v7, %v5453_v40  ;;  %v4711_v56 = vrot.slane %v4710_v9, 1  ;;  %v17055_v55 = vrot.slane %v14421_v33, 1  ;;  %v5460_v8 = vrot.slane %v14517_v39, 1 }
 0x455   :  { %v4767_v12 = vrot.slane %v4766_v52, 1  ;;  %v17056_v21 = vrot.slane %v14045_v18, 1  ;;  %v4705_v16 = vmax.f32 %v14116_v58, %v4704_v59  ;;  %v4761_v27 = vmax.f32 %v14436_v17, %v4760_v6 }
 0x456   :  { %v4754_v32 = vmax.f32 %v14421_v33, %v17055_v55  ;;  %v5466_v25 = vmax.f32 %v5464_v11, %v5465_v38  ;;  %v4774_v22 = vrot.slane %v4773_v24, 1  ;;  %v4780_v60 = vmax.f32 %v4778_v37, %v4779_v15  ;;  %v3282_v11 = vpop.f32.mrf.mxu0 }
 0x457   :  { %v4698_v31 = vmax.f32 %v14045_v18, %v17056_v21  ;;  %v4787_v2 = vmax.f32 %v4785_v28, %v4786_v4  ;;  %v4793_v7 = vrot.slane %v4792_v54, 2  ;;  %v4768_v3 = vmax.f32 %v4766_v52, %v4767_v12 }
 0x458   :  { %v5843_v23 = vsel %vm402_vm0, %v14416_v0, -inf  ;;  %v5846_v33 = vsel %vm402_vm0, %v14444_v62, -inf  ;;  %v4712_v5 = vmax.f32 %v4710_v9, %v4711_v56  ;;  %v5842_v18 = vsel %vm402_vm0, %v14021_v29, -inf  ;;  %v17058_v29 = vld [vmem:[#allocation77_spill] sm:$0xff] }
 0x459   :  { %v5845_v58 = vsel %vm402_vm0, %v14121_v20, -inf  ;;  %v5849_v17 = vsel %vm402_vm0, %v4754_v32, -inf  ;;  %v5848_v28 = vsel %vm402_vm0, %v4698_v31, -inf  ;;  %v5851_v40 = vsel %vm402_vm0, %v4705_v16, -inf  ;;  %v17061_v9 = vld [vmem:[#allocation41_spill] sm:$0xff] }
 0x45a   :  { %v5847_v37 = vmax.f32 %v5845_v58, %v5846_v33  ;;  %v5852_v0 = vsel %vm402_vm0, %v4761_v27, -inf  ;;  %v5844_v47 = vmax.f32 %v5842_v18, %v5843_v23  ;;  %v5850_v45 = vmax.f32 %v5848_v28, %v5849_v17 }
 0x45b   :  { %v5853_v62 = vmax.f32 %v5851_v40, %v5852_v0  ;;  %v17057_v49 = vmax.f32 %v17046_v61, %v14387_v34  ;;  %v17059_v38 = vmax.f32 %v14017_v41, %v17058_v29  ;;  %v5855_v48 = vsel %vm402_vm0, %v4768_v3, -inf  ;;  %v3345_v61 = vpop.f32.mrf.mxu3  ;;  %v17068_v40 = vld [vmem:[#allocation31_spill] sm:$0xff] }
 0x45c   :  { %v17062_v26 = vmax.f32 %v17060_v43, %v17061_v9  ;;  %v3343_v6 = vadd.f32 %v14290_v19, %v3342_v14  ;;  %v3283_v63 = vadd.f32 %v14290_v19, %v3282_v11  ;;  %v5467_v52 = vrot.slane %v5466_v25, 1 }
 0x45d   :  { %v6281_v20 = vsel %vm6225_vm5, %v17059_v38, %v17057_v49  ;;  %v14578_v15 = vsel %vm402_vm0, %v5447_v35, -inf  ;;  %v4781_v34 = vrot.slane %v4780_v60, 1  ;;  %v5854_v4 = vsel %vm402_vm0, %v4712_v5, -inf }
 0x45e   :  { %v6282_v59 = vsel %vm6227_vm6, %v17062_v26, %v6281_v20  ;;  %v3417_v56 = vmax.f32 %v3343_v6, 0.0  ;;  %v3393_v55 = vmax.f32 %v3283_v63, 0.0  ;;  %v4775_v32 = vmax.f32 %v4773_v24, %v4774_v22  ;;  %v17071_v63 = vld [vmem:[#allocation45_spill] sm:$0xff] }
 0x45f   :  { %v6283_v41 = vsel %vm17063_vm8, %v5844_v47, %v6282_v59  ;;  %v4788_v21 = vrot.slane %v4787_v2, 1  ;;  %v5856_v31 = vmax.f32 %v5854_v4, %v5855_v48  ;;  %v4794_v19 = vmax.f32 %v4792_v54, %v4793_v7  ;;  %vm17092_vm8 = vmmov %vm17065_vm2 }
 0x460   :  { %v6284_v12 = vsel %vm17064_vm7, %v5847_v37, %v6283_v41  ;;  %v3659_v35 = vrot.slane %v3417_v56, 2  ;;  %v3660_v27 = vrot.slane %v3417_v56, 4  ;;  %v3661_v23 = vrot.slane %v3417_v56, 6  ;;  %vm17093_vm7 = vmmov %vm17066_vm15 }
 0x461   :  { %v6285_v14 = vsel %vm17065_vm2, %v5850_v45, %v6284_v12  ;;  %v5469_v33 = vsel %vm3872_vm1, %v3417_v56, -inf  ;;  %v3587_v5 = vrot.slane %v3393_v55, 2  ;;  %v5461_v18 = vmax.f32 %v14517_v39, %v5460_v8  ;;  %vm17094_vm2 = vmmov %vm17067_vm14 }
 0x462   :  { %v6286_v16 = vsel %vm17066_vm15, %v5853_v62, %v6285_v14  ;;  %v14589_v58 = vsel %vm402_vm0, %v5454_v1, -inf  ;;  %v4782_v24 = vmax.f32 %v4780_v60, %v4781_v34  ;;  %v3588_v54 = vrot.slane %v3393_v55, 4  ;;  %v17072_v34 = vld [vmem:[#allocation37_spill] sm:$0xff]  ;;  %v17073_v14 = vld [vmem:[#allocation55_spill] sm:$0xff] }
 0x463   :  { %v6287_v3 = vsel %vm17067_vm14, %v5856_v31, %v6286_v16  ;;  %v14593_v22 = vmax.f32 %v5466_v25, %v5467_v52  ;;  %v4789_v7 = vmax.f32 %v4787_v2, %v4788_v21  ;;  %v14596_v17 = vsel %vm402_vm0, %v4775_v32, -inf  ;;  %v14607_v25 = vld [vmem:[%s16494_s2] ss:$0 sm:$0xff]  ;;  %v3347_v43 = vpop.f32.mrf.mxu3 }
 0x464   :  { %6367 = vst.msk [vmem:[#allocation4 + $0x40] sm:$0xff] %vm402_vm0, %v6287_v3  ;;  %6550 = vrot.lane.b32.xlu2 %v6287_v3, %s10653_s16  ;;  %v5476_v11 = vsel %vm3872_vm1, %v3659_v35, -inf  ;;  %v4795_v37 = vrot.slane %v4794_v19, 1  ;;  %v5470_v28 = vrot.slane %v5469_v33, 4  ;;  %v4797_v39 = vsel %vm3872_vm1, %v3393_v55, -inf }
 0x465   :  { %v4804_v1 = vsel %vm3872_vm1, %v3587_v5, -inf  ;;  %v5483_v8 = vsel %vm3872_vm1, %v3660_v27, -inf  ;;  %v5490_v60 = vsel %vm3872_vm1, %v3661_v23, -inf  ;;  %v6055_v0 = vand.u32 7, %v17068_v40  ;;  %v17074_v27 = vld [vmem:[#allocation38_spill] sm:$0xff] }
 0x466   :  { %v3346_v2 = vadd.f32 %v14607_v25, %v3345_v61  ;;  %v14611_v47 = vsel %vm402_vm0, %v4782_v24, -inf  ;;  %v5477_v45 = vrot.slane %v5476_v11, 4  ;;  %v4798_v62 = vrot.slane %v4797_v39, 4 }
 0x467   :  { %v4811_v49 = vsel %vm3872_vm1, %v3588_v54, -inf  ;;  %v14615_v29 = vsel %vm402_vm0, %v5461_v18, -inf  ;;  %v14618_v38 = vsel %vm402_vm0, %v4789_v7, -inf  ;;  %v4805_v20 = vrot.slane %v4804_v1, 4 }
 0x468   :  { %vm14620_vm3 = vcmp.lt.s32.totalorder %v6055_v0, 7  ;;  %v5471_v9 = vmax.f32 %v5469_v33, %v5470_v28  ;;  %v5484_v26 = vrot.slane %v5483_v8, 4  ;;  %v5491_v59 = vrot.slane %v5490_v60, 4 }
 0x469   :  { %v3589_v6 = vrot.slane %v3393_v55, 6  ;;  %v4812_v61 = vrot.slane %v4811_v49, 4  ;;  %v3418_v12 = vmax.f32 %v3346_v2, 0.0  ;;  %v14628_v56 = vmax.f32 %v4794_v19, %v4795_v37 }
 0x46a   :  { %v5478_v32 = vmax.f32 %v5476_v11, %v5477_v45  ;;  %v4799_v21 = vmax.f32 %v4797_v39, %v4798_v62  ;;  %v3348_v31 = vadd.f32 %v14607_v25, %v3347_v43  ;;  %v4806_v35 = vmax.f32 %v4804_v1, %v4805_v20 }
 0x46b   :  { %v6478_v4 = vld [vmem:[#allocation4 + $0x39] sm:$0xff]  ;;  %v17075_v3 = vrot.slane %v17074_v27, 1  ;;  %v5472_v33 = vrot.slane %v5471_v9, 2  ;;  %v5485_v5 = vmax.f32 %v5483_v8, %v5484_v26  ;;  %v14640_v19 = vmax.f32 %v5490_v60, %v5491_v59 }
 0x46c   :  { %v6526_v55 = vsel %vm14620_vm3, %v6478_v4, 0.0  ;;  %v4818_v18 = vsel %vm3872_vm1, %v3589_v6, -inf  ;;  %v4813_v24 = vmax.f32 %v4811_v49, %v4812_v61  ;;  %v3662_v54 = vrot.slane %v3418_v12, 2  ;;  %vm17129_vm3 = vmmov %vm17089_vm9 }
 0x46d   :  { %v14638_v23 = vmax.f32 %v17074_v27, %v17075_v3  ;;  %6612 = vrot.lane.b32.xlu1 %v6526_v55, %s10654_s29  ;;  %v3663_v7 = vrot.slane %v3418_v12, 4  ;;  %v3664_v11 = vrot.slane %v3418_v12, 6  ;;  %v5479_v37 = vrot.slane %v5478_v32, 2 }
 0x46e   :  { %v4800_v28 = vrot.slane %v4799_v21, 2  ;;  %v5497_v39 = vsel %vm3872_vm1, %v3418_v12, -inf  ;;  %v3419_v1 = vmax.f32 %v3348_v31, 0.0  ;;  %v4807_v2 = vrot.slane %v4806_v35, 2 }
 0x46f   :  { %vm14645_vm4 = vcmp.gt.s32.totalorder %v6055_v0, 0  ;;  %v5498_v8 = vrot.slane %v5497_v39, 4  ;;  %v5504_v60 = vsel %vm3872_vm1, %v3662_v54, -inf  ;;  %v5511_v62 = vsel %vm3872_vm1, %v3663_v7, -inf }
 0x470   :  { %v5505_v20 = vrot.slane %v5504_v60, 4  ;;  %v5512_v49 = vrot.slane %v5511_v62, 4  ;;  %v5518_v48 = vsel %vm3872_vm1, %v3664_v11, -inf  ;;  %v3665_v43 = vrot.slane %v3419_v1, 2 }
 0x471   :  { %v4814_v26 = vrot.slane %v4813_v24, 2  ;;  %v4819_v59 = vrot.slane %v4818_v18, 4  ;;  %v5499_v6 = vmax.f32 %v5497_v39, %v5498_v8  ;;  %v5519_v61 = vrot.slane %v5518_v48, 4 }
 0x472   :  { %v5506_v4 = vmax.f32 %v5504_v60, %v5505_v20  ;;  %v5513_v12 = vmax.f32 %v5511_v62, %v5512_v49  ;;  %v5525_v0 = vsel %vm3872_vm1, %v3419_v1, -inf  ;;  %v5532_v31 = vsel %vm3872_vm1, %v3665_v43, -inf }
 0x473   :  { %v5473_v55 = vmax.f32 %v5471_v9, %v5472_v33  ;;  %v5486_v27 = vrot.slane %v5485_v5, 2  ;;  %v4801_v3 = vmax.f32 %v4799_v21, %v4800_v28  ;;  %v4808_v54 = vmax.f32 %v4806_v35, %v4807_v2  ;;  %v6398_v35 = vld [vmem:[#allocation4 + $0x37] sm:$0xff]  ;;  %v6549_v33 = vpop.permute.xlu2 %6548 }
 0x474   :  { %v5500_v7 = vrot.slane %v5499_v6, 2  ;;  %v5520_v57 = vmax.f32 %v5518_v48, %v5519_v61  ;;  %v3666_v51 = vrot.slane %v3419_v1, 4  ;;  %v5526_v16 = vrot.slane %v5525_v0, 4 }
 0x475   :  { %v5507_v11 = vrot.slane %v5506_v4, 2  ;;  %v5514_v41 = vrot.slane %v5513_v12, 2  ;;  %v3667_v52 = vrot.slane %v3419_v1, 6  ;;  %v5533_v40 = vrot.slane %v5532_v31, 4 }
 0x476   :  { %v14654_v39 = vmax.f32 %v5478_v32, %v5479_v37  ;;  %v4815_v60 = vmax.f32 %v4813_v24, %v4814_v26  ;;  %v4820_v62 = vmax.f32 %v4818_v18, %v4819_v59  ;;  %v5474_v20 = vrot.slane %v5473_v55, 1 }
 0x477   :  { %v14657_v49 = vmax.f32 %v5485_v5, %v5486_v27  ;;  %v4802_v9 = vrot.slane %v4801_v3, 1  ;;  %v4809_v21 = vrot.slane %v4808_v54, 1  ;;  %v5501_v28 = vmax.f32 %v5499_v6, %v5500_v7  ;;  %v3325_v5 = vpop.f32.mrf.mxu2 }
 0x478   :  { %v5521_v2 = vrot.slane %v5520_v57, 2  ;;  %v14659_v48 = vmax.f32 %v5525_v0, %v5526_v16  ;;  %v5539_v1 = vsel %vm3872_vm1, %v3666_v51, -inf  ;;  %v14662_v43 = vmax.f32 %v5506_v4, %v5507_v11 }
 0x479   :  { %v14664_v32 = vmax.f32 %v5513_v12, %v5514_v41  ;;  %v14666_v37 = vmax.f32 %v5532_v31, %v5533_v40  ;;  %v5546_v18 = vsel %vm3872_vm1, %v3667_v52, -inf  ;;  %v4821_v26 = vrot.slane %v4820_v62, 2 }
 0x47a   :  { %v6446_v59 = vsel %vm14645_vm4, %v6398_v35, 0.0  ;;  %v4816_v6 = vrot.slane %v4815_v60, 1  ;;  %v14672_v16 = vmax.f32 %v5473_v55, %v5474_v20  ;;  %v4803_v61 = vmax.f32 %v4801_v3, %v4802_v9  ;;  %v17079_v3 = vld [vmem:[#allocation56_spill] sm:$0xff]  ;;  %vm17131_vm4 = vmmov %vm17090_vm10 }
 0x47b   :  { %v14675_v51 = vsel %vm402_vm0, %v6446_v59, %v6549_v33  ;;  %v5540_v41 = vrot.slane %v5539_v1, 4  ;;  %v5502_v4 = vrot.slane %v5501_v28, 1  ;;  %v14677_v40 = vmax.f32 %v5520_v57, %v5521_v2  ;;  %v17081_v9 = vld [vmem:[#allocation64_spill] sm:$0xff] }
 0x47c   :  { %17078 = vst [vmem:[#allocation77_spill] sm:$0xff] %v14675_v51  ;;  %v5528_v52 = vrot.slane %v14659_v48, 2  ;;  %v5547_v12 = vrot.slane %v5546_v18, 4  ;;  %v5509_v0 = vrot.slane %v14662_v43, 1  ;;  %v4810_v27 = vmax.f32 %v4808_v54, %v4809_v21  ;;  %v17083_v2 = vld [vmem:[#allocation40_spill] sm:$0xff] }
 0x47d   :  { %v4817_v55 = vmax.f32 %v4815_v60, %v4816_v6  ;;  %v4822_v7 = vmax.f32 %v4820_v62, %v4821_v26  ;;  %v17080_v11 = vrot.slane %v17079_v3, 1  ;;  %v17082_v35 = vrot.slane %v17081_v9, 2  ;;  %v17084_v62 = vld [vmem:[#allocation42_spill] sm:$0xff]  ;;  %v17085_v26 = vld [vmem:[#allocation57_spill] sm:$0xff] }
 0x47e   :  { %v14689_v33 = vmax.f32 %v5539_v1, %v5540_v41  ;;  %v4877_v59 = vrot.slane %v17083_v2, 2  ;;  %v5866_v24 = vsel %vm402_vm0, %v14628_v56, -inf  ;;  %v5869_v8 = vsel %vm402_vm0, %v4803_v61, -inf }
 0x47f   :  { %v4866_v20 = vmax.f32 %v17079_v3, %v17080_v11  ;;  %v4871_v57 = vmax.f32 %v17081_v9, %v17082_v35  ;;  %v4823_v54 = vrot.slane %v4822_v7, 1  ;;  %v5867_v21 = vsel %vm402_vm0, %v17084_v62, -inf }
 0x480   :  { %v5870_v6 = vsel %vm402_vm0, %v17085_v26, -inf  ;;  %v4878_v3 = vmax.f32 %v17083_v2, %v4877_v59  ;;  %v5868_v11 = vmax.f32 %v5866_v24, %v5867_v21  ;;  %v5872_v41 = vsel %vm402_vm0, %v4810_v27, -inf  ;;  %v3327_v24 = vpop.f32.mrf.mxu2 }
 0x481   :  { %v4872_v60 = vrot.slane %v4871_v57, 1  ;;  %v5871_v1 = vmax.f32 %v5869_v8, %v5870_v6  ;;  %v4824_v9 = vmax.f32 %v4822_v7, %v4823_v54  ;;  %v5873_v56 = vsel %vm402_vm0, %v4866_v20, -inf  ;;  %v17091_v54 = vld [vmem:[#allocation24_spill] sm:$0xff] }
 0x482   :  { %v5875_v61 = vsel %vm402_vm0, %v4817_v55, -inf  ;;  %v4879_v31 = vrot.slane %v4878_v3, 1  ;;  %v5874_v45 = vmax.f32 %v5872_v41, %v5873_v56  ;;  %v17086_v62 = vmax.f32 %v14596_v17, %v17071_v63 }
 0x483   :  { %v4873_v35 = vmax.f32 %v4871_v57, %v4872_v60  ;;  %v17087_v26 = vmax.f32 %v14611_v47, %v17072_v34  ;;  %v3326_v8 = vadd.f32 %v14607_v25, %v3325_v5  ;;  %v14711_v27 = vmax.f32 %v5546_v18, %v5547_v12 }
 0x484   :  { %v5878_v20 = vsel %vm402_vm0, %v4824_v9, -inf  ;;  %v17088_v55 = vmax.f32 %v14618_v38, %v17073_v14  ;;  %v4880_v17 = vmax.f32 %v4878_v3, %v4879_v31  ;;  %v5503_v59 = vmax.f32 %v5501_v28, %v5502_v4 }
 0x485   :  { %v6288_v2 = vsel %vm6225_vm5, %v17087_v26, %v17086_v62  ;;  %v5876_v7 = vsel %vm402_vm0, %v4873_v35, -inf  ;;  %v3410_v34 = vmax.f32 %v3326_v8, 0.0  ;;  %v16659_v18 = vand.u32 7, %v17091_v54 }
 0x486   :  { %v6289_v57 = vsel %vm6227_vm6, %v17088_v55, %v6288_v2  ;;  %v5877_v63 = vmax.f32 %v5875_v61, %v5876_v7  ;;  %v3328_v12 = vadd.f32 %v14607_v25, %v3327_v24  ;;  %v5879_v60 = vsel %vm402_vm0, %v4880_v17, -inf  ;;  %v17095_v7 = vld [vmem:[#allocation32_spill] sm:$0xff] }
 0x487   :  { %v6290_v47 = vsel %vm17089_vm9, %v5868_v11, %v6289_v57  ;;  %v3638_v6 = vrot.slane %v3410_v34, 2  ;;  %v3639_v38 = vrot.slane %v3410_v34, 4  ;;  %v5880_v14 = vmax.f32 %v5878_v20, %v5879_v60  ;;  %vm17133_vm9 = vmmov %vm17092_vm8 }
 0x488   :  { %v6291_v5 = vsel %vm17090_vm10, %v5871_v1, %v6290_v47  ;;  %v3640_v3 = vrot.slane %v3410_v34, 6  ;;  %v5273_v11 = vsel %vm3872_vm1, %v3410_v34, -inf  ;;  %v3411_v1 = vmax.f32 %v3328_v12, 0.0  ;;  %vm17136_vm10 = vmmov %vm17093_vm7 }
 0x489   :  { %v6292_v21 = vsel %vm17092_vm8, %v5874_v45, %v6291_v5  ;;  %v5274_v41 = vrot.slane %v5273_v11, 4  ;;  %v5280_v28 = vsel %vm3872_vm1, %v3638_v6, -inf  ;;  %v5287_v4 = vsel %vm3872_vm1, %v3639_v38, -inf }
 0x48a   :  { %v6293_v31 = vsel %vm17093_vm7, %v5877_v63, %v6292_v21  ;;  %v5281_v35 = vrot.slane %v5280_v28, 4  ;;  %v5288_v56 = vrot.slane %v5287_v4, 4  ;;  %v5294_v45 = vsel %vm3872_vm1, %v3640_v3, -inf }
 0x48b   :  { %v6294_v9 = vsel %vm17094_vm2, %v5880_v14, %v6293_v31  ;;  %v5275_v61 = vmax.f32 %v5273_v11, %v5274_v41  ;;  %v5295_v62 = vrot.slane %v5294_v45, 4  ;;  %v3641_v26 = vrot.slane %v3411_v1, 2 }
 0x48c   :  { %6368 = vst.msk [vmem:[#allocation4 + $0x48] sm:$0xff] %vm402_vm0, %v6294_v9  ;;  %6552 = vrot.lane.b32.xlu0 %v6294_v9, %s10653_s16  ;;  %v3642_v2 = vrot.slane %v3411_v1, 4  ;;  %v5282_v8 = vmax.f32 %v5280_v28, %v5281_v35  ;;  %v5289_v24 = vmax.f32 %v5287_v4, %v5288_v56  ;;  %v16660_v20 = vand.u32 7, %v17095_v7  ;;  %v17125_v7 = vld [vmem:[#allocation58_spill] sm:$0xff] }
 0x48d   :  { %v5301_v55 = vsel %vm3872_vm1, %v3411_v1, -inf  ;;  %v5276_v57 = vrot.slane %v5275_v61, 2  ;;  %v5296_v17 = vmax.f32 %v5294_v45, %v5295_v62  ;;  %v5308_v47 = vsel %vm3872_vm1, %v3641_v26, -inf }
 0x48e   :  { %v5302_v63 = vrot.slane %v5301_v55, 4  ;;  %v5283_v34 = vrot.slane %v5282_v8, 2  ;;  %v5290_v5 = vrot.slane %v5289_v24, 2  ;;  %v5309_v12 = vrot.slane %v5308_v47, 4 }
 0x48f   :  { %v5315_v60 = vsel %vm3872_vm1, %v3642_v2, -inf  ;;  %v5523_v21 = vrot.slane %v14677_v40, 1  ;;  %v5277_v6 = vmax.f32 %v5275_v61, %v5276_v57  ;;  %v5297_v38 = vrot.slane %v5296_v17, 2  ;;  %v17104_v2 = vld [vmem:[#allocation60_spill] sm:$0xff] }
 0x490   :  { %vm14740_vm15 = vcmp.lt.s32.totalorder %v16659_v18, 7  ;;  %vm14746_vm14 = vcmp.lt.s32.totalorder %v16660_v20, 7  ;;  %v3643_v3 = vrot.slane %v3411_v1, 6  ;;  %v5303_v11 = vmax.f32 %v5301_v55, %v5302_v63  ;;  %v17114_v20 = vld [vmem:[#allocation68_spill] sm:$0xff] }
 0x491   :  { %v5316_v41 = vrot.slane %v5315_v60, 4  ;;  %v5510_v28 = vmax.f32 %v14662_v43, %v5509_v0  ;;  %v14756_v4 = vmax.f32 %v14659_v48, %v5528_v52  ;;  %v17100_v9 = vrot.slane %v14666_v37, 2 }
 0x492   :  { %v5310_v56 = vmax.f32 %v5308_v47, %v5309_v12  ;;  %v17101_v45 = vrot.slane %v14664_v32, 1  ;;  %v14769_v61 = vsel %vm402_vm0, %v5503_v59, -inf  ;;  %v14771_v43 = vmax.f32 %v5282_v8, %v5283_v34  ;;  %v6611_v12 = vpop.permute.xlu0 %6610 }
 0x493   :  { %v14761_v35 = vmax.f32 %v14666_v37, %v17100_v9  ;;  %17102 = vst [vmem:[#allocation67_spill] sm:$0xff] %v14769_v61  ;;  %v14773_v0 = vmax.f32 %v5289_v24, %v5290_v5  ;;  %v6479_v48 = vld [vmem:[#allocation4 + $0x41] sm:$0xff]  ;;  %v6480_v52 = vld [vmem:[#allocation4 + $0x49] sm:$0xff]  ;;  %v5278_v62 = vrot.slane %v5277_v6, 1  ;;  %v14775_v26 = vmax.f32 %v5296_v17, %v5297_v38 }
 0x494   :  { %v14766_v1 = vmax.f32 %v14664_v32, %v17101_v45  ;;  %v17103_v37 = vld [vmem:[#allocation39_spill] sm:$0xff]  ;;  %v6527_v32 = vsel %vm14740_vm15, %v6479_v48, 0.0  ;;  %v6528_v59 = vsel %vm14746_vm14, %v6480_v52, 0.0  ;;  %v5304_v24 = vrot.slane %v5303_v11, 2  ;;  %v17106_v48 = vld [vmem:[#allocation46_spill] sm:$0xff]  ;;  %v17107_v52 = vld [vmem:[#allocation36_spill] sm:$0xff] }
 0x495   :  { %v17105_v55 = vpack.i.bf16 %v17103_v37, %v17104_v2  ;;  %6614 = vrot.lane.b32.xlu1 %v6527_v32, %s10654_s29  ;;  %6616 = vrot.lane.b32.xlu2 %v6528_v59, %s10654_s29  ;;  %v14788_v57 = vmax.f32 %v5315_v60, %v5316_v41  ;;  %v14791_v17 = vsel %vm3872_vm1, %v3643_v3, -inf  ;;  %v14794_v63 = vmax.f32 %v14677_v40, %v5523_v21  ;;  %v17110_v32 = vld [vmem:[#allocation59_spill] sm:$0xff]  ;;  %v17115_v60 = vld [vmem:[#allocation52_spill] sm:$0xff] }
 0x496   :  { %v5311_v5 = vrot.slane %v5310_v56, 2  ;;  %v14801_v14 = vsel %vm402_vm0, %v5510_v28, -inf  ;;  %v14805_v3 = vmax.f32 %v5277_v6, %v5278_v62  ;;  %v5323_v41 = vrot.slane %v14791_v17, 4  ;;  %v17109_v62 = vld [vmem:[#allocation48_spill] sm:$0xff] }
 0x497   :  { %10392 = vrot.lane.b32.xlu0 %v17105_v55, %s10655_s17  ;;  %v14810_v9 = vmax.f32 %v5303_v11, %v5304_v24  ;;  %v14815_v28 = vsel %vm1683_vm11, %v17106_v48, %v6611_v12  ;;  %v17108_v37 = vrot.slane %v17107_v52, 2  ;;  %v5045_v55 = vrot.slane %v17109_v62, 2  ;;  %v17112_v24 = vld [vmem:[#allocation49_spill] sm:$0xff]  ;;  %v17117_v21 = vld [vmem:[#allocation44_spill] sm:$0xff] }
 0x498   :  { %v14820_v6 = vmax.f32 %v5310_v56, %v5311_v5  ;;  %6685 = vst.msk [vmem:[#allocation5 + $0x30] sm:$0xff] %vm1748_vm12, %v14815_v28  ;;  %v17111_v11 = vrot.slane %v17110_v32, 1  ;;  %v17113_v18 = vrot.slane %v17112_v24, 2  ;;  %v5101_v38 = vrot.slane %v17114_v20, 2  ;;  %v17116_v5 = vld [vmem:[#allocation53_spill] sm:$0xff] }
 0x499   :  { %v5039_v2 = vmax.f32 %v17107_v52, %v17108_v37  ;;  %v5914_v56 = vsel %vm402_vm0, %v17115_v60, -inf  ;;  %v5915_v52 = vsel %vm402_vm0, %v17116_v5, -inf  ;;  %v3330_v37 = vpop.f32.mrf.mxu2  ;;  %v5046_v34 = vmax.f32 %v17109_v62, %v5045_v55 }
 0x49a   :  { %v5090_v59 = vmax.f32 %v17110_v32, %v17111_v11  ;;  %v5095_v12 = vmax.f32 %v17112_v24, %v17113_v18  ;;  %v5916_v8 = vmax.f32 %v5914_v56, %v5915_v52  ;;  %v5917_v32 = vsel %vm402_vm0, %v17117_v21, -inf  ;;  %v17118_v24 = vld [vmem:[#allocation62_spill] sm:$0xff] }
 0x49b   :  { %v5040_v48 = vrot.slane %v5039_v2, 1  ;;  %v5102_v18 = vmax.f32 %v17114_v20, %v5101_v38  ;;  %v5918_v40 = vsel %vm402_vm0, %v17118_v24, -inf  ;;  %v5920_v60 = vsel %vm402_vm0, %v14638_v23, -inf  ;;  %v17120_v20 = vld [vmem:[#allocation65_spill] sm:$0xff]  ;;  %v17123_v24 = vld [vmem:[#allocation51_spill] sm:$0xff] }
 0x49c   :  { %v5096_v47 = vrot.slane %v5095_v12, 1  ;;  %v5047_v5 = vrot.slane %v5046_v34, 1  ;;  %v5919_v62 = vmax.f32 %v5917_v32, %v5918_v40  ;;  %v5921_v55 = vsel %vm402_vm0, %v5090_v59, -inf }
 0x49d   :  { %v5041_v11 = vmax.f32 %v5039_v2, %v5040_v48  ;;  %6554 = vrot.lane.b32.xlu2 %v14530_v50, %s10653_s16  ;;  %v5103_v56 = vrot.slane %v5102_v18, 1  ;;  %v5922_v52 = vmax.f32 %v5920_v60, %v5921_v55  ;;  %v17119_v2 = vld [vmem:[#allocation63_spill] sm:$0xff]  ;;  %v17122_v48 = vld [vmem:[#allocation50_spill] sm:$0xff] }
 0x49e   :  { %v5097_v31 = vmax.f32 %v5095_v12, %v5096_v47  ;;  %v17121_v38 = vmax.f32 %v17119_v2, %v17120_v20  ;;  %v17124_v45 = vmax.f32 %v17122_v48, %v17123_v24  ;;  %v5048_v54 = vmax.f32 %v5046_v34, %v5047_v5  ;;  %v17126_v47 = vld [vmem:[#allocation54_spill] sm:$0xff]  ;;  %v17128_v12 = vld [vmem:[#allocation20_spill] sm:$0xff] }
 0x49f   :  { %v5923_v21 = vsel %vm402_vm0, %v5041_v11, -inf  ;;  %v17127_v40 = vmax.f32 %v17125_v7, %v17126_v47  ;;  %v6065_v32 = vshra.s32 %v17128_v12, 3  ;;  %v5104_v60 = vmax.f32 %v5102_v18, %v5103_v56  ;;  %v17130_v2 = vld [vmem:[#allocation22_spill] sm:$0xff]  ;;  %v17135_v56 = vld [vmem:[#allocation33_spill] sm:$0xff] }
 0x4a0   :  { %v6302_v23 = vsel %vm6225_vm5, %v17124_v45, %v17121_v38  ;;  %v5924_v50 = vsel %vm402_vm0, %v5097_v31, -inf  ;;  %v6066_v20 = vshra.s32 %v17130_v2, 3  ;;  %v5926_v48 = vsel %vm402_vm0, %v5048_v54, -inf  ;;  %v6714_v31 = vld [vmem:[#allocation5 + $0x10] sm:$0xff]  ;;  %v6715_v18 = vld [vmem:[#allocation5 + $0x18] sm:$0xff] }
 0x4a1   :  { %v6303_v59 = vsel %vm6227_vm6, %v17127_v40, %v6302_v23  ;;  %v5925_v11 = vmax.f32 %v5923_v21, %v5924_v50  ;;  %v14865_v34 = vand.u32 7, %v6065_v32  ;;  %v3331_v5 = vadd.f32 %v14607_v25, %v3330_v37  ;;  %v17137_v50 = vld [vmem:[#allocation25_spill] sm:$0xff] }
 0x4a2   :  { %v6304_v55 = vsel %vm17129_vm3, %v5916_v8, %v6303_v59  ;;  %v5927_v7 = vsel %vm402_vm0, %v5104_v60, -inf  ;;  %v14870_v24 = vand.u32 7, %v6066_v20  ;;  %v16663_v8 = vand.u32 7, %v17135_v56 }
 0x4a3   :  { %v6305_v45 = vsel %vm17131_vm4, %v5919_v62, %v6304_v55  ;;  %17132 = vst [vmem:[#allocation41_spill] sm:$0xff] %v14865_v34  ;;  %v5928_v21 = vmax.f32 %v5926_v48, %v5927_v7  ;;  %vm6776_vm8 = vcmp.lt.s32.totalorder %v14865_v34, 7  ;;  %v3412_v54 = vmax.f32 %v3331_v5, 0.0 }
 0x4a4   :  { %v6306_v38 = vsel %vm17133_vm9, %v5922_v52, %v6305_v45  ;;  %17134 = vst [vmem:[#allocation45_spill] sm:$0xff] %v14870_v24  ;;  %v14876_v62 = vmax.f32 %v14791_v17, %v5323_v41  ;;  %vm6777_vm7 = vcmp.lt.s32.totalorder %v14870_v24, 7  ;;  %v6826_v37 = vsel %vm6776_vm8, %v6714_v31, 0.0  ;;  %v3332_v52 = vpop.f32.mrf.mxu2 }
 0x4a5   :  { %v6307_v23 = vsel %vm17136_vm10, %v5925_v11, %v6306_v38  ;;  %v16665_v47 = vand.u32 7, %v17137_v50  ;;  %v6827_v59 = vsel %vm6777_vm7, %v6715_v18, 0.0  ;;  %v3644_v32 = vrot.slane %v3412_v54, 2  ;;  %v17140_v18 = vld [vmem:[#allocation29_spill] sm:$0xff] }
 0x4a6   :  { %v6308_v40 = vsel %vm17094_vm2, %v5928_v21, %v6307_v23  ;;  %v3645_v60 = vrot.slane %v3412_v54, 4  ;;  %v10396_v11 = vpack.i.bf16 %v6827_v59, %v6826_v37  ;;  %v3646_v55 = vrot.slane %v3412_v54, 6  ;;  %v3350_v37 = vpop.f32.mrf.mxu3 }
 0x4a7   :  { %6370 = vst.msk [vmem:[#allocation4 + $0x58] sm:$0xff] %vm402_vm0, %v6308_v40  ;;  %6556 = vrot.lane.b32.xlu0 %v6308_v40, %s10653_s16  ;;  %v5329_v17 = vsel %vm3872_vm1, %v3412_v54, -inf  ;;  %vm14886_vm15 = vcmp.lt.s32.totalorder %v16663_v8, 7  ;;  %v5336_v48 = vsel %vm3872_vm1, %v3644_v32, -inf  ;;  %v3333_v31 = vadd.f32 %v14607_v25, %v3332_v52  ;;  %v17143_v52 = vld [vmem:[#allocation21_spill] sm:$0xff] }
 0x4a8   :  { %v5330_v20 = vrot.slane %v5329_v17, 4  ;;  %v5343_v45 = vsel %vm3872_vm1, %v3645_v60, -inf  ;;  %10397 = vrot.lane.b32.xlu1 %v10396_v11, %s10656_s18  ;;  %v5337_v5 = vrot.slane %v5336_v48, 4  ;;  %v5350_v38 = vsel %vm3872_vm1, %v3646_v55, -inf }
 0x4a9   :  { %v5344_v7 = vrot.slane %v5343_v45, 4  ;;  %v6067_v21 = vshra.s32 %v17140_v18, 3  ;;  %v5351_v54 = vrot.slane %v5350_v38, 4  ;;  %vm14898_vm14 = vcmp.lt.s32.totalorder %v16665_v47, 7 }
 0x4aa   :  { %v5331_v23 = vmax.f32 %v5329_v17, %v5330_v20  ;;  %v3413_v40 = vmax.f32 %v3333_v31, 0.0  ;;  %v5338_v59 = vmax.f32 %v5336_v48, %v5337_v5  ;;  %v6068_v60 = vshra.s32 %v17143_v52, 3 }
 0x4ab   :  { %v5345_v32 = vmax.f32 %v5343_v45, %v5344_v7  ;;  %v14903_v11 = vand.u32 7, %v6067_v21  ;;  %v5352_v2 = vmax.f32 %v5350_v38, %v5351_v54  ;;  %v17144_v7 = vld [vmem:[#allocation47_spill] sm:$0xff]  ;;  %v17145_v21 = vld [vmem:[#allocation61_spill] sm:$0xff]  ;;  %vm17154_vm9 = vcmask 1043459  }
 0x4ac   :  { %v5332_v8 = vrot.slane %v5331_v23, 2  ;;  %v3647_v55 = vrot.slane %v3413_v40, 2  ;;  %v3648_v12 = vrot.slane %v3413_v40, 4  ;;  %v5339_v18 = vrot.slane %v5338_v59, 2 }
 0x4ad   :  { %v5346_v17 = vrot.slane %v5345_v32, 2  ;;  %v3649_v20 = vrot.slane %v3413_v40, 6  ;;  %v5357_v50 = vsel %vm3872_vm1, %v3413_v40, -inf  ;;  %v5353_v24 = vrot.slane %v5352_v2, 2 }
 0x4ae   :  { %v5333_v47 = vmax.f32 %v5331_v23, %v5332_v8  ;;  %v6482_v34 = vld [vmem:[#allocation4 + $0x59] sm:$0xff]  ;;  %v6481_v56 = vld [vmem:[#allocation4 + $0x51] sm:$0xff]  ;;  %v5358_v31 = vrot.slane %v5357_v50, 4  ;;  %v5364_v48 = vsel %vm3872_vm1, %v3647_v55, -inf  ;;  %v5340_v45 = vmax.f32 %v5338_v59, %v5339_v18 }
 0x4af   :  { %v5347_v5 = vmax.f32 %v5345_v32, %v5346_v17  ;;  %v17146_v38 = vpack.i.bf16 %v17144_v7, %v17145_v21  ;;  %v6530_v54 = vsel %vm14886_vm15, %v6482_v34, 0.0  ;;  %v6529_v40 = vsel %vm14898_vm14, %v6481_v56, 0.0  ;;  %vm17166_vm15 = vmmov %vm17154_vm9 }
 0x4b0   :  { %v5334_v8 = vrot.slane %v5333_v47, 1  ;;  %v5354_v23 = vmax.f32 %v5352_v2, %v5353_v24  ;;  %6620 = vrot.lane.b32.xlu2 %v6530_v54, %s10654_s29  ;;  %v5359_v52 = vmax.f32 %v5357_v50, %v5358_v31  ;;  %v5365_v51 = vrot.slane %v5364_v48, 4  ;;  %6618 = vrot.lane.b32.xlu1 %v6529_v40, %s10654_s29 }
 0x4b1   :  { %10402 = vrot.lane.b32.xlu0 %v17146_v38, %s10655_s17  ;;  %v5341_v55 = vrot.slane %v5340_v45, 1  ;;  %v5348_v18 = vrot.slane %v5347_v5, 1  ;;  %v5371_v59 = vsel %vm3872_vm1, %v3648_v12, -inf  ;;  %v5378_v32 = vsel %vm3872_vm1, %v3649_v20, -inf  ;;  %v17147_v20 = vld [vmem:[#allocation69_spill] sm:$0xff] }
 0x4b2   :  { %v5335_v17 = vmax.f32 %v5333_v47, %v5334_v8  ;;  %v5355_v41 = vrot.slane %v5354_v23, 1  ;;  %v5360_v34 = vrot.slane %v5359_v52, 2  ;;  %v5366_v7 = vmax.f32 %v5364_v48, %v5365_v51  ;;  %v17148_v51 = vld [vmem:[#allocation70_spill] sm:$0xff] }
 0x4b3   :  { %v5342_v56 = vmax.f32 %v5340_v45, %v5341_v55  ;;  %v5349_v21 = vmax.f32 %v5347_v5, %v5348_v18  ;;  %v5372_v2 = vrot.slane %v5371_v59, 4  ;;  %v5379_v24 = vrot.slane %v5378_v32, 4  ;;  %v17149_v45 = vld [vmem:[#allocation71_spill] sm:$0xff] }
 0x4b4   :  { %v5356_v38 = vmax.f32 %v5354_v23, %v5355_v41  ;;  %v5977_v50 = vsel %vm402_vm0, %v5335_v17, -inf  ;;  %v5361_v31 = vmax.f32 %v5359_v52, %v5360_v34  ;;  %v5367_v54 = vrot.slane %v5366_v7, 2 }
 0x4b5   :  { %v5980_v40 = vsel %vm402_vm0, %v5342_v56, -inf  ;;  %v5983_v12 = vsel %vm402_vm0, %v5349_v21, -inf  ;;  %v5373_v61 = vmax.f32 %v5371_v59, %v5372_v2  ;;  %v3351_v47 = vadd.f32 %v14607_v25, %v3350_v37  ;;  %v17150_v56 = vld [vmem:[#allocation43_spill] sm:$0xff] }
 0x4b6   :  { %v5979_v8 = vmax.f32 %v5977_v50, %v17147_v20  ;;  %v5982_v48 = vmax.f32 %v5980_v40, %v17148_v51  ;;  %v5985_v5 = vmax.f32 %v5983_v12, %v17149_v45  ;;  %v5362_v55 = vrot.slane %v5361_v31, 1  ;;  %v14934_v40 = vld [vmem:[#allocation5 + $0x20] sm:$0xff] }
 0x4b7   :  { %v5986_v23 = vsel %vm402_vm0, %v5356_v38, -inf  ;;  %v5368_v18 = vmax.f32 %v5366_v7, %v5367_v54  ;;  %v5374_v17 = vrot.slane %v5373_v61, 2  ;;  %v5380_v52 = vmax.f32 %v5378_v32, %v5379_v24  ;;  %v14936_v7 = vld [vmem:[#allocation5 + $0x28] sm:$0xff] }
 0x4b8   :  { %v6323_v41 = vsel %vm6225_vm5, %v5982_v48, %v5979_v8  ;;  %v5363_v34 = vmax.f32 %v5361_v31, %v5362_v55  ;;  %6558 = vrot.lane.b32.xlu2 %v17150_v56, %s10653_s16  ;;  %v14930_v59 = vand.u32 7, %v6068_v60  ;;  %vm6778_vm3 = vcmp.lt.s32.totalorder %v14903_v11, 7  ;;  %v17152_v38 = vld [vmem:[#allocation72_spill] sm:$0xff] }
 0x4b9   :  { %v6324_v37 = vsel %vm6227_vm6, %v5985_v5, %v6323_v41  ;;  %v5369_v21 = vrot.slane %v5368_v18, 1  ;;  %v5375_v2 = vmax.f32 %v5373_v61, %v5374_v17  ;;  %v5381_v50 = vrot.slane %v5380_v52, 2  ;;  %v17153_v61 = vld [vmem:[#allocation73_spill] sm:$0xff] }
 0x4ba   :  { %v17151_v32 = vrot.slane %v14788_v57, 2  ;;  %v5988_v31 = vmax.f32 %v5986_v23, %v17152_v38  ;;  %v5989_v60 = vsel %vm402_vm0, %v5363_v34, -inf  ;;  %vm6779_vm4 = vcmp.lt.s32.totalorder %v14930_v59, 7  ;;  %v17157_v38 = vld [vmem:[#allocation75_spill] sm:$0xff] }
 0x4bb   :  { %v5370_v54 = vmax.f32 %v5368_v18, %v5369_v21  ;;  %v5376_v12 = vrot.slane %v5375_v2, 1  ;;  %v5382_v20 = vmax.f32 %v5380_v52, %v5381_v50  ;;  %v5991_v8 = vmax.f32 %v5989_v60, %v17153_v61  ;;  %v17156_v18 = vld [vmem:[#allocation74_spill] sm:$0xff] }
 0x4bc   :  { %v14941_v24 = vmax.f32 %v14788_v57, %v17151_v32  ;;  %v6325_v51 = vsel %vm17154_vm9, %v5988_v31, %v6324_v37  ;;  %v6828_v48 = vsel %vm6778_vm3, %v14934_v40, 0.0  ;;  %v6829_v57 = vsel %vm6779_vm4, %v14936_v7, 0.0  ;;  %vm17170_vm9 = vmmov %vm17094_vm2 }
 0x4bd   :  { %v3420_v45 = vmax.f32 %v3351_v47, 0.0  ;;  %v5377_v5 = vmax.f32 %v5375_v2, %v5376_v12  ;;  %v5383_v55 = vrot.slane %v5382_v20, 1  ;;  %v5992_v23 = vsel %vm402_vm0, %v5370_v54, -inf }
 0x4be   :  { %vm17155_vm10 = vcmask 1044484   ;;  %v5994_v41 = vmax.f32 %v5992_v23, %v17156_v18  ;;  %v10406_v52 = vpack.i.bf16 %v6829_v57, %v6828_v48  ;;  %vm17158_vm8 = vcmask 1045509  }
 0x4bf   :  { %v6326_v17 = vsel %vm17155_vm10, %v5991_v8, %v6325_v51  ;;  %v3668_v34 = vrot.slane %v3420_v45, 2  ;;  %v3669_v56 = vrot.slane %v3420_v45, 4  ;;  %v5384_v21 = vmax.f32 %v5382_v20, %v5383_v55  ;;  %v17159_v51 = vld [vmem:[#allocation76_spill] sm:$0xff]  ;;  %vm17167_vm14 = vmmov %vm17155_vm10 }
 0x4c0   :  { %v5995_v37 = vsel %vm402_vm0, %v5377_v5, -inf  ;;  %v3670_v50 = vrot.slane %v3420_v45, 6  ;;  %v5553_v32 = vsel %vm3872_vm1, %v3420_v45, -inf  ;;  %v6327_v47 = vsel %vm17158_vm8, %v5994_v41, %v6326_v17  ;;  %10407 = vrot.lane.b32.xlu1 %v10406_v52, %s10656_s18  ;;  %v3352_v52 = vpop.f32.mrf.mxu3  ;;  %vm17168_vm3 = vmmov %vm17158_vm8 }
 0x4c1   :  { %v5997_v31 = vmax.f32 %v5995_v37, %v17157_v38  ;;  %v5554_v2 = vrot.slane %v5553_v32, 4  ;;  %v5560_v60 = vsel %vm3872_vm1, %v3668_v34, -inf  ;;  %v5998_v54 = vsel %vm402_vm0, %v5384_v21, -inf  ;;  %vm17183_vm8 = vmmov %vm17166_vm15 }
 0x4c2   :  { %v5561_v12 = vrot.slane %v5560_v60, 4  ;;  %v5567_v61 = vsel %vm3872_vm1, %v3669_v56, -inf  ;;  %v5574_v20 = vsel %vm3872_vm1, %v3670_v50, -inf  ;;  %v5325_v8 = vrot.slane %v14876_v62, 2 }
 0x4c3   :  { %v6000_v48 = vmax.f32 %v5998_v54, %v17159_v51  ;;  %vm17160_vm7 = vcmask 1046534   ;;  %v5555_v45 = vmax.f32 %v5553_v32, %v5554_v2  ;;  %v17161_v5 = vrot.slane %v14771_v43, 1 }
 0x4c4   :  { %v6328_v57 = vsel %vm17160_vm7, %v5997_v31, %v6327_v47  ;;  %v17162_v23 = vrot.slane %v14773_v0, 1  ;;  %v5306_v18 = vrot.slane %v14810_v9, 1  ;;  %v5568_v41 = vrot.slane %v5567_v61, 4  ;;  %vm17169_vm4 = vmmov %vm17160_vm7 }
 0x4c5   :  { %v5286_v55 = vmax.f32 %v14771_v43, %v17161_v5  ;;  %v5313_v34 = vrot.slane %v14820_v6, 1  ;;  %v14976_v56 = vsel %vm17094_vm2, %v6000_v48, %v6328_v57  ;;  %v5562_v21 = vmax.f32 %v5560_v60, %v5561_v12  ;;  %vm17186_vm7 = vmmov %vm17167_vm14 }
 0x4c6   :  { %v5293_v17 = vmax.f32 %v14773_v0, %v17162_v23  ;;  %v5575_v37 = vrot.slane %v5574_v20, 4  ;;  %v14980_v50 = vsel %vm402_vm0, %v14766_v1, -inf  ;;  %6373 = vst.msk [vmem:[#allocation4 + $0x70] sm:$0xff] %vm402_vm0, %v14976_v56  ;;  %v5556_v43 = vrot.slane %v5555_v45, 2  ;;  %vm17187_vm2 = vmmov %vm17168_vm3 }
 0x4c7   :  { %v17163_v0 = vrot.slane %v14452_v44, 2  ;;  %v5320_v38 = vrot.slane %v14941_v24, 1  ;;  %v17164_v31 = vrot.slane %v14775_v26, 1  ;;  %v5954_v2 = vsel %vm402_vm0, %v14805_v3, -inf }
 0x4c8   :  { %v5264_v1 = vrot.slane %v14469_v53, 1  ;;  %v5326_v60 = vmax.f32 %v14876_v62, %v5325_v8  ;;  %v5957_v54 = vsel %vm402_vm0, %v5286_v55, -inf  ;;  %v5960_v12 = vsel %vm402_vm0, %v5293_v17, -inf }
 0x4c9   :  { %v5270_v32 = vmax.f32 %v14452_v44, %v17163_v0  ;;  %v5300_v47 = vmax.f32 %v14775_v26, %v17164_v31  ;;  %v5307_v51 = vmax.f32 %v14810_v9, %v5306_v18  ;;  %v5569_v44 = vmax.f32 %v5567_v61, %v5568_v41 }
 0x4ca   :  { %v5563_v48 = vrot.slane %v5562_v21, 2  ;;  %v5576_v57 = vmax.f32 %v5574_v20, %v5575_v37  ;;  %v5314_v5 = vmax.f32 %v14820_v6, %v5313_v34  ;;  %v5327_v23 = vrot.slane %v5326_v60, 1  ;;  %v3355_v34 = vpop.f32.mrf.mxu3 }
 0x4cb   :  { %v5955_v26 = vmax.f32 %v14464_v30, %v5954_v2  ;;  %v15000_v0 = vmax.f32 %v5555_v45, %v5556_v43  ;;  %v5271_v3 = vrot.slane %v5270_v32, 1  ;;  %v5321_v31 = vmax.f32 %v14941_v24, %v5320_v38 }
 0x4cc   :  { %v5958_v62 = vmax.f32 %v14473_v42, %v5957_v54  ;;  %v5961_v8 = vmax.f32 %v14476_v13, %v5960_v12  ;;  %v17165_v55 = vrot.slane %v14467_v46, 1  ;;  %v5265_v61 = vmax.f32 %v14469_v53, %v5264_v1 }
 0x4cd   :  { %v5570_v20 = vrot.slane %v5569_v44, 2  ;;  %v5328_v6 = vmax.f32 %v5326_v60, %v5327_v23  ;;  %v5963_v17 = vsel %vm402_vm0, %v5300_v47, -inf  ;;  %v5966_v30 = vsel %vm402_vm0, %v5307_v51, -inf }
 0x4ce   :  { %v5258_v9 = vmax.f32 %v14467_v46, %v17165_v55  ;;  %v15011_v45 = vmax.f32 %v5562_v21, %v5563_v48  ;;  %v5577_v18 = vrot.slane %v5576_v57, 2  ;;  %v5962_v42 = vsel %vm402_vm0, %v14460_v36, -inf }
 0x4cf   :  { %v5969_v13 = vsel %vm402_vm0, %v5314_v5, -inf  ;;  %v5558_v24 = vrot.slane %v15000_v0, 1  ;;  %v5272_v41 = vmax.f32 %v5270_v32, %v5271_v3  ;;  %v5965_v46 = vsel %vm402_vm0, %v14535_v10, -inf }
 0x4d0   :  { %v5972_v53 = vsel %vm402_vm0, %v5321_v31, -inf  ;;  %v5964_v37 = vmax.f32 %v5962_v42, %v5963_v17  ;;  %v5967_v43 = vmax.f32 %v5965_v46, %v5966_v30  ;;  %v5968_v21 = vsel %vm402_vm0, %v5258_v9, -inf }
 0x4d1   :  { %v5971_v38 = vsel %vm402_vm0, %v5265_v61, -inf  ;;  %v5970_v47 = vmax.f32 %v5968_v21, %v5969_v13  ;;  %v5975_v36 = vsel %vm402_vm0, %v5328_v6, -inf  ;;  %v6316_v2 = vsel %vm6225_vm5, %v5958_v62, %v5955_v26 }
 0x4d2   :  { %v3353_v1 = vadd.f32 %v14607_v25, %v3352_v52  ;;  %v15025_v32 = vmax.f32 %v5569_v44, %v5570_v20  ;;  %v5973_v60 = vmax.f32 %v5971_v38, %v5972_v53  ;;  %v6317_v10 = vsel %vm6227_vm6, %v5961_v8, %v6316_v2 }
 0x4d3   :  { %v3356_v54 = vadd.f32 %v14607_v25, %v3355_v34  ;;  %v5565_v12 = vrot.slane %v15011_v45, 1  ;;  %v5974_v51 = vsel %vm402_vm0, %v5272_v41, -inf  ;;  %v6318_v48 = vsel %vm17166_vm15, %v5964_v37, %v6317_v10 }
 0x4d4   :  { %v3421_v5 = vmax.f32 %v3353_v1, 0.0  ;;  %v15032_v23 = vmax.f32 %v5576_v57, %v5577_v18  ;;  %v5976_v3 = vmax.f32 %v5974_v51, %v5975_v36  ;;  %v6319_v26 = vsel %vm17167_vm14, %v5967_v43, %v6318_v48  ;;  %v17171_v36 = vld [vmem:[#allocation26_spill] sm:$0xff]  ;;  %vm17188_vm14 = vmmov %vm17169_vm4 }
 0x4d5   :  { %v3422_v52 = vmax.f32 %v3356_v54, 0.0  ;;  %v6320_v44 = vsel %vm17168_vm3, %v5970_v47, %v6319_v26  ;;  %v6060_v2 = vand.u32 7, %v17171_v36  ;;  %v5572_v10 = vrot.slane %v15025_v32, 1  ;;  %vm17189_vm3 = vmmov %vm17170_vm9 }
 0x4d6   :  { %v3671_v31 = vrot.slane %v3421_v5, 2  ;;  %v3672_v62 = vrot.slane %v3421_v5, 4  ;;  %v3673_v8 = vrot.slane %v3421_v5, 6  ;;  %v6321_v25 = vsel %vm17169_vm4, %v5973_v60, %v6320_v44  ;;  %v17174_v44 = vld [vmem:[#allocation66_spill] sm:$0xff] }
 0x4d7   :  { %v5581_v55 = vsel %vm3872_vm1, %v3421_v5, -inf  ;;  %v3674_v9 = vrot.slane %v3422_v52, 2  ;;  %v3675_v61 = vrot.slane %v3422_v52, 4  ;;  %v6322_v20 = vsel %vm17170_vm9, %v5976_v3, %v6321_v25 }
 0x4d8   :  { %v5582_v6 = vrot.slane %v5581_v55, 4  ;;  %v5588_v57 = vsel %vm3872_vm1, %v3671_v31, -inf  ;;  %v5595_v17 = vsel %vm3872_vm1, %v3672_v62, -inf  ;;  %6372 = vst.msk [vmem:[#allocation4 + $0x68] sm:$0xff] %vm402_vm0, %v6322_v20  ;;  %6560 = vrot.lane.b32.xlu0 %v6322_v20, %s10653_s16  ;;  %v5602_v42 = vsel %vm3872_vm1, %v3673_v8, -inf }
 0x4d9   :  { %v5589_v30 = vrot.slane %v5588_v57, 4  ;;  %v5596_v18 = vrot.slane %v5595_v17, 4  ;;  %v3676_v13 = vrot.slane %v3422_v52, 6  ;;  %v5603_v46 = vrot.slane %v5602_v42, 4 }
 0x4da   :  { %v5583_v41 = vmax.f32 %v5581_v55, %v5582_v6  ;;  %v5609_v53 = vsel %vm3872_vm1, %v3422_v52, -inf  ;;  %v5616_v34 = vsel %vm3872_vm1, %v3674_v9, -inf  ;;  %v5623_v1 = vsel %vm3872_vm1, %v3675_v61, -inf }
 0x4db   :  { %v5590_v37 = vmax.f32 %v5588_v57, %v5589_v30  ;;  %v5597_v43 = vmax.f32 %v5595_v17, %v5596_v18  ;;  %v5610_v21 = vrot.slane %v5609_v53, 4  ;;  %v5617_v38 = vrot.slane %v5616_v34, 4 }
 0x4dc   :  { %v5604_v47 = vmax.f32 %v5602_v42, %v5603_v46  ;;  %v5630_v60 = vsel %vm3872_vm1, %v3676_v13, -inf  ;;  %v5584_v54 = vrot.slane %v5583_v41, 2  ;;  %vm15052_vm10 = vcmp.lt.s32.totalorder %v6060_v2, 7 }
 0x4dd   :  { %v5611_v51 = vmax.f32 %v5609_v53, %v5610_v21  ;;  %v5618_v48 = vmax.f32 %v5616_v34, %v5617_v38  ;;  %v5591_v5 = vrot.slane %v5590_v37, 2  ;;  %v5598_v3 = vrot.slane %v5597_v43, 2 }
 0x4de   :  { %v5624_v52 = vrot.slane %v5623_v1, 4  ;;  %v10411_v31 = vpack.i.bf16 %v14815_v28, %v17174_v44  ;;  %v5605_v62 = vrot.slane %v5604_v47, 2  ;;  %v5631_v25 = vrot.slane %v5630_v60, 4 }
 0x4df   :  { %v5612_v8 = vrot.slane %v5611_v51, 2  ;;  %v17175_v55 = vrot.slane %v14689_v33, 2  ;;  %v5559_v61 = vmax.f32 %v15000_v0, %v5558_v24  ;;  %v5579_v20 = vrot.slane %v15032_v23, 1  ;;  %v6483_v6 = vld [vmem:[#allocation4 + $0x61] sm:$0xff] }
 0x4e0   :  { %v5619_v57 = vrot.slane %v5618_v48, 2  ;;  %v5566_v17 = vmax.f32 %v15011_v45, %v5565_v12  ;;  %v5585_v30 = vmax.f32 %v5583_v41, %v5584_v54  ;;  %10412 = vrot.lane.b32.xlu0 %v10411_v31, %s10655_s17  ;;  %v6531_v28 = vsel %vm15052_vm10, %v6483_v6, 0.0  ;;  %vm17197_vm10 = vmmov %vm17183_vm8 }
 0x4e1   :  { %v5543_v9 = vmax.f32 %v14689_v33, %v17175_v55  ;;  %v5625_v18 = vmax.f32 %v5623_v1, %v5624_v52  ;;  %v6006_v33 = vmax.f32 %v14589_v58, %v14801_v14  ;;  %v5573_v42 = vmax.f32 %v15025_v32, %v5572_v10  ;;  %6622 = vrot.lane.b32.xlu1 %v6531_v28, %s10654_s29 }
 0x4e2   :  { %v5592_v13 = vmax.f32 %v5590_v37, %v5591_v5  ;;  %v5599_v0 = vmax.f32 %v5597_v43, %v5598_v3  ;;  %v6009_v24 = vmax.f32 %v14615_v29, %v14980_v50  ;;  %v5606_v45 = vmax.f32 %v5604_v47, %v5605_v62 }
 0x4e3   :  { %v5613_v12 = vmax.f32 %v5611_v51, %v5612_v8  ;;  %v5632_v41 = vmax.f32 %v5630_v60, %v5631_v25  ;;  %v17176_v46 = vrot.slane %v14756_v4, 1  ;;  %v5580_v34 = vmax.f32 %v15032_v23, %v5579_v20 }
 0x4e4   :  { %v15080_v58 = vsel %vm402_vm0, %v5559_v61, -inf  ;;  %v5620_v14 = vmax.f32 %v5618_v48, %v5619_v57  ;;  %v15083_v32 = vsel %vm402_vm0, %v5566_v17, -inf  ;;  %v5586_v37 = vrot.slane %v5585_v30, 1 }
 0x4e5   :  { %v5531_v53 = vmax.f32 %v14756_v4, %v17176_v46  ;;  %v5626_v43 = vrot.slane %v5625_v18, 2  ;;  %v17177_v29 = vrot.slane %v14640_v19, 2  ;;  %v15089_v21 = vsel %vm402_vm0, %v5573_v42, -inf }
 0x4e6   :  { %v5593_v38 = vrot.slane %v5592_v13, 1  ;;  %v5600_v4 = vrot.slane %v5599_v0, 1  ;;  %v5488_v23 = vrot.slane %v14657_v49, 1  ;;  %v5607_v47 = vrot.slane %v5606_v45, 1 }
 0x4e7   :  { %v5494_v50 = vmax.f32 %v14640_v19, %v17177_v29  ;;  %v5614_v1 = vrot.slane %v5613_v12, 1  ;;  %v5633_v60 = vrot.slane %v5632_v41, 2  ;;  %v5544_v10 = vrot.slane %v5543_v9, 1  ;;  %v10544_v29 = vld [vmem:[%s16494_s2] ss:$0 sm:$0xff] }
 0x4e8   :  { %v15093_v54 = vsel %vm402_vm0, %v5580_v34, -inf  ;;  %v5621_v51 = vrot.slane %v5620_v14, 1  ;;  %v17178_v48 = vrot.slane %v14654_v39, 1  ;;  %v17179_v19 = vrot.slane %v14711_v27, 2  ;;  %v17181_v34 = vld [vmem:[#allocation67_spill] sm:$0xff] }
 0x4e9   :  { %v15101_v26 = vmax.f32 %v5585_v30, %v5586_v37  ;;  %v5627_v52 = vmax.f32 %v5625_v18, %v5626_v43  ;;  %v5495_v44 = vrot.slane %v5494_v50, 1  ;;  %v17180_v31 = vrot.slane %v14761_v35, 1 }
 0x4ea   :  { %v5482_v5 = vmax.f32 %v14654_v39, %v17178_v48  ;;  %v5550_v3 = vmax.f32 %v14711_v27, %v17179_v19  ;;  %v15106_v8 = vmax.f32 %v5592_v13, %v5593_v38  ;;  %v15108_v25 = vmax.f32 %v5599_v0, %v5600_v4  ;;  %v3357_v13 = vpop.f32.mrf.mxu3 }
 0x4eb   :  { %v5538_v62 = vmax.f32 %v14761_v35, %v17180_v31  ;;  %v5545_v55 = vmax.f32 %v5543_v9, %v5544_v10  ;;  %v15110_v20 = vmax.f32 %v5606_v45, %v5607_v47  ;;  %v5615_v39 = vmax.f32 %v5613_v12, %v5614_v1  ;;  %v17185_v1 = vld [vmem:[#allocation77_spill] sm:$0xff] }
 0x4ec   :  { %v5551_v61 = vrot.slane %v5550_v3, 1  ;;  %v15112_v6 = vmax.f32 %v5632_v41, %v5633_v60  ;;  %v5489_v27 = vmax.f32 %v14657_v49, %v5488_v23  ;;  %v5622_v57 = vmax.f32 %v5620_v14, %v5621_v51  ;;  %v6613_v41 = vpop.permute.xlu1 %6612  ;;  %v17184_v23 = vld [vmem:[#allocation34_spill] sm:$0xff] }
 0x4ed   :  { %v6011_v30 = vsel %vm402_vm0, %v14794_v63, -inf  ;;  %v6014_v35 = vsel %vm402_vm0, %v5531_v53, -inf  ;;  %v5628_v28 = vrot.slane %v5627_v52, 1  ;;  %v5496_v18 = vmax.f32 %v5494_v50, %v5495_v44  ;;  %v6484_v51 = vld [vmem:[#allocation4 + $0x69] sm:$0xff] }
 0x4ee   :  { %v5552_v17 = vmax.f32 %v5550_v3, %v5551_v61  ;;  %v6013_v9 = vsel %vm402_vm0, %v14672_v16, -inf  ;;  %v6017_v42 = vsel %vm402_vm0, %v5538_v62, -inf  ;;  %v6010_v0 = vsel %vm402_vm0, %v14593_v22, -inf }
 0x4ef   :  { %v6015_v45 = vmax.f32 %v6013_v9, %v6014_v35  ;;  %v6016_v49 = vsel %vm402_vm0, %v5482_v5, -inf  ;;  %v6020_v12 = vsel %vm402_vm0, %v5545_v55, -inf  ;;  %v6012_v63 = vmax.f32 %v6010_v0, %v6011_v30 }
 0x4f0   :  { %v6018_v46 = vmax.f32 %v6016_v49, %v6017_v42  ;;  %v6019_v53 = vsel %vm402_vm0, %v5489_v27, -inf  ;;  %v17182_v14 = vmax.f32 %v14578_v15, %v17181_v34  ;;  %v6023_v43 = vsel %vm402_vm0, %v5552_v17, -inf }
 0x4f1   :  { %v6021_v37 = vmax.f32 %v6019_v53, %v6020_v12  ;;  %v3358_v50 = vadd.f32 %v10544_v29, %v3357_v13  ;;  %v5635_v38 = vrot.slane %v15112_v6, 1  ;;  %v6061_v47 = vand.u32 7, %v17184_v23  ;;  %v17190_v53 = vld [vmem:[#allocation30_spill] sm:$0xff]  ;;  %v6551_v29 = vpop.permute.xlu2 %6550 }
 0x4f2   :  { %v6330_v16 = vsel %vm6225_vm5, %v6006_v33, %v17182_v14  ;;  %v15140_v15 = vsel %vm1683_vm11, %v17185_v1, %v6613_v41  ;;  %v6026_v33 = vsel %vm402_vm0, %v5615_v39, -inf  ;;  %v6022_v60 = vsel %vm402_vm0, %v5496_v18, -inf  ;;  %v17191_v14 = vld [vmem:[#allocation23_spill] sm:$0xff] }
 0x4f3   :  { %v6331_v22 = vsel %vm6227_vm6, %v6009_v24, %v6330_v16  ;;  %v3423_v10 = vmax.f32 %v3358_v50, 0.0  ;;  %6686 = vst.msk [vmem:[#allocation5 + $0x38] sm:$0xff] %vm1748_vm12, %v15140_v15  ;;  %v5629_v48 = vmax.f32 %v5627_v52, %v5628_v28  ;;  %v6024_v5 = vmax.f32 %v6022_v60, %v6023_v43  ;;  %v15182_v60 = vld [vmem:[#allocation5 + $0x30] sm:$0xff] }
 0x4f4   :  { %v6332_v4 = vsel %vm17183_vm8, %v6012_v63, %v6331_v22  ;;  %vm6468_vm15 = vcmp.lt.s32.totalorder %v6061_v47, 7  ;;  %v6029_v55 = vsel %vm402_vm0, %v5622_v57, -inf  ;;  %v15162_v57 = vsel %vm402_vm0, %v15101_v26, -inf  ;;  %vm17198_vm8 = vmmov %vm17186_vm7 }
 0x4f5   :  { %v6333_v24 = vsel %vm17186_vm7, %v6015_v45, %v6332_v4  ;;  %v3677_v44 = vrot.slane %v3423_v10, 2  ;;  %v3678_v31 = vrot.slane %v3423_v10, 4  ;;  %v3679_v62 = vrot.slane %v3423_v10, 6 }
 0x4f6   :  { %v6334_v19 = vsel %vm17187_vm2, %v6018_v46, %v6333_v24  ;;  %v5637_v39 = vsel %vm3872_vm1, %v3423_v10, -inf  ;;  %v6532_v27 = vsel %vm6468_vm15, %v6484_v51, 0.0  ;;  %v15166_v42 = vsel %vm402_vm0, %v15106_v8, -inf  ;;  %vm17201_vm15 = vmmov %vm17188_vm14 }
 0x4f7   :  { %v6335_v3 = vsel %vm17188_vm14, %v6021_v37, %v6334_v19  ;;  %v5638_v52 = vrot.slane %v5637_v39, 4  ;;  %v5644_v17 = vsel %vm3872_vm1, %v3677_v44, -inf  ;;  %v5651_v30 = vsel %vm3872_vm1, %v3678_v31, -inf  ;;  %6624 = vrot.lane.b32.xlu2 %v6532_v27, %s10654_s29  ;;  %v6400_v19 = vld [vmem:[#allocation4 + $0x47] sm:$0xff] }
 0x4f8   :  { %v6336_v61 = vsel %vm17189_vm3, %v6024_v5, %v6335_v3  ;;  %v5658_v35 = vsel %vm3872_vm1, %v3679_v62, -inf  ;;  %v5645_v28 = vrot.slane %v5644_v17, 4  ;;  %v5652_v18 = vrot.slane %v5651_v30, 4  ;;  %v17192_v62 = vld [vmem:[#allocation32_spill] sm:$0xff] }
 0x4f9   :  { %6374 = vst.msk [vmem:[#allocation4 + $0x78] sm:$0xff] %vm402_vm0, %v6336_v61  ;;  %6564 = vrot.lane.b32.xlu0 %v6336_v61, %s10653_s16  ;;  %v5659_v9 = vrot.slane %v5658_v35, 4  ;;  %v6030_v13 = vmax.f32 %v15083_v32, %v6029_v55  ;;  %v6032_v0 = vsel %vm402_vm0, %v5629_v48, -inf  ;;  %v5639_v45 = vmax.f32 %v5637_v39, %v5638_v52 }
 0x4fa   :  { %v6027_v49 = vmax.f32 %v15080_v58, %v6026_v33  ;;  %v5646_v12 = vmax.f32 %v5644_v17, %v5645_v28  ;;  %v5653_v41 = vmax.f32 %v5651_v30, %v5652_v18  ;;  %v5636_v26 = vmax.f32 %v15112_v6, %v5635_v38  ;;  %v17196_v28 = vld [vmem:[#allocation27_spill] sm:$0xff] }
 0x4fb   :  { %v5660_v63 = vmax.f32 %v5658_v35, %v5659_v9  ;;  %v5640_v46 = vrot.slane %v5639_v45, 2  ;;  %v6069_v34 = vshra.s32 %v17190_v53, 3  ;;  %v6070_v16 = vshra.s32 %v17191_v14, 3  ;;  %v17199_v14 = vld [vmem:[#allocation24_spill] sm:$0xff] }
 0x4fc   :  { %v6033_v8 = vmax.f32 %v15089_v21, %v6032_v0  ;;  %v5647_v37 = vrot.slane %v5646_v12, 2  ;;  %v5654_v43 = vrot.slane %v5653_v41, 2  ;;  %v6337_v22 = vsel %vm6225_vm5, %v6030_v13, %v6027_v49  ;;  %v15184_v21 = vld [vmem:[#allocation5 + $0x38] sm:$0xff] }
 0x4fd   :  { %v5661_v32 = vrot.slane %v5660_v63, 2  ;;  %v5641_v50 = vmax.f32 %v5639_v45, %v5640_v46  ;;  %v15176_v58 = vand.u32 7, %v6069_v34  ;;  %v15178_v4 = vand.u32 7, %v6070_v16 }
 0x4fe   :  { %v6043_v6 = vsel %vm402_vm0, %v15108_v25, -inf  ;;  %v5648_v38 = vmax.f32 %v5646_v12, %v5647_v37  ;;  %v5655_v1 = vmax.f32 %v5653_v41, %v5654_v43  ;;  %v6035_v24 = vsel %vm402_vm0, %v5636_v26, -inf  ;;  %v6553_v17 = vpop.permute.xlu0 %6552  ;;  %v6617_v26 = vpop.permute.xlu2 %6616 }
 0x4ff   :  { %v5662_v33 = vmax.f32 %v5660_v63, %v5661_v32  ;;  %v5642_v10 = vrot.slane %v5641_v50, 1  ;;  %6562 = vrot.lane.b32.xlu2 %v14976_v56, %s10653_s16  ;;  %vm6780_vm1 = vcmp.lt.s32.totalorder %v15176_v58, 7  ;;  %vm6781_vm4 = vcmp.lt.s32.totalorder %v15178_v4, 7 }
 0x500   :  { %v6338_v51 = vsel %vm6227_vm6, %v6033_v8, %v6337_v22  ;;  %v5649_v25 = vrot.slane %v5648_v38, 1  ;;  %v5656_v48 = vrot.slane %v5655_v1, 1  ;;  %v6830_v44 = vsel %vm6780_vm1, %v15182_v60, 0.0  ;;  %v6399_v8 = vld [vmem:[#allocation4 + $0x3f] sm:$0xff] }
 0x501   :  { %v5663_v5 = vrot.slane %v5662_v33, 1  ;;  %v5643_v3 = vmax.f32 %v5641_v50, %v5642_v10  ;;  %v6831_v31 = vsel %vm6781_vm4, %v15184_v21, 0.0  ;;  %v17193_v55 = vand.u32 7, %v17192_v62 }
 0x502   :  { %v5650_v56 = vmax.f32 %v5648_v38, %v5649_v25  ;;  %v5657_v39 = vmax.f32 %v5655_v1, %v5656_v48  ;;  %v10416_v52 = vpack.i.bf16 %v6831_v31, %v6830_v44  ;;  %v6036_v30 = vmax.f32 %v15093_v54, %v6035_v24  ;;  %v7014_v54 = vld [vmem:[%s16495_s3 + $0x10] sm:$0x3]  ;;  %v17203_v25 = vld [vmem:[#allocation31_spill] sm:$0xff] }
 0x503   :  { %vm15196_vm9 = vcmp.gt.s32.totalorder %v17193_v55, 0  ;;  %v5664_v27 = vmax.f32 %v5662_v33, %v5663_v5  ;;  %v6038_v35 = vsel %vm402_vm0, %v5643_v3, -inf  ;;  %v6062_v18 = vand.u32 7, %v17196_v28  ;;  %v17205_v44 = vld [vmem:[#allocation28_spill] sm:$0xff]  ;;  %v9934_v55 = vld [vmem:[%s16495_s3] sm:$0xff] }
 0x504   :  { %v6448_v9 = vsel %vm15196_vm9, %v6400_v19, 0.0  ;;  %v6039_v13 = vmax.f32 %v15162_v57, %v6038_v35  ;;  %v6041_v0 = vsel %vm402_vm0, %v5650_v56, -inf  ;;  %v6044_v45 = vsel %vm402_vm0, %v5657_v39, -inf  ;;  %10417 = vrot.lane.b32.xlu1 %v10416_v52, %s10656_s18  ;;  %v17204_v19 = vld [vmem:[#allocation35_spill] sm:$0xff] }
 0x505   :  { %v6047_v49 = vsel %vm402_vm0, %v5664_v27, -inf  ;;  %v6339_v12 = vsel %vm17197_vm10, %v6036_v30, %v6338_v51  ;;  %v6042_v41 = vmax.f32 %v15166_v42, %v6041_v0  ;;  %v6045_v63 = vmax.f32 %v6043_v6, %v6044_v45  ;;  %v9935_v51 = vld [vmem:[%s16495_s3 + $0x8] sm:$0xff]  ;;  %s10657_s3 = smov 16  }
 0x506   :  { %v6656_v57 = vsel %vm402_vm0, %v6448_v9, %v6553_v17  ;;  %v6046_v46 = vsel %vm402_vm0, %v15110_v20, -inf  ;;  %v6340_v53 = vsel %vm17198_vm8, %v6039_v13, %v6339_v12  ;;  %v17200_v16 = vand.u32 7, %v17199_v14  ;;  %v6485_v20 = vld [vmem:[#allocation4 + $0x71] sm:$0xff]  ;;  %v6555_v30 = vpop.permute.xlu2 %6554 }
 0x507   :  { %v15220_v34 = vsel %vm1683_vm11, %v6656_v57, %v6617_v26  ;;  %v6048_v37 = vmax.f32 %v6046_v46, %v6047_v49  ;;  %v6341_v43 = vsel %vm17187_vm2, %v6042_v41, %v6340_v53  ;;  %v7028_v42 = vunpack.c.l.b16 %v7014_v54  ;;  %v6615_v33 = vpop.permute.xlu1 %6614  ;;  %v17206_v49 = vld [vmem:[#allocation33_spill] sm:$0xff] }
 0x508   :  { %vm6383_vm7 = vcmp.gt.s32.totalorder %v17200_v16, 0  ;;  %6688 = vst.msk [vmem:[#allocation5 + $0x48] sm:$0xff] %vm1748_vm12, %v15220_v34  ;;  %v6342_v32 = vsel %vm17201_vm15, %v6045_v63, %v6341_v43  ;;  %vm6469_vm14 = vcmp.lt.s32.totalorder %v6062_v18, 7  ;;  %vm17202_vm1 = vcmask 1041408   ;;  %v6402_v12 = vld [vmem:[#allocation4 + $0x57] sm:$0xff] }
 0x509   :  { %v6343_v22 = vsel %vm17189_vm3, %v6048_v37, %v6342_v32  ;;  %v7031_v50 = vpack.c.b16 %v7028_v42, %v7028_v42  ;;  %v6447_v6 = vsel %vm6383_vm7, %v6399_v8, 0.0  ;;  %v6533_v1 = vsel %vm6469_vm14, %v6485_v20, 0.0  ;;  %v10393_v52 = vpop.permute.xlu0 %10392  ;;  %v17208_v41 = vld [vmem:[#allocation41_spill] sm:$0xff]  ;;  %v6712_v63 = vld [vmem:[#allocation5] sm:$0xff] }
 0x50a   :  { %6375 = vst.msk [vmem:[#allocation4 + $0x80] sm:$0xff] %vm402_vm0, %v6343_v22  ;;  %v6655_v38 = vsel %vm402_vm0, %v6447_v6, %v6551_v29  ;;  %v6071_v48 = vshra.s32 %v17203_v25, 3  ;;  %v6072_v5 = vshra.s32 %v17199_v14, 3  ;;  %v6063_v3 = vand.u32 7, %v17204_v19  ;;  %v17209_v26 = vld [vmem:[#allocation45_spill] sm:$0xff] }
 0x50b   :  { %v7059_v24 = vsel %vm17202_vm1, %v7031_v50, 0  ;;  %v6671_v10 = vsel %vm1683_vm11, %v6655_v38, %v6615_v33  ;;  %v6064_v31 = vand.u32 7, %v17205_v44  ;;  %v17207_v54 = vand.u32 7, %v17206_v49  ;;  %v6713_v53 = vld [vmem:[#allocation5 + $0x8] sm:$0xff] }
 0x50c   :  { %6626 = vrot.lane.b32.xlu1 %v6533_v1, %s10654_s29  ;;  %7066 = vmatpush.bf16.msrb.mxu1 %v7059_v24  ;;  %v10421_v29 = vpack.i.bf16 %v6671_v10, %v15140_v15  ;;  %6687 = vst.msk [vmem:[#allocation5 + $0x40] sm:$0xff] %vm1748_vm12, %v6671_v10  ;;  %vm6470_vm4 = vcmp.lt.s32.totalorder %v6063_v3, 7  ;;  %v15251_v61 = vand.u32 7, %v6071_v48  ;;  %v15253_v56 = vand.u32 7, %v6072_v5  ;;  %v17210_v24 = vld [vmem:[#allocation25_spill] sm:$0xff] }
 0x50d   :  { %vm6471_vm8 = vcmp.lt.s32.totalorder %v6064_v31, 7  ;;  %vm6386_vm7 = vcmp.gt.s32.totalorder %v17207_v54, 0  ;;  %vm6696_vm2 = vcmp.gt.s32.totalorder %v17208_v41, 0  ;;  %vm6697_vm15 = vcmp.gt.s32.totalorder %v17209_v26, 0  ;;  %v10545_v54 = vld [vmem:[#allocation5 + $0x10] sm:$0xff]  ;;  %v10546_v41 = vld [vmem:[#allocation5 + $0x18] sm:$0xff] }
 0x50e   :  { %10422 = vrot.lane.b32.xlu0 %v10421_v29, %s10655_s17  ;;  %vm6782_vm9 = vcmp.lt.s32.totalorder %v15251_v61, 7  ;;  %vm6783_vm10 = vcmp.lt.s32.totalorder %v15253_v56, 7  ;;  %v10395_v57 = vunpack.i.h.bf16 %v10393_v52  ;;  %v10394_v46 = vunpack.i.l.bf16 %v10393_v52  ;;  %v6621_v8 = vpop.permute.xlu2 %6620 }
 0x50f   :  { %v15255_v27 = vld [vmem:[#allocation5 + $0x48] sm:$0xff]  ;;  %v6450_v14 = vsel %vm6386_vm7, %v6402_v12, 0.0  ;;  %v6760_v37 = vsel %vm6696_vm2, %v6712_v63, 0.0  ;;  %v6761_v20 = vsel %vm6697_vm15, %v6713_v53, 0.0  ;;  %v17211_v10 = vand.u32 7, %v17210_v24 }
 0x510   :  { %7067 = vmatpush.bf16.msrb.mxu1 %v9935_v51  ;;  %v6833_v13 = vsel %vm6783_vm10, %v15255_v27, 0.0  ;;  %v6970_v6 = vsel %vm1748_vm12, %v6760_v37, %v10394_v46  ;;  %v6971_v38 = vsel %vm1748_vm12, %v6761_v20, %v10395_v57  ;;  %v6401_v51 = vld [vmem:[#allocation4 + $0x4f] sm:$0xff]  ;;  %vm17212_vm3 = vcmask 293888  }
 0x511   :  { %v6486_v39 = vld [vmem:[#allocation4 + $0x79] sm:$0xff]  ;;  %v6487_v17 = vld [vmem:[#allocation4 + $0x81] sm:$0xff]  ;;  %vm6385_vm14 = vcmp.gt.s32.totalorder %v17211_v10, 0  ;;  %vm6698_vm1 = vcmp.gt.s32.totalorder %v14903_v11, 0  ;;  %v6073_v52 = vshra.s32 %v17192_v62, 3  ;;  %vm6388_vm7 = vcmp.gt.s32.totalorder %v6061_v47, 0 }
 0x512   :  { %v6534_v15 = vsel %vm6470_vm4, %v6486_v39, 0.0  ;;  %v6535_v0 = vsel %vm6471_vm8, %v6487_v17, 0.0  ;;  %v6449_v48 = vsel %vm6385_vm14, %v6401_v51, 0.0  ;;  %vm6699_vm4 = vcmp.gt.s32.totalorder %v14930_v59, 0  ;;  %vm17213_vm8 = vmmov %vm17212_vm3 }
 0x513   :  { %6628 = vrot.lane.b32.xlu2 %v6534_v15, %s10654_s29  ;;  %v15262_v35 = vld [vmem:[#allocation5 + $0x40] sm:$0xff]  ;;  %v6657_v5 = vsel %vm402_vm0, %v6449_v48, %v6555_v30  ;;  %v6074_v17 = vshra.s32 %v17210_v24, 3  ;;  %v6762_v12 = vsel %vm6698_vm1, %v10545_v54, 0.0  ;;  %v6763_v11 = vsel %vm6699_vm4, %v10546_v41, 0.0 }
 0x514   :  { %7068 = vmatpush.bf16.msrb.mxu1 %v9934_v55  ;;  %v6832_v9 = vsel %vm6782_vm9, %v15262_v35, 0.0  ;;  %vm6387_vm2 = vcmp.gt.s32.totalorder %v6060_v2, 0  ;;  %v6075_v51 = vshra.s32 %v17206_v49, 3  ;;  %vm6700_vm1 = vcmp.gt.s32.totalorder %v15176_v58, 0  ;;  %v6405_v58 = vld [vmem:[#allocation4 + $0x6f] sm:$0xff] }
 0x515   :  { %v10426_v45 = vpack.i.bf16 %v6833_v13, %v6832_v9  ;;  %v15295_v13 = vand.u32 7, %v6073_v52  ;;  %v6406_v52 = vld [vmem:[#allocation4 + $0x77] sm:$0xff]  ;;  %vm6701_vm4 = vcmp.gt.s32.totalorder %v15178_v4, 0 }
 0x516   :  { %6630 = vrot.lane.b32.xlu0 %v6535_v0, %s10654_s29  ;;  %v15297_v0 = vand.u32 7, %v6074_v17  ;;  %v15327_v48 = vand.u32 7, %v6075_v51  ;;  %s10659_s29 = smov 48  }
 0x517   :  { %10427 = vrot.lane.b32.xlu1 %v10426_v45, %s10656_s18  ;;  %vm6784_vm9 = vcmp.lt.s32.totalorder %v15295_v13, 7 }
 0x518   :  { %vm6785_vm10 = vcmp.lt.s32.totalorder %v15297_v0, 7  ;;  %vm6786_vm15 = vcmp.lt.s32.totalorder %v15327_v48, 7 }
 0x519   :  { %v6557_v16 = vpop.permute.xlu0 %6556 }
 0x51a   :  { %v6658_v43 = vsel %vm402_vm0, %v6450_v14, %v6557_v16  ;;  %v10398_v32 = vpop.permute.xlu1 %10397 }
 0x51b   :  { %6566 = vrot.lane.b32.xlu2 %v6343_v22, %s10653_s16  ;;  %v15275_v42 = vsel %vm1683_vm11, %v6658_v43, %v6621_v8  ;;  %v10400_v22 = vunpack.i.h.bf16 %v10398_v32  ;;  %v10399_v50 = vunpack.i.l.bf16 %v10398_v32  ;;  %v6559_v43 = vpop.permute.xlu2 %6558  ;;  %v6404_v32 = vld [vmem:[#allocation4 + $0x67] sm:$0xff]  ;;  %s10658_s16 = smov 32  }
 0x51c   :  { %6690 = vst.msk [vmem:[#allocation5 + $0x58] sm:$0xff] %vm1748_vm12, %v15275_v42 }
 0x51d   :  { %v6986_v1 = vsel %vm2969_vm13, %v6970_v6, %v10399_v50  ;;  %v6987_v33 = vsel %vm2969_vm13, %v6971_v38, %v10400_v22  ;;  %v6452_v22 = vsel %vm6388_vm7, %v6404_v32, 0.0  ;;  %v6403_v6 = vld [vmem:[#allocation4 + $0x5f] sm:$0xff] }
 0x51e   :  { %v7002_v25 = vpack.c.bf16 %v6987_v33, %v6986_v1  ;;  %v6451_v33 = vsel %vm6387_vm2, %v6403_v6, 0.0 }
 0x51f   :  { %v6659_v24 = vsel %vm402_vm0, %v6451_v33, %v6559_v43  ;;  %v6077_v43 = vshra.s32 %v17184_v23, 3 }
 0x520   :  { %9456 = vmatmul.msk.bf16.vlgmr.msrb.gmra.mxu1 %vm17212_vm3, %v7002_v25  ;;  %v6076_v25 = vshra.s32 %v17171_v36, 3  ;;  %vm6390_vm3 = vcmp.gt.s32.totalorder %v6063_v3, 0  ;;  %v6765_v3 = vsel %vm6701_vm4, %v14936_v7, 0.0  ;;  %vm6705_vm4 = vcmp.gt.s32.totalorder %v15297_v0, 0 }
 0x522   :  { %v6619_v29 = vpop.permute.xlu1 %6618 }
 0x523   :  { %v6673_v55 = vsel %vm1683_vm11, %v6657_v5, %v6619_v29  ;;  %v10403_v15 = vpop.permute.xlu0 %10402  ;;  %v15301_v45 = vld [vmem:[#allocation5 + $0x58] sm:$0xff]  ;;  %v15329_v5 = vand.u32 7, %v6076_v25 }
 0x524   :  { %v10431_v39 = vpack.i.bf16 %v6673_v55, %v15220_v34  ;;  %6689 = vst.msk [vmem:[#allocation5 + $0x50] sm:$0xff] %vm1748_vm12, %v6673_v55  ;;  %v10405_v9 = vunpack.i.h.bf16 %v10403_v15  ;;  %v10404_v30 = vunpack.i.l.bf16 %v10403_v15  ;;  %v6835_v53 = vsel %vm6785_vm10, %v15301_v45, 0.0  ;;  %vm17214_vm10 = vmmov %vm17213_vm8 }
 0x525   :  { %vm6787_vm14 = vcmp.lt.s32.totalorder %v15329_v5, 7 }
 0x526   :  { %10432 = vrot.lane.b32.xlu1 %v10431_v39, %s10655_s17  ;;  %v6973_v62 = vsel %vm1748_vm12, %v6763_v11, %v10405_v9  ;;  %v6972_v57 = vsel %vm1748_vm12, %v6762_v12, %v10404_v30  ;;  %v6454_v9 = vsel %vm6390_vm3, %v6406_v52, 0.0 }
 0x52b   :  { %v15299_v34 = vld [vmem:[#allocation5 + $0x50] sm:$0xff] }
 0x52c   :  { %v6834_v46 = vsel %vm6784_vm9, %v15299_v34, 0.0  ;;  %vm6389_vm9 = vcmp.gt.s32.totalorder %v6062_v18, 0 }
 0x52d   :  { %v10436_v14 = vpack.i.bf16 %v6835_v53, %v6834_v46 }
 0x52f   :  { %10437 = vrot.lane.b32.xlu2 %v10436_v14, %s10656_s18 }
 0x532   :  { %v10408_v63 = vpop.permute.xlu1 %10407 }
 0x533   :  { %v10410_v59 = vunpack.i.h.bf16 %v10408_v63  ;;  %v10409_v26 = vunpack.i.l.bf16 %v10408_v63 }
 0x535   :  { %v6988_v16 = vsel %vm2969_vm13, %v6972_v57, %v10409_v26  ;;  %v6989_v8 = vsel %vm2969_vm13, %v6973_v62, %v10410_v59  ;;  %v6764_v59 = vsel %vm6700_vm1, %v14934_v40, 0.0  ;;  %v6453_v40 = vsel %vm6389_vm9, %v6405_v58, 0.0  ;;  %v15409_v58 = vld [vmem:[#allocation10] ss:$0 sm:$0xff] }
 0x536   :  { %v7003_v37 = vpack.c.bf16 %v6989_v8, %v6988_v16  ;;  %v6078_v8 = vshra.s32 %v17196_v28, 3  ;;  %v6407_v28 = vld [vmem:[#allocation4 + $0x7f] sm:$0xff]  ;;  %vm6704_vm1 = vcmp.gt.s32.totalorder %v15295_v13, 0  ;;  %vm7238_vm9 = vcmask 123904  }
 0x538   :  { %9457 = vmatmul.msk.bf16.gmra.mxu1 %vm17213_vm8, %v7003_v37  ;;  %v15362_v18 = vand.u32 7, %v6078_v8  ;;  %vm15368_vm8 = vcmp.gt.s32.totalorder %v6064_v31, 0 }
 0x53a   :  { %vm6789_vm7 = vcmp.lt.s32.totalorder %v15362_v18, 7 }
 0x54a   :  { %v6561_v20 = vpop.permute.xlu0 %6560 }
 0x54b   :  { %v6660_v50 = vsel %vm402_vm0, %v6452_v22, %v6561_v20  ;;  %v15364_v22 = vand.u32 7, %v6077_v43 }
 0x54d   :  { %vm6788_vm2 = vcmp.lt.s32.totalorder %v15364_v22, 7 }
 0x551   :  { %v6625_v38 = vpop.permute.xlu2 %6624 }
 0x552   :  { %v6676_v1 = vsel %vm1683_vm11, %v6660_v50, %v6625_v38  ;;  %v10413_v39 = vpop.permute.xlu0 %10412  ;;  %v6455_v38 = vsel %vm15368_vm8, %v6407_v28, 0.0  ;;  %vm6706_vm8 = vcmp.gt.s32.totalorder %v15327_v48, 0 }
 0x553   :  { %6692 = vst.msk [vmem:[#allocation5 + $0x68] sm:$0xff] %vm1748_vm12, %v6676_v1  ;;  %v6623_v10 = vpop.permute.xlu1 %6622  ;;  %v10415_v41 = vunpack.i.h.bf16 %v10413_v39  ;;  %v10414_v11 = vunpack.i.l.bf16 %v10413_v39 }
 0x554   :  { %v6675_v47 = vsel %vm1683_vm11, %v6659_v24, %v6623_v10 }
 0x555   :  { %6691 = vst.msk [vmem:[#allocation5 + $0x60] sm:$0xff] %vm1748_vm12, %v6675_v47  ;;  %v10441_v2 = vpack.i.bf16 %v6675_v47, %v15275_v42  ;;  %v6975_v57 = vsel %vm1748_vm12, %v6765_v3, %v10415_v41  ;;  %v6974_v46 = vsel %vm1748_vm12, %v6764_v59, %v10414_v11  ;;  %v6080_v47 = vshra.s32 %v17205_v44, 3 }
 0x557   :  { %10442 = vrot.lane.b32.xlu0 %v10441_v2, %s10655_s17 }
 0x559   :  { %v6563_v15 = vpop.permute.xlu2 %6562 }
 0x55a   :  { %v15331_v29 = vld [vmem:[#allocation5 + $0x68] sm:$0xff]  ;;  %v6661_v7 = vsel %vm402_vm0, %v6453_v40, %v6563_v15 }
 0x55b   :  { %v6837_v49 = vsel %vm6787_vm14, %v15331_v29, 0.0  ;;  %vm6703_vm14 = vcmp.gt.s32.totalorder %v15253_v56, 0 }
 0x55c   :  { %v15335_v55 = vld [vmem:[#allocation5 + $0x60] sm:$0xff] }
 0x55d   :  { %v6836_v36 = vsel %vm6786_vm15, %v15335_v55, 0.0  ;;  %vm6702_vm15 = vcmp.gt.s32.totalorder %v15251_v61, 0  ;;  %v6767_v61 = vsel %vm6703_vm14, %v15184_v21, 0.0  ;;  %v6793_v21 = vld [vmem:[#allocation5 + $0x88] sm:$0xff]  ;;  %vm17219_vm14 = vcmask 1044484  }
 0x55e   :  { %v10446_v42 = vpack.i.bf16 %v6837_v49, %v6836_v36  ;;  %v6766_v36 = vsel %vm6702_vm15, %v15182_v60, 0.0  ;;  %vm17218_vm15 = vcmask 1043459  }
 0x560   :  { %10447 = vrot.lane.b32.xlu1 %v10446_v42, %s10656_s18  ;;  %v6079_v42 = vshra.s32 %v17204_v19, 3 }
 0x56b   :  { %v6565_v17 = vpop.permute.xlu0 %6564 }
 0x56c   :  { %v6662_v30 = vsel %vm402_vm0, %v6454_v9, %v6565_v17  ;;  %v15394_v9 = vand.u32 7, %v6080_v47 }
 0x56d   :  { %v6629_v54 = vpop.permute.xlu2 %6628 }
 0x56e   :  { %v6678_v12 = vsel %vm1683_vm11, %v6662_v30, %v6629_v54  ;;  %v15399_v54 = vand.u32 7, %v6079_v42 }
 0x56f   :  { %6694 = vst.msk [vmem:[#allocation5 + $0x78] sm:$0xff] %vm1748_vm12, %v6678_v12 }
 0x570   :  { %vm6790_vm3 = vcmp.lt.s32.totalorder %v15399_v54, 7 }
 0x575   :  { %v6567_v23 = vpop.permute.xlu2 %6566 }
 0x576   :  { %v10418_v63 = vpop.permute.xlu1 %10417  ;;  %v15372_v6 = vld [vmem:[#allocation5 + $0x78] sm:$0xff]  ;;  %v6663_v51 = vsel %vm402_vm0, %v6455_v38, %v6567_v23  ;;  %vm6791_vm0 = vcmp.lt.s32.totalorder %v15394_v9, 7 }
 0x577   :  { %v10420_v26 = vunpack.i.h.bf16 %v10418_v63  ;;  %v10419_v62 = vunpack.i.l.bf16 %v10418_v63  ;;  %v6839_v33 = vsel %vm6789_vm7, %v15372_v6, 0.0  ;;  %vm6707_vm7 = vcmp.gt.s32.totalorder %v15329_v5, 0 }
 0x579   :  { %v6990_v53 = vsel %vm2969_vm13, %v6974_v46, %v10419_v62  ;;  %v6991_v14 = vsel %vm2969_vm13, %v6975_v57, %v10420_v26 }
 0x57a   :  { %v7004_v4 = vpack.c.bf16 %v6991_v14, %v6990_v53  ;;  %v6768_v53 = vsel %vm6704_vm1, %v15262_v35, 0.0  ;;  %v6769_v14 = vsel %vm6705_vm4, %v15255_v27, 0.0  ;;  %vm17223_vm1 = vcmask 1047559  }
 0x57b   :  { %vm6708_vm4 = vcmp.gt.s32.totalorder %v15364_v22, 0 }
 0x57c   :  { %9458 = vmatmul.msk.bf16.gmra.mxu1 %vm17214_vm10, %v7004_v4 }
 0x57e   :  { %v6627_v16 = vpop.permute.xlu1 %6626 }
 0x57f   :  { %v6677_v37 = vsel %vm1683_vm11, %v6661_v7, %v6627_v16 }
 0x580   :  { %6693 = vst.msk [vmem:[#allocation5 + $0x70] sm:$0xff] %vm1748_vm12, %v6677_v37  ;;  %v10451_v32 = vpack.i.bf16 %v6677_v37, %v6676_v1  ;;  %v10423_v20 = vpop.permute.xlu0 %10422 }
 0x581   :  { %v10425_v24 = vunpack.i.h.bf16 %v10423_v20  ;;  %v10424_v10 = vunpack.i.l.bf16 %v10423_v20 }
 0x582   :  { %10452 = vrot.lane.b32.xlu2 %v10451_v32, %s10655_s17 }
 0x583   :  { %v6977_v52 = vsel %vm1748_vm12, %v6767_v61, %v10425_v24  ;;  %v6976_v17 = vsel %vm1748_vm12, %v6766_v36, %v10424_v10 }
 0x587   :  { %v15378_v1 = vld [vmem:[#allocation5 + $0x70] sm:$0xff] }
 0x588   :  { %v6838_v31 = vsel %vm6788_vm2, %v15378_v1, 0.0  ;;  %v6631_v2 = vpop.permute.xlu0 %6630  ;;  %vm7687_vm2 = vcmask 130048  }
 0x589   :  { %v10456_v25 = vpack.i.bf16 %v6839_v33, %v6838_v31  ;;  %v6679_v49 = vsel %vm1683_vm11, %v6663_v51, %v6631_v2  ;;  %v10428_v39 = vpop.permute.xlu1 %10427  ;;  %vm17217_vm11 = vmmov %vm17214_vm10  ;;  %v10438_v59 = vpop.permute.xlu2 %10437 }
 0x58a   :  { %v10461_v56 = vpack.i.bf16 %v6679_v49, %v6678_v12  ;;  %6695 = vst.msk [vmem:[#allocation5 + $0x80] sm:$0xff] %vm1748_vm12, %v6679_v49  ;;  %v10430_v15 = vunpack.i.h.bf16 %v10428_v39  ;;  %v10429_v44 = vunpack.i.l.bf16 %v10428_v39  ;;  %v6841_v12 = vsel %vm6791_vm0, %v6793_v21, 0.0 }
 0x58b   :  { %10457 = vrot.lane.b32.xlu0 %v10456_v25, %s10656_s18  ;;  %v10440_v57 = vunpack.i.h.bf16 %v10438_v59  ;;  %v10439_v46 = vunpack.i.l.bf16 %v10438_v59  ;;  %vm17220_vm0 = vcmask 1045509  }
 0x58c   :  { %10462 = vrot.lane.b32.xlu1 %v10461_v56, %s10655_s17  ;;  %v6992_v60 = vsel %vm2969_vm13, %v6976_v17, %v10429_v44  ;;  %v6993_v19 = vsel %vm2969_vm13, %v6977_v52, %v10430_v15 }
 0x58d   :  { %v7005_v30 = vpack.c.bf16 %v6993_v19, %v6992_v60 }
 0x58f   :  { %9459 = vmatmul.msk.bf16.gmra.mxu1 %vm17217_vm11, %v7005_v30  ;;  %vm17221_vm11 = vmmov %vm17214_vm10 }
 0x591   :  { %v6792_v41 = vld [vmem:[#allocation5 + $0x80] sm:$0xff] }
 0x592   :  { %v6840_v11 = vsel %vm6790_vm3, %v6792_v41, 0.0  ;;  %vm17222_vm3 = vcmask 1046534  }
 0x593   :  { %v10466_v63 = vpack.i.bf16 %v6841_v12, %v6840_v11 }
 0x595   :  { %10467 = vrot.lane.b32.xlu2 %v10466_v63, %s10656_s18  ;;  %s9397_s18 = sshll.u32 %s16503_s11, 4  ;;  %s9398_s18 = int_to_ptr.hbm [resolvable:$true] %s9397_s18 }
 0x598   :  { %v10433_v3 = vpop.permute.xlu1 %10432 }
 0x599   :  { %v10435_v26 = vunpack.i.h.bf16 %v10433_v3  ;;  %v10434_v62 = vunpack.i.l.bf16 %v10433_v3 }
 0x59b   :  { %v6979_v4 = vsel %vm1748_vm12, %v6769_v14, %v10435_v26  ;;  %v6978_v40 = vsel %vm1748_vm12, %v6768_v53, %v10434_v62 }
 0x59c   :  { %v6994_v7 = vsel %vm2969_vm13, %v6978_v40, %v10439_v46  ;;  %v6995_v13 = vsel %vm2969_vm13, %v6979_v4, %v10440_v57 }
 0x59d   :  { %v7070_v0 = vpop.f32.mrf.mxu1  ;;  %v7006_v16 = vpack.c.bf16 %v6995_v13, %v6994_v7 }
 0x59e   :  { %v7071_v8 = vadd.f32 %v15409_v58, %v7070_v0 }
 0x59f   :  { %9460 = vmatmul.msk.bf16.gmra.mxu1 %vm17214_vm10, %v7006_v16  ;;  %vm6709_vm10 = vcmp.gt.s32.totalorder %v15362_v18, 0 }
 0x5a0   :  { %v7110_v35 = vmax.f32 %v7071_v8, 0.0 }
 0x5a2   :  { %v7142_v37 = vrot.slane %v7110_v35, 2  ;;  %v7143_v27 = vrot.slane %v7110_v35, 4  ;;  %v7144_v43 = vrot.slane %v7110_v35, 6  ;;  %v7239_v32 = vsel %vm7238_vm9, %v7110_v35, -inf }
 0x5a3   :  { %v7240_v20 = vrot.slane %v7239_v32, 4 }
 0x5a4   :  { %v7246_v50 = vsel %vm7238_vm9, %v7142_v37, -inf  ;;  %v7253_v28 = vsel %vm7238_vm9, %v7143_v27, -inf  ;;  %v7260_v23 = vsel %vm7238_vm9, %v7144_v43, -inf }
 0x5a5   :  { %v7247_v38 = vrot.slane %v7246_v50, 4  ;;  %v7254_v33 = vrot.slane %v7253_v28, 4  ;;  %v7261_v31 = vrot.slane %v7260_v23, 4  ;;  %v7072_v24 = vpop.f32.mrf.mxu1  ;;  %v7241_v47 = vmax.f32 %v7239_v32, %v7240_v20 }
 0x5a6   :  { %v7073_v10 = vadd.f32 %v15409_v58, %v7072_v24 }
 0x5a7   :  { %v7248_v25 = vmax.f32 %v7246_v50, %v7247_v38  ;;  %v7255_v2 = vmax.f32 %v7253_v28, %v7254_v33  ;;  %v7262_v36 = vmax.f32 %v7260_v23, %v7261_v31  ;;  %v7242_v56 = vrot.slane %v7241_v47, 2 }
 0x5a8   :  { %v7111_v51 = vmax.f32 %v7073_v10, 0.0  ;;  %v15430_v33 = vsel %vm6706_vm8, %v15299_v34, 0.0  ;;  %v15433_v31 = vsel %vm6707_vm7, %v15301_v45, 0.0  ;;  %vm17224_vm8 = vmmov %vm17221_vm11  ;;  %vm6711_vm7 = vcmp.gt.s32.totalorder %v15394_v9, 0 }
 0x5a9   :  { %v7249_v60 = vrot.slane %v7248_v25, 2  ;;  %v7256_v19 = vrot.slane %v7255_v2, 2  ;;  %v7263_v30 = vrot.slane %v7262_v36, 2  ;;  %v7243_v63 = vmax.f32 %v7241_v47, %v7242_v56 }
 0x5aa   :  { %v7145_v49 = vrot.slane %v7111_v51, 2  ;;  %v7146_v39 = vrot.slane %v7111_v51, 4  ;;  %v7147_v42 = vrot.slane %v7111_v51, 6  ;;  %v7267_v61 = vsel %vm7238_vm9, %v7111_v51, -inf }
 0x5ab   :  { %v7268_v15 = vrot.slane %v7267_v61, 4  ;;  %v7250_v57 = vmax.f32 %v7248_v25, %v7249_v60  ;;  %v7257_v46 = vmax.f32 %v7255_v2, %v7256_v19  ;;  %v7264_v53 = vmax.f32 %v7262_v36, %v7263_v30 }
 0x5ac   :  { %v7274_v44 = vsel %vm7238_vm9, %v7145_v49, -inf  ;;  %v7281_v52 = vsel %vm7238_vm9, %v7146_v39, -inf  ;;  %v7288_v17 = vsel %vm7238_vm9, %v7147_v42, -inf  ;;  %v7244_v13 = vrot.slane %v7243_v63, 1 }
 0x5ad   :  { %v7269_v21 = vmax.f32 %v7267_v61, %v7268_v15  ;;  %v7275_v12 = vrot.slane %v7274_v44, 4  ;;  %v7282_v41 = vrot.slane %v7281_v52, 4  ;;  %v7289_v11 = vrot.slane %v7288_v17, 4 }
 0x5ae   :  { %v7251_v35 = vrot.slane %v7250_v57, 1  ;;  %v7258_v27 = vrot.slane %v7257_v46, 1  ;;  %v7265_v43 = vrot.slane %v7264_v53, 1  ;;  %v7245_v23 = vmax.f32 %v7243_v63, %v7244_v13 }
 0x5af   :  { %v7270_v59 = vrot.slane %v7269_v21, 2  ;;  %v7276_v3 = vmax.f32 %v7274_v44, %v7275_v12  ;;  %v7283_v26 = vmax.f32 %v7281_v52, %v7282_v41  ;;  %v7290_v62 = vmax.f32 %v7288_v17, %v7289_v11 }
 0x5b0   :  { %v7252_v48 = vmax.f32 %v7250_v57, %v7251_v35  ;;  %v7259_v47 = vmax.f32 %v7257_v46, %v7258_v27  ;;  %v7266_v51 = vmax.f32 %v7264_v53, %v7265_v43  ;;  %v7688_v19 = vsel %vm7687_vm2, %v7245_v23, -inf }
 0x5b1   :  { %v7271_v14 = vmax.f32 %v7269_v21, %v7270_v59  ;;  %v7277_v4 = vrot.slane %v7276_v3, 2  ;;  %v7284_v40 = vrot.slane %v7283_v26, 2  ;;  %v7291_v7 = vrot.slane %v7290_v62, 2 }
 0x5b2   :  { %v7691_v30 = vsel %vm7687_vm2, %v7252_v48, -inf  ;;  %v7694_v21 = vsel %vm7687_vm2, %v7259_v47, -inf  ;;  %v15445_v57 = vsel %vm7687_vm2, %v7266_v51, -inf }
 0x5b3   :  { %v7278_v0 = vmax.f32 %v7276_v3, %v7277_v4  ;;  %v7285_v16 = vmax.f32 %v7283_v26, %v7284_v40  ;;  %v7272_v32 = vrot.slane %v7271_v14, 1  ;;  %v7292_v50 = vmax.f32 %v7290_v62, %v7291_v7 }
 0x5b5   :  { %v7075_v8 = vpop.f32.mrf.mxu1  ;;  %v7279_v20 = vrot.slane %v7278_v0, 1  ;;  %v7286_v38 = vrot.slane %v7285_v16, 1  ;;  %v7273_v25 = vmax.f32 %v7271_v14, %v7272_v32  ;;  %v7293_v49 = vrot.slane %v7292_v50, 1 }
 0x5b6   :  { %v7076_v37 = vadd.f32 %v15409_v58, %v7075_v8 }
 0x5b7   :  { %v7280_v36 = vmax.f32 %v7278_v0, %v7279_v20  ;;  %v7287_v61 = vmax.f32 %v7285_v16, %v7286_v38  ;;  %v7294_v3 = vmax.f32 %v7292_v50, %v7293_v49  ;;  %v7689_v26 = vsel %vm7687_vm2, %v7273_v25, -inf }
 0x5b8   :  { %v7112_v28 = vmax.f32 %v7076_v37, 0.0  ;;  %v7690_v48 = vmax.f32 %v7688_v19, %v7689_v26 }
 0x5b9   :  { %v7692_v46 = vsel %vm7687_vm2, %v7280_v36, -inf  ;;  %v7695_v53 = vsel %vm7687_vm2, %v7287_v61, -inf  ;;  %v7698_v47 = vsel %vm7687_vm2, %v7294_v3, -inf }
 0x5ba   :  { %v7148_v24 = vrot.slane %v7112_v28, 2  ;;  %v7149_v5 = vrot.slane %v7112_v28, 4  ;;  %v7150_v10 = vrot.slane %v7112_v28, 6  ;;  %v7295_v2 = vsel %vm7238_vm9, %v7112_v28, -inf }
 0x5bb   :  { %v7296_v39 = vrot.slane %v7295_v2, 4  ;;  %v7693_v27 = vmax.f32 %v7691_v30, %v7692_v46  ;;  %v7696_v49 = vmax.f32 %v7694_v21, %v7695_v53  ;;  %v7699_v21 = vmax.f32 %v15445_v57, %v7698_v47 }
 0x5bc   :  { %v7302_v42 = vsel %vm7238_vm9, %v7148_v24, -inf  ;;  %v7309_v56 = vsel %vm7238_vm9, %v7149_v5, -inf  ;;  %v7316_v45 = vsel %vm7238_vm9, %v7150_v10, -inf }
 0x5bd   :  { %v7303_v34 = vrot.slane %v7302_v42, 4  ;;  %v7077_v15 = vpop.f32.mrf.mxu1  ;;  %v7297_v44 = vmax.f32 %v7295_v2, %v7296_v39  ;;  %v7310_v52 = vrot.slane %v7309_v56, 4  ;;  %v7317_v17 = vrot.slane %v7316_v45, 4 }
 0x5be   :  { %v7078_v60 = vadd.f32 %v15409_v58, %v7077_v15  ;;  %v7828_v61 = vsel %vm6225_vm5, %v7693_v27, %v7690_v48 }
 0x5bf   :  { %v7304_v12 = vmax.f32 %v7302_v42, %v7303_v34  ;;  %v7298_v41 = vrot.slane %v7297_v44, 2  ;;  %v7311_v11 = vmax.f32 %v7309_v56, %v7310_v52  ;;  %v7318_v63 = vmax.f32 %v7316_v45, %v7317_v17 }
 0x5c0   :  { %v7113_v59 = vmax.f32 %v7078_v60, 0.0 }
 0x5c1   :  { %v7305_v62 = vrot.slane %v7304_v12, 2  ;;  %v7312_v14 = vrot.slane %v7311_v11, 2  ;;  %v7319_v40 = vrot.slane %v7318_v63, 2  ;;  %v7299_v16 = vmax.f32 %v7297_v44, %v7298_v41 }
 0x5c2   :  { %v7151_v4 = vrot.slane %v7113_v59, 2  ;;  %v7152_v7 = vrot.slane %v7113_v59, 4  ;;  %v7153_v13 = vrot.slane %v7113_v59, 6  ;;  %v7323_v0 = vsel %vm7238_vm9, %v7113_v59, -inf }
 0x5c3   :  { %v7306_v8 = vmax.f32 %v7304_v12, %v7305_v62  ;;  %v7324_v35 = vrot.slane %v7323_v0, 4  ;;  %v7313_v50 = vmax.f32 %v7311_v11, %v7312_v14  ;;  %v7320_v10 = vmax.f32 %v7318_v63, %v7319_v40 }
 0x5c4   :  { %v7330_v37 = vsel %vm7238_vm9, %v7151_v4, -inf  ;;  %v7337_v32 = vsel %vm7238_vm9, %v7152_v7, -inf  ;;  %v7344_v20 = vsel %vm7238_vm9, %v7153_v13, -inf  ;;  %v7300_v51 = vrot.slane %v7299_v16, 1 }
 0x5c5   :  { %v7331_v43 = vrot.slane %v7330_v37, 4  ;;  %v7325_v28 = vmax.f32 %v7323_v0, %v7324_v35  ;;  %v7338_v23 = vrot.slane %v7337_v32, 4  ;;  %v7345_v38 = vrot.slane %v7344_v20, 4 }
 0x5c6   :  { %v7307_v25 = vrot.slane %v7306_v8, 1  ;;  %v7314_v15 = vrot.slane %v7313_v50, 1  ;;  %v7321_v60 = vrot.slane %v7320_v10, 1  ;;  %v7301_v19 = vmax.f32 %v7299_v16, %v7300_v51 }
 0x5c7   :  { %v7332_v5 = vmax.f32 %v7330_v37, %v7331_v43  ;;  %v7326_v2 = vrot.slane %v7325_v28, 2  ;;  %v7339_v36 = vmax.f32 %v7337_v32, %v7338_v23  ;;  %v7346_v42 = vmax.f32 %v7344_v20, %v7345_v38 }
 0x5c8   :  { %v7308_v41 = vmax.f32 %v7306_v8, %v7307_v25  ;;  %v7829_v59 = vsel %vm6227_vm6, %v7696_v49, %v7828_v61  ;;  %v7315_v62 = vmax.f32 %v7313_v50, %v7314_v15  ;;  %v7322_v14 = vmax.f32 %v7320_v10, %v7321_v60 }
 0x5c9   :  { %v10443_v24 = vpop.permute.xlu0 %10442  ;;  %v7333_v39 = vrot.slane %v7332_v5, 2  ;;  %v7327_v56 = vmax.f32 %v7325_v28, %v7326_v2  ;;  %v7340_v45 = vrot.slane %v7339_v36, 2  ;;  %v7347_v17 = vrot.slane %v7346_v42, 2 }
 0x5ca   :  { %v10445_v34 = vunpack.i.h.bf16 %v10443_v24  ;;  %v10444_v44 = vunpack.i.l.bf16 %v10443_v24  ;;  %v7700_v0 = vsel %vm7687_vm2, %v7301_v19, -inf  ;;  %v7703_v16 = vsel %vm7687_vm2, %v7308_v41, -inf }
 0x5cb   :  { %v7334_v52 = vmax.f32 %v7332_v5, %v7333_v39  ;;  %v7328_v30 = vrot.slane %v7327_v56, 1  ;;  %v7341_v12 = vmax.f32 %v7339_v36, %v7340_v45  ;;  %v7348_v63 = vmax.f32 %v7346_v42, %v7347_v17 }
 0x5cc   :  { %v6981_v3 = vsel %vm1748_vm12, %v15433_v31, %v10445_v34  ;;  %v6980_v53 = vsel %vm1748_vm12, %v15430_v33, %v10444_v44  ;;  %v7706_v43 = vsel %vm7687_vm2, %v7315_v62, -inf  ;;  %v7830_v32 = vsel %vm17218_vm15, %v7699_v21, %v7829_v59 }
 0x5cd   :  { %v7335_v11 = vrot.slane %v7334_v52, 1  ;;  %v7329_v26 = vmax.f32 %v7327_v56, %v7328_v30  ;;  %v7342_v46 = vrot.slane %v7341_v12, 1  ;;  %v7349_v40 = vrot.slane %v7348_v63, 1 }
 0x5ce   :  { %v7709_v48 = vsel %vm7687_vm2, %v7322_v14, -inf  ;;  %v6772_v56 = vsel %vm6708_vm4, %v15335_v55, 0.0  ;;  %v6773_v45 = vsel %vm6709_vm10, %v15331_v29, 0.0  ;;  %vm6710_vm15 = vcmp.gt.s32.totalorder %v15399_v54, 0  ;;  %vm17231_vm10 = vmmov %vm17219_vm14 }
 0x5cf   :  { %v7336_v4 = vmax.f32 %v7334_v52, %v7335_v11  ;;  %v7343_v13 = vmax.f32 %v7341_v12, %v7342_v46  ;;  %v7701_v57 = vsel %vm7687_vm2, %v7329_v26, -inf  ;;  %v7350_v31 = vmax.f32 %v7348_v63, %v7349_v40 }
 0x5d0   :  { %v7702_v37 = vmax.f32 %v7700_v0, %v7701_v57  ;;  %v6775_v12 = vsel %vm6711_vm7, %v15372_v6, 0.0  ;;  %v6774_v11 = vsel %vm6710_vm15, %v15378_v1, 0.0 }
 0x5d1   :  { %v7704_v27 = vsel %vm7687_vm2, %v7336_v4, -inf  ;;  %v7707_v33 = vsel %vm7687_vm2, %v7343_v13, -inf  ;;  %v7710_v24 = vsel %vm7687_vm2, %v7350_v31, -inf }
 0x5d2   :  { %v10448_v7 = vpop.permute.xlu1 %10447  ;;  %v7705_v28 = vmax.f32 %v7703_v16, %v7704_v27  ;;  %v7708_v23 = vmax.f32 %v7706_v43, %v7707_v33  ;;  %v7831_v5 = vsel %vm17219_vm14, %v7702_v37, %v7830_v32  ;;  %v7711_v10 = vmax.f32 %v7709_v48, %v7710_v24 }
 0x5d3   :  { %v10450_v8 = vunpack.i.h.bf16 %v10448_v7  ;;  %v10449_v35 = vunpack.i.l.bf16 %v10448_v7 }
 0x5d4   :  { %v7832_v47 = vsel %vm17220_vm0, %v7705_v28, %v7831_v5 }
 0x5d5   :  { %v6996_v20 = vsel %vm2969_vm13, %v6980_v53, %v10449_v35  ;;  %v6997_v50 = vsel %vm2969_vm13, %v6981_v3, %v10450_v8  ;;  %v7833_v51 = vsel %vm17222_vm3, %v7708_v23, %v7832_v47 }
 0x5d6   :  { %v7007_v38 = vpack.c.bf16 %v6997_v50, %v6996_v20  ;;  %v7834_v25 = vsel %vm17223_vm1, %v7711_v10, %v7833_v51 }
 0x5d7   :  { %7904 = vrot.lane.b32.xlu0 %v7834_v25, %s10657_s3  ;;  %7860 = vst.msk [vmem:[#allocation6 + $0x8] sm:$0xff] %vm7687_vm2, %v7834_v25 }
 0x5d8   :  { %9461 = vmatmul.msk.bf16.gmra.mxu1 %vm17221_vm11, %v7007_v38  ;;  %vm17227_vm11 = vmmov %vm17222_vm3 }
 0x5d9   :  { %vm17228_vm3 = vmmov %vm17223_vm1 }
 0x5da   :  { %vm17233_vm7 = vmmov %vm17227_vm11 }
 0x5db   :  { %vm17234_vm15 = vmmov %vm17228_vm3 }
 0x5dc   :  { %v10453_v2 = vpop.permute.xlu2 %10452 }
 0x5dd   :  { %v10455_v49 = vunpack.i.h.bf16 %v10453_v2  ;;  %v10454_v39 = vunpack.i.l.bf16 %v10453_v2 }
 0x5df   :  { %v6982_v15 = vsel %vm1748_vm12, %v6772_v56, %v10454_v39  ;;  %v6983_v44 = vsel %vm1748_vm12, %v6773_v45, %v10455_v49 }
 0x5ef   :  { %v10468_v29 = vpop.permute.xlu2 %10467 }
 0x5f0   :  { %v10470_v21 = vunpack.i.h.bf16 %v10468_v29  ;;  %v10469_v59 = vunpack.i.l.bf16 %v10468_v29 }
 0x5f9   :  { %v7080_v36 = vpop.f32.mrf.mxu1 }
 0x5fa   :  { %v7081_v30 = vadd.f32 %v15409_v58, %v7080_v36 }
 0x5fc   :  { %v7114_v26 = vmax.f32 %v7081_v30, 0.0 }
 0x5fd   :  { %v10458_v42 = vpop.permute.xlu0 %10457 }
 0x5fe   :  { %v10460_v61 = vunpack.i.h.bf16 %v10458_v42  ;;  %v10459_v34 = vunpack.i.l.bf16 %v10458_v42  ;;  %v10463_v18 = vpop.permute.xlu1 %10462  ;;  %v7154_v14 = vrot.slane %v7114_v26, 2  ;;  %v7351_v4 = vsel %vm7238_vm9, %v7114_v26, -inf }
 0x5ff   :  { %v10465_v19 = vunpack.i.h.bf16 %v10463_v18  ;;  %v10464_v55 = vunpack.i.l.bf16 %v10463_v18  ;;  %v7155_v1 = vrot.slane %v7114_v26, 4  ;;  %v7156_v40 = vrot.slane %v7114_v26, 6 }
 0x600   :  { %v6998_v52 = vsel %vm2969_vm13, %v6982_v15, %v10459_v34  ;;  %v6999_v17 = vsel %vm2969_vm13, %v6983_v44, %v10460_v61  ;;  %v7352_v16 = vrot.slane %v7351_v4, 4  ;;  %v7358_v35 = vsel %vm7238_vm9, %v7154_v14, -inf }
 0x601   :  { %v7008_v22 = vpack.c.bf16 %v6999_v17, %v6998_v52  ;;  %v7082_v60 = vpop.f32.mrf.mxu1  ;;  %v6985_v63 = vsel %vm1748_vm12, %v6775_v12, %v10465_v19  ;;  %v6984_v3 = vsel %vm1748_vm12, %v6774_v11, %v10464_v55  ;;  %vm17225_vm12 = vmmov %vm17224_vm8  ;;  %v7365_v31 = vsel %vm7238_vm9, %v7155_v1, -inf }
 0x602   :  { %v7083_v41 = vadd.f32 %v15409_v58, %v7082_v60  ;;  %v7000_v54 = vsel %vm2969_vm13, %v6984_v3, %v10469_v59  ;;  %v7001_v62 = vsel %vm2969_vm13, %v6985_v63, %v10470_v21  ;;  %v7372_v37 = vsel %vm7238_vm9, %v7156_v40, -inf }
 0x603   :  { %9462 = vmatmul.msk.bf16.gmra.mxu1 %vm17224_vm8, %v7008_v22  ;;  %v7009_v53 = vpack.c.bf16 %v7001_v62, %v7000_v54  ;;  %v7353_v50 = vmax.f32 %v7351_v4, %v7352_v16  ;;  %v7359_v28 = vrot.slane %v7358_v35, 4  ;;  %v7366_v48 = vrot.slane %v7365_v31, 4  ;;  %vm17232_vm8 = vmmov %vm17220_vm0 }
 0x604   :  { %v7115_v46 = vmax.f32 %v7083_v41, 0.0  ;;  %v7373_v24 = vrot.slane %v7372_v37, 4  ;;  %vm17226_vm13 = vcmask 1043459  }
 0x605   :  { %v7360_v55 = vmax.f32 %v7358_v35, %v7359_v28  ;;  %v7367_v29 = vmax.f32 %v7365_v31, %v7366_v48  ;;  %v7354_v54 = vrot.slane %v7353_v50, 2  ;;  %vm17230_vm4 = vmmov %vm17226_vm13 }
 0x606   :  { %v7157_v7 = vrot.slane %v7115_v46, 2  ;;  %v7158_v13 = vrot.slane %v7115_v46, 4  ;;  %v7159_v0 = vrot.slane %v7115_v46, 6  ;;  %v7379_v33 = vsel %vm7238_vm9, %v7115_v46, -inf }
 0x607   :  { %v7380_v47 = vrot.slane %v7379_v33, 4  ;;  %v7374_v41 = vmax.f32 %v7372_v37, %v7373_v24  ;;  %v7368_v40 = vrot.slane %v7367_v29, 2  ;;  %v7355_v31 = vmax.f32 %v7353_v50, %v7354_v54 }
 0x608   :  { %v7386_v27 = vsel %vm7238_vm9, %v7157_v7, -inf  ;;  %v7393_v32 = vsel %vm7238_vm9, %v7158_v13, -inf  ;;  %v7400_v20 = vsel %vm7238_vm9, %v7159_v0, -inf }
 0x609   :  { %v7387_v5 = vrot.slane %v7386_v27, 4  ;;  %v7394_v51 = vrot.slane %v7393_v32, 4  ;;  %v7401_v25 = vrot.slane %v7400_v20, 4  ;;  %v7381_v30 = vmax.f32 %v7379_v33, %v7380_v47 }
 0x60a   :  { %v7375_v7 = vrot.slane %v7374_v41, 2 }
 0x60b   :  { %v7388_v15 = vmax.f32 %v7386_v27, %v7387_v5  ;;  %v7395_v22 = vmax.f32 %v7393_v32, %v7394_v51  ;;  %v7402_v3 = vmax.f32 %v7400_v20, %v7401_v25  ;;  %v7382_v14 = vrot.slane %v7381_v30, 2 }
 0x60c   :  { %v7085_v9 = vpop.f32.mrf.mxu1  ;;  %v7356_v25 = vrot.slane %v7355_v31, 1 }
 0x60d   :  { %v7086_v6 = vadd.f32 %v15409_v58, %v7085_v9  ;;  %v7389_v59 = vrot.slane %v7388_v15, 2  ;;  %v7396_v62 = vrot.slane %v7395_v22, 2  ;;  %v7403_v16 = vrot.slane %v7402_v3, 2 }
 0x60e   :  { %v7383_v32 = vmax.f32 %v7381_v30, %v7382_v14 }
 0x60f   :  { %v7116_v8 = vmax.f32 %v7086_v6, 0.0  ;;  %v7361_v6 = vrot.slane %v7360_v55, 2  ;;  %v7397_v37 = vmax.f32 %v7395_v22, %v7396_v62 }
 0x611   :  { %v7160_v23 = vrot.slane %v7116_v8, 2  ;;  %v7161_v10 = vrot.slane %v7116_v8, 4  ;;  %v7407_v36 = vsel %vm7238_vm9, %v7116_v8, -inf  ;;  %v7162_v61 = vrot.slane %v7116_v8, 6 }
 0x612   :  { %v7408_v60 = vrot.slane %v7407_v36, 4  ;;  %v7362_v33 = vmax.f32 %v7360_v55, %v7361_v6 }
 0x613   :  { %9463 = vmatmul.msk.bf16.gmra.mxu1 %vm17225_vm12, %v7009_v53  ;;  %v7414_v34 = vsel %vm7238_vm9, %v7160_v23, -inf  ;;  %v7421_v44 = vsel %vm7238_vm9, %v7161_v10, -inf  ;;  %v7428_v63 = vsel %vm7238_vm9, %v7162_v61, -inf  ;;  %v7369_v23 = vmax.f32 %v7367_v29, %v7368_v40 }
 0x614   :  { %v7087_v57 = vpop.f32.mrf.mxu1  ;;  %v7415_v12 = vrot.slane %v7414_v34, 4  ;;  %v7422_v11 = vrot.slane %v7421_v44, 4  ;;  %v7409_v46 = vmax.f32 %v7407_v36, %v7408_v60  ;;  %v7429_v1 = vrot.slane %v7428_v63, 4 }
 0x615   :  { %v7088_v43 = vadd.f32 %v15409_v58, %v7087_v57  ;;  %v7390_v57 = vmax.f32 %v7388_v15, %v7389_v59  ;;  %v7404_v10 = vmax.f32 %v7402_v3, %v7403_v16  ;;  %v7363_v50 = vrot.slane %v7362_v33, 1 }
 0x616   :  { %v7416_v4 = vmax.f32 %v7414_v34, %v7415_v12  ;;  %v7423_v13 = vmax.f32 %v7421_v44, %v7422_v11  ;;  %v7410_v27 = vrot.slane %v7409_v46, 2  ;;  %v7430_v28 = vmax.f32 %v7428_v63, %v7429_v1 }
 0x617   :  { %v7117_v38 = vmax.f32 %v7088_v43, 0.0  ;;  %v7391_v5 = vrot.slane %v7390_v57, 1  ;;  %v7370_v34 = vrot.slane %v7369_v23, 1  ;;  %v7364_v30 = vmax.f32 %v7362_v33, %v7363_v50 }
 0x618   :  { %v7417_v20 = vrot.slane %v7416_v4, 2  ;;  %v7424_v48 = vrot.slane %v7423_v13, 2  ;;  %v7411_v36 = vmax.f32 %v7409_v46, %v7410_v27  ;;  %v7431_v61 = vrot.slane %v7430_v28, 2 }
 0x619   :  { %v7163_v2 = vrot.slane %v7117_v38, 2  ;;  %v7164_v49 = vrot.slane %v7117_v38, 4  ;;  %v7165_v39 = vrot.slane %v7117_v38, 6  ;;  %v7435_v42 = vsel %vm7238_vm9, %v7117_v38, -inf }
 0x61a   :  { %v7436_v56 = vrot.slane %v7435_v42, 4  ;;  %v7376_v38 = vmax.f32 %v7374_v41, %v7375_v7  ;;  %v7392_v44 = vmax.f32 %v7390_v57, %v7391_v5  ;;  %v7412_v55 = vrot.slane %v7411_v36, 1 }
 0x61b   :  { %v7442_v45 = vsel %vm7238_vm9, %v7163_v2, -inf  ;;  %v7449_v17 = vsel %vm7238_vm9, %v7164_v49, -inf  ;;  %v7456_v19 = vsel %vm7238_vm9, %v7165_v39, -inf  ;;  %v7398_v2 = vrot.slane %v7397_v37, 1 }
 0x61c   :  { %v7443_v52 = vrot.slane %v7442_v45, 4  ;;  %v7450_v18 = vrot.slane %v7449_v17, 4  ;;  %v7437_v21 = vmax.f32 %v7435_v42, %v7436_v56  ;;  %v7457_v26 = vrot.slane %v7456_v19, 4  ;;  %v7090_v22 = vpop.f32.mrf.mxu1 }
 0x61d   :  { %v7384_v39 = vrot.slane %v7383_v32, 1  ;;  %v7418_v42 = vmax.f32 %v7416_v4, %v7417_v20  ;;  %v7377_v56 = vrot.slane %v7376_v38, 1  ;;  %v7432_v11 = vmax.f32 %v7430_v28, %v7431_v61 }
 0x61e   :  { %v7444_v9 = vmax.f32 %v7442_v45, %v7443_v52  ;;  %v7451_v53 = vmax.f32 %v7449_v17, %v7450_v18  ;;  %v7438_v0 = vrot.slane %v7437_v21, 2  ;;  %v7458_v35 = vmax.f32 %v7456_v19, %v7457_v26 }
 0x61f   :  { %v7425_v45 = vmax.f32 %v7423_v13, %v7424_v48  ;;  %v7405_v52 = vrot.slane %v7404_v10, 1  ;;  %v7357_v18 = vmax.f32 %v7355_v31, %v7356_v25  ;;  %v7399_v19 = vmax.f32 %v7397_v37, %v7398_v2 }
 0x620   :  { %v7445_v8 = vrot.slane %v7444_v9, 2  ;;  %v7452_v43 = vrot.slane %v7451_v53, 2  ;;  %v7439_v24 = vmax.f32 %v7437_v21, %v7438_v0  ;;  %v7459_v51 = vrot.slane %v7458_v35, 2 }
 0x621   :  { %v7385_v12 = vmax.f32 %v7383_v32, %v7384_v39  ;;  %v7419_v41 = vrot.slane %v7418_v42, 1  ;;  %v7371_v63 = vmax.f32 %v7369_v23, %v7370_v34  ;;  %v7378_v21 = vmax.f32 %v7376_v38, %v7377_v56 }
 0x622   :  { %v7446_v47 = vmax.f32 %v7444_v9, %v7445_v8  ;;  %v7453_v49 = vmax.f32 %v7451_v53, %v7452_v43  ;;  %v7440_v15 = vrot.slane %v7439_v24, 1  ;;  %v7460_v60 = vmax.f32 %v7458_v35, %v7459_v51 }
 0x623   :  { %v7426_v3 = vrot.slane %v7425_v45, 1  ;;  %v7406_v9 = vmax.f32 %v7404_v10, %v7405_v52  ;;  %v7716_v26 = vsel %vm7687_vm2, %v7392_v44, -inf  ;;  %v7712_v46 = vsel %vm7687_vm2, %v7357_v18, -inf }
 0x624   :  { %v7447_v17 = vrot.slane %v7446_v47, 1  ;;  %v7454_v29 = vrot.slane %v7453_v49, 1  ;;  %v7441_v59 = vmax.f32 %v7439_v24, %v7440_v15  ;;  %v7461_v62 = vrot.slane %v7460_v60, 1  ;;  %v7092_v20 = vpop.f32.mrf.mxu1 }
 0x625   :  { %v7719_v53 = vsel %vm7687_vm2, %v7399_v19, -inf  ;;  %v7413_v6 = vmax.f32 %v7411_v36, %v7412_v55  ;;  %v7715_v4 = vsel %vm7687_vm2, %v7364_v30, -inf  ;;  %v7713_v1 = vsel %vm7687_vm2, %v7385_v12, -inf }
 0x626   :  { %v7448_v54 = vmax.f32 %v7446_v47, %v7447_v17  ;;  %v7455_v14 = vmax.f32 %v7453_v49, %v7454_v29  ;;  %v7420_v40 = vmax.f32 %v7418_v42, %v7419_v41  ;;  %v7433_v7 = vrot.slane %v7432_v11, 1  ;;  %v17229_v41 = vld [vmem:[#allocation20_spill] sm:$0xff] }
 0x627   :  { %v7718_v13 = vsel %vm7687_vm2, %v7371_v63, -inf  ;;  %v7717_v0 = vmax.f32 %v7715_v4, %v7716_v26  ;;  %v7427_v57 = vmax.f32 %v7425_v45, %v7426_v3  ;;  %v7725_v16 = vsel %vm7687_vm2, %v7441_v59, -inf }
 0x628   :  { %v7720_v8 = vmax.f32 %v7718_v13, %v7719_v53  ;;  %v7462_v35 = vmax.f32 %v7460_v60, %v7461_v62  ;;  %v7722_v31 = vsel %vm7687_vm2, %v7406_v9, -inf  ;;  %v7728_v37 = vsel %vm7687_vm2, %v7448_v54, -inf }
 0x629   :  { %v7714_v27 = vmax.f32 %v7712_v46, %v7713_v1  ;;  %v7091_v43 = vadd.f32 %v15409_v58, %v7090_v22  ;;  %v7724_v33 = vsel %vm7687_vm2, %v7413_v6, -inf  ;;  %v7731_v32 = vsel %vm7687_vm2, %v7455_v14, -inf }
 0x62a   :  { %v7434_v28 = vmax.f32 %v7432_v11, %v7433_v7  ;;  %v7721_v23 = vsel %vm7687_vm2, %v7378_v21, -inf  ;;  %v7726_v38 = vmax.f32 %v7724_v33, %v7725_v16  ;;  %v7727_v48 = vsel %vm7687_vm2, %v7420_v40, -inf }
 0x62b   :  { %v7723_v24 = vmax.f32 %v7721_v23, %v7722_v31  ;;  %v7729_v5 = vmax.f32 %v7727_v48, %v7728_v37  ;;  %v7730_v10 = vsel %vm7687_vm2, %v7427_v57, -inf  ;;  %v7835_v47 = vsel %vm6225_vm5, %v7717_v0, %v7714_v27 }
 0x62c   :  { %v7732_v51 = vmax.f32 %v7730_v10, %v7731_v32  ;;  %v7734_v25 = vsel %vm7687_vm2, %v7462_v35, -inf  ;;  %v7836_v2 = vsel %vm6227_vm6, %v7720_v8, %v7835_v47  ;;  %v7118_v36 = vmax.f32 %v7091_v43, 0.0 }
 0x62d   :  { %v7093_v49 = vadd.f32 %v15409_v58, %v7092_v20  ;;  %v7837_v50 = vsel %vm17226_vm13, %v7723_v24, %v7836_v2  ;;  %v7733_v39 = vsel %vm7687_vm2, %v7434_v28, -inf  ;;  %v7784_v11 = vand.u32 3, %v17229_v41  ;;  %vm17237_vm13 = vmmov %vm17231_vm10 }
 0x62e   :  { %v7838_v42 = vsel %vm17219_vm14, %v7726_v38, %v7837_v50  ;;  %v7735_v61 = vmax.f32 %v7733_v39, %v7734_v25  ;;  %v7166_v45 = vrot.slane %v7118_v36, 2  ;;  %v7167_v52 = vrot.slane %v7118_v36, 4  ;;  %vm17238_vm14 = vmmov %vm17220_vm0 }
 0x62f   :  { %v7839_v34 = vsel %vm17220_vm0, %v7729_v5, %v7838_v42  ;;  %v7119_v15 = vmax.f32 %v7093_v49, 0.0  ;;  %v7463_v17 = vsel %vm7238_vm9, %v7118_v36, -inf  ;;  %v7168_v22 = vrot.slane %v7118_v36, 6  ;;  %vm17239_vm0 = vmmov %vm17233_vm7 }
 0x630   :  { %v7840_v56 = vsel %vm17227_vm11, %v7732_v51, %v7839_v34  ;;  %v7470_v60 = vsel %vm7238_vm9, %v7166_v45, -inf  ;;  %v7464_v19 = vrot.slane %v7463_v17, 4  ;;  %v7477_v55 = vsel %vm7238_vm9, %v7167_v52, -inf  ;;  %vm17240_vm11 = vmmov %vm17228_vm3 }
 0x631   :  { %v7841_v44 = vsel %vm17228_vm3, %v7735_v61, %v7840_v56  ;;  %v7169_v18 = vrot.slane %v7119_v15, 2  ;;  %v7170_v29 = vrot.slane %v7119_v15, 4  ;;  %v7491_v30 = vsel %vm7238_vm9, %v7119_v15, -inf }
 0x632   :  { %7906 = vrot.lane.b32.xlu1 %v7841_v44, %s10657_s3  ;;  %7861 = vst.msk [vmem:[#allocation6 + $0x10] sm:$0xff] %vm7687_vm2, %v7841_v44  ;;  %v7471_v12 = vrot.slane %v7470_v60, 4  ;;  %v7484_v63 = vsel %vm7238_vm9, %v7168_v22, -inf  ;;  %v7478_v3 = vrot.slane %v7477_v55, 4  ;;  %v7492_v9 = vrot.slane %v7491_v30, 4 }
 0x633   :  { %v7498_v21 = vsel %vm7238_vm9, %v7169_v18, -inf  ;;  %vm7884_vm1 = vcmp.lt.s32.totalorder %v7784_v11, 3  ;;  %v7465_v26 = vmax.f32 %v7463_v17, %v7464_v19  ;;  %v7505_v54 = vsel %vm7238_vm9, %v7170_v29, -inf }
 0x634   :  { %v7472_v46 = vmax.f32 %v7470_v60, %v7471_v12  ;;  %v7485_v53 = vrot.slane %v7484_v63, 4  ;;  %v7171_v6 = vrot.slane %v7119_v15, 6  ;;  %v7499_v14 = vrot.slane %v7498_v21, 4 }
 0x635   :  { %v7479_v4 = vmax.f32 %v7477_v55, %v7478_v3  ;;  %v7493_v1 = vmax.f32 %v7491_v30, %v7492_v9  ;;  %v7506_v40 = vrot.slane %v7505_v54, 4  ;;  %v7466_v7 = vrot.slane %v7465_v26, 2 }
 0x636   :  { %v7473_v13 = vrot.slane %v7472_v46, 2  ;;  %v7486_v0 = vmax.f32 %v7484_v63, %v7485_v53  ;;  %v7500_v57 = vmax.f32 %v7498_v21, %v7499_v14  ;;  %v7512_v16 = vsel %vm7238_vm9, %v7171_v6, -inf }
 0x637   :  { %v7480_v8 = vrot.slane %v7479_v4, 2  ;;  %v7494_v35 = vrot.slane %v7493_v1, 2  ;;  %v7507_v31 = vmax.f32 %v7505_v54, %v7506_v40  ;;  %v7513_v37 = vrot.slane %v7512_v16, 4 }
 0x638   :  { %v7467_v27 = vmax.f32 %v7465_v26, %v7466_v7  ;;  %v7474_v43 = vmax.f32 %v7472_v46, %v7473_v13  ;;  %v7487_v33 = vrot.slane %v7486_v0, 2  ;;  %v7501_v32 = vrot.slane %v7500_v57, 2 }
 0x639   :  { %v7888_v59 = vld [vmem:[#allocation6 + $0x9] sm:$0xff]  ;;  %v7481_v20 = vmax.f32 %v7479_v4, %v7480_v8  ;;  %v7495_v28 = vmax.f32 %v7493_v1, %v7494_v35  ;;  %v7508_v23 = vrot.slane %v7507_v31, 2  ;;  %v7514_v38 = vmax.f32 %v7512_v16, %v7513_v37 }
 0x63a   :  { %v7900_v62 = vsel %vm7884_vm1, %v7888_v59, 0.0  ;;  %v7468_v48 = vrot.slane %v7467_v27, 1  ;;  %v7475_v24 = vrot.slane %v7474_v43, 1  ;;  %v7488_v5 = vmax.f32 %v7486_v0, %v7487_v33 }
 0x63b   :  { %7920 = vrot.lane.b32.xlu0 %v7900_v62, %s10658_s16  ;;  %v7502_v10 = vmax.f32 %v7500_v57, %v7501_v32  ;;  %v7482_v25 = vrot.slane %v7481_v20, 1  ;;  %v7496_v2 = vrot.slane %v7495_v28, 1  ;;  %v7509_v36 = vmax.f32 %v7507_v31, %v7508_v23 }
 0x63c   :  { %v7515_v49 = vrot.slane %v7514_v38, 2  ;;  %v7469_v39 = vmax.f32 %v7467_v27, %v7468_v48  ;;  %v7476_v42 = vmax.f32 %v7474_v43, %v7475_v24  ;;  %v7489_v61 = vrot.slane %v7488_v5, 1 }
 0x63d   :  { %v7503_v34 = vrot.slane %v7502_v10, 1  ;;  %v7483_v52 = vmax.f32 %v7481_v20, %v7482_v25  ;;  %v7497_v17 = vmax.f32 %v7495_v28, %v7496_v2  ;;  %v7510_v22 = vrot.slane %v7509_v36, 1 }
 0x63e   :  { %v7516_v18 = vmax.f32 %v7514_v38, %v7515_v49  ;;  %v7490_v3 = vmax.f32 %v7488_v5, %v7489_v61  ;;  %v7736_v9 = vsel %vm7687_vm2, %v7469_v39, -inf  ;;  %v7739_v14 = vsel %vm7687_vm2, %v7476_v42, -inf }
 0x63f   :  { %v7504_v26 = vmax.f32 %v7502_v10, %v7503_v34  ;;  %v7742_v4 = vsel %vm7687_vm2, %v7483_v52, -inf  ;;  %v7511_v1 = vmax.f32 %v7509_v36, %v7510_v22  ;;  %v7737_v13 = vsel %vm7687_vm2, %v7497_v17, -inf }
 0x640   :  { %v7517_v7 = vrot.slane %v7516_v18, 1  ;;  %vm7864_vm3 = vcmp.gt.s32.totalorder %v7784_v11, 0  ;;  %vm7936_vm1 = vcmask 261120  }
 0x641   :  { %v7740_v31 = vsel %vm7687_vm2, %v7504_v26, -inf  ;;  %v7743_v33 = vsel %vm7687_vm2, %v7511_v1, -inf }
 0x642   :  { %v7518_v5 = vmax.f32 %v7516_v18, %v7517_v7  ;;  %v7741_v10 = vmax.f32 %v7739_v14, %v7740_v31  ;;  %v7744_v39 = vmax.f32 %v7742_v4, %v7743_v33 }
 0x644   :  { %v7746_v17 = vsel %vm7687_vm2, %v7518_v5, -inf }
 0x655   :  { %v7095_v47 = vpop.f32.mrf.mxu1 }
 0x656   :  { %v7096_v51 = vadd.f32 %v15409_v58, %v7095_v47 }
 0x658   :  { %v7120_v50 = vmax.f32 %v7096_v51, 0.0 }
 0x65a   :  { %v7172_v56 = vrot.slane %v7120_v50, 2  ;;  %v7173_v45 = vrot.slane %v7120_v50, 4  ;;  %v7174_v15 = vrot.slane %v7120_v50, 6  ;;  %v7519_v44 = vsel %vm7238_vm9, %v7120_v50, -inf }
 0x65b   :  { %v7520_v60 = vrot.slane %v7519_v44, 4  ;;  %v7738_v50 = vmax.f32 %v7736_v9, %v7737_v13 }
 0x65c   :  { %v7526_v19 = vsel %vm7238_vm9, %v7172_v56, -inf  ;;  %v7533_v55 = vsel %vm7238_vm9, %v7173_v45, -inf  ;;  %v7540_v29 = vsel %vm7238_vm9, %v7174_v15, -inf }
 0x65d   :  { %v7521_v30 = vmax.f32 %v7519_v44, %v7520_v60  ;;  %v7527_v12 = vrot.slane %v7526_v19, 4  ;;  %v7534_v63 = vrot.slane %v7533_v55, 4  ;;  %v7541_v21 = vrot.slane %v7540_v29, 4  ;;  %v7097_v59 = vpop.f32.mrf.mxu1 }
 0x65e   :  { %v7098_v54 = vadd.f32 %v15409_v58, %v7097_v59  ;;  %v7842_v22 = vsel %vm6225_vm5, %v7741_v10, %v7738_v50 }
 0x65f   :  { %v7522_v62 = vrot.slane %v7521_v30, 2  ;;  %v7528_v46 = vmax.f32 %v7526_v19, %v7527_v12  ;;  %v7535_v53 = vmax.f32 %v7533_v55, %v7534_v63  ;;  %v7542_v6 = vmax.f32 %v7540_v29, %v7541_v21 }
 0x660   :  { %v7121_v40 = vmax.f32 %v7098_v54, 0.0  ;;  %v7745_v12 = vsel %vm7687_vm2, %v7490_v3, -inf }
 0x661   :  { %v7529_v0 = vrot.slane %v7528_v46, 2  ;;  %v7536_v57 = vrot.slane %v7535_v53, 2  ;;  %v7523_v37 = vmax.f32 %v7521_v30, %v7522_v62  ;;  %v7543_v27 = vrot.slane %v7542_v6, 2 }
 0x662   :  { %v7175_v16 = vrot.slane %v7121_v40, 2  ;;  %v7176_v8 = vrot.slane %v7121_v40, 4  ;;  %v7177_v35 = vrot.slane %v7121_v40, 6  ;;  %v7547_v58 = vsel %vm7238_vm9, %v7121_v40, -inf }
 0x663   :  { %v7548_v43 = vrot.slane %v7547_v58, 4  ;;  %v7530_v23 = vmax.f32 %v7528_v46, %v7529_v0  ;;  %v7537_v38 = vmax.f32 %v7535_v53, %v7536_v57  ;;  %v7524_v25 = vrot.slane %v7523_v37, 1 }
 0x664   :  { %v7554_v32 = vsel %vm7238_vm9, %v7175_v16, -inf  ;;  %v7561_v20 = vsel %vm7238_vm9, %v7176_v8, -inf  ;;  %v7568_v28 = vsel %vm7238_vm9, %v7177_v35, -inf  ;;  %v7544_v49 = vmax.f32 %v7542_v6, %v7543_v27 }
 0x665   :  { %v7549_v48 = vmax.f32 %v7547_v58, %v7548_v43  ;;  %v7555_v24 = vrot.slane %v7554_v32, 4  ;;  %v7562_v47 = vrot.slane %v7561_v20, 4  ;;  %v7569_v51 = vrot.slane %v7568_v28, 4 }
 0x666   :  { %v7531_v34 = vrot.slane %v7530_v23, 1  ;;  %v7538_v15 = vrot.slane %v7537_v38, 1  ;;  %v7525_v60 = vmax.f32 %v7523_v37, %v7524_v25  ;;  %v7545_v55 = vrot.slane %v7544_v49, 1 }
 0x667   :  { %v7550_v2 = vrot.slane %v7549_v48, 2  ;;  %v7556_v36 = vmax.f32 %v7554_v32, %v7555_v24  ;;  %v7563_v42 = vmax.f32 %v7561_v20, %v7562_v47  ;;  %v7570_v61 = vmax.f32 %v7568_v28, %v7569_v51  ;;  %v17235_v20 = vld [vmem:[#allocation22_spill] sm:$0xff] }
 0x668   :  { %v7532_v59 = vmax.f32 %v7530_v23, %v7531_v34  ;;  %v7539_v9 = vmax.f32 %v7537_v38, %v7538_v15  ;;  %v7747_v62 = vmax.f32 %v7745_v12, %v7746_v17  ;;  %v7843_v46 = vsel %vm6227_vm6, %v7744_v39, %v7842_v22  ;;  %v15595_v24 = vld [vmem:[#allocation10] ss:$0 sm:$0xff] }
 0x669   :  { %v7551_v56 = vmax.f32 %v7549_v48, %v7550_v2  ;;  %v7557_v45 = vrot.slane %v7556_v36, 2  ;;  %v7564_v44 = vrot.slane %v7563_v42, 2  ;;  %v7571_v52 = vrot.slane %v7570_v61, 2 }
 0x66a   :  { %v7546_v53 = vmax.f32 %v7544_v49, %v7545_v55  ;;  %v7748_v14 = vsel %vm7687_vm2, %v7525_v60, -inf  ;;  %v7751_v3 = vsel %vm7687_vm2, %v7532_v59, -inf  ;;  %v7754_v0 = vsel %vm7687_vm2, %v7539_v9, -inf }
 0x66b   :  { %v7552_v18 = vrot.slane %v7551_v56, 1  ;;  %v7558_v19 = vmax.f32 %v7556_v36, %v7557_v45  ;;  %v7565_v29 = vmax.f32 %v7563_v42, %v7564_v44  ;;  %v7572_v30 = vmax.f32 %v7570_v61, %v7571_v52 }
 0x66c   :  { %v7844_v57 = vsel %vm17230_vm4, %v7747_v62, %v7843_v46  ;;  %v7757_v37 = vsel %vm7687_vm2, %v7546_v53, -inf  ;;  %v7785_v28 = vand.u32 3, %v17235_v20 }
 0x66d   :  { %v7553_v63 = vmax.f32 %v7551_v56, %v7552_v18  ;;  %v7559_v21 = vrot.slane %v7558_v19, 1  ;;  %v7566_v26 = vrot.slane %v7565_v29, 1  ;;  %v7573_v54 = vrot.slane %v7572_v30, 1 }
 0x66e   :  { %vm7885_vm12 = vcmp.lt.s32.totalorder %v7785_v28, 3 }
 0x66f   :  { %v7560_v6 = vmax.f32 %v7558_v19, %v7559_v21  ;;  %v7749_v4 = vsel %vm7687_vm2, %v7553_v63, -inf  ;;  %v7567_v1 = vmax.f32 %v7565_v29, %v7566_v26  ;;  %v7574_v40 = vmax.f32 %v7572_v30, %v7573_v54 }
 0x670   :  { %v7750_v7 = vmax.f32 %v7748_v14, %v7749_v4 }
 0x671   :  { %v7752_v13 = vsel %vm7687_vm2, %v7560_v6, -inf  ;;  %v7755_v8 = vsel %vm7687_vm2, %v7567_v1, -inf  ;;  %v7758_v35 = vsel %vm7687_vm2, %v7574_v40, -inf }
 0x672   :  { %v7753_v16 = vmax.f32 %v7751_v3, %v7752_v13  ;;  %v7845_v58 = vsel %vm17231_vm10, %v7750_v7, %v7844_v57  ;;  %v7756_v31 = vmax.f32 %v7754_v0, %v7755_v8  ;;  %v7759_v27 = vmax.f32 %v7757_v37, %v7758_v35 }
 0x674   :  { %v7846_v43 = vsel %vm17232_vm8, %v7753_v16, %v7845_v58 }
 0x675   :  { %v7847_v33 = vsel %vm17233_vm7, %v7756_v31, %v7846_v43  ;;  %vm7865_vm7 = vcmp.gt.s32.totalorder %v7785_v28, 0  ;;  %v9943_v28 = vld [vmem:[%s16497_s5 + $0x38] sm:$0xff] }
 0x676   :  { %v7848_v32 = vsel %vm17234_vm15, %v7759_v27, %v7847_v33  ;;  %8110 = vmatpush.bf16.msrb.mxu2 %v9943_v28 }
 0x677   :  { %7908 = vrot.lane.b32.xlu2 %v7848_v32, %s10657_s3  ;;  %7862 = vst.msk [vmem:[#allocation6 + $0x18] sm:$0xff] %vm7687_vm2, %v7848_v32 }
 0x67e   :  { %v7889_v23 = vld [vmem:[#allocation6 + $0x11] sm:$0xff] }
 0x67f   :  { %v7901_v38 = vsel %vm7885_vm12, %v7889_v23, 0.0 }
 0x680   :  { %7922 = vrot.lane.b32.xlu1 %v7901_v38, %s10658_s16  ;;  %v7100_v48 = vpop.f32.mrf.mxu1 }
 0x681   :  { %v7101_v5 = vadd.f32 %v15595_v24, %v7100_v48 }
 0x683   :  { %v7122_v10 = vmax.f32 %v7101_v5, 0.0 }
 0x685   :  { %v7178_v47 = vrot.slane %v7122_v10, 2  ;;  %v7179_v51 = vrot.slane %v7122_v10, 4  ;;  %v7180_v25 = vrot.slane %v7122_v10, 6  ;;  %v7575_v2 = vsel %vm7238_vm9, %v7122_v10, -inf }
 0x686   :  { %v7576_v36 = vrot.slane %v7575_v2, 4 }
 0x687   :  { %v7582_v49 = vsel %vm7238_vm9, %v7178_v47, -inf  ;;  %v7589_v50 = vsel %vm7238_vm9, %v7179_v51, -inf  ;;  %v7596_v39 = vsel %vm7238_vm9, %v7180_v25, -inf }
 0x688   :  { %v7577_v42 = vmax.f32 %v7575_v2, %v7576_v36  ;;  %v7583_v61 = vrot.slane %v7582_v49, 4  ;;  %v7590_v34 = vrot.slane %v7589_v50, 4  ;;  %v7597_v56 = vrot.slane %v7596_v39, 4  ;;  %v7102_v45 = vpop.f32.mrf.mxu1 }
 0x689   :  { %v7103_v15 = vadd.f32 %v15595_v24, %v7102_v45 }
 0x68a   :  { %v7578_v44 = vrot.slane %v7577_v42, 2  ;;  %v7584_v52 = vmax.f32 %v7582_v49, %v7583_v61  ;;  %v7591_v17 = vmax.f32 %v7589_v50, %v7590_v34  ;;  %v7598_v19 = vmax.f32 %v7596_v39, %v7597_v56 }
 0x68b   :  { %v7123_v22 = vmax.f32 %v7103_v15, 0.0 }
 0x68c   :  { %v7585_v60 = vrot.slane %v7584_v52, 2  ;;  %v7592_v18 = vrot.slane %v7591_v17, 2  ;;  %v7579_v63 = vmax.f32 %v7577_v42, %v7578_v44  ;;  %v7599_v46 = vrot.slane %v7598_v19, 2 }
 0x68d   :  { %v7181_v55 = vrot.slane %v7123_v22, 2  ;;  %v7182_v29 = vrot.slane %v7123_v22, 4  ;;  %v7183_v30 = vrot.slane %v7123_v22, 6  ;;  %v7603_v12 = vsel %vm7238_vm9, %v7123_v22, -inf }
 0x68e   :  { %v7604_v21 = vrot.slane %v7603_v12, 4  ;;  %v7586_v54 = vmax.f32 %v7584_v52, %v7585_v60  ;;  %v7593_v62 = vmax.f32 %v7591_v17, %v7592_v18  ;;  %v7580_v40 = vrot.slane %v7579_v63, 1 }
 0x68f   :  { %v7610_v59 = vsel %vm7238_vm9, %v7181_v55, -inf  ;;  %v7617_v9 = vsel %vm7238_vm9, %v7182_v29, -inf  ;;  %v7624_v26 = vsel %vm7238_vm9, %v7183_v30, -inf  ;;  %v7600_v57 = vmax.f32 %v7598_v19, %v7599_v46 }
 0x690   :  { %v7105_v53 = vpop.f32.mrf.mxu1  ;;  %v7605_v6 = vmax.f32 %v7603_v12, %v7604_v21  ;;  %v7611_v14 = vrot.slane %v7610_v59, 4  ;;  %v7618_v4 = vrot.slane %v7617_v9, 4  ;;  %v7625_v1 = vrot.slane %v7624_v26, 4 }
 0x691   :  { %v7106_v16 = vadd.f32 %v15595_v24, %v7105_v53  ;;  %v7587_v8 = vrot.slane %v7586_v54, 1  ;;  %v7594_v35 = vrot.slane %v7593_v62, 1  ;;  %v7581_v37 = vmax.f32 %v7579_v63, %v7580_v40 }
 0x692   :  { %v7606_v7 = vrot.slane %v7605_v6, 2  ;;  %v7612_v3 = vmax.f32 %v7610_v59, %v7611_v14  ;;  %v7619_v13 = vmax.f32 %v7617_v9, %v7618_v4  ;;  %v7626_v0 = vmax.f32 %v7624_v26, %v7625_v1 }
 0x693   :  { %v7124_v27 = vmax.f32 %v7106_v16, 0.0  ;;  %v7588_v47 = vmax.f32 %v7586_v54, %v7587_v8  ;;  %v7595_v51 = vmax.f32 %v7593_v62, %v7594_v35  ;;  %v7601_v25 = vrot.slane %v7600_v57, 1 }
 0x694   :  { %v7613_v58 = vrot.slane %v7612_v3, 2  ;;  %v7620_v31 = vrot.slane %v7619_v13, 2  ;;  %v7607_v43 = vmax.f32 %v7605_v6, %v7606_v7  ;;  %v7627_v23 = vrot.slane %v7626_v0, 2 }
 0x695   :  { %v7184_v38 = vrot.slane %v7124_v27, 2  ;;  %v7185_v48 = vrot.slane %v7124_v27, 4  ;;  %v7186_v5 = vrot.slane %v7124_v27, 6  ;;  %v7631_v10 = vsel %vm7238_vm9, %v7124_v27, -inf }
 0x696   :  { %v7614_v33 = vmax.f32 %v7612_v3, %v7613_v58  ;;  %v7621_v32 = vmax.f32 %v7619_v13, %v7620_v31  ;;  %v7632_v36 = vrot.slane %v7631_v10, 4  ;;  %v7608_v61 = vrot.slane %v7607_v43, 1 }
 0x697   :  { %v7638_v49 = vsel %vm7238_vm9, %v7184_v38, -inf  ;;  %v7645_v50 = vsel %vm7238_vm9, %v7185_v48, -inf  ;;  %v7652_v39 = vsel %vm7238_vm9, %v7186_v5, -inf  ;;  %v7628_v56 = vmax.f32 %v7626_v0, %v7627_v23 }
 0x698   :  { %v7615_v2 = vrot.slane %v7614_v33, 1  ;;  %v7107_v42 = vpop.f32.mrf.mxu1  ;;  %v7622_v34 = vrot.slane %v7621_v32, 1  ;;  %v7633_v15 = vmax.f32 %v7631_v10, %v7632_v36  ;;  %v7639_v44 = vrot.slane %v7638_v49, 4 }
 0x699   :  { %v7646_v52 = vrot.slane %v7645_v50, 4  ;;  %v15612_v17 = vmax.f32 %v7600_v57, %v7601_v25  ;;  %v7760_v22 = vsel %vm7687_vm2, %v7581_v37, -inf  ;;  %v7653_v60 = vrot.slane %v7652_v39, 4 }
 0x69a   :  { %v7616_v45 = vmax.f32 %v7614_v33, %v7615_v2  ;;  %v7108_v18 = vadd.f32 %v15595_v24, %v7107_v42  ;;  %v7763_v19 = vsel %vm7687_vm2, %v7588_v47, -inf  ;;  %v15618_v55 = vsel %vm7687_vm2, %v7595_v51, -inf }
 0x69b   :  { %v7634_v29 = vrot.slane %v7633_v15, 2  ;;  %v7640_v30 = vmax.f32 %v7638_v49, %v7639_v44  ;;  %v7609_v12 = vmax.f32 %v7607_v43, %v7608_v61  ;;  %v7647_v63 = vmax.f32 %v7645_v50, %v7646_v52 }
 0x69c   :  { %v7654_v21 = vmax.f32 %v7652_v39, %v7653_v60  ;;  %v7125_v59 = vmax.f32 %v7108_v18, 0.0  ;;  %v7623_v9 = vmax.f32 %v7621_v32, %v7622_v34  ;;  %v7629_v26 = vrot.slane %v7628_v56, 1 }
 0x69d   :  { %v7764_v54 = vsel %vm7687_vm2, %v7616_v45, -inf  ;;  %v7641_v62 = vrot.slane %v7640_v30, 2  ;;  %v7648_v46 = vrot.slane %v7647_v63, 2  ;;  %v7635_v14 = vmax.f32 %v7633_v15, %v7634_v29 }
 0x69e   :  { %v7655_v53 = vrot.slane %v7654_v21, 2  ;;  %v7187_v6 = vrot.slane %v7125_v59, 2  ;;  %v7188_v24 = vrot.slane %v7125_v59, 4  ;;  %v7189_v1 = vrot.slane %v7125_v59, 6 }
 0x69f   :  { %v7642_v4 = vmax.f32 %v7640_v30, %v7641_v62  ;;  %v7659_v40 = vsel %vm7238_vm9, %v7125_v59, -inf  ;;  %v7649_v7 = vmax.f32 %v7647_v63, %v7648_v46  ;;  %v7630_v57 = vmax.f32 %v7628_v56, %v7629_v26 }
 0x6a0   :  { %v7660_v3 = vrot.slane %v7659_v40, 4  ;;  %v7666_v13 = vsel %vm7238_vm9, %v7187_v6, -inf  ;;  %v7673_v0 = vsel %vm7238_vm9, %v7188_v24, -inf  ;;  %v7761_v16 = vsel %vm7687_vm2, %v7609_v12, -inf }
 0x6a1   :  { %v7667_v8 = vrot.slane %v7666_v13, 4  ;;  %v7674_v35 = vrot.slane %v7673_v0, 4  ;;  %v7767_v58 = vsel %vm7687_vm2, %v7623_v9, -inf  ;;  %v7680_v37 = vsel %vm7238_vm9, %v7189_v1, -inf  ;;  %vm17236_vm9 = vmmov %vm17230_vm4  ;;  %v7905_v1 = vpop.permute.xlu0 %7904 }
 0x6a2   :  { %v7661_v31 = vmax.f32 %v7659_v40, %v7660_v3  ;;  %v7656_v27 = vmax.f32 %v7654_v21, %v7655_v53  ;;  %v7765_v43 = vmax.f32 %v7763_v19, %v7764_v54  ;;  %v7681_v23 = vrot.slane %v7680_v37, 4 }
 0x6a3   :  { %v7668_v33 = vmax.f32 %v7666_v13, %v7667_v8  ;;  %v7675_v32 = vmax.f32 %v7673_v0, %v7674_v35  ;;  %v7636_v38 = vrot.slane %v7635_v14, 1  ;;  %v7643_v48 = vrot.slane %v7642_v4, 1  ;;  %v7868_v8 = vld [vmem:[#allocation6 + $0x7] sm:$0xff]  ;;  %v17241_v35 = vld [vmem:[#allocation21_spill] sm:$0xff] }
 0x6a4   :  { %v7662_v5 = vrot.slane %v7661_v31, 2  ;;  %v7650_v10 = vrot.slane %v7649_v7, 1  ;;  %v7762_v47 = vmax.f32 %v7760_v22, %v7761_v16  ;;  %v7682_v2 = vmax.f32 %v7680_v37, %v7681_v23  ;;  %v17242_v37 = vld [vmem:[#allocation29_spill] sm:$0xff] }
 0x6a5   :  { %v7669_v51 = vrot.slane %v7668_v33, 2  ;;  %v7676_v25 = vrot.slane %v7675_v32, 2  ;;  %v7768_v36 = vmax.f32 %v15618_v55, %v7767_v58  ;;  %v7657_v50 = vrot.slane %v7656_v27, 1 }
 0x6a6   :  { %v7663_v49 = vmax.f32 %v7661_v31, %v7662_v5  ;;  %v7770_v39 = vsel %vm7687_vm2, %v7630_v57, -inf  ;;  %v7683_v34 = vrot.slane %v7682_v2, 2  ;;  %v7849_v56 = vsel %vm6225_vm5, %v7765_v43, %v7762_v47  ;;  %v7907_v5 = vpop.permute.xlu1 %7906 }
 0x6a7   :  { %v7670_v42 = vmax.f32 %v7668_v33, %v7669_v51  ;;  %v7677_v61 = vmax.f32 %v7675_v32, %v7676_v25  ;;  %v7637_v45 = vmax.f32 %v7635_v14, %v7636_v38  ;;  %v7644_v44 = vmax.f32 %v7642_v4, %v7643_v48 }
 0x6a8   :  { %v7664_v15 = vrot.slane %v7663_v49, 1  ;;  %v7651_v52 = vmax.f32 %v7649_v7, %v7650_v10  ;;  %v7684_v18 = vmax.f32 %v7682_v2, %v7683_v34  ;;  %v7769_v19 = vsel %vm7687_vm2, %v15612_v17, -inf  ;;  %v7869_v10 = vld [vmem:[#allocation6 + $0xf] sm:$0xff] }
 0x6a9   :  { %v7671_v60 = vrot.slane %v7670_v42, 1  ;;  %v7678_v22 = vrot.slane %v7677_v61, 1  ;;  %v7658_v29 = vmax.f32 %v7656_v27, %v7657_v50  ;;  %v7771_v30 = vmax.f32 %v7769_v19, %v7770_v39  ;;  %v7870_v50 = vld [vmem:[#allocation6 + $0x17] sm:$0xff] }
 0x6aa   :  { %v7665_v55 = vmax.f32 %v7663_v49, %v7664_v15  ;;  %v7685_v21 = vrot.slane %v7684_v18, 1  ;;  %v7850_v59 = vsel %vm6227_vm6, %v7768_v36, %v7849_v56  ;;  %v7772_v9 = vsel %vm7687_vm2, %v7637_v45, -inf }
 0x6ab   :  { %v7672_v12 = vmax.f32 %v7670_v42, %v7671_v60  ;;  %v7679_v63 = vmax.f32 %v7677_v61, %v7678_v22  ;;  %v7775_v54 = vsel %vm7687_vm2, %v7644_v44, -inf  ;;  %v7778_v62 = vsel %vm7687_vm2, %v7651_v52, -inf }
 0x6ac   :  { %v7773_v26 = vsel %vm7687_vm2, %v7665_v55, -inf  ;;  %v7686_v46 = vmax.f32 %v7684_v18, %v7685_v21  ;;  %v7851_v4 = vsel %vm17236_vm9, %v7771_v30, %v7850_v59  ;;  %v7781_v40 = vsel %vm7687_vm2, %v7658_v29, -inf }
 0x6ad   :  { %v7774_v53 = vmax.f32 %v7772_v9, %v7773_v26  ;;  %v7776_v17 = vsel %vm7687_vm2, %v7672_v12, -inf  ;;  %v7779_v6 = vsel %vm7687_vm2, %v7679_v63, -inf  ;;  %v7787_v58 = vand.u32 3, %v17241_v35  ;;  %v7921_v33 = vpop.permute.xlu0 %7920  ;;  %v9942_v26 = vld [vmem:[%s16497_s5 + $0x30] sm:$0xff] }
 0x6ae   :  { %v7777_v24 = vmax.f32 %v7775_v54, %v7776_v17  ;;  %v7780_v14 = vmax.f32 %v7778_v62, %v7779_v6  ;;  %v7782_v7 = vsel %vm7687_vm2, %v7686_v46, -inf  ;;  %v7880_v31 = vsel %vm7864_vm3, %v7868_v8, 0.0  ;;  %v9944_v54 = vld [vmem:[%s16497_s5 + $0x40] sm:$0xff]  ;;  %8111 = vmatpush.bf16.msrb.mxu2 %v9942_v26 }
 0x6af   :  { %v7852_v3 = vsel %vm17237_vm13, %v7774_v53, %v7851_v4  ;;  %v7783_v13 = vmax.f32 %v7781_v40, %v7782_v7  ;;  %vm7941_vm4 = vcmask 392192   ;;  %v7786_v27 = vand.u32 3, %v17242_v37  ;;  %v9941_v53 = vld [vmem:[%s16497_s5 + $0x28] sm:$0xff]  ;;  %8136 = vmatpush.bf16.msrb.mxu3 %v9944_v54  ;;  %v9940_v6 = vld [vmem:[%s16497_s5 + $0x20] sm:$0xff]  ;;  %v9939_v7 = vld [vmem:[%s16497_s5 + $0x18] sm:$0xff] }
 0x6b0   :  { %v7853_v0 = vsel %vm17238_vm14, %v7777_v24, %v7852_v3  ;;  %v7932_v43 = vsel %vm7687_vm2, %v7880_v31, %v7905_v1  ;;  %vm7887_vm8 = vcmp.lt.s32.totalorder %v7787_v58, 3  ;;  %v7881_v47 = vsel %vm7865_vm7, %v7869_v10, 0.0  ;;  %v9938_v3 = vld [vmem:[%s16497_s5 + $0x10] sm:$0xff] }
 0x6b1   :  { %v7854_v57 = vsel %vm17239_vm0, %v7780_v14, %v7853_v0  ;;  %v7937_v32 = vsel %vm7936_vm1, %v7932_v43, %v7921_v33  ;;  %vm7886_vm10 = vcmp.lt.s32.totalorder %v7786_v27, 3  ;;  %v7933_v51 = vsel %vm7687_vm2, %v7881_v47, %v7907_v5  ;;  %v9936_v0 = vld [vmem:[%s16497_s5] sm:$0xff] }
 0x6b2   :  { %v7855_v16 = vsel %vm17240_vm11, %v7783_v13, %v7854_v57  ;;  %7942 = vst.msk [vmem:[#allocation7 + $0x8] sm:$0xff] %vm7941_vm4, %v7937_v32  ;;  %vm7866_vm15 = vcmp.gt.s32.totalorder %v7786_v27, 0  ;;  %v7788_v56 = vshra.s32 %v17229_v41, 2  ;;  %v7789_v45 = vshra.s32 %v17235_v20, 2  ;;  %8112 = vmatpush.bf16.msrb.mxu2 %v9941_v53  ;;  %v9937_v13 = vld [vmem:[%s16497_s5 + $0x8] sm:$0xff] }
 0x6b3   :  { %7863 = vst.msk [vmem:[#allocation6 + $0x20] sm:$0xff] %vm7687_vm2, %v7855_v16  ;;  %7910 = vrot.lane.b32.xlu0 %v7855_v16, %s10657_s3  ;;  %v7882_v39 = vsel %vm7866_vm15, %v7870_v50, 0.0  ;;  %vm7867_vm13 = vcmp.gt.s32.totalorder %v7787_v58, 0  ;;  %v7791_v30 = vshra.s32 %v17241_v35, 2  ;;  %v7790_v9 = vshra.s32 %v17242_v37, 2 }
 0x6b4   :  { %v7792_v15 = vand.u32 3, %v7788_v56  ;;  %v7793_v44 = vand.u32 3, %v7789_v45  ;;  %vm8180_vm7 = vcmask 517120   ;;  %vm17245_vm15 = vcmask 1045509  }
 0x6b5   :  { %v7795_v46 = vand.u32 3, %v7791_v30  ;;  %v7794_v17 = vand.u32 3, %v7790_v9 }
 0x6b6   :  { %vm7966_vm12 = vcmp.lt.s32.totalorder %v7792_v15, 3  ;;  %vm7967_vm9 = vcmp.lt.s32.totalorder %v7793_v44, 3  ;;  %vm7947_vm14 = vcmp.gt.s32.totalorder %v7793_v44, 0  ;;  %8113 = vmatpush.bf16.msrb.mxu2 %v9940_v6  ;;  %vm7946_vm3 = vcmp.gt.s32.totalorder %v7792_v15, 0 }
 0x6b7   :  { %vm7968_vm0 = vcmp.lt.s32.totalorder %v7794_v17, 3  ;;  %vm7969_vm11 = vcmp.lt.s32.totalorder %v7795_v46, 3 }
 0x6b9   :  { %v7950_v35 = vld [vmem:[#allocation7 + $0x4] sm:$0xff] }
 0x6ba   :  { %v7890_v11 = vld [vmem:[#allocation6 + $0x19] sm:$0xff]  ;;  %v7891_v23 = vld [vmem:[#allocation6 + $0x21] sm:$0xff]  ;;  %8114 = vmatpush.bf16.msrb.mxu2 %v9939_v7  ;;  %v7962_v31 = vsel %vm7946_vm3, %v7950_v35, 0.0 }
 0x6bb   :  { %v7902_v38 = vsel %vm7886_vm10, %v7890_v11, 0.0  ;;  %v7903_v48 = vsel %vm7887_vm8, %v7891_v23, 0.0  ;;  %v7871_v55 = vld [vmem:[#allocation6 + $0x1f] sm:$0xff]  ;;  %vm7948_vm10 = vcmp.gt.s32.totalorder %v7794_v17, 0  ;;  %vm7949_vm8 = vcmp.gt.s32.totalorder %v7795_v46, 0 }
 0x6bc   :  { %7924 = vrot.lane.b32.xlu2 %v7902_v38, %s10658_s16  ;;  %7926 = vrot.lane.b32.xlu1 %v7903_v48, %s10658_s16  ;;  %v7883_v29 = vsel %vm7867_vm13, %v7871_v55, 0.0 }
 0x6be   :  { %8115 = vmatpush.bf16.msrb.mxu2 %v9938_v3 }
 0x6c2   :  { %8116 = vmatpush.bf16.msrb.mxu2 %v9937_v13 }
 0x6c6   :  { %8117 = vmatpush.bf16.msrb.mxu2 %v9936_v0 }
 0x6d1   :  { %v7909_v49 = vpop.permute.xlu2 %7908 }
 0x6d2   :  { %v7934_v42 = vsel %vm7687_vm2, %v7882_v39, %v7909_v49 }
 0x6f2   :  { %v7923_v25 = vpop.permute.xlu1 %7922 }
 0x6f3   :  { %v7938_v2 = vsel %vm7936_vm1, %v7933_v51, %v7923_v25 }
 0x6f4   :  { %7943 = vst.msk [vmem:[#allocation7 + $0x10] sm:$0xff] %vm7941_vm4, %v7938_v2  ;;  %v10471_v36 = vpack.i.bf16 %v7938_v2, %v7937_v32 }
 0x6f6   :  { %10472 = vrot.lane.b32.xlu2 %v10471_v36, %s10659_s29 }
 0x6fb   :  { %v7951_v52 = vld [vmem:[#allocation7 + $0xc] sm:$0xff] }
 0x6fc   :  { %v7979_v22 = vsel %vm7966_vm12, %v7951_v52, 0.0  ;;  %v7963_v12 = vsel %vm7947_vm14, %v7951_v52, 0.0  ;;  %vm17246_vm12 = vcmask 1046534  }
 0x716   :  { %v7925_v61 = vpop.permute.xlu2 %7924 }
 0x717   :  { %v7939_v34 = vsel %vm7936_vm1, %v7934_v42, %v7925_v61 }
 0x718   :  { %7944 = vst.msk [vmem:[#allocation7 + $0x18] sm:$0xff] %vm7941_vm4, %v7939_v34 }
 0x71f   :  { %v15671_v60 = vld [vmem:[#allocation7 + $0x14] sm:$0xff] }
 0x720   :  { %v7980_v18 = vsel %vm7967_vm9, %v15671_v60, 0.0  ;;  %v7964_v2 = vsel %vm7948_vm10, %v15671_v60, 0.0  ;;  %vm17247_vm9 = vcmask 1047559   ;;  %vm8386_vm10 = vcmask 1045504  }
 0x721   :  { %v10476_v19 = vpack.i.bf16 %v7980_v18, %v7979_v22 }
 0x723   :  { %10477 = vrot.lane.b32.xlu0 %v10476_v19, %s10660_s12 }
 0x725   :  { %v7911_v20 = vpop.permute.xlu0 %7910 }
 0x726   :  { %v7935_v63 = vsel %vm7687_vm2, %v7883_v29, %v7911_v20 }
 0x72e   :  { %v7927_v21 = vpop.permute.xlu1 %7926 }
 0x72f   :  { %v7940_v59 = vsel %vm7936_vm1, %v7935_v63, %v7927_v21  ;;  %vm8019_vm1 = vcmask 785408  }
 0x730   :  { %v10481_v62 = vpack.i.bf16 %v7940_v59, %v7939_v34  ;;  %7945 = vst.msk [vmem:[#allocation7 + $0x20] sm:$0xff] %vm7941_vm4, %v7940_v59  ;;  %v15717_v34 = vld [vmem:[#allocation13] ss:$0 sm:$0xff] }
 0x732   :  { %10482 = vrot.lane.b32.xlu1 %v10481_v62, %s10659_s29 }
 0x737   :  { %v7953_v24 = vld [vmem:[#allocation7 + $0x1c] sm:$0xff]  ;;  %v7970_v14 = vld [vmem:[#allocation7 + $0x24] sm:$0xff] }
 0x738   :  { %v7981_v4 = vsel %vm7968_vm0, %v7953_v24, 0.0  ;;  %v7982_v1 = vsel %vm7969_vm11, %v7970_v14, 0.0  ;;  %v7965_v36 = vsel %vm7949_vm8, %v7953_v24, 0.0  ;;  %vm17250_vm11 = vcmask 1041408  }
 0x739   :  { %v10486_v40 = vpack.i.bf16 %v7982_v1, %v7981_v4 }
 0x73b   :  { %10487 = vrot.lane.b32.xlu2 %v10486_v40, %s10660_s12 }
 0x750   :  { %v10473_v57 = vpop.permute.xlu2 %10472 }
 0x751   :  { %v10475_v16 = vunpack.i.h.bf16 %v10473_v57  ;;  %v10474_v8 = vunpack.i.l.bf16 %v10473_v57 }
 0x753   :  { %v8015_v43 = vsel %vm7941_vm4, %v7962_v31, %v10474_v8  ;;  %v8016_v33 = vsel %vm7941_vm4, %v7963_v12, %v10475_v16 }
 0x795   :  { %v10478_v58 = vpop.permute.xlu0 %10477  ;;  %v10488_v48 = vpop.permute.xlu2 %10487 }
 0x796   :  { %v10480_v37 = vunpack.i.h.bf16 %v10478_v58  ;;  %v10479_v27 = vunpack.i.l.bf16 %v10478_v58  ;;  %v10490_v5 = vunpack.i.h.bf16 %v10488_v48  ;;  %v10489_v10 = vunpack.i.l.bf16 %v10488_v48 }
 0x798   :  { %v8025_v32 = vpack.c.bf16 %v10480_v37, %v10479_v27  ;;  %v8020_v11 = vsel %vm8019_vm1, %v8015_v43, %v10479_v27  ;;  %v8021_v23 = vsel %vm8019_vm1, %v8016_v33, %v10480_v37  ;;  %v8027_v28 = vpack.c.bf16 %v10490_v5, %v10489_v10 }
 0x799   :  { %v8024_v38 = vpack.c.bf16 %v8021_v23, %v8020_v11 }
 0x79a   :  { %9500 = vmatmul.msk.bf16.vlgmr.msrb.gmra.mxu3 %vm7687_vm2, %v8025_v32 }
 0x79b   :  { %8118 = vmatmul.bf16.vlgmr.msrb.gmra.mxu2 %v8024_v38 }
 0x7a4   :  { %v10483_v47 = vpop.permute.xlu1 %10482 }
 0x7a5   :  { %v10485_v51 = vunpack.i.h.bf16 %v10483_v47  ;;  %v10484_v25 = vunpack.i.l.bf16 %v10483_v47 }
 0x7a7   :  { %v8017_v49 = vsel %vm7941_vm4, %v7964_v2, %v10484_v25  ;;  %v8018_v50 = vsel %vm7941_vm4, %v7965_v36, %v10485_v51  ;;  %vm17243_vm4 = vcmask 1043459  }
 0x7a8   :  { %v8022_v39 = vsel %vm8019_vm1, %v8017_v49, %v10489_v10  ;;  %v8023_v42 = vsel %vm8019_vm1, %v8018_v50, %v10490_v5  ;;  %vm17253_vm1 = vmmov %vm17250_vm11 }
 0x7a9   :  { %v8026_v61 = vpack.c.bf16 %v8023_v42, %v8022_v39 }
 0x7aa   :  { %9501 = vmatmul.msk.bf16.gmra.mxu3 %vm7687_vm2, %v8027_v28  ;;  %vm8293_vm2 = vcmask 523264  }
 0x7ab   :  { %8123 = vmatmul.bf16.gmra.mxu2 %v8026_v61 }
 0x81d   :  { %v8138_v56 = vpop.f32.mrf.mxu3 }
 0x81e   :  { %v8119_v45 = vpop.f32.mrf.mxu2 }
 0x81f   :  { %v8120_v15 = vadd.f32 %v15717_v34, %v8119_v45 }
 0x821   :  { %v8139_v44 = vadd.f32 %v8138_v56, %v8120_v15 }
 0x823   :  { %v8148_v52 = vmax.f32 %v8139_v44, 0.0 }
 0x825   :  { %v8156_v60 = vrot.slane %v8148_v52, 2  ;;  %v8157_v22 = vrot.slane %v8148_v52, 4  ;;  %v8158_v18 = vrot.slane %v8148_v52, 6  ;;  %v8181_v19 = vsel %vm8180_vm7, %v8148_v52, -inf  ;;  %v8140_v55 = vpop.f32.mrf.mxu3 }
 0x826   :  { %v8182_v20 = vrot.slane %v8181_v19, 4  ;;  %v8121_v29 = vpop.f32.mrf.mxu2 }
 0x827   :  { %v8188_v30 = vsel %vm8180_vm7, %v8156_v60, -inf  ;;  %v8195_v12 = vsel %vm8180_vm7, %v8157_v22, -inf  ;;  %v8202_v63 = vsel %vm8180_vm7, %v8158_v18, -inf  ;;  %v8122_v21 = vadd.f32 %v15717_v34, %v8121_v29  ;;  %v9560_v22 = vld [vmem:[%s16499_s7 + $0x70] sm:$0xf] }
 0x828   :  { %v8183_v59 = vmax.f32 %v8181_v19, %v8182_v20  ;;  %v8189_v9 = vrot.slane %v8188_v30, 4  ;;  %v8196_v26 = vrot.slane %v8195_v12, 4  ;;  %v8203_v54 = vrot.slane %v8202_v63, 4  ;;  %v9960_v18 = vld [vmem:[%s16499_s7 + $0x74] sm:$0xf0] }
 0x829   :  { %v8141_v62 = vadd.f32 %v8140_v55, %v8122_v21 }
 0x82a   :  { %v8184_v46 = vrot.slane %v8183_v59, 2  ;;  %v8190_v53 = vmax.f32 %v8188_v30, %v8189_v9  ;;  %v8197_v17 = vmax.f32 %v8195_v12, %v8196_v26  ;;  %v8204_v6 = vmax.f32 %v8202_v63, %v8203_v54  ;;  %v9552_v12 = vld [vmem:[%s16499_s7 + $0x60] sm:$0xf]  ;;  %v9958_v63 = vld [vmem:[%s16499_s7 + $0x64] sm:$0xf0] }
 0x82b   :  { %v8149_v24 = vmax.f32 %v8141_v62, 0.0  ;;  %v9561_v30 = vor.u32 %v9960_v18, %v9560_v22  ;;  %v9544_v54 = vld [vmem:[%s16499_s7 + $0x50] sm:$0xf]  ;;  %v9956_v62 = vld [vmem:[%s16499_s7 + $0x54] sm:$0xf0] }
 0x82c   :  { %v8185_v14 = vmax.f32 %v8183_v59, %v8184_v46  ;;  %v8191_v4 = vrot.slane %v8190_v53, 2  ;;  %v8198_v1 = vrot.slane %v8197_v17, 2  ;;  %v8205_v40 = vrot.slane %v8204_v6, 2 }
 0x82d   :  { %v8159_v7 = vrot.slane %v8149_v24, 2  ;;  %v8160_v3 = vrot.slane %v8149_v24, 4  ;;  %v8161_v13 = vrot.slane %v8149_v24, 6  ;;  %v8209_v0 = vsel %vm8180_vm7, %v8149_v24, -inf  ;;  %v8143_v58 = vpop.f32.mrf.mxu3  ;;  %8853 = vmatpush.bf16.msra.mxu3 %v9561_v30 }
 0x82e   :  { %v8186_v57 = vrot.slane %v8185_v14, 1  ;;  %v8192_v16 = vmax.f32 %v8190_v53, %v8191_v4  ;;  %v8199_v8 = vmax.f32 %v8197_v17, %v8198_v1  ;;  %v8206_v35 = vmax.f32 %v8204_v6, %v8205_v40  ;;  %v8124_v31 = vpop.f32.mrf.mxu2 }
 0x82f   :  { %v8210_v37 = vrot.slane %v8209_v0, 4  ;;  %v8216_v27 = vsel %vm8180_vm7, %v8159_v7, -inf  ;;  %v8223_v43 = vsel %vm8180_vm7, %v8160_v3, -inf  ;;  %v8230_v33 = vsel %vm8180_vm7, %v8161_v13, -inf }
 0x830   :  { %v8187_v32 = vmax.f32 %v8185_v14, %v8186_v57  ;;  %v8193_v11 = vrot.slane %v8192_v16, 1  ;;  %v8200_v23 = vrot.slane %v8199_v8, 1  ;;  %v8207_v38 = vrot.slane %v8206_v35, 1 }
 0x831   :  { %v8211_v48 = vmax.f32 %v8209_v0, %v8210_v37  ;;  %v8217_v5 = vrot.slane %v8216_v27, 4  ;;  %v8224_v10 = vrot.slane %v8223_v43, 4  ;;  %v8231_v47 = vrot.slane %v8230_v33, 4 }
 0x832   :  { %v8194_v51 = vmax.f32 %v8192_v16, %v8193_v11  ;;  %v8201_v25 = vmax.f32 %v8199_v8, %v8200_v23  ;;  %v8208_v2 = vmax.f32 %v8206_v35, %v8207_v38  ;;  %v8294_v36 = vsel %vm8293_vm2, %v8187_v32, -inf }
 0x833   :  { %v8212_v49 = vrot.slane %v8211_v48, 2  ;;  %v8218_v50 = vmax.f32 %v8216_v27, %v8217_v5  ;;  %v8225_v28 = vmax.f32 %v8223_v43, %v8224_v10  ;;  %v8232_v39 = vmax.f32 %v8230_v33, %v8231_v47 }
 0x834   :  { %v8295_v42 = vsel %vm8293_vm2, %v8201_v25, -inf  ;;  %v8297_v61 = vsel %vm8293_vm2, %v8194_v51, -inf  ;;  %v8298_v56 = vsel %vm8293_vm2, %v8208_v2, -inf  ;;  %v8125_v45 = vadd.f32 %v15717_v34, %v8124_v31 }
 0x835   :  { %v8296_v15 = vmax.f32 %v8294_v36, %v8295_v42  ;;  %v8299_v44 = vmax.f32 %v8297_v61, %v8298_v56  ;;  %v8213_v52 = vmax.f32 %v8211_v48, %v8212_v49  ;;  %v8219_v60 = vrot.slane %v8218_v50, 2  ;;  %v8145_v6 = vpop.f32.mrf.mxu3 }
 0x836   :  { %v8226_v19 = vrot.slane %v8225_v28, 2  ;;  %v8233_v55 = vrot.slane %v8232_v39, 2  ;;  %v8144_v20 = vadd.f32 %v8143_v58, %v8125_v45  ;;  %v8126_v29 = vpop.f32.mrf.mxu2  ;;  %v9553_v24 = vor.u32 %v9958_v63, %v9552_v12 }
 0x837   :  { %v8214_v21 = vrot.slane %v8213_v52, 1  ;;  %v8220_v59 = vmax.f32 %v8218_v50, %v8219_v60  ;;  %v8127_v9 = vadd.f32 %v15717_v34, %v8126_v29  ;;  %v15748_v26 = vsel %vm6225_vm5, %v8299_v44, %v8296_v15 }
 0x838   :  { %v8227_v46 = vmax.f32 %v8225_v28, %v8226_v19  ;;  %v8234_v53 = vmax.f32 %v8232_v39, %v8233_v55  ;;  %v8150_v17 = vmax.f32 %v8144_v20, 0.0  ;;  %v9545_v1 = vor.u32 %v9956_v62, %v9544_v54  ;;  %8854 = vmatpush.bf16.msra.mxu3 %v9553_v24 }
 0x839   :  { %v8215_v14 = vmax.f32 %v8213_v52, %v8214_v21  ;;  %v8221_v4 = vrot.slane %v8220_v59, 1  ;;  %v8146_v34 = vadd.f32 %v8145_v6, %v8127_v9 }
 0x83a   :  { %v8228_v40 = vrot.slane %v8227_v46, 1  ;;  %v8235_v7 = vrot.slane %v8234_v53, 1  ;;  %v8162_v3 = vrot.slane %v8150_v17, 2  ;;  %v8163_v13 = vrot.slane %v8150_v17, 4 }
 0x83b   :  { %v8222_v0 = vmax.f32 %v8220_v59, %v8221_v4  ;;  %v15757_v57 = vsel %vm8293_vm2, %v8215_v14, -inf  ;;  %v8164_v16 = vrot.slane %v8150_v17, 6  ;;  %v8237_v8 = vsel %vm8180_vm7, %v8150_v17, -inf }
 0x83c   :  { %v8229_v35 = vmax.f32 %v8227_v46, %v8228_v40  ;;  %v8236_v58 = vmax.f32 %v8234_v53, %v8235_v7  ;;  %v8238_v31 = vrot.slane %v8237_v8, 4  ;;  %v8244_v37 = vsel %vm8180_vm7, %v8162_v3, -inf  ;;  %8855 = vmatpush.bf16.msra.mxu3 %v9545_v1 }
 0x83d   :  { %v8245_v27 = vrot.slane %v8244_v37, 4  ;;  %v8251_v43 = vsel %vm8180_vm7, %v8163_v13, -inf  ;;  %v8258_v33 = vsel %vm8180_vm7, %v8164_v16, -inf  ;;  %v8151_v32 = vmax.f32 %v8146_v34, 0.0 }
 0x83e   :  { %v15764_v11 = vsel %vm8293_vm2, %v8229_v35, -inf  ;;  %v8239_v23 = vmax.f32 %v8237_v8, %v8238_v31  ;;  %v8252_v38 = vrot.slane %v8251_v43, 4  ;;  %v8259_v48 = vrot.slane %v8258_v33, 4 }
 0x83f   :  { %v8302_v5 = vmax.f32 %v15757_v57, %v15764_v11  ;;  %v8246_v10 = vmax.f32 %v8244_v37, %v8245_v27  ;;  %v8165_v47 = vrot.slane %v8151_v32, 2  ;;  %v8166_v51 = vrot.slane %v8151_v32, 4  ;;  %v9536_v27 = vld [vmem:[%s16499_s7 + $0x40] sm:$0xf] }
 0x840   :  { %v8240_v25 = vrot.slane %v8239_v23, 2  ;;  %v8253_v2 = vmax.f32 %v8251_v43, %v8252_v38  ;;  %v8260_v36 = vmax.f32 %v8258_v33, %v8259_v48  ;;  %v8167_v49 = vrot.slane %v8151_v32, 6 }
 0x841   :  { %v8247_v50 = vrot.slane %v8246_v10, 2  ;;  %v8265_v28 = vsel %vm8180_vm7, %v8151_v32, -inf  ;;  %v8272_v39 = vsel %vm8180_vm7, %v8165_v47, -inf  ;;  %v8279_v42 = vsel %vm8180_vm7, %v8166_v51, -inf  ;;  %v9952_v47 = vld [vmem:[%s16499_s7 + $0x34] sm:$0xf0] }
 0x842   :  { %v8241_v61 = vmax.f32 %v8239_v23, %v8240_v25  ;;  %v8254_v56 = vrot.slane %v8253_v2, 2  ;;  %v8261_v45 = vrot.slane %v8260_v36, 2  ;;  %v8266_v15 = vrot.slane %v8265_v28, 4 }
 0x843   :  { %v8248_v44 = vmax.f32 %v8246_v10, %v8247_v50  ;;  %v8273_v52 = vrot.slane %v8272_v39, 4  ;;  %v8280_v60 = vrot.slane %v8279_v42, 4  ;;  %v8286_v22 = vsel %vm8180_vm7, %v8167_v49, -inf  ;;  %v9528_v10 = vld [vmem:[%s16499_s7 + $0x30] sm:$0xf] }
 0x844   :  { %v8242_v18 = vrot.slane %v8241_v61, 1  ;;  %v8255_v19 = vmax.f32 %v8253_v2, %v8254_v56  ;;  %v8262_v55 = vmax.f32 %v8260_v36, %v8261_v45  ;;  %v8267_v20 = vmax.f32 %v8265_v28, %v8266_v15 }
 0x845   :  { %v8274_v29 = vmax.f32 %v8272_v39, %v8273_v52  ;;  %v8281_v30 = vmax.f32 %v8279_v42, %v8280_v60  ;;  %v8287_v12 = vrot.slane %v8286_v22, 4  ;;  %v8249_v63 = vrot.slane %v8248_v44, 1  ;;  %v9520_v60 = vld [vmem:[%s16499_s7 + $0x20] sm:$0xf] }
 0x846   :  { %v8243_v21 = vmax.f32 %v8241_v61, %v8242_v18  ;;  %v8256_v59 = vrot.slane %v8255_v19, 1  ;;  %v8268_v9 = vrot.slane %v8267_v20, 2  ;;  %v8263_v54 = vrot.slane %v8262_v55, 1 }
 0x847   :  { %v8282_v62 = vrot.slane %v8281_v30, 2  ;;  %v8288_v46 = vmax.f32 %v8286_v22, %v8287_v12  ;;  %v8250_v53 = vmax.f32 %v8248_v44, %v8249_v63  ;;  %v8275_v17 = vrot.slane %v8274_v29, 2  ;;  %v9950_v22 = vld [vmem:[%s16499_s7 + $0x24] sm:$0xf0]  ;;  %v9991_v63 = vld [vmem:[%s16499_s7 + $0x174] sm:$0xf] }
 0x848   :  { %v8269_v6 = vmax.f32 %v8267_v20, %v8268_v9  ;;  %v8257_v24 = vmax.f32 %v8255_v19, %v8256_v59  ;;  %v8264_v14 = vmax.f32 %v8262_v55, %v8263_v54  ;;  %v8303_v4 = vsel %vm8293_vm2, %v8222_v0, -inf  ;;  %v9954_v0 = vld [vmem:[%s16499_s7 + $0x44] sm:$0xf0]  ;;  %v9512_v19 = vld [vmem:[%s16499_s7 + $0x10] sm:$0xf] }
 0x849   :  { %v8276_v34 = vmax.f32 %v8274_v29, %v8275_v17  ;;  %v8283_v1 = vmax.f32 %v8281_v30, %v8282_v62  ;;  %v8289_v40 = vrot.slane %v8288_v46, 2  ;;  %v8304_v7 = vsel %vm8293_vm2, %v8236_v58, -inf  ;;  %v9948_v55 = vld [vmem:[%s16499_s7 + $0x14] sm:$0xf0]  ;;  %v9504_v29 = vld [vmem:[%s16499_s7] sm:$0xf] }
 0x84a   :  { %v8270_v3 = vrot.slane %v8269_v6, 1  ;;  %v8305_v13 = vmax.f32 %v8303_v4, %v8304_v7  ;;  %v8306_v57 = vsel %vm8293_vm2, %v8243_v21, -inf  ;;  %v8307_v16 = vsel %vm8293_vm2, %v8257_v24, -inf  ;;  %v9946_v30 = vld [vmem:[%s16499_s7 + $0x4] sm:$0xf0] }
 0x84b   :  { %v8277_v8 = vrot.slane %v8276_v34, 1  ;;  %v8284_v35 = vrot.slane %v8283_v1, 1  ;;  %v8290_v31 = vmax.f32 %v8288_v46, %v8289_v40  ;;  %v8308_v37 = vmax.f32 %v8306_v57, %v8307_v16  ;;  %v9690_v21 = vld [vmem:[%s16499_s7 + $0x178] sm:$0xf0]  ;;  %v9624_v59 = vld [vmem:[%s16499_s7 + $0xf0] sm:$0xf] }
 0x84c   :  { %v8271_v43 = vmax.f32 %v8269_v6, %v8270_v3  ;;  %v8309_v58 = vsel %vm8293_vm2, %v8250_v53, -inf  ;;  %v8310_v33 = vsel %vm8293_vm2, %v8264_v14, -inf  ;;  %v8330_v32 = vsel %vm6227_vm6, %v8302_v5, %v15748_v26  ;;  %v9976_v54 = vld [vmem:[%s16499_s7 + $0xf4] sm:$0xf0]  ;;  %v9616_v62 = vld [vmem:[%s16499_s7 + $0xe0] sm:$0xf] }
 0x84d   :  { %v8278_v11 = vmax.f32 %v8276_v34, %v8277_v8  ;;  %v8285_v23 = vmax.f32 %v8283_v1, %v8284_v35  ;;  %v8291_v38 = vrot.slane %v8290_v31, 1  ;;  %v8311_v48 = vmax.f32 %v8309_v58, %v8310_v33  ;;  %v9974_v46 = vld [vmem:[%s16499_s7 + $0xe4] sm:$0xf0]  ;;  %v9989_v17 = vld [vmem:[%s16499_s7 + $0x164] sm:$0xf] }
 0x84e   :  { %v8312_v51 = vsel %vm8293_vm2, %v8271_v43, -inf  ;;  %v8331_v25 = vsel %vm17243_vm4, %v8305_v13, %v8330_v32  ;;  %v9537_v2 = vor.u32 %v9954_v0, %v9536_v27  ;;  %vm17244_vm6 = vcmask 1044484   ;;  %v9682_v6 = vld [vmem:[%s16499_s7 + $0x168] sm:$0xf0]  ;;  %v9608_v14 = vld [vmem:[%s16499_s7 + $0xd0] sm:$0xf] }
 0x84f   :  { %v8292_v36 = vmax.f32 %v8290_v31, %v8291_v38  ;;  %v8313_v26 = vsel %vm8293_vm2, %v8285_v23, -inf  ;;  %v8315_v5 = vsel %vm8293_vm2, %v8278_v11, -inf  ;;  %v8332_v49 = vsel %vm17244_vm6, %v8308_v37, %v8331_v25  ;;  %v9688_v34 = vld [vmem:[%s16499_s7 + $0x170] sm:$0xf]  ;;  %v9992_v1 = vld [vmem:[%s16499_s7 + $0x174] sm:$0xf0]  ;;  %vm17256_vm6 = vmmov %vm17253_vm1 }
 0x850   :  { %v8314_v50 = vmax.f32 %v8312_v51, %v8313_v26  ;;  %8856 = vmatpush.bf16.msra.mxu3 %v9537_v2  ;;  %v9529_v28 = vor.u32 %v9952_v47, %v9528_v10  ;;  %v8333_v42 = vsel %vm17245_vm15, %v8311_v48, %v8332_v49  ;;  %v8318_v15 = vand.u32 1, %v17229_v41  ;;  %v9972_v40 = vld [vmem:[%s16499_s7 + $0xd4] sm:$0xf0]  ;;  %v9680_v3 = vld [vmem:[%s16499_s7 + $0x160] sm:$0xf]  ;;  %vm17257_vm15 = vmmov %vm17253_vm1 }
 0x851   :  { %v8316_v39 = vsel %vm8293_vm2, %v8292_v36, -inf  ;;  %v9521_v18 = vor.u32 %v9950_v22, %v9520_v60  ;;  %v9513_v20 = vor.u32 %v9948_v55, %v9512_v19  ;;  %v9505_v12 = vor.u32 %v9946_v30, %v9504_v29  ;;  %v9990_v13 = vld [vmem:[%s16499_s7 + $0x164] sm:$0xf0]  ;;  %v9672_v16 = vld [vmem:[%s16499_s7 + $0x150] sm:$0xf] }
 0x852   :  { %v8317_v61 = vmax.f32 %v8315_v5, %v8316_v39  ;;  %v8334_v56 = vsel %vm17246_vm12, %v8314_v50, %v8333_v42  ;;  %vm8343_vm13 = vcmp.lt.s32.totalorder %v8318_v15, 1  ;;  %v9693_v9 = vor.u32 %v9991_v63, %v9690_v21  ;;  %v9988_v35 = vld [vmem:[%s16499_s7 + $0x154] sm:$0xf0]  ;;  %v9987_v31 = vld [vmem:[%s16499_s7 + $0x154] sm:$0xf]  ;;  %vm17258_vm12 = vmmov %vm17253_vm1 }
 0x853   :  { %v9625_v53 = vor.u32 %v9976_v54, %v9624_v59  ;;  %v9617_v24 = vor.u32 %v9974_v46, %v9616_v62  ;;  %v9685_v4 = vor.u32 %v9989_v17, %v9682_v6  ;;  %v9689_v7 = vor.u32 %v9992_v1, %v9688_v34  ;;  %v9674_v37 = vld [vmem:[%s16499_s7 + $0x158] sm:$0xf0]  ;;  %v9600_v27 = vld [vmem:[%s16499_s7 + $0xc0] sm:$0xf]  ;;  %v9970_v0 = vld [vmem:[%s16499_s7 + $0xc4] sm:$0xf0] }
 0x854   :  { %v8335_v45 = vsel %vm17247_vm9, %v8317_v61, %v8334_v56  ;;  %8857 = vmatpush.bf16.msra.mxu3 %v9529_v28  ;;  %8944 = vmatpush.bf16.msra.mxu1 %v9693_v9  ;;  %v9681_v57 = vor.u32 %v9990_v13, %v9680_v3  ;;  %v9609_v8 = vor.u32 %v9972_v40, %v9608_v14  ;;  %v9592_v32 = vld [vmem:[%s16499_s7 + $0xb0] sm:$0xf]  ;;  %v9664_v11 = vld [vmem:[%s16499_s7 + $0x140] sm:$0xf]  ;;  %v9986_v23 = vld [vmem:[%s16499_s7 + $0x144] sm:$0xf0] }
 0x855   :  { %8348 = vrot.lane.b32.xlu0 %v8335_v45, %s10661_s23  ;;  %8337 = vst.msk [vmem:[#allocation8 + $0x8] sm:$0xff] %vm8293_vm2, %v8335_v45  ;;  %8866 = vmatpush.bf16.msra.mxu2 %v9625_v53  ;;  %v9677_v43 = vor.u32 %v9987_v31, %v9674_v37  ;;  %v9673_v58 = vor.u32 %v9988_v35, %v9672_v16  ;;  %v9968_v38 = vld [vmem:[%s16499_s7 + $0xb4] sm:$0xf0]  ;;  %v9985_v48 = vld [vmem:[%s16499_s7 + $0x144] sm:$0xf]  ;;  %vm15904_vm14 = vcmp.gt.s32.totalorder %v8318_v15, 0  ;;  %vm17259_vm9 = vmmov %vm17253_vm1 }
 0x856   :  { %v9601_v33 = vor.u32 %v9970_v0, %v9600_v27  ;;  %v9666_v10 = vld [vmem:[%s16499_s7 + $0x148] sm:$0xf0]  ;;  %v9665_v2 = vor.u32 %v9986_v23, %v9664_v11  ;;  %v9983_v36 = vld [vmem:[%s16499_s7 + $0x134] sm:$0xf]  ;;  %v9658_v26 = vld [vmem:[%s16499_s7 + $0x138] sm:$0xf0]  ;;  %v9593_v5 = vor.u32 %v9968_v38, %v9592_v32 }
 0x857   :  { %v9669_v25 = vor.u32 %v9985_v48, %v9666_v10  ;;  %v9656_v49 = vld [vmem:[%s16499_s7 + $0x130] sm:$0xf]  ;;  %v9984_v50 = vld [vmem:[%s16499_s7 + $0x134] sm:$0xf0]  ;;  %v9661_v28 = vor.u32 %v9983_v36, %v9658_v26  ;;  %v9584_v61 = vld [vmem:[%s16499_s7 + $0xa0] sm:$0xf] }
 0x858   :  { %8858 = vmatpush.bf16.msra.mxu3 %v9521_v18  ;;  %8945 = vmatpush.bf16.msra.mxu1 %v9685_v4  ;;  %v9966_v56 = vld [vmem:[%s16499_s7 + $0xa4] sm:$0xf0]  ;;  %v9981_v15 = vld [vmem:[%s16499_s7 + $0x124] sm:$0xf]  ;;  %v8319_v22 = vshra.s32 %v17229_v41, 1  ;;  %v9657_v18 = vor.u32 %v9984_v50, %v9656_v49  ;;  %vm8992_vm4 = vcmask 1045508  }
 0x859   :  { %8867 = vmatpush.bf16.msra.mxu2 %v9617_v24  ;;  %v9585_v19 = vor.u32 %v9966_v56, %v9584_v61  ;;  %v9576_v55 = vld [vmem:[%s16499_s7 + $0x90] sm:$0xf]  ;;  %v9982_v29 = vld [vmem:[%s16499_s7 + $0x124] sm:$0xf0]  ;;  %v9964_v41 = vld [vmem:[%s16499_s7 + $0x94] sm:$0xf0] }
 0x85a   :  { %v9979_v30 = vld [vmem:[%s16499_s7 + $0x114] sm:$0xf]  ;;  %v15956_v59 = vand.u32 1, %v8319_v22  ;;  %v9577_v9 = vor.u32 %v9964_v41, %v9576_v55  ;;  %v9640_v54 = vld [vmem:[%s16499_s7 + $0x110] sm:$0xf] }
 0x85b   :  { %v8355_v63 = vld [vmem:[#allocation9] sm:$0xc0]  ;;  %v9980_v62 = vld [vmem:[%s16499_s7 + $0x114] sm:$0xf0]  ;;  %v9568_v17 = vld [vmem:[%s16499_s7 + $0x80] sm:$0xf] }
 0x85c   :  { %v8344_v44 = vld [vmem:[#allocation8 + $0x9] sm:$0xff]  ;;  %8859 = vmatpush.bf16.msra.mxu3 %v9513_v20  ;;  %8946 = vmatpush.bf16.msra.mxu1 %v9677_v43  ;;  %v8365_v53 = vrot.slane %v8355_v63, 6  ;;  %v9752_v14 = vld [vmem:[%s16499_s7 + $0x1f0] sm:$0xf]  ;;  %v10008_v4 = vld [vmem:[%s16499_s7 + $0x1f4] sm:$0xf0]  ;;  %v9641_v1 = vor.u32 %v9980_v62, %v9640_v54 }
 0x85d   :  { %v15804_v52 = vsel %vm8343_vm13, %v8344_v44, 0.0  ;;  %8868 = vmatpush.bf16.msra.mxu2 %v9609_v8  ;;  %v8339_v51 = vld [vmem:[#allocation8 + $0x7] sm:$0xff]  ;;  %v9650_v44 = vld [vmem:[%s16499_s7 + $0x128] sm:$0xf0]  ;;  %v9962_v6 = vld [vmem:[%s16499_s7 + $0x84] sm:$0xf0]  ;;  %v9753_v16 = vor.u32 %v10008_v4, %v9752_v14 }
 0x85e   :  { %8353 = vst.msk [vmem:[#allocation9 + $0x18] sm:$0xff] %vm8293_vm2, %v15804_v52  ;;  %v8342_v42 = vsel %vm15904_vm14, %v8339_v51, 0.0  ;;  %v9648_v20 = vld [vmem:[%s16499_s7 + $0x120] sm:$0xf]  ;;  %vm8354_vm0 = vcmp.gt.s32.totalorder %v15956_v59, 0  ;;  %v9569_v40 = vor.u32 %v9962_v6, %v9568_v17  ;;  %vm8375_vm8 = vcmp.lt.s32.totalorder %v15956_v59, 1  ;;  %vm17260_vm13 = vmmov %vm17253_vm1 }
 0x85f   :  { %v9649_v21 = vor.u32 %v9982_v29, %v9648_v20  ;;  %v9978_v3 = vld [vmem:[%s16499_s7 + $0x104] sm:$0xf0]  ;;  %vm15987_vm3 = vmpackc.low %vm8354_vm0, %vm8354_vm0  ;;  %v9784_v8 = vld [vmem:[%s16499_s7 + $0x230] sm:$0xf] }
 0x860   :  { %8860 = vmatpush.bf16.msra.mxu3 %v9505_v12  ;;  %8947 = vmatpush.bf16.msra.mxu1 %v9669_v25  ;;  %v9642_v12 = vld [vmem:[%s16499_s7 + $0x118] sm:$0xf0]  ;;  %v10016_v35 = vld [vmem:[%s16499_s7 + $0x234] sm:$0xf0]  ;;  %v9744_v37 = vld [vmem:[%s16499_s7 + $0x1e0] sm:$0xf] }
 0x861   :  { %8869 = vmatpush.bf16.msra.mxu2 %v9601_v33  ;;  %v9645_v46 = vor.u32 %v9979_v30, %v9642_v12  ;;  %v10006_v27 = vld [vmem:[%s16499_s7 + $0x1e4] sm:$0xf0]  ;;  %v9785_v43 = vor.u32 %v10016_v35, %v9784_v8  ;;  %v9776_v33 = vld [vmem:[%s16499_s7 + $0x220] sm:$0xf]  ;;  %v9736_v11 = vld [vmem:[%s16499_s7 + $0x1d0] sm:$0xf] }
 0x862   :  { %v10014_v32 = vld [vmem:[%s16499_s7 + $0x224] sm:$0xf0]  ;;  %v10004_v23 = vld [vmem:[%s16499_s7 + $0x1d4] sm:$0xf0]  ;;  %v9728_v10 = vld [vmem:[%s16499_s7 + $0x1c0] sm:$0xf] }
 0x863   :  { %v9777_v38 = vor.u32 %v10014_v32, %v9776_v33  ;;  %v9737_v48 = vor.u32 %v10004_v23, %v9736_v11  ;;  %v10002_v47 = vld [vmem:[%s16499_s7 + $0x1c4] sm:$0xf0]  ;;  %v9720_v25 = vld [vmem:[%s16499_s7 + $0x1b0] sm:$0xf]  ;;  %v9712_v26 = vld [vmem:[%s16499_s7 + $0x1a0] sm:$0xf] }
 0x864   :  { %8879 = vmatpush.bf16.msrb.mxu3 %v9689_v7  ;;  %8948 = vmatpush.bf16.msra.mxu1 %v9661_v28  ;;  %v9632_v7 = vld [vmem:[%s16499_s7 + $0x100] sm:$0xf]  ;;  %v9729_v51 = vor.u32 %v10002_v47, %v9728_v10  ;;  %v9768_v50 = vld [vmem:[%s16499_s7 + $0x210] sm:$0xf]  ;;  %v10012_v28 = vld [vmem:[%s16499_s7 + $0x214] sm:$0xf0] }
 0x865   :  { %8870 = vmatpush.bf16.msra.mxu2 %v9593_v5  ;;  %v9633_v0 = vor.u32 %v9978_v3, %v9632_v7  ;;  %v9998_v5 = vld [vmem:[%s16499_s7 + $0x1a4] sm:$0xf0]  ;;  %v9996_v61 = vld [vmem:[%s16499_s7 + $0x194] sm:$0xf0]  ;;  %v9977_v56 = vld [vmem:[%s16499_s7 + $0x104] sm:$0xf] }
 0x866   :  { %v9713_v49 = vor.u32 %v9998_v5, %v9712_v26  ;;  %v10010_v22 = vld [vmem:[%s16499_s7 + $0x204] sm:$0xf0]  ;;  %v8356_v29 = vld [vmem:[#allocation9 + $0x8] sm:$0xc0]  ;;  %v9554_v7 = vld [vmem:[%s16499_s7 + $0x68] sm:$0xf0] }
 0x867   :  { %v9994_v55 = vld [vmem:[%s16499_s7 + $0x184] sm:$0xf0]  ;;  %v8368_v41 = vrot.slane %v8356_v29, 6  ;;  %v9973_v3 = vld [vmem:[%s16499_s7 + $0xe4] sm:$0xf]  ;;  %vm16139_vm7 = vmpackc.low %vm8375_vm8, %vm8375_vm8 }
 0x868   :  { %8880 = vmatpush.bf16.msrb.mxu3 %v9681_v57  ;;  %v8377_v8 = vld [vmem:[#allocation9 + $0x18] sm:$0xfc]  ;;  %v8379_v35 = vld [vmem:[#allocation9 + $0x28] sm:$0x3]  ;;  %v8378_v32 = vld [vmem:[#allocation9 + $0x20] sm:$0x3] }
 0x869   :  { %8871 = vmatpush.bf16.msra.mxu2 %v9585_v19  ;;  %v8390_v11 = vrot.slane %v8377_v8, 2  ;;  %v8391_v23 = vrot.slane %v8379_v35, 2  ;;  %v9953_v10 = vld [vmem:[%s16499_s7 + $0x44] sm:$0xf]  ;;  %v9538_v47 = vld [vmem:[%s16499_s7 + $0x48] sm:$0xf0]  ;;  %vm17261_vm14 = vmmov %vm17253_vm1 }
 0x86a   :  { %v9541_v5 = vor.u32 %v9953_v10, %v9538_v47  ;;  %v9967_v59 = vld [vmem:[%s16499_s7 + $0xb4] sm:$0xf]  ;;  %v9778_v8 = vld [vmem:[%s16499_s7 + $0x228] sm:$0xf0]  ;;  %v9722_v10 = vld [vmem:[%s16499_s7 + $0x1b8] sm:$0xf0] }
 0x86b   :  { %v8392_v26 = vsel %vm8386_vm10, %v8390_v11, %v8391_v23  ;;  %v10001_v11 = vld [vmem:[%s16499_s7 + $0x1c4] sm:$0xf]  ;;  %v9730_v57 = vld [vmem:[%s16499_s7 + $0x1c8] sm:$0xf0] }
 0x86c   :  { %8881 = vmatpush.bf16.msrb.mxu3 %v9673_v58  ;;  %v9745_v58 = vor.u32 %v10006_v27, %v9744_v37  ;;  %v9955_v27 = vld [vmem:[%s16499_s7 + $0x54] sm:$0xf]  ;;  %v10009_v23 = vld [vmem:[%s16499_s7 + $0x204] sm:$0xf] }
 0x86d   :  { %8872 = vmatpush.bf16.msra.mxu2 %v9577_v9  ;;  %v9562_v9 = vld [vmem:[%s16499_s7 + $0x78] sm:$0xf0] }
 0x870   :  { %8882 = vmatpush.bf16.msrb.mxu3 %v9665_v2  ;;  %v10000_v2 = vld [vmem:[%s16499_s7 + $0x1b4] sm:$0xf0] }
 0x871   :  { %8873 = vmatpush.bf16.msra.mxu2 %v9569_v40  ;;  %v9721_v36 = vor.u32 %v10000_v2, %v9720_v25  ;;  %v9957_v40 = vld [vmem:[%s16499_s7 + $0x64] sm:$0xf]  ;;  %v9602_v25 = vld [vmem:[%s16499_s7 + $0xc8] sm:$0xf0] }
 0x874   :  { %8883 = vmatpush.bf16.msrb.mxu3 %v9657_v18  ;;  %v9696_v18 = vld [vmem:[%s16499_s7 + $0x180] sm:$0xf] }
 0x875   :  { %8892 = vmatpush.bf16.msrb.mxu2 %v9753_v16  ;;  %v9697_v20 = vor.u32 %v9994_v55, %v9696_v18  ;;  %v9557_v16 = vor.u32 %v9957_v40, %v9554_v7  ;;  %v9522_v18 = vld [vmem:[%s16499_s7 + $0x28] sm:$0xf0]  ;;  %v10005_v7 = vld [vmem:[%s16499_s7 + $0x1e4] sm:$0xf] }
 0x876   :  { %v9586_v55 = vld [vmem:[%s16499_s7 + $0xa8] sm:$0xf0] }
 0x878   :  { %8884 = vmatpush.bf16.msrb.mxu3 %v9649_v21  ;;  %v9959_v21 = vld [vmem:[%s16499_s7 + $0x74] sm:$0xf] }
 0x879   :  { %8893 = vmatpush.bf16.msrb.mxu2 %v9745_v58  ;;  %v9565_v14 = vor.u32 %v9959_v21, %v9562_v9  ;;  %v9610_v58 = vld [vmem:[%s16499_s7 + $0xd8] sm:$0xf0] }
 0x87c   :  { %8885 = vmatpush.bf16.msrb.mxu3 %v9641_v1 }
 0x87d   :  { %8894 = vmatpush.bf16.msrb.mxu2 %v9737_v48 }
 0x880   :  { %8886 = vmatpush.bf16.msrb.mxu3 %v9633_v0  ;;  %v9546_v0 = vld [vmem:[%s16499_s7 + $0x58] sm:$0xf0] }
 0x881   :  { %8895 = vmatpush.bf16.msrb.mxu2 %v9729_v51  ;;  %v9969_v51 = vld [vmem:[%s16499_s7 + $0xc4] sm:$0xf] }
 0x885   :  { %8896 = vmatpush.bf16.msrb.mxu2 %v9721_v36  ;;  %v8388_v36 = vrot.slane %v8378_v32, 2 }
 0x889   :  { %8897 = vmatpush.bf16.msrb.mxu2 %v9713_v49  ;;  %v9605_v49 = vor.u32 %v9969_v51, %v9602_v25  ;;  %v9997_v25 = vld [vmem:[%s16499_s7 + $0x1a4] sm:$0xf] }
 0x8c7   :  { %v8349_v39 = vpop.permute.xlu0 %8348 }
 0x8c8   :  { %v8351_v45 = vsel %vm8293_vm2, %v8342_v42, %v8349_v39  ;;  %v9704_v39 = vld [vmem:[%s16499_s7 + $0x190] sm:$0xf]  ;;  %v9769_v42 = vor.u32 %v10012_v28, %v9768_v50  ;;  %v9951_v50 = vld [vmem:[%s16499_s7 + $0x34] sm:$0xf]  ;;  %v9530_v28 = vld [vmem:[%s16499_s7 + $0x38] sm:$0xf0] }
 0x8c9   :  { %v10491_v60 = vpack.i.bf16 %v15804_v52, %v8351_v45  ;;  %8352 = vst [vmem:[#allocation9 + $0x10] sm:$0xff] %v8351_v45  ;;  %v9653_v52 = vor.u32 %v9981_v15, %v9650_v44  ;;  %v9634_v45 = vld [vmem:[%s16499_s7 + $0x108] sm:$0xf0]  ;;  %v9705_v15 = vor.u32 %v9996_v61, %v9704_v39  ;;  %v9594_v61 = vld [vmem:[%s16499_s7 + $0xb8] sm:$0xf0] }
 0x8ca   :  { %v9637_v44 = vor.u32 %v9977_v56, %v9634_v45  ;;  %v9533_v45 = vor.u32 %v9951_v50, %v9530_v28  ;;  %v9993_v50 = vld [vmem:[%s16499_s7 + $0x184] sm:$0xf]  ;;  %v9698_v28 = vld [vmem:[%s16499_s7 + $0x188] sm:$0xf0]  ;;  %v8484_v56 = vld [vmem:[%s16500_s8] sm:$0x3] }
 0x8cb   :  { %10492 = vrot.lane.b32.xlu1 %v10491_v60, %s10661_s23  ;;  %8949 = vmatpush.bf16.msra.mxu1 %v9653_v52  ;;  %v9760_v60 = vld [vmem:[%s16499_s7 + $0x200] sm:$0xf]  ;;  %v8358_v52 = vld [vmem:[#allocation9 + $0x18] sm:$0x3f] }
 0x8cc   :  { %v9761_v19 = vor.u32 %v10010_v22, %v9760_v60  ;;  %8898 = vmatpush.bf16.msrb.mxu2 %v9705_v15  ;;  %v8369_v30 = vrot.slane %v8358_v52, 6  ;;  %v9597_v60 = vor.u32 %v9967_v59, %v9594_v61  ;;  %v9949_v22 = vld [vmem:[%s16499_s7 + $0x24] sm:$0xf]  ;;  %v9947_v52 = vld [vmem:[%s16499_s7 + $0x14] sm:$0xf] }
 0x8ce   :  { %v8370_v12 = vsel %vm17253_vm1, %v8368_v41, %v8369_v30  ;;  %v9514_v41 = vld [vmem:[%s16499_s7 + $0x18] sm:$0xf0]  ;;  %v9963_v30 = vld [vmem:[%s16499_s7 + $0x94] sm:$0xf] }
 0x8cf   :  { %8950 = vmatpush.bf16.msra.mxu1 %v9645_v46  ;;  %v9975_v46 = vld [vmem:[%s16499_s7 + $0xf4] sm:$0xf]  ;;  %v8374_v17 = vsel %vm8354_vm0, %v8370_v12, 0.0  ;;  %v9578_v12 = vld [vmem:[%s16499_s7 + $0x98] sm:$0xf0]  ;;  %vm17262_vm0 = vmmov %vm17253_vm1 }
 0x8d0   :  { %v8357_v24 = vld [vmem:[#allocation9 + $0x10] sm:$0x3f]  ;;  %8899 = vmatpush.bf16.msrb.mxu2 %v9697_v20  ;;  %v9525_v20 = vor.u32 %v9949_v22, %v9522_v18  ;;  %v9581_v9 = vor.u32 %v9963_v30, %v9578_v12  ;;  %v8487_v30 = vperm.slane %v8484_v56, 1  ;;  %vm17265_vm1 = vmmov %vm17262_vm0 }
 0x8d1   :  { %v8366_v34 = vrot.slane %v8357_v24, 6  ;;  %v8376_v33 = vld [vmem:[#allocation9 + $0x10] sm:$0xfc] }
 0x8d2   :  { %v8387_v2 = vrot.slane %v8376_v33, 2  ;;  %v9770_v33 = vld [vmem:[%s16499_s7 + $0x218] sm:$0xf0] }
 0x8d3   :  { %v8367_v13 = vsel %vm17250_vm11, %v8365_v53, %v8366_v34  ;;  %8951 = vmatpush.bf16.msra.mxu1 %v9637_v44  ;;  %v9626_v53 = vld [vmem:[%s16499_s7 + $0xf8] sm:$0xf0]  ;;  %vm17263_vm11 = vmmov %vm17262_vm0 }
 0x8d4   :  { %v15997_v31 = vpack.c.bf16 %v8367_v13, %v8367_v13  ;;  %v9629_v1 = vor.u32 %v9975_v46, %v9626_v53  ;;  %v9618_v13 = vld [vmem:[%s16499_s7 + $0xe8] sm:$0xf0]  ;;  %v8389_v39 = vsel %vm8386_vm10, %v8387_v2, %v8388_v36  ;;  %v9961_v46 = vld [vmem:[%s16499_s7 + $0x84] sm:$0xf] }
 0x8d5   :  { %v9621_v37 = vor.u32 %v9973_v3, %v9618_v13  ;;  %v16145_v44 = vpack.c.bf16 %v8389_v39, %v8389_v39  ;;  %v9570_v53 = vld [vmem:[%s16499_s7 + $0x88] sm:$0xf0]  ;;  %v9701_v39 = vor.u32 %v9993_v50, %v9698_v28  ;;  %v9830_v50 = vld [vmem:[%s16501_s9 + $0x30] sm:$0xf]  ;;  %v10024_v28 = vld [vmem:[%s16501_s9 + $0x34] sm:$0xf0] }
 0x8d6   :  { %9792 = vmatmul.msk.bf16.vlgmr.msra.gmra.mxu3 %vm15987_vm3, %v15997_v31  ;;  %v9746_v3 = vld [vmem:[%s16499_s7 + $0x1e8] sm:$0xf0] }
 0x8d7   :  { %8909 = vmatpush.bf16.msra.mxu3 %v9785_v43  ;;  %v9971_v43 = vld [vmem:[%s16499_s7 + $0xd4] sm:$0xf]  ;;  %v9714_v2 = vld [vmem:[%s16499_s7 + $0x1a8] sm:$0xf0] }
 0x8d8   :  { %v9613_v48 = vor.u32 %v9971_v43, %v9610_v58  ;;  %v10011_v58 = vld [vmem:[%s16499_s7 + $0x214] sm:$0xf]  ;;  %v9717_v36 = vor.u32 %v9997_v25, %v9714_v2 }
 0x8db   :  { %8910 = vmatpush.bf16.msra.mxu3 %v9777_v38  ;;  %v9549_v38 = vor.u32 %v9955_v27, %v9546_v0  ;;  %v10003_v27 = vld [vmem:[%s16499_s7 + $0x1d4] sm:$0xf]  ;;  %v9738_v0 = vld [vmem:[%s16499_s7 + $0x1d8] sm:$0xf0] }
 0x8dc   :  { %v9741_v32 = vor.u32 %v10003_v27, %v9738_v0 }
 0x8df   :  { %8911 = vmatpush.bf16.msra.mxu3 %v9769_v42  ;;  %v8396_v42 = vsel %vm8375_vm8, %v8392_v26, 0.0  ;;  %v9995_v26 = vld [vmem:[%s16499_s7 + $0x194] sm:$0xf]  ;;  %vm17268_vm8 = vmmov %vm17262_vm0 }
 0x8e0   :  { %v16143_v15 = vpack.c.bf16 %v8396_v42, %v8396_v42 }
 0x8e3   :  { %8912 = vmatpush.bf16.msra.mxu3 %v9761_v19  ;;  %v9965_v19 = vld [vmem:[%s16499_s7 + $0xa4] sm:$0xf] }
 0x8e4   :  { %v9589_v29 = vor.u32 %v9965_v19, %v9586_v55 }
 0x93d   :  { %v10493_v63 = vpop.permute.xlu1 %10492 }
 0x93e   :  { %v10495_v54 = vunpack.i.h.bf16 %v10493_v63  ;;  %v10494_v62 = vunpack.i.l.bf16 %v10493_v63  ;;  %v9517_v63 = vor.u32 %v9947_v52, %v9514_v41 }
 0x940   :  { %v8403_v6 = vsel %vm8293_vm2, %v10494_v62, %v10495_v54  ;;  %v8406_v24 = vsel %vm8293_vm2, %v8374_v17, %v10494_v62  ;;  %v9945_v54 = vld [vmem:[%s16499_s7 + $0x4] sm:$0xf]  ;;  %v9506_v62 = vld [vmem:[%s16499_s7 + $0x8] sm:$0xf0]  ;;  %v10007_v17 = vld [vmem:[%s16499_s7 + $0x1f4] sm:$0xf] }
 0x941   :  { %v16085_v4 = vpack.c.bf16 %v8406_v24, %v8406_v24  ;;  %v8409_v34 = vpack.c.bf16 %v8403_v6, %v8403_v6  ;;  %v9754_v6 = vld [vmem:[%s16499_s7 + $0x1f8] sm:$0xf0]  ;;  %v10015_v24 = vld [vmem:[%s16499_s7 + $0x234] sm:$0xf] }
 0x942   :  { %v9757_v40 = vor.u32 %v10007_v17, %v9754_v6 }
 0x943   :  { %8874 = vmatmul.bf16.vlgmr.msra.gmra.mxu2 %v16085_v4  ;;  %8887 = vmatmul.bf16.vlgmr.msrb.gmra.mxu3 %v8409_v34 }
 0x944   :  { %8918 = vmatpush.bf16.msrb.mxu3 %v9565_v14  ;;  %8952 = vmatmul.bf16.vlgmr.msra.gmra.mxu1 %v8409_v34  ;;  %v9786_v14 = vld [vmem:[%s16499_s7 + $0x238] sm:$0xf0]  ;;  %v9509_v34 = vor.u32 %v9945_v54, %v9506_v62  ;;  %v9854_v54 = vld [vmem:[%s16501_s9 + $0x60] sm:$0xf] }
 0x945   :  { %8931 = vmatpush.bf16.msra.mxu2 %v9629_v1  ;;  %v9573_v1 = vor.u32 %v9961_v46, %v9570_v53  ;;  %v9789_v13 = vor.u32 %v10015_v24, %v9786_v14  ;;  %v10030_v46 = vld [vmem:[%s16501_s9 + $0x64] sm:$0xf0]  ;;  %v9926_v53 = vld [vmem:[%s16501_s9 + $0xf0] sm:$0xf]  ;;  %v10048_v14 = vld [vmem:[%s16501_s9 + $0xf4] sm:$0xf0] }
 0x946   :  { %v9855_v24 = vor.u32 %v10030_v46, %v9854_v54  ;;  %v9824_v54 = vld [vmem:[%s16501_s9 + $0x28] sm:$0xf0]  ;;  %v9814_v46 = vld [vmem:[%s16501_s9 + $0x10] sm:$0xf] }
 0x948   :  { %8919 = vmatpush.bf16.msrb.mxu3 %v9557_v16  ;;  %v10013_v16 = vld [vmem:[%s16499_s7 + $0x224] sm:$0xf] }
 0x949   :  { %8932 = vmatpush.bf16.msra.mxu2 %v9621_v37  ;;  %v9749_v37 = vor.u32 %v10005_v7, %v9746_v3  ;;  %v9781_v43 = vor.u32 %v10013_v16, %v9778_v8  ;;  %v9927_v7 = vor.u32 %v10048_v14, %v9926_v53  ;;  %v10046_v8 = vld [vmem:[%s16501_s9 + $0xe4] sm:$0xf0]  ;;  %v10020_v53 = vld [vmem:[%s16501_s9 + $0x14] sm:$0xf0] }
 0x94c   :  { %8920 = vmatpush.bf16.msrb.mxu3 %v9549_v38  ;;  %v9733_v38 = vor.u32 %v10001_v11, %v9730_v57  ;;  %v10027_v11 = vld [vmem:[%s16501_s9 + $0x54] sm:$0xf]  ;;  %v9848_v57 = vld [vmem:[%s16501_s9 + $0x58] sm:$0xf0] }
 0x94d   :  { %8933 = vmatpush.bf16.msra.mxu2 %v9613_v48  ;;  %v9999_v48 = vld [vmem:[%s16499_s7 + $0x1b4] sm:$0xf] }
 0x94e   :  { %v9725_v51 = vor.u32 %v9999_v48, %v9722_v10  ;;  %v9851_v10 = vor.u32 %v10027_v11, %v9848_v57  ;;  %v10017_v11 = vld [vmem:[%s16501_s9 + $0x4] sm:$0xf]  ;;  %v9808_v57 = vld [vmem:[%s16501_s9 + $0x8] sm:$0xf0] }
 0x950   :  { %8921 = vmatpush.bf16.msrb.mxu3 %v9541_v5  ;;  %v9706_v5 = vld [vmem:[%s16499_s7 + $0x198] sm:$0xf0] }
 0x951   :  { %8934 = vmatpush.bf16.msra.mxu2 %v9605_v49  ;;  %v9709_v49 = vor.u32 %v9995_v26, %v9706_v5  ;;  %v10025_v26 = vld [vmem:[%s16501_s9 + $0x44] sm:$0xf]  ;;  %v9840_v5 = vld [vmem:[%s16501_s9 + $0x48] sm:$0xf0] }
 0x953   :  { %9795 = vmatmul.msk.bf16.vlgmr.msrb.gmra.mxu2 %vm16139_vm7, %v16145_v44  ;;  %9796 = vmatmul.msk.bf16.vlgmr.msra.gmra.mxu3 %vm8293_vm2, %v16143_v15 }
 0x954   :  { %8922 = vmatpush.bf16.msrb.mxu3 %v9533_v45 }
 0x955   :  { %8935 = vmatpush.bf16.msra.mxu2 %v9597_v60 }
 0x958   :  { %8923 = vmatpush.bf16.msrb.mxu3 %v9525_v20 }
 0x959   :  { %8936 = vmatpush.bf16.msra.mxu2 %v9589_v29  ;;  %v16176_v21 = vpop.f32.mrf.mxu3 }
 0x95c   :  { %8924 = vmatpush.bf16.msrb.mxu3 %v9517_v63  ;;  %v9862_v63 = vld [vmem:[%s16501_s9 + $0x70] sm:$0xf] }
 0x95d   :  { %8937 = vmatpush.bf16.msra.mxu2 %v9581_v9  ;;  %v10032_v9 = vld [vmem:[%s16501_s9 + $0x74] sm:$0xf0] }
 0x95e   :  { %v9863_v62 = vor.u32 %v10032_v9, %v9862_v63  ;;  %v10021_v9 = vld [vmem:[%s16501_s9 + $0x24] sm:$0xf] }
 0x960   :  { %8925 = vmatpush.bf16.msrb.mxu3 %v9509_v34  ;;  %9294 = vmatpush.bf16.msrb.mxu1 %v9863_v62  ;;  %v10031_v34 = vld [vmem:[%s16501_s9 + $0x74] sm:$0xf] }
 0x961   :  { %8938 = vmatpush.bf16.msra.mxu2 %v9573_v1  ;;  %v8864_v35 = vpop.f32.mrf.mxu3  ;;  %v9864_v1 = vld [vmem:[%s16501_s9 + $0x78] sm:$0xf0] }
 0x962   :  { %v9867_v3 = vor.u32 %v10031_v34, %v9864_v1  ;;  %v10029_v35 = vld [vmem:[%s16501_s9 + $0x64] sm:$0xf] }
 0x963   :  { %9799 = vmatmul.msk.bf16.vlgmr.msrb.gmra.mxu3 %vm15987_vm3, %v15997_v31  ;;  %v9773_v31 = vor.u32 %v10011_v58, %v9770_v33  ;;  %vm17264_vm3 = vmmov %vm17262_vm0 }
 0x964   :  { %8957 = vmatpush.bf16.msra.mxu3 %v9757_v40  ;;  %8939 = vmatmul.bf16.vlgmr.msra.gmra.mxu2 %v16085_v4  ;;  %v9762_v4 = vld [vmem:[%s16499_s7 + $0x208] sm:$0xf0]  ;;  %v9846_v40 = vld [vmem:[%s16501_s9 + $0x50] sm:$0xf] }
 0x965   :  { %8974 = vmatpush.bf16.msrb.mxu2 %v9789_v13  ;;  %v9765_v47 = vor.u32 %v10009_v23, %v9762_v4  ;;  %v9918_v13 = vld [vmem:[%s16501_s9 + $0xe0] sm:$0xf]  ;;  %9295 = vmatpush.bf16.msrb.mxu1 %v9855_v24  ;;  %v10026_v4 = vld [vmem:[%s16501_s9 + $0x44] sm:$0xf0] }
 0x966   :  { %v9919_v27 = vor.u32 %v10046_v8, %v9918_v13  ;;  %v9838_v23 = vld [vmem:[%s16501_s9 + $0x40] sm:$0xf]  ;;  %v10019_v13 = vld [vmem:[%s16501_s9 + $0x14] sm:$0xf] }
 0x967   :  { %v9839_v2 = vor.u32 %v10026_v4, %v9838_v23  ;;  %v9806_v8 = vld [vmem:[%s16501_s9] sm:$0xf]  ;;  %v10045_v4 = vld [vmem:[%s16501_s9 + $0xe4] sm:$0xf] }
 0x968   :  { %8958 = vmatpush.bf16.msra.mxu3 %v9749_v37  ;;  %v9856_v37 = vld [vmem:[%s16501_s9 + $0x68] sm:$0xf0] }
 0x969   :  { %8975 = vmatpush.bf16.msrb.mxu2 %v9781_v43  ;;  %v9859_v0 = vor.u32 %v10029_v35, %v9856_v37  ;;  %v9910_v43 = vld [vmem:[%s16501_s9 + $0xd0] sm:$0xf]  ;;  %v10018_v35 = vld [vmem:[%s16501_s9 + $0x4] sm:$0xf0]  ;;  %v10047_v37 = vld [vmem:[%s16501_s9 + $0xf4] sm:$0xf] }
 0x96c   :  { %8959 = vmatpush.bf16.msra.mxu3 %v9741_v32  ;;  %v10044_v32 = vld [vmem:[%s16501_s9 + $0xd4] sm:$0xf0] }
 0x96d   :  { %8976 = vmatpush.bf16.msrb.mxu2 %v9773_v31  ;;  %v9911_v48 = vor.u32 %v10044_v32, %v9910_v43  ;;  %v9807_v32 = vor.u32 %v10018_v35, %v9806_v8 }
 0x970   :  { %8960 = vmatpush.bf16.msra.mxu3 %v9733_v38 }
 0x971   :  { %8977 = vmatpush.bf16.msrb.mxu2 %v9765_v47  ;;  %v9902_v47 = vld [vmem:[%s16501_s9 + $0xc0] sm:$0xf] }
 0x974   :  { %8961 = vmatpush.bf16.msra.mxu3 %v9725_v51  ;;  %9803 = vmatmul.msk.bf16.vlgmr.msrb.gmra.mxu2 %vm8293_vm2, %v16143_v15  ;;  %vm8989_vm2 = vcmask 1043458  }
 0x975   :  { %9307 = vmatpush.bf16.msra.mxu2 %v9927_v7  ;;  %v9815_v7 = vor.u32 %v10020_v53, %v9814_v46 }
 0x978   :  { %8962 = vmatpush.bf16.msra.mxu3 %v9717_v36  ;;  %v10042_v36 = vld [vmem:[%s16501_s9 + $0xc4] sm:$0xf0] }
 0x979   :  { %9308 = vmatpush.bf16.msra.mxu2 %v9919_v27  ;;  %v9928_v27 = vld [vmem:[%s16501_s9 + $0xf8] sm:$0xf0] }
 0x97a   :  { %v9931_v23 = vor.u32 %v10047_v37, %v9928_v27 }
 0x97c   :  { %8963 = vmatpush.bf16.msra.mxu3 %v9709_v49 }
 0x97d   :  { %9309 = vmatpush.bf16.msra.mxu2 %v9911_v48 }
 0x980   :  { %8964 = vmatpush.bf16.msra.mxu3 %v9701_v39 }
 0x983   :  { %9802 = vmatmul.msk.bf16.vlgmr.msra.gmra.mxu3 %vm16139_vm7, %v16145_v44  ;;  %v8486_v44 = vperm.slane %v8484_v56, 0  ;;  %v9886_v56 = vld [vmem:[%s16501_s9 + $0xa0] sm:$0xf]  ;;  %vm17269_vm7 = vmmov %vm17262_vm0 }
 0x984   :  { %9320 = vmatpush.bf16.msrb.mxu3 %v9867_v3  ;;  %v10036_v3 = vld [vmem:[%s16501_s9 + $0x94] sm:$0xf0] }
 0x985   :  { %v8863_v17 = vadd.f32 %v16176_v21, %v8486_v44  ;;  %v10028_v21 = vld [vmem:[%s16501_s9 + $0x54] sm:$0xf0]  ;;  %v10038_v44 = vld [vmem:[%s16501_s9 + $0xa4] sm:$0xf0] }
 0x986   :  { %v9847_v33 = vor.u32 %v10028_v21, %v9846_v40  ;;  %v9887_v1 = vor.u32 %v10038_v44, %v9886_v56  ;;  %v9827_v40 = vor.u32 %v10021_v9, %v9824_v54  ;;  %v9878_v21 = vld [vmem:[%s16501_s9 + $0x90] sm:$0xf] }
 0x988   :  { %9321 = vmatpush.bf16.msrb.mxu3 %v9859_v0  ;;  %9296 = vmatpush.bf16.msrb.mxu1 %v9847_v33  ;;  %v9879_v0 = vor.u32 %v10036_v3, %v9878_v21  ;;  %v10034_v33 = vld [vmem:[%s16501_s9 + $0x84] sm:$0xf0]  ;;  %v10039_v21 = vld [vmem:[%s16501_s9 + $0xb4] sm:$0xf] }
 0x98c   :  { %9322 = vmatpush.bf16.msrb.mxu3 %v9851_v10  ;;  %9297 = vmatpush.bf16.msrb.mxu1 %v9839_v2 }
 0x9c1   :  { %v8953_v42 = vpop.f32.mrf.mxu1 }
 0x9c6   :  { %v8875_v59 = vpop.f32.mrf.mxu2  ;;  %v8888_v61 = vpop.f32.mrf.mxu3 }
 0x9c7   :  { %v8876_v16 = vadd.f32 %v8875_v59, %v8863_v17  ;;  %v9843_v59 = vor.u32 %v10025_v26, %v9840_v5 }
 0x9c9   :  { %v8955_v45 = vpop.f32.mrf.mxu1  ;;  %v8889_v38 = vadd.f32 %v8888_v61, %v8876_v16  ;;  %v9894_v61 = vld [vmem:[%s16501_s9 + $0xb0] sm:$0xf]  ;;  %9323 = vmatpush.bf16.msrb.mxu3 %v9843_v59  ;;  %v9816_v16 = vld [vmem:[%s16501_s9 + $0x18] sm:$0xf0]  ;;  %v10043_v59 = vld [vmem:[%s16501_s9 + $0xd4] sm:$0xf] }
 0x9ca   :  { %v9819_v43 = vor.u32 %v10019_v13, %v9816_v16 }
 0x9ce   :  { %v8877_v15 = vpop.f32.mrf.mxu2  ;;  %v8890_v60 = vpop.f32.mrf.mxu3 }
 0x9cf   :  { %v9831_v60 = vor.u32 %v10024_v28, %v9830_v50 }
 0x9d1   :  { %9298 = vmatpush.bf16.msrb.mxu1 %v9831_v60 }
 0x9d6   :  { %v8901_v22 = vpop.f32.mrf.mxu2  ;;  %v16271_v18 = vpop.f32.mrf.mxu3 }
 0x9d7   :  { %v8902_v51 = vadd.f32 %v8901_v22, %v8889_v38  ;;  %v10040_v22 = vld [vmem:[%s16501_s9 + $0xb4] sm:$0xf0]  ;;  %v9920_v38 = vld [vmem:[%s16501_s9 + $0xe8] sm:$0xf0] }
 0x9d9   :  { %v8915_v45 = vadd.f32 %v16271_v18, %v8902_v51  ;;  %v10022_v18 = vld [vmem:[%s16501_s9 + $0x24] sm:$0xf0] }
 0x9de   :  { %v8903_v19 = vpop.f32.mrf.mxu2  ;;  %v8916_v55 = vpop.f32.mrf.mxu3 }
 0x9df   :  { %v10023_v19 = vld [vmem:[%s16501_s9 + $0x34] sm:$0xf]  ;;  %v9832_v55 = vld [vmem:[%s16501_s9 + $0x38] sm:$0xf0] }
 0x9e6   :  { %v8927_v20 = vpop.f32.mrf.mxu3 }
 0x9e7   :  { %v8940_v29 = vpop.f32.mrf.mxu2  ;;  %v8928_v6 = vadd.f32 %v8927_v20, %v8487_v30  ;;  %v9822_v20 = vld [vmem:[%s16501_s9 + $0x20] sm:$0xf]  ;;  %v8983_v30 = vmax.f32 %v8915_v45, 0.0 }
 0x9e8   :  { %v9823_v63 = vor.u32 %v10022_v18, %v9822_v20  ;;  %v10041_v18 = vld [vmem:[%s16501_s9 + $0xc4] sm:$0xf] }
 0x9e9   :  { %v8941_v58 = vadd.f32 %v8940_v29, %v8928_v6 }
 0x9ea   :  { %9299 = vmatpush.bf16.msrb.mxu1 %v9823_v63 }
 0x9eb   :  { %v8954_v25 = vadd.f32 %v8953_v42, %v8941_v58  ;;  %v9903_v42 = vor.u32 %v10042_v36, %v9902_v47  ;;  %v9870_v58 = vld [vmem:[%s16501_s9 + $0x80] sm:$0xf] }
 0x9ec   :  { %v9871_v47 = vor.u32 %v10034_v33, %v9870_v58 }
 0x9ed   :  { %9310 = vmatpush.bf16.msra.mxu2 %v9903_v42 }
 0x9ee   :  { %v8929_v52 = vpop.f32.mrf.mxu3  ;;  %9300 = vmatpush.bf16.msrb.mxu1 %v9815_v7  ;;  %v9896_v7 = vld [vmem:[%s16501_s9 + $0xb8] sm:$0xf0] }
 0x9ef   :  { %v8942_v41 = vpop.f32.mrf.mxu2  ;;  %v9895_v52 = vor.u32 %v10040_v22, %v9894_v61  ;;  %v9912_v61 = vld [vmem:[%s16501_s9 + $0xd8] sm:$0xf0]  ;;  %v9899_v58 = vor.u32 %v10039_v21, %v9896_v7 }
 0x9f0   :  { %v9835_v41 = vor.u32 %v10023_v19, %v9832_v55  ;;  %v9915_v20 = vor.u32 %v10043_v59, %v9912_v61 }
 0x9f1   :  { %9311 = vmatpush.bf16.msra.mxu2 %v9895_v52 }
 0x9f2   :  { %9324 = vmatpush.bf16.msrb.mxu3 %v9835_v41  ;;  %9301 = vmatpush.bf16.msrb.mxu1 %v9807_v32 }
 0x9f5   :  { %9312 = vmatpush.bf16.msra.mxu2 %v9887_v1 }
 0x9f6   :  { %9325 = vmatpush.bf16.msrb.mxu3 %v9827_v40  ;;  %9333 = vmatpush.bf16.msra.mxu1 %v9931_v23 }
 0x9f7   :  { %v8979_v12 = vpop.f32.mrf.mxu2 }
 0x9f9   :  { %9313 = vmatpush.bf16.msra.mxu2 %v9879_v0 }
 0x9fa   :  { %9326 = vmatpush.bf16.msrb.mxu3 %v9819_v43 }
 0x9fd   :  { %9314 = vmatpush.bf16.msra.mxu2 %v9871_v47 }
 0x9ff   :  { %v8981_v31 = vpop.f32.mrf.mxu2 }
 0xa06   :  { %v8966_v49 = vpop.f32.mrf.mxu3 }
 0xa07   :  { %v8967_v39 = vadd.f32 %v8966_v49, %v8954_v25  ;;  %v9811_v25 = vor.u32 %v10017_v11, %v9808_v57  ;;  %v9923_v49 = vor.u32 %v10045_v4, %v9920_v38  ;;  %v10037_v57 = vld [vmem:[%s16501_s9 + $0xa4] sm:$0xf] }
 0xa09   :  { %v8980_v15 = vadd.f32 %v8979_v12, %v8967_v39  ;;  %9327 = vmatpush.bf16.msrb.mxu3 %v9811_v25  ;;  %9334 = vmatpush.bf16.msra.mxu1 %v9923_v49  ;;  %v10035_v49 = vld [vmem:[%s16501_s9 + $0x94] sm:$0xf] }
 0xa0b   :  { %v8984_v29 = vmax.f32 %v8980_v15, 0.0 }
 0xa0d   :  { %v8987_v12 = vrot.slane %v8984_v29, 6  ;;  %v9904_v29 = vld [vmem:[%s16501_s9 + $0xc8] sm:$0xf0]  ;;  %9335 = vmatpush.bf16.msra.mxu1 %v9915_v20 }
 0xa0e   :  { %v8968_v62 = vpop.f32.mrf.mxu3  ;;  %v9872_v20 = vld [vmem:[%s16501_s9 + $0x88] sm:$0xf0] }
 0xa0f   :  { %v8988_v17 = vsel %vm17256_vm6, %v8983_v30, %v8987_v12  ;;  %v8990_v6 = vsel %vm8989_vm2, %v8983_v30, %v8987_v12  ;;  %v8993_v24 = vsel %vm8992_vm4, %v8983_v30, %v8987_v12  ;;  %v8995_v14 = vsel %vm8386_vm10, %v8987_v12, %v8983_v30  ;;  %vm17267_vm10 = vmmov %vm17262_vm0 }
 0xa10   :  { %v8991_v34 = vrot.slane %v8990_v6, 2  ;;  %8997 = vst [vmem:[#allocation1] ss:$4 sm:$0xff] %v8988_v17  ;;  %v8994_v31 = vrot.slane %v8993_v24, 4  ;;  %v8996_v51 = vrot.slane %v8995_v14, 6  ;;  %v9907_v17 = vor.u32 %v10041_v18, %v9904_v29 }
 0xa12   :  { %9001 = vst [vmem:[#allocation1 + $0x20] ss:$4 sm:$0xff] %v8991_v34  ;;  %9336 = vmatpush.bf16.msra.mxu1 %v9907_v17 }
 0xa16   :  { %9337 = vmatpush.bf16.msra.mxu1 %v9899_v58 }
 0xa17   :  { %v8998_v48 = vld.sshfl [vmem:[#allocation1] sm:$0xff pattern:$0x73625140]  ;;  %v8999_v10 = vld.sshfl [vmem:[#allocation1 + $0x8] sm:$0xff pattern:$0x73625140] }
 0xa18   :  { %9004 = vst [vmem:[#allocation1] ss:$4 sm:$0xff] %v8994_v31  ;;  %v9018_v2 = vsel %vm17257_vm15, %v8998_v48, -inf  ;;  %v9025_v36 = vsel %vm17258_vm12, %v8999_v10, -inf  ;;  %v9888_v31 = vld [vmem:[%s16501_s9 + $0xa8] sm:$0xf0] }
 0xa19   :  { %v9002_v26 = vld.sshfl [vmem:[#allocation1 + $0x20] sm:$0xff pattern:$0x73625140]  ;;  %v9003_v5 = vld.sshfl [vmem:[#allocation1 + $0x28] sm:$0xff pattern:$0x73625140] }
 0xa1a   :  { %9007 = vst [vmem:[#allocation1 + $0x20] ss:$4 sm:$0xff] %v8996_v51  ;;  %v9019_v50 = vrot.slane %v9018_v2, 4  ;;  %v9032_v28 = vsel %vm17259_vm9, %v9002_v26, -inf  ;;  %v9026_v39 = vrot.slane %v9025_v36, 4  ;;  %v9039_v42 = vsel %vm17260_vm13, %v9003_v5, -inf }
 0xa1b   :  { %v9033_v45 = vrot.slane %v9032_v28, 4  ;;  %v9040_v15 = vrot.slane %v9039_v42, 4 }
 0xa1c   :  { %v9020_v60 = vmax.f32 %v9018_v2, %v9019_v50  ;;  %v9027_v22 = vmax.f32 %v9025_v36, %v9026_v39  ;;  %v9891_v36 = vor.u32 %v10037_v57, %v9888_v31  ;;  %v9880_v50 = vld [vmem:[%s16501_s9 + $0x98] sm:$0xf0] }
 0xa1d   :  { %v9034_v19 = vmax.f32 %v9032_v28, %v9033_v45  ;;  %v9041_v55 = vmax.f32 %v9039_v42, %v9040_v15 }
 0xa1e   :  { %v9021_v52 = vrot.slane %v9020_v60, 2  ;;  %v9028_v63 = vrot.slane %v9027_v22, 2  ;;  %9338 = vmatpush.bf16.msra.mxu1 %v9891_v36 }
 0xa1f   :  { %v9005_v41 = vld.sshfl [vmem:[#allocation1] sm:$0xff pattern:$0x73625140]  ;;  %v9035_v56 = vrot.slane %v9034_v19, 2  ;;  %v9042_v44 = vrot.slane %v9041_v55, 2 }
 0xa20   :  { %v9046_v30 = vsel %vm17261_vm14, %v9005_v41, -inf  ;;  %v9006_v12 = vld.sshfl [vmem:[#allocation1 + $0x8] sm:$0xff pattern:$0x73625140]  ;;  %v9022_v54 = vmax.f32 %v9020_v60, %v9021_v52  ;;  %v9029_v3 = vmax.f32 %v9027_v22, %v9028_v63  ;;  %v9883_v60 = vor.u32 %v10035_v49, %v9880_v50 }
 0xa21   :  { %v9008_v9 = vld.sshfl [vmem:[#allocation1 + $0x20] sm:$0xff pattern:$0x73625140]  ;;  %v9036_v62 = vmax.f32 %v9034_v19, %v9035_v56  ;;  %v9047_v46 = vrot.slane %v9046_v30, 4  ;;  %v9053_v53 = vsel %vm17262_vm0, %v9006_v12, -inf  ;;  %v9043_v14 = vmax.f32 %v9041_v55, %v9042_v44 }
 0xa22   :  { %v9060_v6 = vsel %vm17263_vm11, %v9008_v9, -inf  ;;  %v9009_v24 = vld.sshfl [vmem:[#allocation1 + $0x28] sm:$0xff pattern:$0x73625140]  ;;  %v9054_v13 = vrot.slane %v9053_v53, 4  ;;  %v9023_v8 = vrot.slane %v9022_v54, 1  ;;  %9339 = vmatpush.bf16.msra.mxu1 %v9883_v60 }
 0xa23   :  { %v9037_v34 = vrot.slane %v9036_v62, 1  ;;  %v9048_v1 = vmax.f32 %v9046_v30, %v9047_v46  ;;  %v9061_v40 = vrot.slane %v9060_v6, 4  ;;  %v9067_v16 = vsel %vm17264_vm3, %v9009_v24, -inf  ;;  %v10033_v55 = vld [vmem:[%s16501_s9 + $0x84] sm:$0xf]  ;;  %s10662_s9 = smov [#allocation16]  }
 0xa24   :  { %v9044_v27 = vrot.slane %v9043_v14, 1  ;;  %v9055_v0 = vmax.f32 %v9053_v53, %v9054_v13  ;;  %v9068_v43 = vrot.slane %v9067_v16, 4  ;;  %v9030_v23 = vrot.slane %v9029_v3, 1  ;;  %v9114_v24 = vld [vmem:[#allocation15] sm:$0x3]  ;;  %s9395_s29 = sshll.u32 %s10662_s9, 4  ;;  %s9396_s29 = int_to_ptr.vmem [resolvable:$true] %s9395_s29 }
 0xa25   :  { %v9049_v35 = vrot.slane %v9048_v1, 2  ;;  %v9062_v37 = vmax.f32 %v9060_v6, %v9061_v40  ;;  %v9038_v33 = vmax.f32 %v9036_v62, %v9037_v34  ;;  %v9024_v48 = vmax.f32 %v9022_v54, %v9023_v8 }
 0xa26   :  { %v9056_v4 = vrot.slane %v9055_v0, 2  ;;  %v9069_v38 = vmax.f32 %v9067_v16, %v9068_v43  ;;  %v9045_v51 = vmax.f32 %v9043_v14, %v9044_v27  ;;  %v9031_v28 = vmax.f32 %v9029_v3, %v9030_v23 }
 0xa27   :  { %v9050_v32 = vmax.f32 %v9048_v1, %v9049_v35  ;;  %v9063_v11 = vrot.slane %v9062_v37, 2  ;;  %v9074_v5 = vmax.f32 %v9024_v48, %v9038_v33  ;;  %v9875_v44 = vor.u32 %v10033_v55, %v9872_v20 }
 0xa28   :  { %v9057_v25 = vmax.f32 %v9055_v0, %v9056_v4  ;;  %v9070_v2 = vrot.slane %v9069_v38, 2  ;;  %v9075_v15 = vmax.f32 %v9031_v28, %v9045_v51  ;;  %v9116_v14 = vperm.slane %v9114_v24, 0 }
 0xa29   :  { %v9051_v10 = vrot.slane %v9050_v32, 1  ;;  %v9064_v47 = vmax.f32 %v9062_v37, %v9063_v11  ;;  %v9078_v19 = vpack.c.bf16 %v9074_v5, %v9074_v5  ;;  %9340 = vmatpush.bf16.msra.mxu1 %v9875_v44  ;;  %v9117_v16 = vperm.slane %v9114_v24, 1 }
 0xa2a   :  { %v9058_v39 = vrot.slane %v9057_v25, 1  ;;  %v9071_v42 = vmax.f32 %v9069_v38, %v9070_v2  ;;  %v9079_v56 = vpack.c.bf16 %v9075_v15, %v9075_v15 }
 0xa2b   :  { %v9065_v26 = vrot.slane %v9064_v47, 1  ;;  %v9052_v59 = vmax.f32 %v9050_v32, %v9051_v10  ;;  %v9124_v30 = vunpack.c.l.b16 %v9078_v19 }
 0xa2c   :  { %v9072_v45 = vrot.slane %v9071_v42, 1  ;;  %v9059_v18 = vmax.f32 %v9057_v25, %v9058_v39  ;;  %v9125_v62 = vunpack.c.l.b16 %v9079_v56 }
 0xa2d   :  { %v9066_v61 = vmax.f32 %v9064_v47, %v9065_v26 }
 0xa2e   :  { %v9073_v29 = vmax.f32 %v9071_v42, %v9072_v45 }
 0xa2f   :  { %v9076_v22 = vmax.f32 %v9052_v59, %v9066_v61 }
 0xa30   :  { %v9077_v41 = vmax.f32 %v9059_v18, %v9073_v29 }
 0xa31   :  { %v9080_v52 = vpack.c.bf16 %v9076_v22, %v9076_v22 }
 0xa32   :  { %v9081_v63 = vpack.c.bf16 %v9077_v41, %v9077_v41 }
 0xa33   :  { %v9126_v12 = vunpack.c.l.b16 %v9080_v52 }
 0xa34   :  { %v9127_v46 = vunpack.c.l.b16 %v9081_v63 }
 0xa35   :  { %v9128_v9 = vsel %vm6225_vm5, %v9126_v12, %v9124_v30 }
 0xa36   :  { %v9130_v54 = vpack.c.b16 %v9128_v9, %v9128_v9  ;;  %v9129_v53 = vsel %vm6225_vm5, %v9127_v46, %v9125_v62  ;;  %vm17266_vm5 = vmmov %vm17262_vm0 }
 0xa37   :  { %v9131_v17 = vpack.c.b16 %v9129_v53, %v9129_v53 }
 0xa38   :  { %9302 = vmatmul.bf16.vlgmr.msrb.gmra.mxu1 %v9130_v54  ;;  %9328 = vmatmul.bf16.vlgmr.msrb.gmra.mxu3 %v9130_v54 }
 0xa39   :  { %9315 = vmatmul.bf16.vlgmr.msra.gmra.mxu2 %v9131_v17 }
 0xa48   :  { %9341 = vmatmul.bf16.vlgmr.msra.gmra.mxu1 %v9131_v17 }
 0xab5   :  { %v9303_v6 = vpop.f32.mrf.mxu1 }
 0xab6   :  { %v9304_v34 = vadd.f32 %v9303_v6, %v9116_v14 }
 0xabb   :  { %v9329_v8 = vpop.f32.mrf.mxu3 }
 0xabc   :  { %v9316_v40 = vpop.f32.mrf.mxu2  ;;  %v9330_v27 = vadd.f32 %v9329_v8, %v9117_v16 }
 0xabd   :  { %v9305_v1 = vpop.f32.mrf.mxu1  ;;  %v9317_v21 = vadd.f32 %v9316_v40, %v9304_v34 }
 0xabf   :  { %v9346_v7 = vsel %vm17265_vm1, %v9317_v21, -inf }
 0xac0   :  { %v9347_v3 = vrot.slane %v9346_v7, 4 }
 0xac2   :  { %v9348_v13 = vmax.f32 %v9346_v7, %v9347_v3 }
 0xac3   :  { %v9331_v31 = vpop.f32.mrf.mxu3 }
 0xac4   :  { %v9349_v37 = vrot.slane %v9348_v13, 2  ;;  %v9318_v0 = vpop.f32.mrf.mxu2 }
 0xac5   :  { %v9342_v35 = vpop.f32.mrf.mxu1 }
 0xac6   :  { %v9350_v43 = vmax.f32 %v9348_v13, %v9349_v37  ;;  %v9343_v58 = vadd.f32 %v9342_v35, %v9330_v27 }
 0xac8   :  { %v9351_v33 = vrot.slane %v9350_v43, 1  ;;  %v9353_v32 = vsel %vm17266_vm5, %v9343_v58, -inf }
 0xac9   :  { %v9354_v11 = vrot.slane %v9353_v32, 4 }
 0xaca   :  { %v9352_v57 = vmax.f32 %v9350_v43, %v9351_v33 }
 0xacb   :  { %v9355_v23 = vmax.f32 %v9353_v32, %v9354_v11 }
 0xacc   :  { %v9360_v38 = vsub.f32 %v9317_v21, %v9352_v57 }
 0xacd   :  { %v9344_v4 = vpop.f32.mrf.mxu1  ;;  %v9356_v48 = vrot.slane %v9355_v23, 2 }
 0xace   :  { %v9362_v10 = vmul.f32 1.442695, %v9360_v38 }
 0xacf   :  { %v9357_v47 = vmax.f32 %v9355_v23, %v9356_v48 }
 0xad0   :  { %10499 = vpow2.f32 %v9362_v10 }
 0xad1   :  { %v9358_v51 = vrot.slane %v9357_v47, 1 }
 0xad3   :  { %v9359_v25 = vmax.f32 %v9357_v47, %v9358_v51 }
 0xad5   :  { %v9361_v2 = vsub.f32 %v9343_v58, %v9359_v25 }
 0xad6   :  { %v10500_v36 = vpop.eup %10499 }
 0xad7   :  { %v9366_v26 = vsel %vm17267_vm10, %v10500_v36, 0.0  ;;  %v9364_v5 = vmul.f32 1.442695, %v9361_v2 }
 0xad8   :  { %v9367_v49 = vrot.slane %v9366_v26, 4 }
 0xad9   :  { %10501 = vpow2.f32 %v9364_v5 }
 0xada   :  { %v9368_v50 = vadd.f32 %v9367_v49, %v9366_v26 }
 0xadc   :  { %v9369_v28 = vrot.slane %v9368_v50, 2 }
 0xade   :  { %v9370_v42 = vadd.f32 %v9369_v28, %v9368_v50 }
 0xadf   :  { %v10502_v39 = vpop.eup %10501 }
 0xae0   :  { %v9373_v59 = vsel %vm17268_vm8, %v10502_v39, 0.0  ;;  %v9371_v15 = vrot.slane %v9370_v42, 1 }
 0xae1   :  { %v9374_v61 = vrot.slane %v9373_v59, 4 }
 0xae2   :  { %v9372_v19 = vadd.f32 %v9371_v15, %v9370_v42 }
 0xae3   :  { %v9375_v45 = vadd.f32 %v9374_v61, %v9373_v59 }
 0xae4   :  { %10503 = vrcp.f32 %v9372_v19 }
 0xae5   :  { %v9376_v60 = vrot.slane %v9375_v45, 2 }
 0xae7   :  { %v9377_v22 = vadd.f32 %v9376_v60, %v9375_v45 }
 0xae9   :  { %v9378_v55 = vrot.slane %v9377_v22, 1 }
 0xaea   :  { %v10504_v18 = vpop.eup %10503 }
 0xaeb   :  { %v9379_v20 = vadd.f32 %v9378_v55, %v9377_v22  ;;  %v9382_v41 = vmul.f32 %v10504_v18, %v10500_v36 }
 0xaed   :  { %10505 = vrcp.f32 %v9379_v20 }
 0xaf3   :  { %v10506_v29 = vpop.eup %10505 }
 0xaf4   :  { %v9383_v52 = vmul.f32 %v10506_v29, %v10502_v39 }
 0xaf6   :  { %v9386_v56 = vrot.slane %v9383_v52, 6 }
 0xaf8   :  { %v9387_v44 = vsel %vm17269_vm7, %v9382_v41, %v9386_v56 }
 0xaf9   :  { %9389 = vst [vmem:[#allocation16] sm:$0xf] %v9387_v44 }
 0xafa   :  { %9400 = dma.vmem_to_hbm [thread:$0]  %s9396_s29, 64, %s9398_s18, [#allocation12]  }
 0xafb   :  { %10648 = dma.done.wait [#allocation12], 64  }
 0xafc   :  { %10649 = vsyncadd [#allocation12], 4294967232 }
 0xafd   :  { %9405 = vsyncpa [#allocation11], 1 }
 0xafe   :  { %9406 = vsyncpa [#allocation14], 1 }
 0xaff   :  { %9407 = vsyncpa [#allocation12], 1 }

</bundles_post_ra>
